<compile_context>
chip_gen: v7x
topology: tpu7x:2x2x1
jax: 0.10.0
libtpu: 0.0.40
codegen_flags: <defaults>
</compile_context>

<pallas_src>
import math
import numpy as np
import jax
import jax.numpy as jnp
from jax.experimental import pallas as pl
from jax.experimental.pallas import tpu as pltpu

# ----------------- small synthetic configuration (lane-aligned stand-ins) ---
B, T = 2, 2
BT = B * T
SENSOR_NAMES = sorted(["raw_manipulation_camera", "raw_navigation_camera"])
N_SENSORS = len(SENSOR_NAMES)

C_ENC, HP, WP = 128, 2, 4          # stand-in for DINOv2-small output (384, 7, 12)
HW = HP * WP                       # 8 pixels per frame
D_MODEL = 128                      # stand-in for fusion_xformer.d_model = 512
N_HEAD = 4
HEAD_DIM = D_MODEL // N_HEAD       # 32 (real: 64)
N_LAYERS = 2                       # stand-in for num_layers = 3
D_FF = 256                         # stand-in for dim_feedforward = 2048
TEXT_DIM = 128                     # stand-in for t5-small hidden = 512
L_TEXT = 7                         # chosen so SEQ is a multiple of 8

NPIX = BT * HW                     # 32 pixel-rows per sensor
SEQ = 1 + N_SENSORS * HW + L_TEXT  # 1 + 16 + 7 = 24
LN_EPS = 1e-5
BF16 = jnp.bfloat16


# ----------------- in-kernel helpers -----------------
def _layernorm(x, g, b):
    mu = jnp.mean(x, axis=-1, keepdims=True)
    var = jnp.mean((x - mu) ** 2, axis=-1, keepdims=True)
    return (x - mu) * jax.lax.rsqrt(var + LN_EPS) * g + b


# ----------------- the fused kernel -----------------
def fused_encoder_kernel(
    # constant-index inputs (DMA'd once)
    pix_ref,          # (N_SENSORS, NPIX, C_ENC)  bf16
    goals_ref,        # (B*L_TEXT, TEXT_DIM)      bf16
    vc_w1, vc_b1, vc_w2, vc_b2,          # visual compressor (1x1 convs)
    va_w, va_b, va_g, va_beta,           # visual adapter (Linear+LN+ReLU)
    ta_w, ta_b, ta_g, ta_beta,           # text adapter   (Linear+LN+ReLU)
    cam_ref,          # (N_SENSORS, D)
    fus_ref,          # (1, D)
    # per-layer weights, streamed one layer per grid step (block (1, ...))
    wqkv, bqkv, wo, bo, g1, bt1, wf1, bf1, wf2, bf2, g2, bt2,
    # outputs
    fused_ref,        # (BT, D)
    text_ref,         # (B*L_TEXT, D)
    # scratch
    seq_s,            # VMEM (BT, SEQ, D) f32 — sequence resident across layers
):
    l = pl.program_id(0)
    n_l = pl.num_programs(0)

    # ---------------- prologue (layer 0 only): encoders + sequence assembly --
    @pl.when(l == 0)
    def _prologue():
        # --- text adapter: Linear + LayerNorm + ReLU ---
        th = jnp.dot(goals_ref[...], ta_w[...],
                     preferred_element_type=jnp.float32) + ta_b[...]
        th = jnp.maximum(_layernorm(th, ta_g[...], ta_beta[...]), 0.0)  # (B*L, D)
        # NOTE: text_ref is written only on grid step 0 and relies on the output
        # block staying VMEM-resident across the "arbitrary" layer axis (constant
        # output index_map). Do NOT mark the layer axis "parallel" or change the
        # output index_map without moving this store.
        text_ref[...] = th

        # --- visual compressor (two 1x1 convs) + adapter, fused over BOTH sensors ---
        x = pix_ref[...].reshape(N_SENSORS * NPIX, C_ENC)               # (64, 128) bf16
        h = jnp.maximum(jnp.dot(x, vc_w1[...],
                                preferred_element_type=jnp.float32) + vc_b1[...], 0.0)
        h = jnp.maximum(jnp.dot(h.astype(BF16), vc_w2[...],
                                preferred_element_type=jnp.float32) + vc_b2[...], 0.0)
        h = jnp.dot(h.astype(BF16), va_w[...],
                    preferred_element_type=jnp.float32) + va_b[...]
        h = jnp.maximum(_layernorm(h, va_g[...], va_beta[...]), 0.0)
        h4 = h.reshape(N_SENSORS, BT, HW, D_MODEL)

        parts = [jnp.broadcast_to(fus_ref[...][None], (BT, 1, D_MODEL))]  # fusion token
        for s in range(N_SENSORS):
            parts.append(h4[s] + cam_ref[s])                            # + camera token

        # --- text tokens tiled over T (sample order bt = b*T + t), via broadcast ---
        text_tiled = jnp.broadcast_to(
            th.reshape(B, 1, L_TEXT, D_MODEL), (B, T, L_TEXT, D_MODEL)
        ).reshape(BT, L_TEXT, D_MODEL)
        parts.append(text_tiled)

        seq_s[...] = jnp.concatenate(parts, axis=1)                     # (BT, SEQ, D)

    # ---------------- one post-norm TransformerEncoderLayer (every step) -----
    x_bf = seq_s[...].reshape(BT * SEQ, D_MODEL).astype(BF16)           # bf16 matmul input
    qkv = jnp.dot(x_bf, wqkv[0], preferred_element_type=jnp.float32) + bqkv[0]
    qkv3 = qkv.astype(BF16).reshape(BT, SEQ, 3 * D_MODEL)               # cast ONCE

    scale = 1.0 / math.sqrt(HEAD_DIM)
    head_outs = []
    for h in range(N_HEAD):
        q_h = qkv3[:, :, h * HEAD_DIM:(h + 1) * HEAD_DIM]
        k_h = qkv3[:, :, D_MODEL + h * HEAD_DIM:D_MODEL + (h + 1) * HEAD_DIM]
        v_h = qkv3[:, :, 2 * D_MODEL + h * HEAD_DIM:2 * D_MODEL + (h + 1) * HEAD_DIM]
        # batched over all B*T samples (single leading batch dim — known-good lowering)
        s = jnp.einsum("bqd,bkd->bqk", q_h, k_h,
                       preferred_element_type=jnp.float32) * scale      # (BT, SEQ, SEQ)
        s = s - jnp.max(s, axis=-1, keepdims=True)
        p = jnp.exp(s)
        p = p * pl.reciprocal(jnp.sum(p, axis=-1, keepdims=True), approx=True)
        head_outs.append(jnp.einsum("bqk,bkd->bqd", p.astype(BF16), v_h,
                                    preferred_element_type=jnp.float32))  # (BT, SEQ, HD)

    # heads contiguous along the lane axis -> single K=128 output projection
    o = jnp.concatenate(head_outs, axis=-1)                             # (BT, SEQ, D)
    attn = jnp.dot(o.reshape(BT * SEQ, D_MODEL).astype(BF16), wo[0],
                   preferred_element_type=jnp.float32) + bo[0]

    resid = seq_s[...].reshape(BT * SEQ, D_MODEL)                       # re-read residual (f32)
    y = _layernorm(resid + attn, g1[0], bt1[0])
    ff = jnp.maximum(jnp.dot(y.astype(BF16), wf1[0],
                             preferred_element_type=jnp.float32) + bf1[0], 0.0)
    ff = jnp.dot(ff.astype(BF16), wf2[0],
                 preferred_element_type=jnp.float32) + bf2[0]
    out = _layernorm(y + ff, g2[0], bt2[0])

    @pl.when(l < n_l - 1)
    def _writeback():
        seq_s[...] = out.reshape(BT, SEQ, D_MODEL)                      # feed next layer

    @pl.when(l == n_l - 1)
    def _finalize():
        fused_ref[...] = out.reshape(BT, SEQ, D_MODEL)[:, 0, :]         # fusion-token row


# ----------------- wrapper -----------------
def _const2(l):
    return (0, 0)


def _const3(l):
    return (0, 0, 0)


def _layer3(l):
    return (l, 0, 0)


def forward_pallas(frames, goals, p):
    # frames: dict sensor -> (B, T, C_ENC, HP, WP)  (NCHW per frame, as PyTorch)
    pix = []
    for name in SENSOR_NAMES:
        f = frames[name]
        x = jnp.transpose(f.reshape(BT, C_ENC, HW), (0, 2, 1)).reshape(NPIX, C_ENC)
        pix.append(x)
    pix = jnp.stack(pix, axis=0)                       # (N_SENSORS, NPIX, C_ENC)
    goals_rows = goals.reshape(B * L_TEXT, TEXT_DIM)

    bf = lambda a: a.astype(BF16)
    st = lambda k: jnp.stack([lp[k] for lp in p["layers"]])

    inputs = [
        bf(pix), bf(goals_rows),
        bf(p["vc_w1"]), p["vc_b1"], bf(p["vc_w2"]), p["vc_b2"],
        bf(p["va_w"]), p["va_b"], p["va_g"], p["va_beta"],
        bf(p["ta_w"]), p["ta_b"], p["ta_g"], p["ta_beta"],
        p["cam_tokens"], p["fusion_token"].reshape(1, D_MODEL),
        bf(st("wqkv")), st("bqkv"), bf(st("wo")), st("bo"),
        st("g1"), st("bt1"),
        bf(st("wf1")), st("bf1"), bf(st("wf2")), st("bf2"),
        st("g2"), st("bt2"),
    ]

    in_specs = [
        pl.BlockSpec((N_SENSORS, NPIX, C_ENC), _const3),
        pl.BlockSpec((B * L_TEXT, TEXT_DIM), _const2),
        pl.BlockSpec((C_ENC, D_MODEL), _const2), pl.BlockSpec((1, D_MODEL), _const2),
        pl.BlockSpec((D_MODEL, D_MODEL), _const2), pl.BlockSpec((1, D_MODEL), _const2),
        pl.BlockSpec((D_MODEL, D_MODEL), _const2), pl.BlockSpec((1, D_MODEL), _const2),
        pl.BlockSpec((1, D_MODEL), _const2), pl.BlockSpec((1, D_MODEL), _const2),
        pl.BlockSpec((TEXT_DIM, D_MODEL), _const2), pl.BlockSpec((1, D_MODEL), _const2),
        pl.BlockSpec((1, D_MODEL), _const2), pl.BlockSpec((1, D_MODEL), _const2),
        pl.BlockSpec((N_SENSORS, D_MODEL), _const2),
        pl.BlockSpec((1, D_MODEL), _const2),
        pl.BlockSpec((1, D_MODEL, 3 * D_MODEL), _layer3),
        pl.BlockSpec((1, 1, 3 * D_MODEL), _layer3),
        pl.BlockSpec((1, D_MODEL, D_MODEL), _layer3),
        pl.BlockSpec((1, 1, D_MODEL), _layer3),
        pl.BlockSpec((1, 1, D_MODEL), _layer3),
        pl.BlockSpec((1, 1, D_MODEL), _layer3),
        pl.BlockSpec((1, D_MODEL, D_FF), _layer3),
        pl.BlockSpec((1, 1, D_FF), _layer3),
        pl.BlockSpec((1, D_FF, D_MODEL), _layer3),
        pl.BlockSpec((1, 1, D_MODEL), _layer3),
        pl.BlockSpec((1, 1, D_MODEL), _layer3),
        pl.BlockSpec((1, 1, D_MODEL), _layer3),
    ]
    out_specs = [
        pl.BlockSpec((BT, D_MODEL), _const2),
        pl.BlockSpec((B * L_TEXT, D_MODEL), _const2),
    ]
    out_shape = (
        jax.ShapeDtypeStruct((BT, D_MODEL), jnp.float32),
        jax.ShapeDtypeStruct((B * L_TEXT, D_MODEL), jnp.float32),
    )

    fused, text = pl.pallas_call(
        fused_encoder_kernel,
        grid=(N_LAYERS,),
        in_specs=in_specs,
        out_specs=out_specs,
        out_shape=out_shape,
        scratch_shapes=[pltpu.VMEM((BT, SEQ, D_MODEL), jnp.float32)],
        compiler_params=pltpu.CompilerParams(
            dimension_semantics=("arbitrary",),    # layer axis is sequential
            vmem_limit_bytes=64 * 1024 * 1024,
        ),
    )(*inputs)

    return fused.reshape(B, T, D_MODEL), text.reshape(B, L_TEXT, D_MODEL)


# ----------------- pure-JAX f32 reference (same math, no Pallas) -------------
def _ref_ln(x, g, b):
    mu = jnp.mean(x, axis=-1, keepdims=True)
    var = jnp.mean((x - mu) ** 2, axis=-1, keepdims=True)
    return (x - mu) * jax.lax.rsqrt(var + LN_EPS) * g + b


def forward_ref(frames, goals, p):
    per_sensor = []
    for i, name in enumerate(SENSOR_NAMES):
        f = frames[name]
        x = jnp.transpose(f.reshape(BT, C_ENC, HW), (0, 2, 1)).reshape(NPIX, C_ENC)
        h = jnp.maximum(x @ p["vc_w1"] + p["vc_b1"], 0.0)
        h = jnp.maximum(h @ p["vc_w2"] + p["vc_b2"], 0.0)
        h = h @ p["va_w"] + p["va_b"]
        h = jnp.maximum(_ref_ln(h, p["va_g"], p["va_beta"]), 0.0)
        h = h.reshape(BT, HW, D_MODEL) + p["cam_tokens"][i]
        per_sensor.append(h)
    concatenated = jnp.concatenate(per_sensor, axis=1)

    t = goals.reshape(B * L_TEXT, TEXT_DIM) @ p["ta_w"] + p["ta_b"]
    t = jnp.maximum(_ref_ln(t, p["ta_g"], p["ta_beta"]), 0.0).reshape(B, L_TEXT, D_MODEL)
    t_ = jnp.broadcast_to(t[:, None], (B, T, L_TEXT, D_MODEL)).reshape(BT, L_TEXT, D_MODEL)
    fus = jnp.broadcast_to(p["fusion_token"].reshape(1, 1, D_MODEL), (BT, 1, D_MODEL))
    x = jnp.concatenate([fus, concatenated, t_], axis=1)

    scale = 1.0 / math.sqrt(HEAD_DIM)
    for lp in p["layers"]:
        qkv = x @ lp["wqkv"] + lp["bqkv"]
        heads = []
        for h in range(N_HEAD):
            qh = qkv[..., h * HEAD_DIM:(h + 1) * HEAD_DIM]
            kh = qkv[..., D_MODEL + h * HEAD_DIM:D_MODEL + (h + 1) * HEAD_DIM]
            vh = qkv[..., 2 * D_MODEL + h * HEAD_DIM:2 * D_MODEL + (h + 1) * HEAD_DIM]
            s = jnp.einsum("nqd,nkd->nqk", qh, kh) * scale
            s = s - jnp.max(s, axis=-1, keepdims=True)
            pr = jnp.exp(s)
            pr = pr / jnp.sum(pr, axis=-1, keepdims=True)
            heads.append(jnp.einsum("nqk,nkd->nqd", pr, vh))
        attn = jnp.concatenate(heads, axis=-1) @ lp["wo"] + lp["bo"]
        y = _ref_ln(x + attn, lp["g1"], lp["bt1"])
        ff = jnp.maximum(y @ lp["wf1"] + lp["bf1"], 0.0) @ lp["wf2"] + lp["bf2"]
        x = _ref_ln(y + ff, lp["g2"], lp["bt2"])
    return x[:, 0, :].reshape(B, T, D_MODEL), t


# ----------------- deterministic parameter init -----------------
def init_params(key):
    ks = iter(jax.random.split(key, 64))
    n = lambda shape, s=0.05: s * jax.random.normal(next(ks), shape, jnp.float32)
    u = lambda shape: 0.1 * jax.random.uniform(next(ks), shape, jnp.float32)
    p = dict(
        vc_w1=n((C_ENC, D_MODEL)), vc_b1=n((1, D_MODEL)),
        vc_w2=n((D_MODEL, D_MODEL)), vc_b2=n((1, D_MODEL)),
        va_w=n((D_MODEL, D_MODEL)), va_b=n((1, D_MODEL)),
        va_g=1.0 + n((1, D_MODEL)), va_beta=n((1, D_MODEL)),
        ta_w=n((TEXT_DIM, D_MODEL)), ta_b=n((1, D_MODEL)),
        ta_g=1.0 + n((1, D_MODEL)), ta_beta=n((1, D_MODEL)),
        cam_tokens=u((N_SENSORS, D_MODEL)),
        fusion_token=u((D_MODEL,)),
    )
    layers = []
    for _ in range(N_LAYERS):
        layers.append(dict(
            wqkv=n((D_MODEL, 3 * D_MODEL)), bqkv=n((1, 3 * D_MODEL)),
            wo=n((D_MODEL, D_MODEL)), bo=n((1, D_MODEL)),
            g1=1.0 + n((1, D_MODEL)), bt1=n((1, D_MODEL)),
            wf1=n((D_MODEL, D_FF)), bf1=n((1, D_FF)),
            wf2=n((D_FF, D_MODEL)), bf2=n((1, D_MODEL)),
            g2=1.0 + n((1, D_MODEL)), bt2=n((1, D_MODEL)),
        ))
    p["layers"] = layers
    return p


if __name__ == "__main__":
    key = jax.random.PRNGKey(0)
    k_p, k_f1, k_f2, k_g = jax.random.split(key, 4)
    params = init_params(k_p)

    # frames: per-sensor DINOv2-pooled feature maps (B, T, C_enc, H', W')
    frames = {
        SENSOR_NAMES[0]: jax.random.normal(k_f1, (B, T, C_ENC, HP, WP), jnp.float32),
        SENSOR_NAMES[1]: jax.random.normal(k_f2, (B, T, C_ENC, HP, WP), jnp.float32),
    }
    # goals: T5 last_hidden_state stand-in (B, L, text_dim)
    goals = jax.random.normal(k_g, (B, L_TEXT, TEXT_DIM), jnp.float32)

    fwd = jax.jit(forward_pallas)
    fused, text_feats = fwd(frames, goals, params)
    jax.block_until_ready((fused, text_feats))

    fused_ref, text_ref_out = forward_ref(frames, goals, params)
    # tolerance reflects bf16 MXU inputs + approx reciprocal vs. f32 reference
    np.testing.assert_allclose(np.asarray(fused), np.asarray(fused_ref),
                               rtol=5e-2, atol=5e-2)
    np.testing.assert_allclose(np.asarray(text_feats), np.asarray(text_ref_out),
                               rtol=5e-2, atol=5e-2)

    assert fused.shape == (B, T, D_MODEL) and text_feats.shape == (B, L_TEXT, D_MODEL)
    print("KERNEL_OK")
</pallas_src>

<mosaic_0001>
module attributes {stable_mosaic.version = 11 : i64} {
  func.func @fused_encoder_kernel(%arg0: i32, %arg1: memref<2x32x128xbf16, #tpu.memory_space<vmem>>, %arg2: memref<14x128xbf16, #tpu.memory_space<vmem>>, %arg3: memref<128x128xbf16, #tpu.memory_space<vmem>>, %arg4: memref<1x128xf32, #tpu.memory_space<vmem>>, %arg5: memref<128x128xbf16, #tpu.memory_space<vmem>>, %arg6: memref<1x128xf32, #tpu.memory_space<vmem>>, %arg7: memref<128x128xbf16, #tpu.memory_space<vmem>>, %arg8: memref<1x128xf32, #tpu.memory_space<vmem>>, %arg9: memref<1x128xf32, #tpu.memory_space<vmem>>, %arg10: memref<1x128xf32, #tpu.memory_space<vmem>>, %arg11: memref<128x128xbf16, #tpu.memory_space<vmem>>, %arg12: memref<1x128xf32, #tpu.memory_space<vmem>>, %arg13: memref<1x128xf32, #tpu.memory_space<vmem>>, %arg14: memref<1x128xf32, #tpu.memory_space<vmem>>, %arg15: memref<2x128xf32, #tpu.memory_space<vmem>>, %arg16: memref<1x128xf32, #tpu.memory_space<vmem>>, %arg17: memref<1x128x384xbf16, #tpu.memory_space<vmem>>, %arg18: memref<1x1x384xf32, #tpu.memory_space<vmem>>, %arg19: memref<1x128x128xbf16, #tpu.memory_space<vmem>>, %arg20: memref<1x1x128xf32, #tpu.memory_space<vmem>>, %arg21: memref<1x1x128xf32, #tpu.memory_space<vmem>>, %arg22: memref<1x1x128xf32, #tpu.memory_space<vmem>>, %arg23: memref<1x128x256xbf16, #tpu.memory_space<vmem>>, %arg24: memref<1x1x256xf32, #tpu.memory_space<vmem>>, %arg25: memref<1x256x128xbf16, #tpu.memory_space<vmem>>, %arg26: memref<1x1x128xf32, #tpu.memory_space<vmem>>, %arg27: memref<1x1x128xf32, #tpu.memory_space<vmem>>, %arg28: memref<1x1x128xf32, #tpu.memory_space<vmem>>, %arg29: memref<4x128xf32, #tpu.memory_space<vmem>>, %arg30: memref<14x128xf32, #tpu.memory_space<vmem>>, %arg31: memref<4x24x128xf32, #tpu.memory_space<vmem>>) attributes {dimension_semantics = [#tpu.dimension_semantics<arbitrary>], iteration_bounds = array<i64: 2>, scalar_prefetch = 0 : i64, scratch_operands = 1 : i64, tpu.core_type = #tpu.core_type<tc>, window_params = [{pipeline_mode = #tpu.pipeline_mode<synchronous>, transform_indices = @transform_0, window_bounds = array<i64: 2, 32, 128>}, {pipeline_mode = #tpu.pipeline_mode<synchronous>, transform_indices = @transform_1, window_bounds = array<i64: 14, 128>}, {pipeline_mode = #tpu.pipeline_mode<synchronous>, transform_indices = @transform_2, window_bounds = array<i64: 128, 128>}, {pipeline_mode = #tpu.pipeline_mode<synchronous>, transform_indices = @transform_3, window_bounds = array<i64: 1, 128>}, {pipeline_mode = #tpu.pipeline_mode<synchronous>, transform_indices = @transform_4, window_bounds = array<i64: 128, 128>}, {pipeline_mode = #tpu.pipeline_mode<synchronous>, transform_indices = @transform_5, window_bounds = array<i64: 1, 128>}, {pipeline_mode = #tpu.pipeline_mode<synchronous>, transform_indices = @transform_6, window_bounds = array<i64: 128, 128>}, {pipeline_mode = #tpu.pipeline_mode<synchronous>, transform_indices = @transform_7, window_bounds = array<i64: 1, 128>}, {pipeline_mode = #tpu.pipeline_mode<synchronous>, transform_indices = @transform_8, window_bounds = array<i64: 1, 128>}, {pipeline_mode = #tpu.pipeline_mode<synchronous>, transform_indices = @transform_9, window_bounds = array<i64: 1, 128>}, {pipeline_mode = #tpu.pipeline_mode<synchronous>, transform_indices = @transform_10, window_bounds = array<i64: 128, 128>}, {pipeline_mode = #tpu.pipeline_mode<synchronous>, transform_indices = @transform_11, window_bounds = array<i64: 1, 128>}, {pipeline_mode = #tpu.pipeline_mode<synchronous>, transform_indices = @transform_12, window_bounds = array<i64: 1, 128>}, {pipeline_mode = #tpu.pipeline_mode<synchronous>, transform_indices = @transform_13, window_bounds = array<i64: 1, 128>}, {pipeline_mode = #tpu.pipeline_mode<synchronous>, transform_indices = @transform_14, window_bounds = array<i64: 2, 128>}, {pipeline_mode = #tpu.pipeline_mode<synchronous>, transform_indices = @transform_15, window_bounds = array<i64: 1, 128>}, {transform_indices = @transform_16, window_bounds = array<i64: 1, 128, 384>}, {transform_indices = @transform_17, window_bounds = array<i64: 1, 1, 384>}, {transform_indices = @transform_18, window_bounds = array<i64: 1, 128, 128>}, {transform_indices = @transform_19, window_bounds = array<i64: 1, 1, 128>}, {transform_indices = @transform_20, window_bounds = array<i64: 1, 1, 128>}, {transform_indices = @transform_21, window_bounds = array<i64: 1, 1, 128>}, {transform_indices = @transform_22, window_bounds = array<i64: 1, 128, 256>}, {transform_indices = @transform_23, window_bounds = array<i64: 1, 1, 256>}, {transform_indices = @transform_24, window_bounds = array<i64: 1, 256, 128>}, {transform_indices = @transform_25, window_bounds = array<i64: 1, 1, 128>}, {transform_indices = @transform_26, window_bounds = array<i64: 1, 1, 128>}, {transform_indices = @transform_27, window_bounds = array<i64: 1, 1, 128>}, {pipeline_mode = #tpu.pipeline_mode<synchronous>, transform_indices = @transform_28, window_bounds = array<i64: 4, 128>}, {pipeline_mode = #tpu.pipeline_mode<synchronous>, transform_indices = @transform_29, window_bounds = array<i64: 14, 128>}]} {
    %c0_i32 = arith.constant 0 : i32
    %0 = arith.cmpi eq, %arg0, %c0_i32 : i32
    %1 = arith.extui %0 : i1 to i32
    %c0_i32_0 = arith.constant 0 : i32
    %2 = arith.cmpi ne, %1, %c0_i32_0 : i32
    scf.if %2 {
      %c0_79 = arith.constant 0 : index
      %c0_80 = arith.constant 0 : index
      %177 = vector.load %arg2[%c0_79, %c0_80] : memref<14x128xbf16, #tpu.memory_space<vmem>>, vector<14x128xbf16>
      %c0_81 = arith.constant 0 : index
      %c0_82 = arith.constant 0 : index
      %178 = vector.load %arg11[%c0_81, %c0_82] : memref<128x128xbf16, #tpu.memory_space<vmem>>, vector<128x128xbf16>
      %cst_83 = arith.constant dense<0.000000e+00> : vector<14x128xf32>
      %179 = tpu.matmul %177, %178, %cst_83 {dimension_numbers = #tpu.dot_dimension_numbers<[1], [0], [0], [1], [0, 0, 1, 1], [], []>} : vector<14x128xbf16>, vector<128x128xbf16>, vector<14x128xf32> -> vector<14x128xf32>
      %c0_84 = arith.constant 0 : index
      %c0_85 = arith.constant 0 : index
      %180 = vector.load %arg12[%c0_84, %c0_85] : memref<1x128xf32, #tpu.memory_space<vmem>>, vector<1x128xf32>
      %181 = vector.broadcast %180 : vector<1x128xf32> to vector<14x128xf32>
      %182 = arith.addf %179, %181 : vector<14x128xf32>
      %c0_86 = arith.constant 0 : index
      %c0_87 = arith.constant 0 : index
      %183 = vector.load %arg13[%c0_86, %c0_87] : memref<1x128xf32, #tpu.memory_space<vmem>>, vector<1x128xf32>
      %c0_88 = arith.constant 0 : index
      %c0_89 = arith.constant 0 : index
      %184 = vector.load %arg14[%c0_88, %c0_89] : memref<1x128xf32, #tpu.memory_space<vmem>>, vector<1x128xf32>
      %cst_90 = arith.constant dense<0.000000e+00> : vector<14xf32>
      %185 = vector.multi_reduction <add>, %182, %cst_90 [1] : vector<14x128xf32> to vector<14xf32>
      %186 = vector.shape_cast %185 : vector<14xf32> to vector<14x1xf32>
      %cst_91 = arith.constant 1.280000e+02 : f32
      %187 = vector.broadcast %cst_91 : f32 to vector<14x1xf32>
      %188 = arith.divf %186, %187 : vector<14x1xf32>
      %189 = vector.broadcast %188 : vector<14x1xf32> to vector<14x128xf32>
      %190 = arith.subf %182, %189 : vector<14x128xf32>
      %191 = arith.mulf %190, %190 : vector<14x128xf32>
      %cst_92 = arith.constant dense<0.000000e+00> : vector<14xf32>
      %192 = vector.multi_reduction <add>, %191, %cst_92 [1] : vector<14x128xf32> to vector<14xf32>
      %193 = vector.shape_cast %192 : vector<14xf32> to vector<14x1xf32>
      %cst_93 = arith.constant 1.280000e+02 : f32
      %194 = vector.broadcast %cst_93 : f32 to vector<14x1xf32>
      %195 = arith.divf %193, %194 : vector<14x1xf32>
      %196 = vector.broadcast %188 : vector<14x1xf32> to vector<14x128xf32>
      %197 = arith.subf %182, %196 : vector<14x128xf32>
      %cst_94 = arith.constant 9.99999974E-6 : f32
      %198 = vector.broadcast %cst_94 : f32 to vector<14x1xf32>
      %199 = arith.addf %195, %198 : vector<14x1xf32>
      %200 = math.rsqrt %199 : vector<14x1xf32>
      %201 = vector.broadcast %200 : vector<14x1xf32> to vector<14x128xf32>
      %202 = arith.mulf %197, %201 : vector<14x128xf32>
      %203 = vector.broadcast %183 : vector<1x128xf32> to vector<14x128xf32>
      %204 = arith.mulf %202, %203 : vector<14x128xf32>
      %205 = vector.broadcast %184 : vector<1x128xf32> to vector<14x128xf32>
      %206 = arith.addf %204, %205 : vector<14x128xf32>
      %cst_95 = arith.constant 0.000000e+00 : f32
      %207 = vector.broadcast %cst_95 : f32 to vector<14x128xf32>
      %208 = arith.maximumf %206, %207 : vector<14x128xf32>
      %c0_96 = arith.constant 0 : index
      %c0_97 = arith.constant 0 : index
      %209 = vector.load %arg30[%c0_96, %c0_97] : memref<14x128xf32, #tpu.memory_space<vmem>>, vector<14x128xf32>
      tpu.vector_store %arg30[%c0_96, %c0_97], %208 {strides = array<i32>} : memref<14x128xf32, #tpu.memory_space<vmem>>, vector<14x128xf32>,
      %c0_98 = arith.constant 0 : index
      %c0_99 = arith.constant 0 : index
      %c0_100 = arith.constant 0 : index
      %210 = vector.load %arg1[%c0_98, %c0_99, %c0_100] : memref<2x32x128xbf16, #tpu.memory_space<vmem>>, vector<2x32x128xbf16>
      %211 = vector.shape_cast %210 : vector<2x32x128xbf16> to vector<64x128xbf16>
      %c0_101 = arith.constant 0 : index
      %c0_102 = arith.constant 0 : index
      %212 = vector.load %arg3[%c0_101, %c0_102] : memref<128x128xbf16, #tpu.memory_space<vmem>>, vector<128x128xbf16>
      %cst_103 = arith.constant dense<0.000000e+00> : vector<64x128xf32>
      %213 = tpu.matmul %211, %212, %cst_103 {dimension_numbers = #tpu.dot_dimension_numbers<[1], [0], [0], [1], [0, 0, 1, 1], [], []>} : vector<64x128xbf16>, vector<128x128xbf16>, vector<64x128xf32> -> vector<64x128xf32>
      %c0_104 = arith.constant 0 : index
      %c0_105 = arith.constant 0 : index
      %214 = vector.load %arg4[%c0_104, %c0_105] : memref<1x128xf32, #tpu.memory_space<vmem>>, vector<1x128xf32>
      %215 = vector.broadcast %214 : vector<1x128xf32> to vector<64x128xf32>
      %216 = arith.addf %213, %215 : vector<64x128xf32>
      %cst_106 = arith.constant 0.000000e+00 : f32
      %217 = vector.broadcast %cst_106 : f32 to vector<64x128xf32>
      %218 = arith.maximumf %216, %217 : vector<64x128xf32>
      %219 = arith.truncf %218 : vector<64x128xf32> to vector<64x128xbf16>
      %c0_107 = arith.constant 0 : index
      %c0_108 = arith.constant 0 : index
      %220 = vector.load %arg5[%c0_107, %c0_108] : memref<128x128xbf16, #tpu.memory_space<vmem>>, vector<128x128xbf16>
      %cst_109 = arith.constant dense<0.000000e+00> : vector<64x128xf32>
      %221 = tpu.matmul %219, %220, %cst_109 {dimension_numbers = #tpu.dot_dimension_numbers<[1], [0], [0], [1], [0, 0, 1, 1], [], []>} : vector<64x128xbf16>, vector<128x128xbf16>, vector<64x128xf32> -> vector<64x128xf32>
      %c0_110 = arith.constant 0 : index
      %c0_111 = arith.constant 0 : index
      %222 = vector.load %arg6[%c0_110, %c0_111] : memref<1x128xf32, #tpu.memory_space<vmem>>, vector<1x128xf32>
      %223 = vector.broadcast %222 : vector<1x128xf32> to vector<64x128xf32>
      %224 = arith.addf %221, %223 : vector<64x128xf32>
      %cst_112 = arith.constant 0.000000e+00 : f32
      %225 = vector.broadcast %cst_112 : f32 to vector<64x128xf32>
      %226 = arith.maximumf %224, %225 : vector<64x128xf32>
      %227 = arith.truncf %226 : vector<64x128xf32> to vector<64x128xbf16>
      %c0_113 = arith.constant 0 : index
      %c0_114 = arith.constant 0 : index
      %228 = vector.load %arg7[%c0_113, %c0_114] : memref<128x128xbf16, #tpu.memory_space<vmem>>, vector<128x128xbf16>
      %cst_115 = arith.constant dense<0.000000e+00> : vector<64x128xf32>
      %229 = tpu.matmul %227, %228, %cst_115 {dimension_numbers = #tpu.dot_dimension_numbers<[1], [0], [0], [1], [0, 0, 1, 1], [], []>} : vector<64x128xbf16>, vector<128x128xbf16>, vector<64x128xf32> -> vector<64x128xf32>
      %c0_116 = arith.constant 0 : index
      %c0_117 = arith.constant 0 : index
      %230 = vector.load %arg8[%c0_116, %c0_117] : memref<1x128xf32, #tpu.memory_space<vmem>>, vector<1x128xf32>
      %231 = vector.broadcast %230 : vector<1x128xf32> to vector<64x128xf32>
      %232 = arith.addf %229, %231 : vector<64x128xf32>
      %c0_118 = arith.constant 0 : index
      %c0_119 = arith.constant 0 : index
      %233 = vector.load %arg9[%c0_118, %c0_119] : memref<1x128xf32, #tpu.memory_space<vmem>>, vector<1x128xf32>
      %c0_120 = arith.constant 0 : index
      %c0_121 = arith.constant 0 : index
      %234 = vector.load %arg10[%c0_120, %c0_121] : memref<1x128xf32, #tpu.memory_space<vmem>>, vector<1x128xf32>
      %cst_122 = arith.constant dense<0.000000e+00> : vector<64xf32>
      %235 = vector.multi_reduction <add>, %232, %cst_122 [1] : vector<64x128xf32> to vector<64xf32>
      %236 = vector.shape_cast %235 : vector<64xf32> to vector<64x1xf32>
      %cst_123 = arith.constant 1.280000e+02 : f32
      %237 = vector.broadcast %cst_123 : f32 to vector<64x1xf32>
      %238 = arith.divf %236, %237 : vector<64x1xf32>
      %239 = vector.broadcast %238 : vector<64x1xf32> to vector<64x128xf32>
      %240 = arith.subf %232, %239 : vector<64x128xf32>
      %241 = arith.mulf %240, %240 : vector<64x128xf32>
      %cst_124 = arith.constant dense<0.000000e+00> : vector<64xf32>
      %242 = vector.multi_reduction <add>, %241, %cst_124 [1] : vector<64x128xf32> to vector<64xf32>
      %243 = vector.shape_cast %242 : vector<64xf32> to vector<64x1xf32>
      %cst_125 = arith.constant 1.280000e+02 : f32
      %244 = vector.broadcast %cst_125 : f32 to vector<64x1xf32>
      %245 = arith.divf %243, %244 : vector<64x1xf32>
      %246 = vector.broadcast %238 : vector<64x1xf32> to vector<64x128xf32>
      %247 = arith.subf %232, %246 : vector<64x128xf32>
      %cst_126 = arith.constant 9.99999974E-6 : f32
      %248 = vector.broadcast %cst_126 : f32 to vector<64x1xf32>
      %249 = arith.addf %245, %248 : vector<64x1xf32>
      %250 = math.rsqrt %249 : vector<64x1xf32>
      %251 = vector.broadcast %250 : vector<64x1xf32> to vector<64x128xf32>
      %252 = arith.mulf %247, %251 : vector<64x128xf32>
      %253 = vector.broadcast %233 : vector<1x128xf32> to vector<64x128xf32>
      %254 = arith.mulf %252, %253 : vector<64x128xf32>
      %255 = vector.broadcast %234 : vector<1x128xf32> to vector<64x128xf32>
      %256 = arith.addf %254, %255 : vector<64x128xf32>
      %cst_127 = arith.constant 0.000000e+00 : f32
      %257 = vector.broadcast %cst_127 : f32 to vector<64x128xf32>
      %258 = arith.maximumf %256, %257 : vector<64x128xf32>
      %259 = vector.shape_cast %258 : vector<64x128xf32> to vector<2x4x8x128xf32>
      %c0_128 = arith.constant 0 : index
      %c0_129 = arith.constant 0 : index
      %260 = vector.load %arg16[%c0_128, %c0_129] : memref<1x128xf32, #tpu.memory_space<vmem>>, vector<1x128xf32>
      %261 = vector.shape_cast %260 : vector<1x128xf32> to vector<1x1x128xf32>
      %262 = vector.shape_cast %261 : vector<1x1x128xf32> to vector<1x1x128xf32>
      %263 = vector.broadcast %262 : vector<1x1x128xf32> to vector<4x1x128xf32>
      %264 = vector.extract_strided_slice %259 {offsets = [0, 0, 0, 0], sizes = [1, 4, 8, 128], strides = [1, 1, 1, 1]} : vector<2x4x8x128xf32> to vector<1x4x8x128xf32>
      %265 = vector.shape_cast %264 : vector<1x4x8x128xf32> to vector<4x8x128xf32>
      %c0_130 = arith.constant 0 : index
      %c0_131 = arith.constant 0 : index
      %266 = vector.load %arg15[%c0_130, %c0_131] : memref<2x128xf32, #tpu.memory_space<vmem>>, vector<1x128xf32>
      %267 = vector.shape_cast %266 : vector<1x128xf32> to vector<128xf32>
      %268 = vector.shape_cast %267 : vector<128xf32> to vector<1x1x128xf32>
      %269 = vector.broadcast %268 : vector<1x1x128xf32> to vector<4x8x128xf32>
      %270 = arith.addf %265, %269 : vector<4x8x128xf32>
      %271 = vector.extract_strided_slice %259 {offsets = [1, 0, 0, 0], sizes = [1, 4, 8, 128], strides = [1, 1, 1, 1]} : vector<2x4x8x128xf32> to vector<1x4x8x128xf32>
      %272 = vector.shape_cast %271 : vector<1x4x8x128xf32> to vector<4x8x128xf32>
      %c1 = arith.constant 1 : index
      %c0_132 = arith.constant 0 : index
      %273 = vector.load %arg15[%c1, %c0_132] : memref<2x128xf32, #tpu.memory_space<vmem>>, vector<1x128xf32>
      %274 = vector.shape_cast %273 : vector<1x128xf32> to vector<128xf32>
      %275 = vector.shape_cast %274 : vector<128xf32> to vector<1x1x128xf32>
      %276 = vector.broadcast %275 : vector<1x1x128xf32> to vector<4x8x128xf32>
      %277 = arith.addf %272, %276 : vector<4x8x128xf32>
      %278 = vector.shape_cast %208 : vector<14x128xf32> to vector<2x1x7x128xf32>
      %279 = vector.shape_cast %278 : vector<2x1x7x128xf32> to vector<2x1x7x128xf32>
      %280 = vector.broadcast %279 : vector<2x1x7x128xf32> to vector<2x2x7x128xf32>
      %281 = vector.shape_cast %280 : vector<2x2x7x128xf32> to vector<4x7x128xf32>
      %282 = tpu.concatenate %263, %270, %277, %281 in 1 : vector<4x1x128xf32>, vector<4x8x128xf32>, vector<4x8x128xf32>, vector<4x7x128xf32> -> vector<4x24x128xf32>
      %c0_133 = arith.constant 0 : index
      %c0_134 = arith.constant 0 : index
      %c0_135 = arith.constant 0 : index
      %283 = vector.load %arg31[%c0_133, %c0_134, %c0_135] : memref<4x24x128xf32, #tpu.memory_space<vmem>>, vector<4x24x128xf32>
      tpu.vector_store %arg31[%c0_133, %c0_134, %c0_135], %282 {strides = array<i32>} : memref<4x24x128xf32, #tpu.memory_space<vmem>>, vector<4x24x128xf32>,
    } else {
    }
    %c0 = arith.constant 0 : index
    %c0_1 = arith.constant 0 : index
    %c0_2 = arith.constant 0 : index
    %3 = vector.load %arg31[%c0, %c0_1, %c0_2] : memref<4x24x128xf32, #tpu.memory_space<vmem>>, vector<4x24x128xf32>
    %4 = vector.shape_cast %3 : vector<4x24x128xf32> to vector<96x128xf32>
    %5 = arith.truncf %4 : vector<96x128xf32> to vector<96x128xbf16>
    %c0_3 = arith.constant 0 : index
    %c0_4 = arith.constant 0 : index
    %c0_5 = arith.constant 0 : index
    %6 = vector.load %arg17[%c0_3, %c0_4, %c0_5] : memref<1x128x384xbf16, #tpu.memory_space<vmem>>, vector<1x128x384xbf16>
    %7 = vector.shape_cast %6 : vector<1x128x384xbf16> to vector<128x384xbf16>
    %cst = arith.constant dense<0.000000e+00> : vector<96x384xf32>
    %8 = tpu.matmul %5, %7, %cst {dimension_numbers = #tpu.dot_dimension_numbers<[1], [0], [0], [1], [0, 0, 1, 1], [], []>} : vector<96x128xbf16>, vector<128x384xbf16>, vector<96x384xf32> -> vector<96x384xf32>
    %c0_6 = arith.constant 0 : index
    %c0_7 = arith.constant 0 : index
    %c0_8 = arith.constant 0 : index
    %9 = vector.load %arg18[%c0_6, %c0_7, %c0_8] : memref<1x1x384xf32, #tpu.memory_space<vmem>>, vector<1x1x384xf32>
    %10 = vector.shape_cast %9 : vector<1x1x384xf32> to vector<1x384xf32>
    %11 = vector.broadcast %10 : vector<1x384xf32> to vector<96x384xf32>
    %12 = arith.addf %8, %11 : vector<96x384xf32>
    %13 = arith.truncf %12 : vector<96x384xf32> to vector<96x384xbf16>
    %14 = vector.shape_cast %13 : vector<96x384xbf16> to vector<4x24x384xbf16>
    %15 = vector.extract_strided_slice %14 {offsets = [0, 0, 0], sizes = [4, 24, 32], strides = [1, 1, 1]} : vector<4x24x384xbf16> to vector<4x24x32xbf16>
    %16 = vector.extract_strided_slice %14 {offsets = [0, 0, 128], sizes = [4, 24, 32], strides = [1, 1, 1]} : vector<4x24x384xbf16> to vector<4x24x32xbf16>
    %17 = vector.extract_strided_slice %14 {offsets = [0, 0, 256], sizes = [4, 24, 32], strides = [1, 1, 1]} : vector<4x24x384xbf16> to vector<4x24x32xbf16>
    "tpu.trace_start"() <{level = 10 : i32, message = "bqd,bkd->bqk"}> : () -> ()
    %cst_9 = arith.constant dense<0.000000e+00> : vector<4x24x24xf32>
    %18 = tpu.matmul %15, %16, %cst_9 {dimension_numbers = #tpu.dot_dimension_numbers<[2], [2], [1], [1], [0, 0, 0, 1, 1, 1], [0], [0]>} : vector<4x24x32xbf16>, vector<4x24x32xbf16>, vector<4x24x24xf32> -> vector<4x24x24xf32>
    "tpu.trace_stop"() : () -> ()
    %cst_10 = arith.constant 0.176776692 : f32
    %19 = vector.broadcast %cst_10 : f32 to vector<4x24x24xf32>
    %20 = arith.mulf %18, %19 : vector<4x24x24xf32>
    %cst_11 = arith.constant dense<0xFF800000> : vector<4x24xf32>
    %21 = vector.multi_reduction <maximumf>, %20, %cst_11 [2] : vector<4x24x24xf32> to vector<4x24xf32>
    %22 = vector.shape_cast %21 : vector<4x24xf32> to vector<4x24x1xf32>
    %23 = vector.broadcast %22 : vector<4x24x1xf32> to vector<4x24x24xf32>
    %24 = arith.subf %20, %23 : vector<4x24x24xf32>
    %25 = math.exp %24 : vector<4x24x24xf32>
    %cst_12 = arith.constant dense<0.000000e+00> : vector<4x24xf32>
    %26 = vector.multi_reduction <add>, %25, %cst_12 [2] : vector<4x24x24xf32> to vector<4x24xf32>
    %27 = vector.shape_cast %26 : vector<4x24xf32> to vector<4x24x1xf32>
    %28 = tpu.reciprocal %27 {approx = true} : vector<4x24x1xf32> -> vector<4x24x1xf32>
    %29 = vector.broadcast %28 : vector<4x24x1xf32> to vector<4x24x24xf32>
    %30 = arith.mulf %25, %29 : vector<4x24x24xf32>
    %31 = arith.truncf %30 : vector<4x24x24xf32> to vector<4x24x24xbf16>
    "tpu.trace_start"() <{level = 10 : i32, message = "bqk,bkd->bqd"}> : () -> ()
    %cst_13 = arith.constant dense<0.000000e+00> : vector<4x24x32xf32>
    %32 = tpu.matmul %31, %17, %cst_13 {dimension_numbers = #tpu.dot_dimension_numbers<[2], [1], [1], [2], [0, 0, 0, 1, 1, 2], [0], [0]>} : vector<4x24x24xbf16>, vector<4x24x32xbf16>, vector<4x24x32xf32> -> vector<4x24x32xf32>
    "tpu.trace_stop"() : () -> ()
    %33 = vector.extract_strided_slice %14 {offsets = [0, 0, 32], sizes = [4, 24, 32], strides = [1, 1, 1]} : vector<4x24x384xbf16> to vector<4x24x32xbf16>
    %34 = vector.extract_strided_slice %14 {offsets = [0, 0, 160], sizes = [4, 24, 32], strides = [1, 1, 1]} : vector<4x24x384xbf16> to vector<4x24x32xbf16>
    %35 = vector.extract_strided_slice %14 {offsets = [0, 0, 288], sizes = [4, 24, 32], strides = [1, 1, 1]} : vector<4x24x384xbf16> to vector<4x24x32xbf16>
    "tpu.trace_start"() <{level = 10 : i32, message = "bqd,bkd->bqk"}> : () -> ()
    %cst_14 = arith.constant dense<0.000000e+00> : vector<4x24x24xf32>
    %36 = tpu.matmul %33, %34, %cst_14 {dimension_numbers = #tpu.dot_dimension_numbers<[2], [2], [1], [1], [0, 0, 0, 1, 1, 1], [0], [0]>} : vector<4x24x32xbf16>, vector<4x24x32xbf16>, vector<4x24x24xf32> -> vector<4x24x24xf32>
    "tpu.trace_stop"() : () -> ()
    %cst_15 = arith.constant 0.176776692 : f32
    %37 = vector.broadcast %cst_15 : f32 to vector<4x24x24xf32>
    %38 = arith.mulf %36, %37 : vector<4x24x24xf32>
    %cst_16 = arith.constant dense<0xFF800000> : vector<4x24xf32>
    %39 = vector.multi_reduction <maximumf>, %38, %cst_16 [2] : vector<4x24x24xf32> to vector<4x24xf32>
    %40 = vector.shape_cast %39 : vector<4x24xf32> to vector<4x24x1xf32>
    %41 = vector.broadcast %40 : vector<4x24x1xf32> to vector<4x24x24xf32>
    %42 = arith.subf %38, %41 : vector<4x24x24xf32>
    %43 = math.exp %42 : vector<4x24x24xf32>
    %cst_17 = arith.constant dense<0.000000e+00> : vector<4x24xf32>
    %44 = vector.multi_reduction <add>, %43, %cst_17 [2] : vector<4x24x24xf32> to vector<4x24xf32>
    %45 = vector.shape_cast %44 : vector<4x24xf32> to vector<4x24x1xf32>
    %46 = tpu.reciprocal %45 {approx = true} : vector<4x24x1xf32> -> vector<4x24x1xf32>
    %47 = vector.broadcast %46 : vector<4x24x1xf32> to vector<4x24x24xf32>
    %48 = arith.mulf %43, %47 : vector<4x24x24xf32>
    %49 = arith.truncf %48 : vector<4x24x24xf32> to vector<4x24x24xbf16>
    "tpu.trace_start"() <{level = 10 : i32, message = "bqk,bkd->bqd"}> : () -> ()
    %cst_18 = arith.constant dense<0.000000e+00> : vector<4x24x32xf32>
    %50 = tpu.matmul %49, %35, %cst_18 {dimension_numbers = #tpu.dot_dimension_numbers<[2], [1], [1], [2], [0, 0, 0, 1, 1, 2], [0], [0]>} : vector<4x24x24xbf16>, vector<4x24x32xbf16>, vector<4x24x32xf32> -> vector<4x24x32xf32>
    "tpu.trace_stop"() : () -> ()
    %51 = vector.extract_strided_slice %14 {offsets = [0, 0, 64], sizes = [4, 24, 32], strides = [1, 1, 1]} : vector<4x24x384xbf16> to vector<4x24x32xbf16>
    %52 = vector.extract_strided_slice %14 {offsets = [0, 0, 192], sizes = [4, 24, 32], strides = [1, 1, 1]} : vector<4x24x384xbf16> to vector<4x24x32xbf16>
    %53 = vector.extract_strided_slice %14 {offsets = [0, 0, 320], sizes = [4, 24, 32], strides = [1, 1, 1]} : vector<4x24x384xbf16> to vector<4x24x32xbf16>
    "tpu.trace_start"() <{level = 10 : i32, message = "bqd,bkd->bqk"}> : () -> ()
    %cst_19 = arith.constant dense<0.000000e+00> : vector<4x24x24xf32>
    %54 = tpu.matmul %51, %52, %cst_19 {dimension_numbers = #tpu.dot_dimension_numbers<[2], [2], [1], [1], [0, 0, 0, 1, 1, 1], [0], [0]>} : vector<4x24x32xbf16>, vector<4x24x32xbf16>, vector<4x24x24xf32> -> vector<4x24x24xf32>
    "tpu.trace_stop"() : () -> ()
    %cst_20 = arith.constant 0.176776692 : f32
    %55 = vector.broadcast %cst_20 : f32 to vector<4x24x24xf32>
    %56 = arith.mulf %54, %55 : vector<4x24x24xf32>
    %cst_21 = arith.constant dense<0xFF800000> : vector<4x24xf32>
    %57 = vector.multi_reduction <maximumf>, %56, %cst_21 [2] : vector<4x24x24xf32> to vector<4x24xf32>
    %58 = vector.shape_cast %57 : vector<4x24xf32> to vector<4x24x1xf32>
    %59 = vector.broadcast %58 : vector<4x24x1xf32> to vector<4x24x24xf32>
    %60 = arith.subf %56, %59 : vector<4x24x24xf32>
    %61 = math.exp %60 : vector<4x24x24xf32>
    %cst_22 = arith.constant dense<0.000000e+00> : vector<4x24xf32>
    %62 = vector.multi_reduction <add>, %61, %cst_22 [2] : vector<4x24x24xf32> to vector<4x24xf32>
    %63 = vector.shape_cast %62 : vector<4x24xf32> to vector<4x24x1xf32>
    %64 = tpu.reciprocal %63 {approx = true} : vector<4x24x1xf32> -> vector<4x24x1xf32>
    %65 = vector.broadcast %64 : vector<4x24x1xf32> to vector<4x24x24xf32>
    %66 = arith.mulf %61, %65 : vector<4x24x24xf32>
    %67 = arith.truncf %66 : vector<4x24x24xf32> to vector<4x24x24xbf16>
    "tpu.trace_start"() <{level = 10 : i32, message = "bqk,bkd->bqd"}> : () -> ()
    %cst_23 = arith.constant dense<0.000000e+00> : vector<4x24x32xf32>
    %68 = tpu.matmul %67, %53, %cst_23 {dimension_numbers = #tpu.dot_dimension_numbers<[2], [1], [1], [2], [0, 0, 0, 1, 1, 2], [0], [0]>} : vector<4x24x24xbf16>, vector<4x24x32xbf16>, vector<4x24x32xf32> -> vector<4x24x32xf32>
    "tpu.trace_stop"() : () -> ()
    %69 = vector.extract_strided_slice %14 {offsets = [0, 0, 96], sizes = [4, 24, 32], strides = [1, 1, 1]} : vector<4x24x384xbf16> to vector<4x24x32xbf16>
    %70 = vector.extract_strided_slice %14 {offsets = [0, 0, 224], sizes = [4, 24, 32], strides = [1, 1, 1]} : vector<4x24x384xbf16> to vector<4x24x32xbf16>
    %71 = vector.extract_strided_slice %14 {offsets = [0, 0, 352], sizes = [4, 24, 32], strides = [1, 1, 1]} : vector<4x24x384xbf16> to vector<4x24x32xbf16>
    "tpu.trace_start"() <{level = 10 : i32, message = "bqd,bkd->bqk"}> : () -> ()
    %cst_24 = arith.constant dense<0.000000e+00> : vector<4x24x24xf32>
    %72 = tpu.matmul %69, %70, %cst_24 {dimension_numbers = #tpu.dot_dimension_numbers<[2], [2], [1], [1], [0, 0, 0, 1, 1, 1], [0], [0]>} : vector<4x24x32xbf16>, vector<4x24x32xbf16>, vector<4x24x24xf32> -> vector<4x24x24xf32>
    "tpu.trace_stop"() : () -> ()
    %cst_25 = arith.constant 0.176776692 : f32
    %73 = vector.broadcast %cst_25 : f32 to vector<4x24x24xf32>
    %74 = arith.mulf %72, %73 : vector<4x24x24xf32>
    %cst_26 = arith.constant dense<0xFF800000> : vector<4x24xf32>
    %75 = vector.multi_reduction <maximumf>, %74, %cst_26 [2] : vector<4x24x24xf32> to vector<4x24xf32>
    %76 = vector.shape_cast %75 : vector<4x24xf32> to vector<4x24x1xf32>
    %77 = vector.broadcast %76 : vector<4x24x1xf32> to vector<4x24x24xf32>
    %78 = arith.subf %74, %77 : vector<4x24x24xf32>
    %79 = math.exp %78 : vector<4x24x24xf32>
    %cst_27 = arith.constant dense<0.000000e+00> : vector<4x24xf32>
    %80 = vector.multi_reduction <add>, %79, %cst_27 [2] : vector<4x24x24xf32> to vector<4x24xf32>
    %81 = vector.shape_cast %80 : vector<4x24xf32> to vector<4x24x1xf32>
    %82 = tpu.reciprocal %81 {approx = true} : vector<4x24x1xf32> -> vector<4x24x1xf32>
    %83 = vector.broadcast %82 : vector<4x24x1xf32> to vector<4x24x24xf32>
    %84 = arith.mulf %79, %83 : vector<4x24x24xf32>
    %85 = arith.truncf %84 : vector<4x24x24xf32> to vector<4x24x24xbf16>
    "tpu.trace_start"() <{level = 10 : i32, message = "bqk,bkd->bqd"}> : () -> ()
    %cst_28 = arith.constant dense<0.000000e+00> : vector<4x24x32xf32>
    %86 = tpu.matmul %85, %71, %cst_28 {dimension_numbers = #tpu.dot_dimension_numbers<[2], [1], [1], [2], [0, 0, 0, 1, 1, 2], [0], [0]>} : vector<4x24x24xbf16>, vector<4x24x32xbf16>, vector<4x24x32xf32> -> vector<4x24x32xf32>
    "tpu.trace_stop"() : () -> ()
    %87 = tpu.concatenate %32, %50, %68, %86 in 2 : vector<4x24x32xf32>, vector<4x24x32xf32>, vector<4x24x32xf32>, vector<4x24x32xf32> -> vector<4x24x128xf32>
    %88 = vector.shape_cast %87 : vector<4x24x128xf32> to vector<96x128xf32>
    %89 = arith.truncf %88 : vector<96x128xf32> to vector<96x128xbf16>
    %c0_29 = arith.constant 0 : index
    %c0_30 = arith.constant 0 : index
    %c0_31 = arith.constant 0 : index
    %90 = vector.load %arg19[%c0_29, %c0_30, %c0_31] : memref<1x128x128xbf16, #tpu.memory_space<vmem>>, vector<1x128x128xbf16>
    %91 = vector.shape_cast %90 : vector<1x128x128xbf16> to vector<128x128xbf16>
    %cst_32 = arith.constant dense<0.000000e+00> : vector<96x128xf32>
    %92 = tpu.matmul %89, %91, %cst_32 {dimension_numbers = #tpu.dot_dimension_numbers<[1], [0], [0], [1], [0, 0, 1, 1], [], []>} : vector<96x128xbf16>, vector<128x128xbf16>, vector<96x128xf32> -> vector<96x128xf32>
    %c0_33 = arith.constant 0 : index
    %c0_34 = arith.constant 0 : index
    %c0_35 = arith.constant 0 : index
    %93 = vector.load %arg20[%c0_33, %c0_34, %c0_35] : memref<1x1x128xf32, #tpu.memory_space<vmem>>, vector<1x1x128xf32>
    %94 = vector.shape_cast %93 : vector<1x1x128xf32> to vector<1x128xf32>
    %95 = vector.broadcast %94 : vector<1x128xf32> to vector<96x128xf32>
    %96 = arith.addf %92, %95 : vector<96x128xf32>
    %c0_36 = arith.constant 0 : index
    %c0_37 = arith.constant 0 : index
    %c0_38 = arith.constant 0 : index
    %97 = vector.load %arg31[%c0_36, %c0_37, %c0_38] : memref<4x24x128xf32, #tpu.memory_space<vmem>>, vector<4x24x128xf32>
    %98 = vector.shape_cast %97 : vector<4x24x128xf32> to vector<96x128xf32>
    %99 = arith.addf %98, %96 : vector<96x128xf32>
    %c0_39 = arith.constant 0 : index
    %c0_40 = arith.constant 0 : index
    %c0_41 = arith.constant 0 : index
    %100 = vector.load %arg21[%c0_39, %c0_40, %c0_41] : memref<1x1x128xf32, #tpu.memory_space<vmem>>, vector<1x1x128xf32>
    %101 = vector.shape_cast %100 : vector<1x1x128xf32> to vector<1x128xf32>
    %c0_42 = arith.constant 0 : index
    %c0_43 = arith.constant 0 : index
    %c0_44 = arith.constant 0 : index
    %102 = vector.load %arg22[%c0_42, %c0_43, %c0_44] : memref<1x1x128xf32, #tpu.memory_space<vmem>>, vector<1x1x128xf32>
    %103 = vector.shape_cast %102 : vector<1x1x128xf32> to vector<1x128xf32>
    %cst_45 = arith.constant dense<0.000000e+00> : vector<96xf32>
    %104 = vector.multi_reduction <add>, %99, %cst_45 [1] : vector<96x128xf32> to vector<96xf32>
    %105 = vector.shape_cast %104 : vector<96xf32> to vector<96x1xf32>
    %cst_46 = arith.constant 1.280000e+02 : f32
    %106 = vector.broadcast %cst_46 : f32 to vector<96x1xf32>
    %107 = arith.divf %105, %106 : vector<96x1xf32>
    %108 = vector.broadcast %107 : vector<96x1xf32> to vector<96x128xf32>
    %109 = arith.subf %99, %108 : vector<96x128xf32>
    %110 = arith.mulf %109, %109 : vector<96x128xf32>
    %cst_47 = arith.constant dense<0.000000e+00> : vector<96xf32>
    %111 = vector.multi_reduction <add>, %110, %cst_47 [1] : vector<96x128xf32> to vector<96xf32>
    %112 = vector.shape_cast %111 : vector<96xf32> to vector<96x1xf32>
    %cst_48 = arith.constant 1.280000e+02 : f32
    %113 = vector.broadcast %cst_48 : f32 to vector<96x1xf32>
    %114 = arith.divf %112, %113 : vector<96x1xf32>
    %115 = vector.broadcast %107 : vector<96x1xf32> to vector<96x128xf32>
    %116 = arith.subf %99, %115 : vector<96x128xf32>
    %cst_49 = arith.constant 9.99999974E-6 : f32
    %117 = vector.broadcast %cst_49 : f32 to vector<96x1xf32>
    %118 = arith.addf %114, %117 : vector<96x1xf32>
    %119 = math.rsqrt %118 : vector<96x1xf32>
    %120 = vector.broadcast %119 : vector<96x1xf32> to vector<96x128xf32>
    %121 = arith.mulf %116, %120 : vector<96x128xf32>
    %122 = vector.broadcast %101 : vector<1x128xf32> to vector<96x128xf32>
    %123 = arith.mulf %121, %122 : vector<96x128xf32>
    %124 = vector.broadcast %103 : vector<1x128xf32> to vector<96x128xf32>
    %125 = arith.addf %123, %124 : vector<96x128xf32>
    %126 = arith.truncf %125 : vector<96x128xf32> to vector<96x128xbf16>
    %c0_50 = arith.constant 0 : index
    %c0_51 = arith.constant 0 : index
    %c0_52 = arith.constant 0 : index
    %127 = vector.load %arg23[%c0_50, %c0_51, %c0_52] : memref<1x128x256xbf16, #tpu.memory_space<vmem>>, vector<1x128x256xbf16>
    %128 = vector.shape_cast %127 : vector<1x128x256xbf16> to vector<128x256xbf16>
    %cst_53 = arith.constant dense<0.000000e+00> : vector<96x256xf32>
    %129 = tpu.matmul %126, %128, %cst_53 {dimension_numbers = #tpu.dot_dimension_numbers<[1], [0], [0], [1], [0, 0, 1, 1], [], []>} : vector<96x128xbf16>, vector<128x256xbf16>, vector<96x256xf32> -> vector<96x256xf32>
    %c0_54 = arith.constant 0 : index
    %c0_55 = arith.constant 0 : index
    %c0_56 = arith.constant 0 : index
    %130 = vector.load %arg24[%c0_54, %c0_55, %c0_56] : memref<1x1x256xf32, #tpu.memory_space<vmem>>, vector<1x1x256xf32>
    %131 = vector.shape_cast %130 : vector<1x1x256xf32> to vector<1x256xf32>
    %132 = vector.broadcast %131 : vector<1x256xf32> to vector<96x256xf32>
    %133 = arith.addf %129, %132 : vector<96x256xf32>
    %cst_57 = arith.constant 0.000000e+00 : f32
    %134 = vector.broadcast %cst_57 : f32 to vector<96x256xf32>
    %135 = arith.maximumf %133, %134 : vector<96x256xf32>
    %136 = arith.truncf %135 : vector<96x256xf32> to vector<96x256xbf16>
    %c0_58 = arith.constant 0 : index
    %c0_59 = arith.constant 0 : index
    %c0_60 = arith.constant 0 : index
    %137 = vector.load %arg25[%c0_58, %c0_59, %c0_60] : memref<1x256x128xbf16, #tpu.memory_space<vmem>>, vector<1x256x128xbf16>
    %138 = vector.shape_cast %137 : vector<1x256x128xbf16> to vector<256x128xbf16>
    %cst_61 = arith.constant dense<0.000000e+00> : vector<96x128xf32>
    %139 = tpu.matmul %136, %138, %cst_61 {dimension_numbers = #tpu.dot_dimension_numbers<[1], [0], [0], [1], [0, 0, 1, 1], [], []>} : vector<96x256xbf16>, vector<256x128xbf16>, vector<96x128xf32> -> vector<96x128xf32>
    %c0_62 = arith.constant 0 : index
    %c0_63 = arith.constant 0 : index
    %c0_64 = arith.constant 0 : index
    %140 = vector.load %arg26[%c0_62, %c0_63, %c0_64] : memref<1x1x128xf32, #tpu.memory_space<vmem>>, vector<1x1x128xf32>
    %141 = vector.shape_cast %140 : vector<1x1x128xf32> to vector<1x128xf32>
    %142 = vector.broadcast %141 : vector<1x128xf32> to vector<96x128xf32>
    %143 = arith.addf %139, %142 : vector<96x128xf32>
    %144 = arith.addf %125, %143 : vector<96x128xf32>
    %c0_65 = arith.constant 0 : index
    %c0_66 = arith.constant 0 : index
    %c0_67 = arith.constant 0 : index
    %145 = vector.load %arg27[%c0_65, %c0_66, %c0_67] : memref<1x1x128xf32, #tpu.memory_space<vmem>>, vector<1x1x128xf32>
    %146 = vector.shape_cast %145 : vector<1x1x128xf32> to vector<1x128xf32>
    %c0_68 = arith.constant 0 : index
    %c0_69 = arith.constant 0 : index
    %c0_70 = arith.constant 0 : index
    %147 = vector.load %arg28[%c0_68, %c0_69, %c0_70] : memref<1x1x128xf32, #tpu.memory_space<vmem>>, vector<1x1x128xf32>
    %148 = vector.shape_cast %147 : vector<1x1x128xf32> to vector<1x128xf32>
    %cst_71 = arith.constant dense<0.000000e+00> : vector<96xf32>
    %149 = vector.multi_reduction <add>, %144, %cst_71 [1] : vector<96x128xf32> to vector<96xf32>
    %150 = vector.shape_cast %149 : vector<96xf32> to vector<96x1xf32>
    %cst_72 = arith.constant 1.280000e+02 : f32
    %151 = vector.broadcast %cst_72 : f32 to vector<96x1xf32>
    %152 = arith.divf %150, %151 : vector<96x1xf32>
    %153 = vector.broadcast %152 : vector<96x1xf32> to vector<96x128xf32>
    %154 = arith.subf %144, %153 : vector<96x128xf32>
    %155 = arith.mulf %154, %154 : vector<96x128xf32>
    %cst_73 = arith.constant dense<0.000000e+00> : vector<96xf32>
    %156 = vector.multi_reduction <add>, %155, %cst_73 [1] : vector<96x128xf32> to vector<96xf32>
    %157 = vector.shape_cast %156 : vector<96xf32> to vector<96x1xf32>
    %cst_74 = arith.constant 1.280000e+02 : f32
    %158 = vector.broadcast %cst_74 : f32 to vector<96x1xf32>
    %159 = arith.divf %157, %158 : vector<96x1xf32>
    %160 = vector.broadcast %152 : vector<96x1xf32> to vector<96x128xf32>
    %161 = arith.subf %144, %160 : vector<96x128xf32>
    %cst_75 = arith.constant 9.99999974E-6 : f32
    %162 = vector.broadcast %cst_75 : f32 to vector<96x1xf32>
    %163 = arith.addf %159, %162 : vector<96x1xf32>
    %164 = math.rsqrt %163 : vector<96x1xf32>
    %165 = vector.broadcast %164 : vector<96x1xf32> to vector<96x128xf32>
    %166 = arith.mulf %161, %165 : vector<96x128xf32>
    %167 = vector.broadcast %146 : vector<1x128xf32> to vector<96x128xf32>
    %168 = arith.mulf %166, %167 : vector<96x128xf32>
    %169 = vector.broadcast %148 : vector<1x128xf32> to vector<96x128xf32>
    %170 = arith.addf %168, %169 : vector<96x128xf32>
    %c1_i32 = arith.constant 1 : i32
    %171 = arith.cmpi slt, %arg0, %c1_i32 : i32
    %172 = arith.extui %171 : i1 to i32
    %c0_i32_76 = arith.constant 0 : i32
    %173 = arith.cmpi ne, %172, %c0_i32_76 : i32
    scf.if %173 {
      %177 = vector.shape_cast %170 : vector<96x128xf32> to vector<4x24x128xf32>
      %c0_79 = arith.constant 0 : index
      %c0_80 = arith.constant 0 : index
      %c0_81 = arith.constant 0 : index
      %178 = vector.load %arg31[%c0_79, %c0_80, %c0_81] : memref<4x24x128xf32, #tpu.memory_space<vmem>>, vector<4x24x128xf32>
      tpu.vector_store %arg31[%c0_79, %c0_80, %c0_81], %177 {strides = array<i32>} : memref<4x24x128xf32, #tpu.memory_space<vmem>>, vector<4x24x128xf32>,
    } else {
    }
    %c1_i32_77 = arith.constant 1 : i32
    %174 = arith.cmpi eq, %arg0, %c1_i32_77 : i32
    %175 = arith.extui %174 : i1 to i32
    %c0_i32_78 = arith.constant 0 : i32
    %176 = arith.cmpi ne, %175, %c0_i32_78 : i32
    scf.if %176 {
      %177 = vector.shape_cast %170 : vector<96x128xf32> to vector<4x24x128xf32>
      %178 = vector.extract_strided_slice %177 {offsets = [0, 0, 0], sizes = [4, 1, 128], strides = [1, 1, 1]} : vector<4x24x128xf32> to vector<4x1x128xf32>
      %179 = vector.shape_cast %178 : vector<4x1x128xf32> to vector<4x128xf32>
      %c0_79 = arith.constant 0 : index
      %c0_80 = arith.constant 0 : index
      %180 = vector.load %arg29[%c0_79, %c0_80] : memref<4x128xf32, #tpu.memory_space<vmem>>, vector<4x128xf32>
      tpu.vector_store %arg29[%c0_79, %c0_80], %179 {strides = array<i32>} : memref<4x128xf32, #tpu.memory_space<vmem>>, vector<4x128xf32>,
    } else {
    }
    return
  }
  func.func @transform_0(%arg0: i32) -> (i32, i32, i32) {
    %c0_i32 = arith.constant 0 : i32
    %c0_i32_0 = arith.constant 0 : i32
    %c0_i32_1 = arith.constant 0 : i32
    %c0_i32_2 = arith.constant 0 : i32
    return %c0_i32, %c0_i32_0, %c0_i32_1 : i32, i32, i32
  }
  func.func @transform_1(%arg0: i32) -> (i32, i32) {
    %c0_i32 = arith.constant 0 : i32
    %c0_i32_0 = arith.constant 0 : i32
    %c0_i32_1 = arith.constant 0 : i32
    return %c0_i32, %c0_i32_0 : i32, i32
  }
  func.func @transform_2(%arg0: i32) -> (i32, i32) {
    %c0_i32 = arith.constant 0 : i32
    %c0_i32_0 = arith.constant 0 : i32
    %c0_i32_1 = arith.constant 0 : i32
    return %c0_i32, %c0_i32_0 : i32, i32
  }
  func.func @transform_3(%arg0: i32) -> (i32, i32) {
    %c0_i32 = arith.constant 0 : i32
    %c0_i32_0 = arith.constant 0 : i32
    %c0_i32_1 = arith.constant 0 : i32
    return %c0_i32, %c0_i32_0 : i32, i32
  }
  func.func @transform_4(%arg0: i32) -> (i32, i32) {
    %c0_i32 = arith.constant 0 : i32
    %c0_i32_0 = arith.constant 0 : i32
    %c0_i32_1 = arith.constant 0 : i32
    return %c0_i32, %c0_i32_0 : i32, i32
  }
  func.func @transform_5(%arg0: i32) -> (i32, i32) {
    %c0_i32 = arith.constant 0 : i32
    %c0_i32_0 = arith.constant 0 : i32
    %c0_i32_1 = arith.constant 0 : i32
    return %c0_i32, %c0_i32_0 : i32, i32
  }
  func.func @transform_6(%arg0: i32) -> (i32, i32) {
    %c0_i32 = arith.constant 0 : i32
    %c0_i32_0 = arith.constant 0 : i32
    %c0_i32_1 = arith.constant 0 : i32
    return %c0_i32, %c0_i32_0 : i32, i32
  }
  func.func @transform_7(%arg0: i32) -> (i32, i32) {
    %c0_i32 = arith.constant 0 : i32
    %c0_i32_0 = arith.constant 0 : i32
    %c0_i32_1 = arith.constant 0 : i32
    return %c0_i32, %c0_i32_0 : i32, i32
  }
  func.func @transform_8(%arg0: i32) -> (i32, i32) {
    %c0_i32 = arith.constant 0 : i32
    %c0_i32_0 = arith.constant 0 : i32
    %c0_i32_1 = arith.constant 0 : i32
    return %c0_i32, %c0_i32_0 : i32, i32
  }
  func.func @transform_9(%arg0: i32) -> (i32, i32) {
    %c0_i32 = arith.constant 0 : i32
    %c0_i32_0 = arith.constant 0 : i32
    %c0_i32_1 = arith.constant 0 : i32
    return %c0_i32, %c0_i32_0 : i32, i32
  }
  func.func @transform_10(%arg0: i32) -> (i32, i32) {
    %c0_i32 = arith.constant 0 : i32
    %c0_i32_0 = arith.constant 0 : i32
    %c0_i32_1 = arith.constant 0 : i32
    return %c0_i32, %c0_i32_0 : i32, i32
  }
  func.func @transform_11(%arg0: i32) -> (i32, i32) {
    %c0_i32 = arith.constant 0 : i32
    %c0_i32_0 = arith.constant 0 : i32
    %c0_i32_1 = arith.constant 0 : i32
    return %c0_i32, %c0_i32_0 : i32, i32
  }
  func.func @transform_12(%arg0: i32) -> (i32, i32) {
    %c0_i32 = arith.constant 0 : i32
    %c0_i32_0 = arith.constant 0 : i32
    %c0_i32_1 = arith.constant 0 : i32
    return %c0_i32, %c0_i32_0 : i32, i32
  }
  func.func @transform_13(%arg0: i32) -> (i32, i32) {
    %c0_i32 = arith.constant 0 : i32
    %c0_i32_0 = arith.constant 0 : i32
    %c0_i32_1 = arith.constant 0 : i32
    return %c0_i32, %c0_i32_0 : i32, i32
  }
  func.func @transform_14(%arg0: i32) -> (i32, i32) {
    %c0_i32 = arith.constant 0 : i32
    %c0_i32_0 = arith.constant 0 : i32
    %c0_i32_1 = arith.constant 0 : i32
    return %c0_i32, %c0_i32_0 : i32, i32
  }
  func.func @transform_15(%arg0: i32) -> (i32, i32) {
    %c0_i32 = arith.constant 0 : i32
    %c0_i32_0 = arith.constant 0 : i32
    %c0_i32_1 = arith.constant 0 : i32
    return %c0_i32, %c0_i32_0 : i32, i32
  }
  func.func @transform_16(%arg0: i32) -> (i32, i32, i32) {
    %c0_i32 = arith.constant 0 : i32
    %c0_i32_0 = arith.constant 0 : i32
    %c0_i32_1 = arith.constant 0 : i32
    return %arg0, %c0_i32, %c0_i32_0 : i32, i32, i32
  }
  func.func @transform_17(%arg0: i32) -> (i32, i32, i32) {
    %c0_i32 = arith.constant 0 : i32
    %c0_i32_0 = arith.constant 0 : i32
    %c0_i32_1 = arith.constant 0 : i32
    return %arg0, %c0_i32, %c0_i32_0 : i32, i32, i32
  }
  func.func @transform_18(%arg0: i32) -> (i32, i32, i32) {
    %c0_i32 = arith.constant 0 : i32
    %c0_i32_0 = arith.constant 0 : i32
    %c0_i32_1 = arith.constant 0 : i32
    return %arg0, %c0_i32, %c0_i32_0 : i32, i32, i32
  }
  func.func @transform_19(%arg0: i32) -> (i32, i32, i32) {
    %c0_i32 = arith.constant 0 : i32
    %c0_i32_0 = arith.constant 0 : i32
    %c0_i32_1 = arith.constant 0 : i32
    return %arg0, %c0_i32, %c0_i32_0 : i32, i32, i32
  }
  func.func @transform_20(%arg0: i32) -> (i32, i32, i32) {
    %c0_i32 = arith.constant 0 : i32
    %c0_i32_0 = arith.constant 0 : i32
    %c0_i32_1 = arith.constant 0 : i32
    return %arg0, %c0_i32, %c0_i32_0 : i32, i32, i32
  }
  func.func @transform_21(%arg0: i32) -> (i32, i32, i32) {
    %c0_i32 = arith.constant 0 : i32
    %c0_i32_0 = arith.constant 0 : i32
    %c0_i32_1 = arith.constant 0 : i32
    return %arg0, %c0_i32, %c0_i32_0 : i32, i32, i32
  }
  func.func @transform_22(%arg0: i32) -> (i32, i32, i32) {
    %c0_i32 = arith.constant 0 : i32
    %c0_i32_0 = arith.constant 0 : i32
    %c0_i32_1 = arith.constant 0 : i32
    return %arg0, %c0_i32, %c0_i32_0 : i32, i32, i32
  }
  func.func @transform_23(%arg0: i32) -> (i32, i32, i32) {
    %c0_i32 = arith.constant 0 : i32
    %c0_i32_0 = arith.constant 0 : i32
    %c0_i32_1 = arith.constant 0 : i32
    return %arg0, %c0_i32, %c0_i32_0 : i32, i32, i32
  }
  func.func @transform_24(%arg0: i32) -> (i32, i32, i32) {
    %c0_i32 = arith.constant 0 : i32
    %c0_i32_0 = arith.constant 0 : i32
    %c0_i32_1 = arith.constant 0 : i32
    return %arg0, %c0_i32, %c0_i32_0 : i32, i32, i32
  }
  func.func @transform_25(%arg0: i32) -> (i32, i32, i32) {
    %c0_i32 = arith.constant 0 : i32
    %c0_i32_0 = arith.constant 0 : i32
    %c0_i32_1 = arith.constant 0 : i32
    return %arg0, %c0_i32, %c0_i32_0 : i32, i32, i32
  }
  func.func @transform_26(%arg0: i32) -> (i32, i32, i32) {
    %c0_i32 = arith.constant 0 : i32
    %c0_i32_0 = arith.constant 0 : i32
    %c0_i32_1 = arith.constant 0 : i32
    return %arg0, %c0_i32, %c0_i32_0 : i32, i32, i32
  }
  func.func @transform_27(%arg0: i32) -> (i32, i32, i32) {
    %c0_i32 = arith.constant 0 : i32
    %c0_i32_0 = arith.constant 0 : i32
    %c0_i32_1 = arith.constant 0 : i32
    return %arg0, %c0_i32, %c0_i32_0 : i32, i32, i32
  }
  func.func @transform_28(%arg0: i32) -> (i32, i32) {
    %c0_i32 = arith.constant 0 : i32
    %c0_i32_0 = arith.constant 0 : i32
    %c0_i32_1 = arith.constant 0 : i32
    return %c0_i32, %c0_i32_0 : i32, i32
  }
  func.func @transform_29(%arg0: i32) -> (i32, i32) {
    %c0_i32 = arith.constant 0 : i32
    %c0_i32_0 = arith.constant 0 : i32
    %c0_i32_1 = arith.constant 0 : i32
    return %c0_i32, %c0_i32_0 : i32, i32
  }
}

</mosaic_0001>

<bundles_post_ra>
// kernel: forward_pallas.1
= control target key start
LH: loop header
LB: loop body
LE: loop exit
PB: predicated region body
PF: predicated region fallthrough
CT: control target
= control target key end

     0   :  { %s10228_s6 = smov 1   ;;  %s10229_s10 = smov 2   ;;  %s12834_s0 = inlined_call_operand.smem [shape: u32[30], index: -1, kind: input, shape index: {}] }
   0x1   :  { %s10310_s5 = sld [smem:[%s12834_s0]]   ;;  %s10230_s14 = smov 3  }
   0x2   :  { %s10315_s9 = sld [smem:[%s12834_s0 + %s10228_s6]]   ;;  %s10231_s18 = smov 4  }
   0x3   :  { %s10320_s13 = sld [smem:[%s12834_s0 + %s10229_s10]]   ;;  %s10232_s22 = smov 5  }
   0x4   :  { %s10325_s17 = sld [smem:[%s12834_s0 + %s10230_s14]]   ;;  %s10233_s26 = smov 6  }
   0x5   :  { %s10330_s21 = sld [smem:[%s12834_s0 + %s10231_s18]]   ;;  %s10234_s30 = smov 7  }
   0x6   :  { %s10335_s25 = sld [smem:[%s12834_s0 + %s10232_s22]]   ;;  %s10235_s4 = smov 8  }
   0x7   :  { %12911 = sst [smem:[#allocation56_spill]] %s10310_s5  ;;  %s10236_s10 = smov 9  }
   0x8   :  { %12912 = sst [smem:[#allocation57_spill]] %s10315_s9  ;;  %s10237_s15 = smov 10  }
   0x9   :  { %12913 = sst [smem:[#allocation58_spill]] %s10320_s13  ;;  %s10238_s20 = smov 11  }
   0xa   :  { %s10340_s29 = sld [smem:[%s12834_s0 + %s10233_s26]]   ;;  %s10239_s26 = smov 12  }
   0xb   :  { %12914 = sst [smem:[#allocation59_spill]] %s10330_s21  ;;  %s10240_s1 = smov 13  }
   0xc   :  { %12915 = sst [smem:[#allocation60_spill]] %s10335_s25  ;;  %s10241_s7 = smov 14  }
   0xd   :  { %s10345_s3 = sld [smem:[%s12834_s0 + %s10234_s30]]   ;;  %s10243_s22 = smov 16  }
   0xe   :  { %s10350_s8 = sld [smem:[%s12834_s0 + %s10235_s4]]   ;;  %s10244_s28 = smov 17  }
   0xf   :  { %s10355_s14 = sld [smem:[%s12834_s0 + %s10236_s10]]  }
  0x10   :  { %12916 = sst [smem:[#allocation61_spill]] %s10340_s29 }
  0x11   :  { %s10360_s19 = sld [smem:[%s12834_s0 + %s10237_s15]]   ;;  %s10242_s15 = smov 15  }
  0x12   :  { %s10365_s24 = sld [smem:[%s12834_s0 + %s10238_s20]]  }
  0x13   :  { %12917 = sst [smem:[#allocation62_spill]] %s10345_s3 }
  0x14   :  { %12918 = sst [smem:[#allocation63_spill]] %s10350_s8 }
  0x15   :  { %12919 = sst [smem:[#allocation64_spill]] %s10355_s14 }
  0x16   :  { %s10370_s30 = sld [smem:[%s12834_s0 + %s10239_s26]]  }
  0x17   :  { %12920 = sst [smem:[#allocation65_spill]] %s10360_s19 }
  0x18   :  { %12921 = sst [smem:[#allocation66_spill]] %s10365_s24 }
  0x19   :  { %s10375_s6 = sld [smem:[%s12834_s0 + %s10240_s1]]  }
  0x1a   :  { %s10380_s12 = sld [smem:[%s12834_s0 + %s10241_s7]]   ;;  %s10245_s7 = smov 18  }
  0x1b   :  { %s10385_s20 = sld [smem:[%s12834_s0 + %s10242_s15]]   ;;  %s10246_s15 = smov 19  }
  0x1c   :  { %12922 = sst [smem:[#allocation67_spill]] %s10370_s30 }
  0x1d   :  { %s10390_s27 = sld [smem:[%s12834_s0 + %s10243_s22]]   ;;  %s10247_s22 = smov 20  }
  0x1e   :  { %s10395_s4 = sld [smem:[%s12834_s0 + %s10244_s28]]   ;;  %s10248_s28 = smov 21  }
  0x1f   :  { %12923 = sst [smem:[#allocation68_spill]] %s10375_s6 }
  0x20   :  { %12924 = sst [smem:[#allocation69_spill]] %s10380_s12 }
  0x21   :  { %12925 = sst [smem:[#allocation70_spill]] %s10385_s20 }
  0x22   :  { %s10400_s12 = sld [smem:[%s12834_s0 + %s10245_s7]]   ;;  %s10249_s7 = smov 22  }
  0x23   :  { %12926 = sst [smem:[#allocation71_spill]] %s10390_s27 }
  0x24   :  { %12927 = sst [smem:[#allocation72_spill]] %s10395_s4 }
  0x25   :  { %s10405_s20 = sld [smem:[%s12834_s0 + %s10246_s15]]   ;;  %s10250_s15 = smov 23  }
  0x26   :  { %s10410_s30 = sld [smem:[%s12834_s0 + %s10247_s22]]   ;;  %s10251_s22 = smov 24  }
  0x27   :  { %s10415_s19 = sld [smem:[%s12834_s0 + %s10248_s28]]   ;;  %s10252_s28 = smov 25  }
  0x28   :  { %12928 = sst [smem:[#allocation73_spill]] %s10400_s12 }
  0x29   :  { %s10420_s8 = sld [smem:[%s12834_s0 + %s10249_s7]]   ;;  %s10253_s7 = smov 26  }
  0x2a   :  { %s10425_s29 = sld [smem:[%s12834_s0 + %s10250_s15]]   ;;  %s10254_s15 = smov 27  }
  0x2b   :  { %s10430_s21 = sld [smem:[%s12834_s0 + %s10251_s22]]   ;;  %s10255_s22 = smov 28  }
  0x2c   :  { %s10435_s13 = sld [smem:[%s12834_s0 + %s10252_s28]]   ;;  %s10256_s28 = smov 29  }
  0x2d   :  { %s10440_s6 = sld [smem:[%s12834_s0 + %s10253_s7]]  }
  0x2e   :  { %s10445_s24 = sld [smem:[%s12834_s0 + %s10254_s15]]  }
  0x2f   :  { %12929 = sst [smem:[#allocation74_spill]] %s10420_s8 }
  0x30   :  { %s10450_s14 = sld [smem:[%s12834_s0 + %s10255_s22]]  }
  0x31   :  { %s10455_s3 = sld [smem:[%s12834_s0 + %s10256_s28]]  }
  0x33   :  { %12930 = sst [smem:[#allocation75_spill]] %s10440_s6 }
  0x34   :  { %12931 = sst [smem:[#allocation76_spill]] %s10445_s24 }
  0x36   :  { %12932 = sst [smem:[#allocation77_spill]] %s10450_s14 }
  0x37   :  { %12933 = sst [smem:[#allocation78_spill]] %s10455_s3 }
  0x38   :  { %65 = vsyncpa [#allocation4], 0 }
  0x39   :  { %66 = vsyncpa [#allocation7], 0 }
  0x3a   :  { %67 = vsyncpa [#allocation10], 0 }
  0x3b   :  { %68 = vsyncpa [#allocation13], 0 }
  0x3c   :  { %69 = vsyncpa [#allocation16], 0 }
  0x3d   :  { %70 = vsyncpa [#allocation19], 0 }
  0x3e   :  { %71 = vsyncpa [#allocation22], 0 }
  0x3f   :  { %72 = vsyncpa [#allocation25], 0 }
  0x40   :  { %73 = vsyncpa [#allocation28], 0 }
  0x41   :  { %74 = vsyncpa [#allocation5], 0 }
  0x42   :  { %75 = vsyncpa [#allocation43], 0  ;;  %s10457_s7 = smov 0   ;;  %s10459_s10 = smov 0  }
  0x43   :  { %s10461_s11 = smov 0   ;;  %s10463_s15 = smov 0  }
  0x44 LB: > { %s12934_s12 = sld [smem:[#allocation73_spill]]  ;;  %s12936_s8 = sld [smem:[#allocation74_spill]]  ;;  %s10218_s10 = sphi %s10459_s10, %s13071_s10   ;;  %s10214_s7 = sphi %s10457_s7, %s13070_s7   ;;  %s10226_s15 = sphi %s10463_s15, %s13069_s15   ;;  %s10222_s11 = sphi %s10461_s11, %s13072_s11  }
  0x45   : > { %s12935_s9 = sld [smem:[#allocation57_spill]]  ;;  %s12937_s4 = sld [smem:[#allocation72_spill]] }
  0x46   : > { %s12938_s27 = sld [smem:[#allocation71_spill]]  ;;  %s12939_s5 = sld [smem:[#allocation56_spill]] }
  0x47   : > { %12940 = sst [smem:[#allocation79_spill]] %s10218_s10  ;;  %s10257_s0 = smov [#allocation3]  }
  0x48   : > { %12941 = sst [smem:[#allocation80_spill]] %s10222_s11  ;;  %s788_s16 = sshll.u32 %s10257_s0, 4  ;;  %s789_s16 = int_to_ptr.vmem [resolvable:$true] %s788_s16 }
  0x49   : > { %s10478_s18 = sadd.s32 4294967295, %s10226_s15   ;;  %p7454_p0 = scmp.ge.s32.totalorder %s10226_s15, 1 }
  0x4a   : > { %12942 = sst [smem:[#allocation81_spill]] %s10478_s18  ;;  %p12847_p1 = scmp.eq.s32.totalorder %s10478_s18, 0 }
  0x4b   : > { %p776_p2 = scmp.lt.s32.totalorder %s10226_s15, 3  ;;  %s10497_s26 = sadd.s32 1, %s10226_s15  }
  0x4c   : > { %12946 = sst [smem:[#allocation83_spill]] %s10497_s26  ;;  %s9288_s28 = scalar_lea.hbm %s12939_s5, 512 }
  0x4d   : > { %p10484_p4 = pnand %p7454_p0, %p776_p2  ;;  %p9289_p7 = scmp.ne.s32.totalorder %s12939_s5, %s9288_s28 }
  0x4e   : > { %p9295_p11 = scmp.lt.u32.totalorder %s9288_s28, %s12939_s5 }
  0x4f   : > { %s12943_s22 = scalar_select %p10484_p4, 1, 0 }
  0x50   : > { %p8604_p5 = pneg %p10484_p4 }
  0x51   : > { %12944 = sst [smem:[#allocation82_spill]] %s12943_s22 }
  0x52   : > { %p10492_p6 = pnand %p8604_p5, %p12847_p1 }
  0x54   : > { %s12945_s23 = scalar_select %p10492_p6, 1, 0 }
  0x55   : > { %p10503_p8 = pneg %p10492_p6 }
  0x57   : > { %s12947_s1 = scalar_select %p10503_p8, 1, 0 }
  0x58   : > { %p9291_p9 = pnand %p10503_p8, %p9289_p7 }
  0x5a   : > { %p9292_p10 = pneg %p9291_p9 }
  0x5c   : > { %p9297_p12 = pnand %p9295_p11, %p9292_p10 }
  0x5e   : > { %9300 = shalt.err (!%p9297_p12)
}
  0x5f   : > { %s9301_s2 = scalar_lea.vmem %s789_s16, 512  ;;  %p9309_p5 = scmp.lt.s32.totalorder %s789_s16, %s789_s16 }
  0x60   : > { %p9302_p13 = scmp.ne.s32.totalorder %s789_s16, %s9301_s2  ;;  %p9310_p3 = scmp.lt.s32.totalorder %s9301_s2, %s9301_s2 }
  0x62   : > { %p9304_p0 = pnand %p9302_p13, %p10503_p8  ;;  %p9311_p1 = por %p9310_p3, %p9309_p5 }
  0x64   : > { %p9305_p2 = pneg %p9304_p0 }
  0x66   : > { %p9312_p4 = pnand %p9311_p1, %p9305_p2 }
  0x68   : > { %9315 = shalt.err (!%p9312_p4)
}
  0x69   : > { %s12853_s0 = smov 64   ;;  %s12855_s28 = smov 4  }
  0x6a   : > { %8607 = dma.hbm_to_vmem [thread:$0]  (!%p10492_p6), %s12939_s5, 512, %s789_s16, [#allocation4], %s12853_s0, %s12853_s0, %s12855_s28  }
  0x6b   : > { %s421_s2 = ssub.s32 %s10226_s15, %s10497_s26  ;;  %s424_s3 = sadd.s32 1, %s10222_s11 }
  0x6c   : > { %p422_p1 = scmp.eq.s32.totalorder %s421_s2, 0  ;;  %p431_p3 = scmp.ne.s32.totalorder %s10222_s11, %s10218_s10 }
  0x6d   : > { %p432_p4 = scmp.eq.s32.totalorder %s10226_s15, 0  ;;  %p437_p7 = scmp.ne.s32.totalorder %s10218_s10, %s10214_s7 }
  0x6e   : > { %s10527_s14 = scalar_select %p422_p1, %s10222_s11, %s424_s3  }
  0x6f   : > { %p433_p9 = por %p432_p4, %p431_p3  ;;  %p12949_p10 = scmp.eq.s32.totalorder %s10478_s18, 0 }
  0x70   : > { %12948 = sst [smem:[#allocation84_spill]] %s10527_s14  ;;  %p8706_p12 = scmp.lt.s32.totalorder %s10226_s15, 2 }
  0x71   : > { %p10531_p11 = por %p12949_p10, %p437_p7  ;;  %s977_s24 = sand.u32 1, %s10226_s15  }
  0x72   : > { %s10538_s16 = sand.u32 1, %s10222_s11   ;;  %p10541_p13 = pnand %p8706_p12, %p433_p9 }
  0x73   : > { %s12950_s22 = scalar_select %p10531_p11, 1, 0 }
  0x74   : > { %s8502_s0 = smul.u32 192, %s10538_s16  ;;  %s10551_s14 = scalar_lea.sflag [#allocation4], %s977_s24 }
  0x75   : > { %12951 = sst [smem:[#allocation85_spill]] %s12950_s22  ;;  %s8503_s3 = smul.u32 3072, %s10226_s15 }
  0x76   : > { %s12952_s2 = scalar_select %p10541_p13, 1, 0 }
  0x77   : > { %s10547_s7 = scalar_lea.hbm %s12938_s27, %s8503_s3  ;;  %s981_s28 = scalar_lea.vmem [#allocation29], %s8502_s0 }
  0x78   : > { %s988_s5 = sshll.u32 %s981_s28, 4  ;;  %s9316_s11 = scalar_lea.hbm %s10547_s7, 3072  ;;  %s10549_s5 = int_to_ptr.vmem [resolvable:$true] %s988_s5 }
  0x79   : > { %p9317_p0 = scmp.ne.s32.totalorder %s10547_s7, %s9316_s11  ;;  %p10557_p2 = pneg %p10541_p13 }
  0x7a   : > { %s9321_s3 = scalar_lea.hbm %s12938_s27, 6144  ;;  %p9322_p3 = scmp.lt.u32.totalorder %s10547_s7, %s12938_s27 }
  0x7b   : > { %s12953_s26 = scalar_select %p10557_p2, 1, 0 }
  0x7c   : > { %p9319_p5 = pnand %p10557_p2, %p9317_p0  ;;  %p9323_p4 = scmp.lt.u32.totalorder %s9321_s3, %s9316_s11 }
  0x7d   : > { %p9325_p9 = scmp.lt.u32.totalorder %s9316_s11, %s10547_s7 }
  0x7e   : > { %p9320_p1 = pneg %p9319_p5  ;;  %p9324_p7 = por %p9323_p4, %p9322_p3 }
  0x80   : > { %p9326_p10 = por %p9325_p9, %p9324_p7 }
  0x82   : > { %p9327_p12 = pnand %p9326_p10, %p9320_p1 }
  0x84   : > { %9330 = shalt.err (!%p9327_p12)
}
  0x85   : > { %s9331_s24 = scalar_lea.vmem %s10549_s5, 3072  ;;  %s10260_s0 = smov [#allocation29]  }
  0x86   : > { %p9332_p11 = scmp.ne.s32.totalorder %s10549_s5, %s9331_s24  ;;  %s9336_s28 = sshll.u32 %s10260_s0, 4  ;;  %s9337_s28 = int_to_ptr.vmem [resolvable:$false] %s9336_s28 }
  0x87   : > { %s9338_s22 = scalar_lea.vmem %s9337_s28, 6144  ;;  %p9339_p0 = scmp.lt.s32.totalorder %s10549_s5, %s9337_s28 }
  0x88   : > { %p9334_p6 = pnand %p9332_p11, %p10557_p2  ;;  %p9340_p5 = scmp.lt.s32.totalorder %s9338_s22, %s9331_s24 }
  0x8a   : > { %p9335_p8 = pneg %p9334_p6  ;;  %p9341_p3 = por %p9340_p5, %p9339_p0 }
  0x8c   : > { %p9342_p4 = pnand %p9341_p3, %p9335_p8 }
  0x8e   : > { %9345 = shalt.err (!%p9342_p4)
}
  0x8f   : > { %s10261_s11 = smov 192   ;;  %s10262_s3 = smov 12  }
  0x90   : > { %8656 = dma.hbm_to_vmem [thread:$0]  (!%p10541_p13), %s10547_s7, 3072, %s10549_s5, %s10551_s14, %s10261_s11, %s10261_s11, %s10262_s3  }
  0x91   : > { %s8504_s22 = smul.u32 3, %s10538_s16  ;;  %s7474_s24 = sshll.u32 %s10538_s16, 6 }
  0x92   : > { %s8505_s0 = smul.u32 48, %s10226_s15  ;;  %s7757_s28 = sshll.u32 %s10226_s15, 10 }
  0x93   : > { %s1002_s10 = scalar_lea.vmem [#allocation30], %s8504_s22  ;;  %s10585_s6 = scalar_lea.hbm %s12934_s12, %s7757_s28 }
  0x94   : > { %s10582_s27 = scalar_lea.hbm %s12937_s4, %s8505_s0  ;;  %s1010_s18 = sshll.u32 %s1002_s10, 4  ;;  %s1011_s18 = int_to_ptr.vmem [resolvable:$true] %s1010_s18 }
  0x95   : > { %s9346_s25 = scalar_lea.hbm %s10582_s27, 48  ;;  %s9351_s5 = scalar_lea.hbm %s12937_s4, 96 }
  0x96   : > { %p9347_p6 = scmp.ne.s32.totalorder %s10582_s27, %s9346_s25  ;;  %p9352_p1 = scmp.lt.u32.totalorder %s10582_s27, %s12937_s4 }
  0x97   : > { %p9353_p7 = scmp.lt.u32.totalorder %s9351_s5, %s9346_s25  ;;  %p9355_p10 = scmp.lt.u32.totalorder %s9346_s25, %s10582_s27 }
  0x98   : > { %p9349_p8 = pnand %p9347_p6, %p10557_p2 }
  0x99   : > { %p9354_p9 = por %p9353_p7, %p9352_p1 }
  0x9a   : > { %p9350_p11 = pneg %p9349_p8 }
  0x9b   : > { %p9356_p12 = por %p9355_p10, %p9354_p9 }
  0x9d   : > { %p9357_p0 = pnand %p9356_p12, %p9350_p11 }
  0x9f   : > { %9360 = shalt.err (!%p9357_p0)
}
  0xa0   : > { %s9361_s7 = scalar_lea.vmem %s1011_s18, 48  ;;  %s10263_s10 = smov [#allocation30]  }
  0xa1   : > { %p9362_p5 = scmp.ne.s32.totalorder %s1011_s18, %s9361_s7  ;;  %s9366_s11 = sshll.u32 %s10263_s10, 4  ;;  %s9367_s11 = int_to_ptr.vmem [resolvable:$false] %s9366_s11 }
  0xa2   : > { %s9368_s3 = scalar_lea.vmem %s9367_s11, 96  ;;  %p9369_p6 = scmp.lt.s32.totalorder %s1011_s18, %s9367_s11 }
  0xa3   : > { %p9364_p3 = pnand %p9362_p5, %p10557_p2  ;;  %p9370_p8 = scmp.lt.s32.totalorder %s9368_s3, %s9361_s7 }
  0xa5   : > { %p9365_p4 = pneg %p9364_p3  ;;  %p9371_p13 = por %p9370_p8, %p9369_p6 }
  0xa7   : > { %p9372_p1 = pnand %p9371_p13, %p9365_p4 }
  0xa9   : > { %9375 = shalt.err (!%p9372_p1)
}
  0xaa   : > { %p12954_p7 = scmp.ne.s32.totalorder %s12952_s2, 0  ;;  %s1021_s25 = scalar_lea.vmem [#allocation31], %s7474_s24 }
  0xab   : > { %s1028_s22 = sshll.u32 %s1021_s25, 4  ;;  %s10606_s0 = sshll.u32 %s10226_s15, 4  ;;  %s10603_s22 = int_to_ptr.vmem [resolvable:$true] %s1028_s22 }
  0xac   : > { %8659 = dma.hbm_to_vmem [thread:$0]  (!%p12954_p7), %s10582_s27, 48, %s1011_s18, %s10551_s14  }
  0xad   : > { %s9376_s28 = scalar_lea.hbm %s10585_s6, 1024  ;;  %s9381_s5 = scalar_lea.hbm %s12934_s12, 2048 }
  0xae   : > { %p9377_p13 = scmp.ne.s32.totalorder %s10585_s6, %s9376_s28  ;;  %p9382_p10 = scmp.lt.u32.totalorder %s10585_s6, %s12934_s12 }
  0xaf   : > { %p9383_p12 = scmp.lt.u32.totalorder %s9381_s5, %s9376_s28  ;;  %p9385_p5 = scmp.lt.u32.totalorder %s9376_s28, %s10585_s6 }
  0xb0   : > { %p9379_p11 = pnand %p9377_p13, %p10557_p2 }
  0xb1   : > { %p9384_p0 = por %p9383_p12, %p9382_p10 }
  0xb2   : > { %p9380_p9 = pneg %p9379_p11 }
  0xb3   : > { %p9386_p3 = por %p9385_p5, %p9384_p0 }
  0xb5   : > { %p9387_p4 = pnand %p9386_p3, %p9380_p9 }
  0xb7   : > { %9390 = shalt.err (!%p9387_p4)
}
  0xb8   : > { %s9391_s27 = scalar_lea.vmem %s10603_s22, 1024  ;;  %s10264_s18 = smov [#allocation31]  }
  0xb9   : > { %p9392_p6 = scmp.ne.s32.totalorder %s10603_s22, %s9391_s27  ;;  %s9396_s24 = sshll.u32 %s10264_s18, 4  ;;  %s9397_s24 = int_to_ptr.vmem [resolvable:$false] %s9396_s24 }
  0xba   : > { %s9398_s7 = scalar_lea.vmem %s9397_s24, 2048  ;;  %p9399_p13 = scmp.lt.s32.totalorder %s10603_s22, %s9397_s24 }
  0xbb   : > { %p9394_p8 = pnand %p9392_p6, %p10557_p2  ;;  %p9400_p11 = scmp.lt.s32.totalorder %s9398_s7, %s9391_s27 }
  0xbd   : > { %p9395_p1 = pneg %p9394_p8  ;;  %p9401_p10 = por %p9400_p11, %p9399_p13 }
  0xbf   : > { %p9402_p12 = pnand %p9401_p10, %p9395_p1 }
  0xc1   : > { %9405 = shalt.err (!%p9402_p12)
}
  0xc2   : > { %s12955_s10 = smov 4   ;;  %s12956_s11 = smov 64  }
  0xc3   : > { %8662 = dma.hbm_to_vmem [thread:$0]  (!%p12954_p7), %s10585_s6, 1024, %s10603_s22, %s10551_s14, %s12956_s11, %s12956_s11, %s12955_s10  }
  0xc4   : > { %s10631_s3 = scalar_lea.hbm %s10405_s20, %s10606_s0  ;;  %s1041_s25 = scalar_lea.vmem [#allocation32], %s10538_s16 }
  0xc5   : > { %s1048_s28 = sshll.u32 %s1041_s25, 4  ;;  %s9406_s5 = scalar_lea.hbm %s10631_s3, 16  ;;  %s1049_s28 = int_to_ptr.vmem [resolvable:$true] %s1048_s28 }
  0xc6   : > { %p9407_p9 = scmp.ne.s32.totalorder %s10631_s3, %s9406_s5  ;;  %s9411_s27 = scalar_lea.hbm %s10405_s20, 32 }
  0xc7   : > { %p9412_p3 = scmp.lt.u32.totalorder %s10631_s3, %s10405_s20  ;;  %p9413_p4 = scmp.lt.u32.totalorder %s9411_s27, %s9406_s5 }
  0xc8   : > { %p9409_p0 = pnand %p9407_p9, %p10557_p2  ;;  %p9415_p8 = scmp.lt.u32.totalorder %s9406_s5, %s10631_s3 }
  0xc9   : > { %p9414_p6 = por %p9413_p4, %p9412_p3 }
  0xca   : > { %p9410_p5 = pneg %p9409_p0 }
  0xcb   : > { %p9416_p1 = por %p9415_p8, %p9414_p6 }
  0xcd   : > { %p9417_p13 = pnand %p9416_p1, %p9410_p5 }
  0xcf   : > { %9420 = shalt.err (!%p9417_p13)
}
  0xd0   : > { %s9421_s6 = scalar_lea.vmem %s1049_s28, 16  ;;  %s10265_s22 = smov [#allocation32]  }
  0xd1   : > { %p9422_p11 = scmp.ne.s32.totalorder %s1049_s28, %s9421_s6  ;;  %s9426_s18 = sshll.u32 %s10265_s22, 4  ;;  %s9427_s18 = int_to_ptr.vmem [resolvable:$false] %s9426_s18 }
  0xd2   : > { %s9428_s24 = scalar_lea.vmem %s9427_s18, 32  ;;  %p9429_p9 = scmp.lt.s32.totalorder %s1049_s28, %s9427_s18 }
  0xd3   : > { %p9424_p10 = pnand %p9422_p11, %p10557_p2  ;;  %p9430_p0 = scmp.lt.s32.totalorder %s9428_s24, %s9421_s6 }
  0xd5   : > { %p9425_p12 = pneg %p9424_p10  ;;  %p9431_p7 = por %p9430_p0, %p9429_p9 }
  0xd7   : > { %p9432_p3 = pnand %p9431_p7, %p9425_p12 }
  0xd9   : > { %9435 = shalt.err (!%p9432_p3)
}
  0xda   : > { %p12957_p4 = scmp.ne.s32.totalorder %s12952_s2, 0  ;;  %s10650_s7 = scalar_lea.hbm %s10410_s30, %s10606_s0 }
  0xdb   : > { %s1058_s25 = scalar_lea.vmem [#allocation33], %s10538_s16  ;;  %s9436_s27 = scalar_lea.hbm %s10650_s7, 16 }
  0xdc   : > { %8665 = dma.hbm_to_vmem [thread:$0]  (!%p12957_p4), %s10631_s3, 16, %s1049_s28, %s10551_s14  }
  0xdd   : > { %s1065_s5 = sshll.u32 %s1058_s25, 4  ;;  %p9437_p7 = scmp.ne.s32.totalorder %s10650_s7, %s9436_s27  ;;  %s1066_s5 = int_to_ptr.vmem [resolvable:$true] %s1065_s5 }
  0xde   : > { %s9441_s6 = scalar_lea.hbm %s10410_s30, 32  ;;  %p9442_p8 = scmp.lt.u32.totalorder %s10650_s7, %s10410_s30 }
  0xdf   : > { %p9439_p5 = pnand %p9437_p7, %p10557_p2  ;;  %p9443_p1 = scmp.lt.u32.totalorder %s9441_s6, %s9436_s27 }
  0xe0   : > { %p9445_p11 = scmp.lt.u32.totalorder %s9436_s27, %s10650_s7 }
  0xe1   : > { %p9440_p6 = pneg %p9439_p5  ;;  %p9444_p13 = por %p9443_p1, %p9442_p8 }
  0xe3   : > { %p9446_p10 = por %p9445_p11, %p9444_p13 }
  0xe5   : > { %p9447_p12 = pnand %p9446_p10, %p9440_p6 }
  0xe7   : > { %9450 = shalt.err (!%p9447_p12)
}
  0xe8   : > { %s9451_s3 = scalar_lea.vmem %s1066_s5, 16  ;;  %s10266_s28 = smov [#allocation33]  }
  0xe9   : > { %p9452_p9 = scmp.ne.s32.totalorder %s1066_s5, %s9451_s3  ;;  %s9456_s22 = sshll.u32 %s10266_s28, 4  ;;  %s9457_s22 = int_to_ptr.vmem [resolvable:$false] %s9456_s22 }
  0xea   : > { %s9458_s18 = scalar_lea.vmem %s9457_s22, 32  ;;  %p9459_p7 = scmp.lt.s32.totalorder %s1066_s5, %s9457_s22 }
  0xeb   : > { %p9454_p0 = pnand %p9452_p9, %p10557_p2  ;;  %p9460_p5 = scmp.lt.s32.totalorder %s9458_s18, %s9451_s3 }
  0xed   : > { %p9455_p3 = pneg %p9454_p0  ;;  %p9461_p4 = por %p9460_p5, %p9459_p7 }
  0xef   : > { %p9462_p1 = pnand %p9461_p4, %p9455_p3 }
  0xf1   : > { %9465 = shalt.err (!%p9462_p1)
}
  0xf2   : > { %p12958_p8 = scmp.ne.s32.totalorder %s12952_s2, 0  ;;  %s10669_s24 = scalar_lea.hbm %s10415_s19, %s10606_s0 }
  0xf3   : > { %s1075_s25 = scalar_lea.vmem [#allocation34], %s10538_s16  ;;  %s12878_s6 = sshll.u32 %s10538_s16, 7 }
  0xf4   : > { %8668 = dma.hbm_to_vmem [thread:$0]  (!%p12958_p8), %s10650_s7, 16, %s1066_s5, %s10551_s14  }
  0xf5   : > { %s1082_s27 = sshll.u32 %s1075_s25, 4  ;;  %s9466_s3 = scalar_lea.hbm %s10669_s24, 16  ;;  %s1083_s27 = int_to_ptr.vmem [resolvable:$true] %s1082_s27 }
  0xf6   : > { %p9467_p4 = scmp.ne.s32.totalorder %s10669_s24, %s9466_s3  ;;  %s9471_s28 = scalar_lea.hbm %s10415_s19, 32 }
  0xf7   : > { %p9472_p11 = scmp.lt.u32.totalorder %s10669_s24, %s10415_s19  ;;  %p9473_p10 = scmp.lt.u32.totalorder %s9471_s28, %s9466_s3 }
  0xf8   : > { %p9469_p6 = pnand %p9467_p4, %p10557_p2  ;;  %p9475_p9 = scmp.lt.u32.totalorder %s9466_s3, %s10669_s24 }
  0xf9   : > { %p9474_p12 = por %p9473_p10, %p9472_p11 }
  0xfa   : > { %p9470_p13 = pneg %p9469_p6 }
  0xfb   : > { %p9476_p0 = por %p9475_p9, %p9474_p12 }
  0xfd   : > { %p9477_p3 = pnand %p9476_p0, %p9470_p13 }
  0xff   : > { %9480 = shalt.err (!%p9477_p3)
}
 0x100   : > { %s9481_s7 = scalar_lea.vmem %s1083_s27, 16  ;;  %s10267_s5 = smov [#allocation34]  }
 0x101   : > { %p9482_p7 = scmp.ne.s32.totalorder %s1083_s27, %s9481_s7  ;;  %s9486_s22 = sshll.u32 %s10267_s5, 4  ;;  %s9487_s22 = int_to_ptr.vmem [resolvable:$false] %s9486_s22 }
 0x102   : > { %s9488_s18 = scalar_lea.vmem %s9487_s22, 32  ;;  %p9489_p4 = scmp.lt.s32.totalorder %s1083_s27, %s9487_s22 }
 0x103   : > { %p9484_p5 = pnand %p9482_p7, %p10557_p2  ;;  %p9490_p6 = scmp.lt.s32.totalorder %s9488_s18, %s9481_s7 }
 0x105   : > { %p9485_p1 = pneg %p9484_p5  ;;  %p9491_p8 = por %p9490_p6, %p9489_p4 }
 0x107   : > { %p9492_p10 = pnand %p9491_p8, %p9485_p1 }
 0x109   : > { %9495 = shalt.err (!%p9492_p10)
}
 0x10a   : > { %p12959_p11 = scmp.ne.s32.totalorder %s12952_s2, 0  ;;  %s12879_s25 = sshll.u32 %s10226_s15, 11 }
 0x10b   : > { %s10691_s3 = scalar_lea.hbm %s12936_s8, %s12879_s25  ;;  %s1093_s28 = scalar_lea.vmem [#allocation35], %s12878_s6 }
 0x10c   : > { %8671 = dma.hbm_to_vmem [thread:$0]  (!%p12959_p11), %s10669_s24, 16, %s1083_s27, %s10551_s14  }
 0x10d   : > { %s1100_s7 = sshll.u32 %s1093_s28, 4  ;;  %s7483_s5 = sshll.u32 %s10538_s16, 1  ;;  %s10695_s7 = int_to_ptr.vmem [resolvable:$true] %s1100_s7 }
 0x10e   : > { %s9496_s22 = scalar_lea.hbm %s10691_s3, 2048  ;;  %s9501_s24 = scalar_lea.hbm %s12936_s8, 4096 }
 0x10f   : > { %p9497_p8 = scmp.ne.s32.totalorder %s10691_s3, %s9496_s22  ;;  %p9502_p9 = scmp.lt.u32.totalorder %s10691_s3, %s12936_s8 }
 0x110   : > { %p9503_p0 = scmp.lt.u32.totalorder %s9501_s24, %s9496_s22  ;;  %p9505_p7 = scmp.lt.u32.totalorder %s9496_s22, %s10691_s3 }
 0x111   : > { %p9499_p13 = pnand %p9497_p8, %p10557_p2 }
 0x112   : > { %p9504_p3 = por %p9503_p0, %p9502_p9 }
 0x113   : > { %p9500_p12 = pneg %p9499_p13 }
 0x114   : > { %p9506_p5 = por %p9505_p7, %p9504_p3 }
 0x116   : > { %p9507_p1 = pnand %p9506_p5, %p9500_p12 }
 0x118   : > { %9510 = shalt.err (!%p9507_p1)
}
 0x119   : > { %s9511_s27 = scalar_lea.vmem %s10695_s7, 2048  ;;  %s10268_s18 = smov [#allocation35]  }
 0x11a   : > { %p9512_p4 = scmp.ne.s32.totalorder %s10695_s7, %s9511_s27  ;;  %s9516_s28 = sshll.u32 %s10268_s18, 4  ;;  %s9517_s28 = int_to_ptr.vmem [resolvable:$false] %s9516_s28 }
 0x11b   : > { %s9518_s6 = scalar_lea.vmem %s9517_s28, 4096  ;;  %p9519_p8 = scmp.lt.s32.totalorder %s10695_s7, %s9517_s28 }
 0x11c   : > { %p9514_p6 = pnand %p9512_p4, %p10557_p2  ;;  %p9520_p13 = scmp.lt.s32.totalorder %s9518_s6, %s9511_s27 }
 0x11e   : > { %p9515_p10 = pneg %p9514_p6  ;;  %p9521_p9 = por %p9520_p13, %p9519_p8 }
 0x120   : > { %p9522_p0 = pnand %p9521_p9, %p9515_p10 }
 0x122   : > { %9525 = shalt.err (!%p9522_p0)
}
 0x123   : > { %s10269_s22 = smov 128   ;;  %s10270_s24 = smov 8  }
 0x124   : > { %8674 = dma.hbm_to_vmem [thread:$0]  (!%p12959_p11), %s10691_s3, 2048, %s10695_s7, %s10551_s14, %s10269_s22, %s10269_s22, %s10270_s24  }
 0x125   : > { %s7759_s18 = sshll.u32 %s10226_s15, 5  ;;  %s1114_s6 = scalar_lea.vmem [#allocation36], %s7483_s5 }
 0x126   : > { %s10718_s28 = scalar_lea.hbm %s10425_s29, %s7759_s18  ;;  %s1122_s27 = sshll.u32 %s1114_s6, 4  ;;  %s1123_s27 = int_to_ptr.vmem [resolvable:$true] %s1122_s27 }
 0x127   : > { %s9526_s25 = scalar_lea.hbm %s10718_s28, 32  ;;  %s9531_s4 = scalar_lea.hbm %s10425_s29, 64 }
 0x128   : > { %p9527_p12 = scmp.ne.s32.totalorder %s10718_s28, %s9526_s25  ;;  %p9532_p5 = scmp.lt.u32.totalorder %s10718_s28, %s10425_s29 }
 0x129   : > { %p9533_p1 = scmp.lt.u32.totalorder %s9531_s4, %s9526_s25  ;;  %p9535_p6 = scmp.lt.u32.totalorder %s9526_s25, %s10718_s28 }
 0x12a   : > { %p9529_p3 = pnand %p9527_p12, %p10557_p2 }
 0x12b   : > { %p9534_p4 = por %p9533_p1, %p9532_p5 }
 0x12c   : > { %p9530_p7 = pneg %p9529_p3 }
 0x12d   : > { %p9536_p10 = por %p9535_p6, %p9534_p4 }
 0x12f   : > { %p9537_p8 = pnand %p9536_p10, %p9530_p7 }
 0x131   : > { %9540 = shalt.err (!%p9537_p8)
}
 0x132   : > { %s9541_s3 = scalar_lea.vmem %s1123_s27, 32  ;;  %s10271_s7 = smov [#allocation36]  }
 0x133   : > { %p9542_p13 = scmp.ne.s32.totalorder %s1123_s27, %s9541_s3  ;;  %s9546_s5 = sshll.u32 %s10271_s7, 4  ;;  %s9547_s5 = int_to_ptr.vmem [resolvable:$false] %s9546_s5 }
 0x134   : > { %s9548_s22 = scalar_lea.vmem %s9547_s5, 64  ;;  %p9549_p12 = scmp.lt.s32.totalorder %s1123_s27, %s9547_s5 }
 0x135   : > { %p9544_p9 = pnand %p9542_p13, %p10557_p2  ;;  %p9550_p3 = scmp.lt.s32.totalorder %s9548_s22, %s9541_s3 }
 0x137   : > { %p9545_p0 = pneg %p9544_p9  ;;  %p9551_p11 = por %p9550_p3, %p9549_p12 }
 0x139   : > { %p9552_p1 = pnand %p9551_p11, %p9545_p0 }
 0x13b   : > { %9555 = shalt.err (!%p9552_p1)
}
 0x13c   : > { %p12960_p5 = scmp.ne.s32.totalorder %s12952_s2, 0  ;;  %s12961_s4 = sshll.u32 %s10226_s15, 11 }
 0x13d   : > { %s10739_s25 = scalar_lea.hbm %s10430_s21, %s12961_s4  ;;  %s12962_s24 = sshll.u32 %s10538_s16, 7 }
 0x13e   : > { %8677 = dma.hbm_to_vmem [thread:$0]  (!%p12960_p5), %s10718_s28, 32, %s1123_s27, %s10551_s14  }
 0x13f   : > { %s1133_s18 = scalar_lea.vmem [#allocation37], %s12962_s24  ;;  %s9556_s3 = scalar_lea.hbm %s10739_s25, 2048 }
 0x140   : > { %s1140_s6 = sshll.u32 %s1133_s18, 4  ;;  %p9557_p11 = scmp.ne.s32.totalorder %s10739_s25, %s9556_s3  ;;  %s10743_s6 = int_to_ptr.vmem [resolvable:$true] %s1140_s6 }
 0x141   : > { %s9561_s7 = scalar_lea.hbm %s10430_s21, 4096  ;;  %p9562_p6 = scmp.lt.u32.totalorder %s10739_s25, %s10430_s21 }
 0x142   : > { %p9559_p7 = pnand %p9557_p11, %p10557_p2  ;;  %p9563_p10 = scmp.lt.u32.totalorder %s9561_s7, %s9556_s3 }
 0x143   : > { %p9565_p13 = scmp.lt.u32.totalorder %s9556_s3, %s10739_s25 }
 0x144   : > { %p9560_p4 = pneg %p9559_p7  ;;  %p9564_p8 = por %p9563_p10, %p9562_p6 }
 0x146   : > { %p9566_p9 = por %p9565_p13, %p9564_p8 }
 0x148   : > { %p9567_p0 = pnand %p9566_p9, %p9560_p4 }
 0x14a   : > { %9570 = shalt.err (!%p9567_p0)
}
 0x14b   : > { %s9571_s15 = scalar_lea.vmem %s10743_s6, 2048  ;;  %s10272_s28 = smov [#allocation37]  }
 0x14c   : > { %p9572_p12 = scmp.ne.s32.totalorder %s10743_s6, %s9571_s15  ;;  %s9576_s27 = sshll.u32 %s10272_s28, 4  ;;  %s9577_s27 = int_to_ptr.vmem [resolvable:$false] %s9576_s27 }
 0x14d   : > { %s9578_s5 = scalar_lea.vmem %s9577_s27, 4096  ;;  %p9579_p11 = scmp.lt.s32.totalorder %s10743_s6, %s9577_s27 }
 0x14e   : > { %p9574_p3 = pnand %p9572_p12, %p10557_p2  ;;  %p9580_p7 = scmp.lt.s32.totalorder %s9578_s5, %s9571_s15 }
 0x150   : > { %p9575_p1 = pneg %p9574_p3  ;;  %p9581_p6 = por %p9580_p7, %p9579_p11 }
 0x152   : > { %p9582_p10 = pnand %p9581_p6, %p9575_p1 }
 0x154   : > { %9585 = shalt.err (!%p9582_p10)
}
 0x155   : > { %8680 = dma.hbm_to_vmem [thread:$0]  (!%p12960_p5), %s10739_s25, 2048, %s10743_s6, %s10551_s14, %s12956_s11, %s12956_s11, %s12955_s10  }
 0x156   : > { %s10768_s22 = scalar_lea.hbm %s10435_s13, %s10606_s0  ;;  %s1153_s4 = scalar_lea.vmem [#allocation38], %s10538_s16 }
 0x157   : > { %s1160_s24 = sshll.u32 %s1153_s4, 4  ;;  %s9586_s18 = scalar_lea.hbm %s10768_s22, 16  ;;  %s1161_s24 = int_to_ptr.vmem [resolvable:$true] %s1160_s24 }
 0x158   : > { %p9587_p4 = scmp.ne.s32.totalorder %s10768_s22, %s9586_s18  ;;  %s9591_s3 = scalar_lea.hbm %s10435_s13, 32 }
 0x159   : > { %p9592_p9 = scmp.lt.u32.totalorder %s10768_s22, %s10435_s13  ;;  %p9593_p0 = scmp.lt.u32.totalorder %s9591_s3, %s9586_s18 }
 0x15a   : > { %p9589_p8 = pnand %p9587_p4, %p10557_p2  ;;  %p9595_p3 = scmp.lt.u32.totalorder %s9586_s18, %s10768_s22 }
 0x15b   : > { %p9594_p12 = por %p9593_p0, %p9592_p9 }
 0x15c   : > { %p9590_p13 = pneg %p9589_p8 }
 0x15d   : > { %p9596_p1 = por %p9595_p3, %p9594_p12 }
 0x15f   : > { %p9597_p11 = pnand %p9596_p1, %p9590_p13 }
 0x161   : > { %9600 = shalt.err (!%p9597_p11)
}
 0x162   : > { %s9601_s25 = scalar_lea.vmem %s1161_s24, 16  ;;  %s10273_s6 = smov [#allocation38]  }
 0x163   : > { %p9602_p7 = scmp.ne.s32.totalorder %s1161_s24, %s9601_s25  ;;  %s9606_s7 = sshll.u32 %s10273_s6, 4  ;;  %s9607_s7 = int_to_ptr.vmem [resolvable:$false] %s9606_s7 }
 0x164   : > { %s9608_s15 = scalar_lea.vmem %s9607_s7, 32  ;;  %p9609_p4 = scmp.lt.s32.totalorder %s1161_s24, %s9607_s7 }
 0x165   : > { %p9604_p6 = pnand %p9602_p7, %p10557_p2  ;;  %p9610_p8 = scmp.lt.s32.totalorder %s9608_s15, %s9601_s25 }
 0x167   : > { %p9605_p10 = pneg %p9604_p6  ;;  %p9611_p5 = por %p9610_p8, %p9609_p4 }
 0x169   : > { %p9612_p0 = pnand %p9611_p5, %p9605_p10 }
 0x16b   : > { %9615 = shalt.err (!%p9612_p0)
}
 0x16c   : > { %p12963_p9 = scmp.ne.s32.totalorder %s12952_s2, 0  ;;  %s10274_s28 = smov [#allocation6]  }
 0x16d   : > { %s801_s27 = sshll.u32 %s10274_s28, 4  ;;  %s10275_s5 = smov [#allocation9]   ;;  %s802_s27 = int_to_ptr.vmem [resolvable:$true] %s801_s27 }
 0x16e   : > { %8683 = dma.hbm_to_vmem [thread:$0]  (!%p12963_p9), %s10768_s22, 16, %s1161_s24, %s10551_s14  }
 0x16f   : > { %s828_s4 = sshll.u32 %s10275_s5, 4  ;;  %s9616_s18 = scalar_lea.hbm %s12935_s9, 128  ;;  %s829_s4 = int_to_ptr.vmem [resolvable:$true] %s828_s4 }
 0x170   : > { %p9617_p13 = scmp.ne.s32.totalorder %s12935_s9, %s9616_s18  ;;  %p12964_p12 = scmp.ne.s32.totalorder %s12947_s1, 0 }
 0x171   : > { %p9623_p1 = scmp.lt.u32.totalorder %s9616_s18, %s12935_s9 }
 0x172   : > { %p9619_p3 = pnand %p9617_p13, %p12964_p12 }
 0x174   : > { %p9620_p5 = pneg %p9619_p3 }
 0x176   : > { %p9625_p11 = pnand %p9623_p1, %p9620_p5 }
 0x178   : > { %9628 = shalt.err (!%p9625_p11)
}
 0x179   : > { %s9629_s3 = scalar_lea.vmem %s802_s27, 128  ;;  %p9637_p4 = scmp.lt.s32.totalorder %s802_s27, %s802_s27 }
 0x17a   : > { %p9630_p7 = scmp.ne.s32.totalorder %s802_s27, %s9629_s3  ;;  %p9638_p8 = scmp.lt.s32.totalorder %s9629_s3, %s9629_s3 }
 0x17c   : > { %p9632_p6 = pnand %p9630_p7, %p12964_p12  ;;  %p9639_p0 = por %p9638_p8, %p9637_p4 }
 0x17e   : > { %p9633_p10 = pneg %p9632_p6 }
 0x180   : > { %p9640_p9 = pnand %p9639_p0, %p9633_p10 }
 0x182   : > { %9643 = shalt.err (!%p9640_p9)
}
 0x183   : > { %p12965_p2 = scmp.ne.s32.totalorder %s12945_s23, 0  ;;  %s9644_s22 = scalar_lea.hbm %s10325_s17, 16 }
 0x184   : > { %p9645_p13 = scmp.ne.s32.totalorder %s10325_s17, %s9644_s22  ;;  %p9651_p1 = scmp.lt.u32.totalorder %s9644_s22, %s10325_s17 }
 0x185   : > { %8610 = dma.hbm_to_vmem [thread:$0]  (!%p12965_p2), %s12935_s9, 128, %s802_s27, [#allocation7], %s12956_s11, %s12956_s11, %s12955_s10  }
 0x186   : > { %p9647_p3 = pnand %p9645_p13, %p12964_p12 }
 0x188   : > { %p9648_p5 = pneg %p9647_p3 }
 0x18a   : > { %p9653_p11 = pnand %p9651_p1, %p9648_p5 }
 0x18c   : > { %9656 = shalt.err (!%p9653_p11)
}
 0x18d   : > { %s9657_s24 = scalar_lea.vmem %s829_s4, 16  ;;  %s9664_s25 = scalar_lea.vmem %s829_s4, 32 }
 0x18e   : > { %p9658_p9 = scmp.ne.s32.totalorder %s829_s4, %s9657_s24  ;;  %p9665_p10 = scmp.lt.s32.totalorder %s829_s4, %s829_s4 }
 0x18f   : > { %p9666_p4 = scmp.lt.s32.totalorder %s9664_s25, %s9657_s24 }
 0x190   : > { %p9660_p7 = pnand %p9658_p9, %p12964_p12 }
 0x191   : > { %p9667_p8 = por %p9666_p4, %p9665_p10 }
 0x192   : > { %p9661_p6 = pneg %p9660_p7 }
 0x194   : > { %p9668_p0 = pnand %p9667_p8, %p9661_p6 }
 0x196   : > { %9671 = shalt.err (!%p9668_p0)
}
 0x197   : > { %s12966_s6 = sld [smem:[#allocation60_spill]]  ;;  %s10276_s7 = smov [#allocation12]  }
 0x198   : > { %8616 = dma.hbm_to_vmem [thread:$0]  (!%p12965_p2), %s10325_s17, 16, %s829_s4, [#allocation10]  }
 0x199   : > { %s852_s15 = sshll.u32 %s10276_s7, 4  ;;  %s10277_s28 = smov [#allocation15]   ;;  %s853_s15 = int_to_ptr.vmem [resolvable:$true] %s852_s15 }
 0x19a   : > { %s876_s27 = sshll.u32 %s10277_s28, 4  ;;  %s877_s27 = int_to_ptr.vmem [resolvable:$true] %s876_s27 }
 0x19d   : > { %s9672_s5 = scalar_lea.hbm %s12966_s6, 16 }
 0x19e   : > { %p9673_p13 = scmp.ne.s32.totalorder %s12966_s6, %s9672_s5  ;;  %p9679_p1 = scmp.lt.u32.totalorder %s9672_s5, %s12966_s6 }
 0x1a0   : > { %p9675_p3 = pnand %p9673_p13, %p12964_p12 }
 0x1a2   : > { %p9676_p5 = pneg %p9675_p3 }
 0x1a4   : > { %p9681_p11 = pnand %p9679_p1, %p9676_p5 }
 0x1a6   : > { %9684 = shalt.err (!%p9681_p11)
}
 0x1a7   : > { %s9685_s18 = scalar_lea.vmem %s853_s15, 16  ;;  %s9692_s4 = scalar_lea.vmem %s853_s15, 32 }
 0x1a8   : > { %p9686_p9 = scmp.ne.s32.totalorder %s853_s15, %s9685_s18  ;;  %p9693_p10 = scmp.lt.s32.totalorder %s853_s15, %s853_s15 }
 0x1a9   : > { %p9694_p4 = scmp.lt.s32.totalorder %s9692_s4, %s9685_s18 }
 0x1aa   : > { %p9688_p7 = pnand %p9686_p9, %p12964_p12 }
 0x1ab   : > { %p9695_p8 = por %p9694_p4, %p9693_p10 }
 0x1ac   : > { %p9689_p6 = pneg %p9688_p7 }
 0x1ae   : > { %p9696_p0 = pnand %p9695_p8, %p9689_p6 }
 0x1b0   : > { %9699 = shalt.err (!%p9696_p0)
}
 0x1b1   : > { %s12967_s3 = sld [smem:[#allocation62_spill]] }
 0x1b2   : > { %8622 = dma.hbm_to_vmem [thread:$0]  (!%p12965_p2), %s12966_s6, 16, %s853_s15, [#allocation13]  }
 0x1b7   : > { %s9700_s22 = scalar_lea.hbm %s12967_s3, 16 }
 0x1b8   : > { %p9701_p13 = scmp.ne.s32.totalorder %s12967_s3, %s9700_s22  ;;  %p9707_p1 = scmp.lt.u32.totalorder %s9700_s22, %s12967_s3 }
 0x1ba   : > { %p9703_p3 = pnand %p9701_p13, %p12964_p12 }
 0x1bc   : > { %p9704_p5 = pneg %p9703_p3 }
 0x1be   : > { %p9709_p11 = pnand %p9707_p1, %p9704_p5 }
 0x1c0   : > { %9712 = shalt.err (!%p9709_p11)
}
 0x1c1   : > { %s9713_s24 = scalar_lea.vmem %s877_s27, 16  ;;  %s9720_s25 = scalar_lea.vmem %s877_s27, 32 }
 0x1c2   : > { %p9714_p9 = scmp.ne.s32.totalorder %s877_s27, %s9713_s24  ;;  %p9721_p10 = scmp.lt.s32.totalorder %s877_s27, %s877_s27 }
 0x1c3   : > { %p9722_p4 = scmp.lt.s32.totalorder %s9720_s25, %s9713_s24 }
 0x1c4   : > { %p9716_p7 = pnand %p9714_p9, %p12964_p12 }
 0x1c5   : > { %p9723_p8 = por %p9722_p4, %p9721_p10 }
 0x1c6   : > { %p9717_p6 = pneg %p9716_p7 }
 0x1c8   : > { %p9724_p0 = pnand %p9723_p8, %p9717_p6 }
 0x1ca   : > { %9727 = shalt.err (!%p9724_p0)
}
 0x1cb   : > { %s12968_s7 = sld [smem:[#allocation64_spill]]  ;;  %s10278_s15 = smov [#allocation18]  }
 0x1cc   : > { %8628 = dma.hbm_to_vmem [thread:$0]  (!%p12965_p2), %s12967_s3, 16, %s877_s27, [#allocation16]  }
 0x1cd   : > { %s898_s5 = sshll.u32 %s10278_s15, 4  ;;  %s10279_s18 = smov [#allocation21]   ;;  %s899_s5 = int_to_ptr.vmem [resolvable:$true] %s898_s5 }
 0x1ce   : > { %s922_s4 = sshll.u32 %s10279_s18, 4  ;;  %s923_s4 = int_to_ptr.vmem [resolvable:$true] %s922_s4 }
 0x1d1   : > { %s12969_s28 = smov %s12968_s7  ;;  %s9728_s22 = scalar_lea.hbm %s12968_s7, 16 }
 0x1d2   : > { %p9729_p13 = scmp.ne.s32.totalorder %s12969_s28, %s9728_s22  ;;  %p9735_p1 = scmp.lt.u32.totalorder %s9728_s22, %s12969_s28 }
 0x1d4   : > { %p9731_p3 = pnand %p9729_p13, %p12964_p12 }
 0x1d6   : > { %p9732_p5 = pneg %p9731_p3 }
 0x1d8   : > { %p9737_p11 = pnand %p9735_p1, %p9732_p5 }
 0x1da   : > { %9740 = shalt.err (!%p9737_p11)
}
 0x1db   : > { %s9741_s24 = scalar_lea.vmem %s899_s5, 16  ;;  %s9748_s27 = scalar_lea.vmem %s899_s5, 32 }
 0x1dc   : > { %p9742_p9 = scmp.ne.s32.totalorder %s899_s5, %s9741_s24  ;;  %p9749_p10 = scmp.lt.s32.totalorder %s899_s5, %s899_s5 }
 0x1dd   : > { %p9750_p4 = scmp.lt.s32.totalorder %s9748_s27, %s9741_s24 }
 0x1de   : > { %p9744_p7 = pnand %p9742_p9, %p12964_p12 }
 0x1df   : > { %p9751_p8 = por %p9750_p4, %p9749_p10 }
 0x1e0   : > { %p9745_p6 = pneg %p9744_p7 }
 0x1e2   : > { %p9752_p0 = pnand %p9751_p8, %p9745_p6 }
 0x1e4   : > { %9755 = shalt.err (!%p9752_p0)
}
 0x1e5   : > { %s12970_s25 = sld [smem:[#allocation66_spill]] }
 0x1e6   : > { %8634 = dma.hbm_to_vmem [thread:$0]  (!%p12965_p2), %s12969_s28, 16, %s899_s5, [#allocation19]  }
 0x1eb   : > { %s9756_s7 = scalar_lea.hbm %s12970_s25, 16 }
 0x1ec   : > { %p9757_p13 = scmp.ne.s32.totalorder %s12970_s25, %s9756_s7  ;;  %p9763_p1 = scmp.lt.u32.totalorder %s9756_s7, %s12970_s25 }
 0x1ee   : > { %p9759_p3 = pnand %p9757_p13, %p12964_p12 }
 0x1f0   : > { %p9760_p5 = pneg %p9759_p3 }
 0x1f2   : > { %p9765_p11 = pnand %p9763_p1, %p9760_p5 }
 0x1f4   : > { %9768 = shalt.err (!%p9765_p11)
}
 0x1f5   : > { %s9769_s15 = scalar_lea.vmem %s923_s4, 16  ;;  %s9776_s18 = scalar_lea.vmem %s923_s4, 32 }
 0x1f6   : > { %p9770_p9 = scmp.ne.s32.totalorder %s923_s4, %s9769_s15  ;;  %p9777_p10 = scmp.lt.s32.totalorder %s923_s4, %s923_s4 }
 0x1f7   : > { %p9778_p4 = scmp.lt.s32.totalorder %s9776_s18, %s9769_s15 }
 0x1f8   : > { %p9772_p7 = pnand %p9770_p9, %p12964_p12 }
 0x1f9   : > { %p9779_p8 = por %p9778_p4, %p9777_p10 }
 0x1fa   : > { %p9773_p6 = pneg %p9772_p7 }
 0x1fc   : > { %p9780_p0 = pnand %p9779_p8, %p9773_p6 }
 0x1fe   : > { %9783 = shalt.err (!%p9780_p0)
}
 0x1ff   : > { %s12971_s5 = sld [smem:[#allocation75_spill]]  ;;  %s12972_s22 = sld [smem:[#allocation68_spill]] }
 0x200   : > { %8640 = dma.hbm_to_vmem [thread:$0]  (!%p12965_p2), %s12970_s25, 16, %s923_s4, [#allocation22]  }
 0x201   : > { %s10280_s24 = smov [#allocation24]  }
 0x202   : > { %s944_s27 = sshll.u32 %s10280_s24, 4  ;;  %s945_s27 = int_to_ptr.vmem [resolvable:$true] %s944_s27 }
 0x205   : > { %s10850_s7 = scalar_lea.hbm %s12971_s5, %s10606_s0  ;;  %s9784_s3 = scalar_lea.hbm %s12972_s22, 16 }
 0x206   : > { %p9785_p13 = scmp.ne.s32.totalorder %s12972_s22, %s9784_s3  ;;  %p9791_p1 = scmp.lt.u32.totalorder %s9784_s3, %s12972_s22 }
 0x208   : > { %p9787_p3 = pnand %p9785_p13, %p12964_p12 }
 0x20a   : > { %p9788_p5 = pneg %p9787_p3 }
 0x20c   : > { %p9793_p11 = pnand %p9791_p1, %p9788_p5 }
 0x20e   : > { %9796 = shalt.err (!%p9793_p11)
}
 0x20f   : > { %s9797_s15 = scalar_lea.vmem %s945_s27, 16  ;;  %s9804_s4 = scalar_lea.vmem %s945_s27, 32 }
 0x210   : > { %p9798_p9 = scmp.ne.s32.totalorder %s945_s27, %s9797_s15  ;;  %p9805_p10 = scmp.lt.s32.totalorder %s945_s27, %s945_s27 }
 0x211   : > { %p9806_p4 = scmp.lt.s32.totalorder %s9804_s4, %s9797_s15 }
 0x212   : > { %p9800_p7 = pnand %p9798_p9, %p12964_p12 }
 0x213   : > { %p9807_p8 = por %p9806_p4, %p9805_p10 }
 0x214   : > { %p9801_p6 = pneg %p9800_p7 }
 0x216   : > { %p9808_p0 = pnand %p9807_p8, %p9801_p6 }
 0x218   : > { %9811 = shalt.err (!%p9808_p0)
}
 0x219   : > { %8646 = dma.hbm_to_vmem [thread:$0]  (!%p12965_p2), %s12972_s22, 16, %s945_s27, [#allocation25]  }
 0x21a   : > { %s1170_s3 = scalar_lea.vmem [#allocation39], %s10538_s16  ;;  %s10281_s24 = smov [#allocation8]  }
 0x21b   : > { %s1177_s18 = sshll.u32 %s1170_s3, 4  ;;  %s814_s15 = sshll.u32 %s10281_s24, 4  ;;  %s10863_s18 = int_to_ptr.vmem [resolvable:$true] %s1177_s18  ;;  %s815_s15 = int_to_ptr.vmem [resolvable:$true] %s814_s15 }
 0x21c   : > { %s9812_s4 = scalar_lea.hbm %s10850_s7, 16  ;;  %p12973_p3 = scmp.ne.s32.totalorder %s12953_s26, 0 }
 0x21d   : > { %p9813_p13 = scmp.ne.s32.totalorder %s10850_s7, %s9812_s4  ;;  %s9817_s6 = scalar_lea.hbm %s12971_s5, 32 }
 0x21e   : > { %p9818_p11 = scmp.lt.u32.totalorder %s10850_s7, %s12971_s5  ;;  %p9819_p9 = scmp.lt.u32.totalorder %s9817_s6, %s9812_s4 }
 0x21f   : > { %p9815_p5 = pnand %p9813_p13, %p12973_p3  ;;  %p9821_p6 = scmp.lt.u32.totalorder %s9812_s4, %s10850_s7 }
 0x220   : > { %p9820_p7 = por %p9819_p9, %p9818_p11 }
 0x221   : > { %p9816_p1 = pneg %p9815_p5 }
 0x222   : > { %p9822_p10 = por %p9821_p6, %p9820_p7 }
 0x224   : > { %p9823_p4 = pnand %p9822_p10, %p9816_p1 }
 0x226   : > { %9826 = shalt.err (!%p9823_p4)
}
 0x227   : > { %s9827_s27 = scalar_lea.vmem %s10863_s18, 16  ;;  %s10282_s3 = smov [#allocation39]  }
 0x228   : > { %p9828_p8 = scmp.ne.s32.totalorder %s10863_s18, %s9827_s27  ;;  %s9832_s24 = sshll.u32 %s10282_s3, 4  ;;  %s9833_s24 = int_to_ptr.vmem [resolvable:$false] %s9832_s24 }
 0x229   : > { %s9834_s8 = scalar_lea.vmem %s9833_s24, 32  ;;  %p9835_p13 = scmp.lt.s32.totalorder %s10863_s18, %s9833_s24 }
 0x22a   : > { %p9830_p0 = pnand %p9828_p8, %p12973_p3  ;;  %p9836_p5 = scmp.lt.s32.totalorder %s9834_s8, %s9827_s27 }
 0x22c   : > { %p9831_p2 = pneg %p9830_p0  ;;  %p9837_p11 = por %p9836_p5, %p9835_p13 }
 0x22e   : > { %p9838_p9 = pnand %p9837_p11, %p9831_p2 }
 0x230   : > { %9841 = shalt.err (!%p9838_p9)
}
 0x231   : > { %p12974_p1 = scmp.ne.s32.totalorder %s12952_s2, 0  ;;  %s12975_s6 = sld [smem:[#allocation58_spill]] }
 0x233   : > { %8686 = dma.hbm_to_vmem [thread:$0]  (!%p12974_p1), %s10850_s7, 16, %s10863_s18, %s10551_s14  }
 0x237   : > { %s9842_s4 = scalar_lea.hbm %s12975_s6, 1024 }
 0x238   : > { %p9843_p7 = scmp.ne.s32.totalorder %s12975_s6, %s9842_s4  ;;  %p9849_p4 = scmp.lt.u32.totalorder %s9842_s4, %s12975_s6 }
 0x23a   : > { %p9845_p6 = pnand %p9843_p7, %p12964_p12 }
 0x23c   : > { %p9846_p10 = pneg %p9845_p6 }
 0x23e   : > { %p9851_p8 = pnand %p9849_p4, %p9846_p10 }
 0x240   : > { %9854 = shalt.err (!%p9851_p8)
}
 0x241   : > { %s9855_s8 = scalar_lea.vmem %s815_s15, 1024  ;;  %p9863_p5 = scmp.lt.s32.totalorder %s815_s15, %s815_s15 }
 0x242   : > { %p9856_p2 = scmp.ne.s32.totalorder %s815_s15, %s9855_s8  ;;  %p9864_p11 = scmp.lt.s32.totalorder %s9855_s8, %s9855_s8 }
 0x244   : > { %p9858_p0 = pnand %p9856_p2, %p12964_p12  ;;  %p9865_p9 = por %p9864_p11, %p9863_p5 }
 0x246   : > { %p9859_p13 = pneg %p9858_p0 }
 0x248   : > { %p9866_p3 = pnand %p9865_p9, %p9859_p13 }
 0x24a   : > { %9869 = shalt.err (!%p9866_p3)
}
 0x24b   : > { %p12976_p1 = scmp.ne.s32.totalorder %s12945_s23, 0  ;;  %s12977_s7 = sld [smem:[#allocation59_spill]] }
 0x24c   : > { %s10283_s27 = smov [#allocation11]   ;;  %s10284_s24 = smov [#allocation14]  }
 0x24d   : > { %8613 = dma.hbm_to_vmem [thread:$0]  (!%p12976_p1), %s12975_s6, 1024, %s815_s15, [#allocation7], %s12956_s11, %s12956_s11, %s12955_s10  }
 0x24e   : > { %s838_s3 = sshll.u32 %s10283_s27, 4  ;;  %s862_s4 = sshll.u32 %s10284_s24, 4  ;;  %s839_s3 = int_to_ptr.vmem [resolvable:$true] %s838_s3  ;;  %s863_s4 = int_to_ptr.vmem [resolvable:$true] %s862_s4 }
 0x251   : > { %s12978_s18 = smov %s12977_s7  ;;  %s9870_s8 = scalar_lea.hbm %s12977_s7, 1024 }
 0x252   : > { %p9871_p7 = scmp.ne.s32.totalorder %s12978_s18, %s9870_s8  ;;  %p9877_p10 = scmp.lt.u32.totalorder %s9870_s8, %s12978_s18 }
 0x254   : > { %p9873_p3 = pnand %p9871_p7, %p12964_p12 }
 0x256   : > { %p9874_p6 = pneg %p9873_p3 }
 0x258   : > { %p9879_p4 = pnand %p9877_p10, %p9874_p6 }
 0x25a   : > { %9882 = shalt.err (!%p9879_p4)
}
 0x25b   : > { %s9883_s5 = scalar_lea.vmem %s839_s3, 1024  ;;  %p9891_p13 = scmp.lt.s32.totalorder %s839_s3, %s839_s3 }
 0x25c   : > { %p9884_p8 = scmp.ne.s32.totalorder %s839_s3, %s9883_s5  ;;  %p9892_p5 = scmp.lt.s32.totalorder %s9883_s5, %s9883_s5 }
 0x25e   : > { %p9886_p2 = pnand %p9884_p8, %p12964_p12  ;;  %p9893_p11 = por %p9892_p5, %p9891_p13 }
 0x260   : > { %p9887_p0 = pneg %p9886_p2 }
 0x262   : > { %p9894_p9 = pnand %p9893_p11, %p9887_p0 }
 0x264   : > { %9897 = shalt.err (!%p9894_p9)
}
 0x265   : > { %s12979_s15 = sld [smem:[#allocation61_spill]] }
 0x266   : > { %8619 = dma.hbm_to_vmem [thread:$0]  (!%p12976_p1), %s12978_s18, 1024, %s839_s3, [#allocation10], %s12956_s11, %s12956_s11, %s12955_s10  }
 0x26b   : > { %s12980_s27 = smov %s12979_s15  ;;  %s9898_s7 = scalar_lea.hbm %s12979_s15, 1024 }
 0x26c   : > { %p9899_p7 = scmp.ne.s32.totalorder %s12980_s27, %s9898_s7  ;;  %p9905_p10 = scmp.lt.u32.totalorder %s9898_s7, %s12980_s27 }
 0x26e   : > { %p9901_p3 = pnand %p9899_p7, %p12964_p12 }
 0x270   : > { %p9902_p6 = pneg %p9901_p3 }
 0x272   : > { %p9907_p4 = pnand %p9905_p10, %p9902_p6 }
 0x274   : > { %9910 = shalt.err (!%p9907_p4)
}
 0x275   : > { %s9911_s5 = scalar_lea.vmem %s863_s4, 1024  ;;  %p9919_p13 = scmp.lt.s32.totalorder %s863_s4, %s863_s4 }
 0x276   : > { %p9912_p8 = scmp.ne.s32.totalorder %s863_s4, %s9911_s5  ;;  %p9920_p5 = scmp.lt.s32.totalorder %s9911_s5, %s9911_s5 }
 0x278   : > { %p9914_p2 = pnand %p9912_p8, %p12964_p12  ;;  %p9921_p11 = por %p9920_p5, %p9919_p13 }
 0x27a   : > { %p9915_p0 = pneg %p9914_p2 }
 0x27c   : > { %p9922_p9 = pnand %p9921_p11, %p9915_p0 }
 0x27e   : > { %9925 = shalt.err (!%p9922_p9)
}
 0x27f   : > { %s12981_s3 = sld [smem:[#allocation63_spill]]  ;;  %s10285_s24 = smov [#allocation17]  }
 0x280   : > { %8625 = dma.hbm_to_vmem [thread:$0]  (!%p12976_p1), %s12980_s27, 1024, %s863_s4, [#allocation13], %s12956_s11, %s12956_s11, %s12955_s10  }
 0x281   : > { %s887_s8 = sshll.u32 %s10285_s24, 4  ;;  %s10286_s15 = smov [#allocation20]   ;;  %s888_s8 = int_to_ptr.vmem [resolvable:$true] %s887_s8 }
 0x282   : > { %s908_s7 = sshll.u32 %s10286_s15, 4  ;;  %s909_s7 = int_to_ptr.vmem [resolvable:$true] %s908_s7 }
 0x285   : > { %s9926_s5 = scalar_lea.hbm %s12981_s3, 16 }
 0x286   : > { %p9927_p7 = scmp.ne.s32.totalorder %s12981_s3, %s9926_s5  ;;  %p9933_p10 = scmp.lt.u32.totalorder %s9926_s5, %s12981_s3 }
 0x288   : > { %p9929_p3 = pnand %p9927_p7, %p12964_p12 }
 0x28a   : > { %p9930_p6 = pneg %p9929_p3 }
 0x28c   : > { %p9935_p4 = pnand %p9933_p10, %p9930_p6 }
 0x28e   : > { %9938 = shalt.err (!%p9935_p4)
}
 0x28f   : > { %s9939_s6 = scalar_lea.vmem %s888_s8, 16  ;;  %s9946_s4 = scalar_lea.vmem %s888_s8, 32 }
 0x290   : > { %p9940_p8 = scmp.ne.s32.totalorder %s888_s8, %s9939_s6  ;;  %p9947_p13 = scmp.lt.s32.totalorder %s888_s8, %s888_s8 }
 0x291   : > { %p9948_p5 = scmp.lt.s32.totalorder %s9946_s4, %s9939_s6 }
 0x292   : > { %p9942_p2 = pnand %p9940_p8, %p12964_p12 }
 0x293   : > { %p9949_p11 = por %p9948_p5, %p9947_p13 }
 0x294   : > { %p9943_p0 = pneg %p9942_p2 }
 0x296   : > { %p9950_p9 = pnand %p9949_p11, %p9943_p0 }
 0x298   : > { %9953 = shalt.err (!%p9950_p9)
}
 0x299   : > { %s12982_s24 = sld [smem:[#allocation65_spill]] }
 0x29a   : > { %8631 = dma.hbm_to_vmem [thread:$0]  (!%p12976_p1), %s12981_s3, 16, %s888_s8, [#allocation16]  }
 0x29f   : > { %s9954_s15 = scalar_lea.hbm %s12982_s24, 1024 }
 0x2a0   : > { %p9955_p7 = scmp.ne.s32.totalorder %s12982_s24, %s9954_s15  ;;  %p9961_p10 = scmp.lt.u32.totalorder %s9954_s15, %s12982_s24 }
 0x2a2   : > { %p9957_p3 = pnand %p9955_p7, %p12964_p12 }
 0x2a4   : > { %p9958_p6 = pneg %p9957_p3 }
 0x2a6   : > { %p9963_p4 = pnand %p9961_p10, %p9958_p6 }
 0x2a8   : > { %9966 = shalt.err (!%p9963_p4)
}
 0x2a9   : > { %s9967_s6 = scalar_lea.vmem %s909_s7, 1024  ;;  %p9975_p13 = scmp.lt.s32.totalorder %s909_s7, %s909_s7 }
 0x2aa   : > { %p9968_p8 = scmp.ne.s32.totalorder %s909_s7, %s9967_s6  ;;  %p9976_p5 = scmp.lt.s32.totalorder %s9967_s6, %s9967_s6 }
 0x2ac   : > { %p9970_p2 = pnand %p9968_p8, %p12964_p12  ;;  %p9977_p11 = por %p9976_p5, %p9975_p13 }
 0x2ae   : > { %p9971_p0 = pneg %p9970_p2 }
 0x2b0   : > { %p9978_p9 = pnand %p9977_p11, %p9971_p0 }
 0x2b2   : > { %9981 = shalt.err (!%p9978_p9)
}
 0x2b3   : > { %s12983_s8 = sld [smem:[#allocation67_spill]]  ;;  %s10287_s5 = smov [#allocation23]  }
 0x2b4   : > { %8637 = dma.hbm_to_vmem [thread:$0]  (!%p12976_p1), %s12982_s24, 1024, %s909_s7, [#allocation19], %s12956_s11, %s12956_s11, %s12955_s10  }
 0x2b5   : > { %s933_s4 = sshll.u32 %s10287_s5, 4  ;;  %s10288_s15 = smov [#allocation26]   ;;  %s934_s4 = int_to_ptr.vmem [resolvable:$true] %s933_s4 }
 0x2b6   : > { %s955_s3 = sshll.u32 %s10288_s15, 4  ;;  %s956_s3 = int_to_ptr.vmem [resolvable:$true] %s955_s3 }
 0x2b9   : > { %s9982_s6 = scalar_lea.hbm %s12983_s8, 16 }
 0x2ba   : > { %p9983_p7 = scmp.ne.s32.totalorder %s12983_s8, %s9982_s6  ;;  %p9989_p10 = scmp.lt.u32.totalorder %s9982_s6, %s12983_s8 }
 0x2bc   : > { %p9985_p3 = pnand %p9983_p7, %p12964_p12 }
 0x2be   : > { %p9986_p6 = pneg %p9985_p3 }
 0x2c0   : > { %p9991_p4 = pnand %p9989_p10, %p9986_p6 }
 0x2c2   : > { %9994 = shalt.err (!%p9991_p4)
}
 0x2c3   : > { %s9995_s9 = scalar_lea.vmem %s934_s4, 16  ;;  %s10002_s10 = scalar_lea.vmem %s934_s4, 32 }
 0x2c4   : > { %p9996_p8 = scmp.ne.s32.totalorder %s934_s4, %s9995_s9  ;;  %p10003_p13 = scmp.lt.s32.totalorder %s934_s4, %s934_s4 }
 0x2c5   : > { %p10004_p5 = scmp.lt.s32.totalorder %s10002_s10, %s9995_s9 }
 0x2c6   : > { %p9998_p2 = pnand %p9996_p8, %p12964_p12 }
 0x2c7   : > { %p10005_p11 = por %p10004_p5, %p10003_p13 }
 0x2c8   : > { %p9999_p0 = pneg %p9998_p2 }
 0x2ca   : > { %p10006_p9 = pnand %p10005_p11, %p9999_p0 }
 0x2cc   : > { %10009 = shalt.err (!%p10006_p9)
}
 0x2cd   : > { %s12984_s11 = sld [smem:[#allocation69_spill]] }
 0x2ce   : > { %8643 = dma.hbm_to_vmem [thread:$0]  (!%p12976_p1), %s12983_s8, 16, %s934_s4, [#allocation22]  }
 0x2d3   : > { %s12985_s5 = smov %s12984_s11  ;;  %s10010_s7 = scalar_lea.hbm %s12984_s11, 32 }
 0x2d4   : > { %p10011_p7 = scmp.ne.s32.totalorder %s12985_s5, %s10010_s7  ;;  %p10017_p10 = scmp.lt.u32.totalorder %s10010_s7, %s12985_s5 }
 0x2d6   : > { %p10013_p3 = pnand %p10011_p7, %p12964_p12 }
 0x2d8   : > { %p10014_p6 = pneg %p10013_p3 }
 0x2da   : > { %p10019_p4 = pnand %p10017_p10, %p10014_p6 }
 0x2dc   : > { %10022 = shalt.err (!%p10019_p4)
}
 0x2dd   : > { %s10023_s9 = scalar_lea.vmem %s956_s3, 32  ;;  %p10031_p13 = scmp.lt.s32.totalorder %s956_s3, %s956_s3 }
 0x2de   : > { %p10024_p8 = scmp.ne.s32.totalorder %s956_s3, %s10023_s9  ;;  %p10032_p5 = scmp.lt.s32.totalorder %s10023_s9, %s10023_s9 }
 0x2e0   : > { %p10026_p2 = pnand %p10024_p8, %p12964_p12  ;;  %p10033_p11 = por %p10032_p5, %p10031_p13 }
 0x2e2   : > { %p10027_p0 = pneg %p10026_p2 }
 0x2e4   : > { %p10034_p9 = pnand %p10033_p11, %p10027_p0 }
 0x2e6   : > { %10037 = shalt.err (!%p10034_p9)
}
 0x2e7   : > { %s12986_s4 = sld [smem:[#allocation76_spill]]  ;;  %s12987_s15 = sld [smem:[#allocation70_spill]] }
 0x2e8   : > { %8649 = dma.hbm_to_vmem [thread:$0]  (!%p12976_p1), %s12985_s5, 32, %s956_s3, [#allocation25]  }
 0x2e9   : > { %s10289_s10 = smov [#allocation27]  }
 0x2ea   : > { %s966_s11 = sshll.u32 %s10289_s10, 4  ;;  %s967_s11 = int_to_ptr.vmem [resolvable:$true] %s966_s11 }
 0x2ed   : > { %s12988_s6 = smov %s12987_s15  ;;  %s10967_s7 = scalar_lea.hbm %s12986_s4, %s10606_s0 }
 0x2ee   : > { %s10038_s8 = scalar_lea.hbm %s12987_s15, 16 }
 0x2ef   : > { %p10039_p7 = scmp.ne.s32.totalorder %s12988_s6, %s10038_s8  ;;  %p10045_p10 = scmp.lt.u32.totalorder %s10038_s8, %s12988_s6 }
 0x2f1   : > { %p10041_p3 = pnand %p10039_p7, %p12964_p12 }
 0x2f3   : > { %p10042_p6 = pneg %p10041_p3 }
 0x2f5   : > { %p10047_p4 = pnand %p10045_p10, %p10042_p6 }
 0x2f7   : > { %10050 = shalt.err (!%p10047_p4)
}
 0x2f8   : > { %s10051_s9 = scalar_lea.vmem %s967_s11, 16  ;;  %s10058_s3 = scalar_lea.vmem %s967_s11, 32 }
 0x2f9   : > { %p10052_p8 = scmp.ne.s32.totalorder %s967_s11, %s10051_s9  ;;  %p10059_p13 = scmp.lt.s32.totalorder %s967_s11, %s967_s11 }
 0x2fa   : > { %p10060_p5 = scmp.lt.s32.totalorder %s10058_s3, %s10051_s9 }
 0x2fb   : > { %p10054_p2 = pnand %p10052_p8, %p12964_p12 }
 0x2fc   : > { %p10061_p11 = por %p10060_p5, %p10059_p13 }
 0x2fd   : > { %p10055_p0 = pneg %p10054_p2 }
 0x2ff   : > { %p10062_p9 = pnand %p10061_p11, %p10055_p0 }
 0x301   : > { %10065 = shalt.err (!%p10062_p9)
}
 0x302   : > { %8652 = dma.hbm_to_vmem [thread:$0]  (!%p12976_p1), %s12988_s6, 16, %s967_s11, [#allocation28]  }
 0x303   : > { %s1187_s1 = scalar_lea.vmem [#allocation40], %s10538_s16  ;;  %s10066_s8 = scalar_lea.hbm %s10967_s7, 16 }
 0x304   : > { %s1194_s0 = sshll.u32 %s1187_s1, 4  ;;  %p10067_p12 = scmp.ne.s32.totalorder %s10967_s7, %s10066_s8  ;;  %s1195_s0 = int_to_ptr.vmem [resolvable:$true] %s1194_s0 }
 0x305   : > { %p12989_p7 = scmp.ne.s32.totalorder %s12953_s26, 0  ;;  %s10071_s15 = scalar_lea.hbm %s12986_s4, 32 }
 0x306   : > { %p10072_p10 = scmp.lt.u32.totalorder %s10967_s7, %s12986_s4  ;;  %p10073_p4 = scmp.lt.u32.totalorder %s10071_s15, %s10066_s8 }
 0x307   : > { %p10069_p3 = pnand %p10067_p12, %p12989_p7  ;;  %p10075_p2 = scmp.lt.u32.totalorder %s10066_s8, %s10967_s7 }
 0x308   : > { %p10074_p8 = por %p10073_p4, %p10072_p10 }
 0x309   : > { %p10070_p6 = pneg %p10069_p3 }
 0x30a   : > { %p10076_p0 = por %p10075_p2, %p10074_p8 }
 0x30c   : > { %p10077_p13 = pnand %p10076_p0, %p10070_p6 }
 0x30e   : > { %10080 = shalt.err (!%p10077_p13)
}
 0x30f   : > { %s10081_s23 = scalar_lea.vmem %s1195_s0, 16  ;;  %s10290_s16 = smov [#allocation40]  }
 0x310   : > { %p10082_p5 = scmp.ne.s32.totalorder %s1195_s0, %s10081_s23  ;;  %s10086_s10 = sshll.u32 %s10290_s16, 4  ;;  %s10087_s10 = int_to_ptr.vmem [resolvable:$false] %s10086_s10 }
 0x311   : > { %s10088_s11 = scalar_lea.vmem %s10087_s10, 32  ;;  %p10089_p9 = scmp.lt.s32.totalorder %s1195_s0, %s10087_s10 }
 0x312   : > { %p10084_p1 = pnand %p10082_p5, %p12989_p7  ;;  %p10090_p12 = scmp.lt.s32.totalorder %s10088_s11, %s10081_s23 }
 0x314   : > { %p10085_p11 = pneg %p10084_p1  ;;  %p10091_p3 = por %p10090_p12, %p10089_p9 }
 0x316   : > { %p10092_p4 = pnand %p10091_p3, %p10085_p11 }
 0x318   : > { %10095 = shalt.err (!%p10092_p4)
}
 0x319   : > { %p12990_p10 = scmp.ne.s32.totalorder %s12952_s2, 0  ;;  %s12991_s9 = sld [smem:[#allocation82_spill]] }
 0x31b   : > { %8689 = dma.hbm_to_vmem [thread:$0]  (!%p12990_p10), %s10967_s7, 16, %s1195_s0, %s10551_s14  }
 0x31f   : > { %p12992_p6 = scmp.ne.s32.totalorder %s12991_s9, 0 }
 0x321   : > { %1203 = sbr.rel (%p12992_p6) target bundleno = 6335 (0x18bf), region = 132 }
 0x328   : > { %s12993_s26 = sld [smem:[#allocation81_spill]] }
 0x32e   : > { %p12994_p7 = scmp.eq.s32.totalorder %s12993_s26, 0 }
 0x330   : > { %10165 = dma.done.wait (%p12994_p7), [#allocation4], 512   ;;  %p12995_p8 = pmov %p12994_p7 }
 0x331   : > { %p12996_p2 = pmov %p12994_p7 }
 0x332   : > { %10167 = vsyncadd (%p12995_p8), [#allocation4], 4294966784 }
 0x333   : > { %10169 = dma.done.wait (%p12996_p2), [#allocation7], 1152   ;;  %p12997_p0 = pmov %p12996_p2 }
 0x335   : > { %10171 = vsyncadd (%p12997_p0), [#allocation7], 4294966144  ;;  %p12998_p13 = pmov %p12997_p0 }
 0x336   : > { %p12999_p5 = pmov %p12997_p0 }
 0x337   : > { %10173 = dma.done.wait (%p12998_p13), [#allocation10], 1040  }
 0x338   : > { %10175 = vsyncadd (%p12999_p5), [#allocation10], 4294966256  ;;  %p13000_p1 = pmov %p12997_p0 }
 0x339   : > { %p13001_p11 = pmov %p12997_p0 }
 0x33a   : > { %10177 = dma.done.wait (%p13000_p1), [#allocation13], 1040  }
 0x33b   : > { %10179 = vsyncadd (%p13001_p11), [#allocation13], 4294966256  ;;  %p13002_p9 = pmov %p12997_p0 }
 0x33c   : > { %p13003_p12 = pmov %p12997_p0 }
 0x33d   : > { %10181 = dma.done.wait (%p13002_p9), [#allocation16], 32  }
 0x33e   : > { %10183 = vsyncadd (%p13003_p12), [#allocation16], 4294967264  ;;  %p13004_p3 = pmov %p12997_p0 }
 0x33f   : > { %p13005_p4 = pmov %p12997_p0 }
 0x340   : > { %10185 = dma.done.wait (%p13004_p3), [#allocation19], 1040  }
 0x341   : > { %10187 = vsyncadd (%p13005_p4), [#allocation19], 4294966256  ;;  %p13006_p10 = pmov %p12997_p0 }
 0x342   : > { %p13007_p6 = pmov %p12997_p0 }
 0x343   : > { %10189 = dma.done.wait (%p13006_p10), [#allocation22], 32  }
 0x344   : > { %10191 = vsyncadd (%p13007_p6), [#allocation22], 4294967264  ;;  %p13008_p7 = pmov %p12997_p0 }
 0x345   : > { %p13009_p8 = pmov %p12997_p0 }
 0x346   : > { %10193 = dma.done.wait (%p13008_p7), [#allocation25], 48  }
 0x347   : > { %10195 = vsyncadd (%p13009_p8), [#allocation25], 4294967248  ;;  %p13010_p2 = pmov %p12997_p0 }
 0x349   : > { %10197 = dma.done.wait (%p13010_p2), [#allocation28], 16  }
 0x34a   : > { %10199 = vsyncadd (%p12997_p0), [#allocation28], 4294967280  ;;  %s13011_s14 = sld [smem:[#allocation79_spill]]  ;;  %s13012_s2 = sld [smem:[#allocation85_spill]] }
 0x34b   : > { %s1269_s7 = sand.u32 1, %s12993_s26  }
 0x34c   : > { %s1270_s0 = scalar_lea.sflag [#allocation4], %s1269_s7 }
 0x350   : > { %s11034_s3 = sand.u32 1, %s13011_s14   ;;  %p13013_p13 = scmp.ne.s32.totalorder %s13012_s2, 0 }
 0x351   : > { %s8506_s1 = smul.u32 192, %s11034_s3 }
 0x353   : > { %s11037_s8 = scalar_lea.vmem [#allocation29], %s8506_s1 }
 0x354   : > { %10201 = dma.done.wait (%p13013_p13), %s1270_s0, 8368  }
 0x355   : > { %10203 = vsyncadd (%p13013_p13), %s1270_s0, 4294958928  ;;  %s8507_s15 = smul.u32 3, %s11034_s3  ;;  %s7509_s23 = sshll.u32 %s11034_s3, 6 }
 0x356   : > { %s7510_s16 = sshll.u32 %s11034_s3, 7  ;;  %s7511_s10 = sshll.u32 %s11034_s3, 1 }
 0x357   : > { %s11047_s11 = scalar_lea.vmem [#allocation30], %s8507_s15  ;;  %s11049_s9 = scalar_lea.vmem [#allocation31], %s7509_s23 }
 0x358   : > { %s1299_s14 = scalar_lea.vmem [#allocation32], %s11034_s3  ;;  %s1307_s2 = scalar_lea.vmem [#allocation33], %s11034_s3 }
 0x359   : > { %s1315_s7 = scalar_lea.vmem [#allocation34], %s11034_s3  ;;  %s11054_s1 = scalar_lea.vmem [#allocation35], %s7510_s16 }
 0x35a   : > { %s11056_s0 = scalar_lea.vmem [#allocation36], %s7511_s10  ;;  %s11058_s4 = scalar_lea.vmem [#allocation37], %s7510_s16 }
 0x35b   : > { %s1350_s5 = scalar_lea.vmem [#allocation38], %s11034_s3  ;;  %s1358_s6 = scalar_lea.vmem [#allocation39], %s11034_s3 }
 0x35c   : > { %s1366_s12 = scalar_lea.vmem [#allocation40], %s11034_s3  ;;  %p13014_p5 = scmp.ne.s32.totalorder %s12993_s26, 0 }
 0x35d   : > { %v8821_v0 = vld [vmem:[#allocation8] sm:$0xff] (!%p13014_p5)   ;;  %v8822_v1 = vld [vmem:[#allocation8 + $0x8] sm:$0xff] (!%p13014_p5)   ;;  %v10291_v2 = vmov (!%p13014_p5), 0.0   ;;  %vm10292_vm0 = vmmov (!%p13014_p5), 0   ;;  %v8823_v3 = vld [vmem:[#allocation8 + $0x10] sm:$0xff] (!%p13014_p5)   ;;  %vm1614_vm1 = vcmask (!%p13014_p5), 1045504  }
 0x35e   : > { %1489 = sbr.rel (%p13014_p5) target bundleno = 1888 (0x760), region = 248  ;;  %8034 = vmatprep.subr.bf16.mxu0 (!%p13014_p5), %v10291_v2  ;;  %8054 = vmatprep.subr.bf16.mxu1 (!%p13014_p5), %v8821_v0  ;;  %v8824_v4 = vld [vmem:[#allocation8 + $0x18] sm:$0xff] (!%p13014_p5)   ;;  %v8825_v6 = vld [vmem:[#allocation8 + $0x20] sm:$0xff] (!%p13014_p5)   ;;  %v8833_v7 = vld [vmem:[#allocation20] sm:$0xff] (!%p13014_p5)   ;;  %vm2489_vm2 = vcmask (!%p13014_p5), 1040384  }
 0x35f   : > { %8050 = vmatprep.mubr.msk.bf16.mxu0 (!%p13014_p5), %vm10292_vm0, %v10291_v2  ;;  %8055 = vmatpush3.bf16.msra.mxu1 (!%p13014_p5), %v8821_v0  ;;  %v8829_v5 = vld [vmem:[#allocation3] sm:$0xff] (!%p13014_p5)   ;;  %v8826_v9 = vld [vmem:[#allocation8 + $0x28] sm:$0xff] (!%p13014_p5)   ;;  %v8827_v11 = vld [vmem:[#allocation8 + $0x30] sm:$0xff] (!%p13014_p5)  }
 0x360   : > { %8056 = vmatprep.subr.bf16.mxu1 (!%p13014_p5), %v8822_v1  ;;  %8070 = vmatprep.mubr.bf16.mxu1 (!%p13014_p5), %v8829_v5  ;;  %v8834_v8 = vld [vmem:[#allocation20 + $0x8] sm:$0xff] (!%p13014_p5)   ;;  %v8835_v10 = vld [vmem:[#allocation20 + $0x10] sm:$0xff] (!%p13014_p5)   ;;  %v8836_v12 = vld [vmem:[#allocation20 + $0x18] sm:$0xff] (!%p13014_p5)  }
 0x361   : > { %8035 = vmatpush3.bf16.msra.mxu0 (!%p13014_p5), %v8833_v7  ;;  %v8828_v13 = vld [vmem:[#allocation8 + $0x38] sm:$0xff] (!%p13014_p5)   ;;  %v8837_v14 = vld [vmem:[#allocation20 + $0x20] sm:$0xff] (!%p13014_p5)   ;;  %v8830_v15 = vld [vmem:[#allocation3 + $0x8] sm:$0xff] (!%p13014_p5)  }
 0x362   : > { %8036 = vmatprep.subr.bf16.mxu0 (!%p13014_p5), %v10291_v2  ;;  %v8838_v16 = vld [vmem:[#allocation20 + $0x28] sm:$0xff] (!%p13014_p5)   ;;  %v8831_v17 = vld [vmem:[#allocation3 + $0x10] sm:$0xff] (!%p13014_p5)   ;;  %v8839_v18 = vld [vmem:[#allocation20 + $0x30] sm:$0xff] (!%p13014_p5)  }
 0x363   : > { %8057 = vmatpush3.bf16.msra.mxu1 (!%p13014_p5), %v8822_v1  ;;  %v8832_v19 = vld [vmem:[#allocation3 + $0x18] sm:$0xff] (!%p13014_p5)   ;;  %v8840_v20 = vld [vmem:[#allocation20 + $0x38] sm:$0xff] (!%p13014_p5)   ;;  %v8841_v22 = vld [vmem:[#allocation6] sm:$0x7f] (!%p13014_p5)  }
 0x364   : > { %8058 = vmatprep.subr.bf16.mxu1 (!%p13014_p5), %v8823_v3  ;;  %v8842_v21 = vld [vmem:[#allocation11] sm:$0xff] (!%p13014_p5)   ;;  %v8843_v23 = vld [vmem:[#allocation11 + $0x8] sm:$0xff] (!%p13014_p5)   ;;  %v8844_v24 = vld [vmem:[#allocation11 + $0x10] sm:$0xff] (!%p13014_p5)  }
 0x365   : > { %8037 = vmatpush3.bf16.msra.mxu0 %v8834_v8  ;;  %v8845_v25 = vld [vmem:[#allocation11 + $0x18] sm:$0xff]   ;;  %v8846_v26 = vld [vmem:[#allocation11 + $0x20] sm:$0xff]   ;;  %v8847_v27 = vld [vmem:[#allocation11 + $0x28] sm:$0xff]  }
 0x366   : > { %8038 = vmatprep.subr.bf16.mxu0 %v10291_v2  ;;  %v8848_v28 = vld [vmem:[#allocation11 + $0x30] sm:$0xff]   ;;  %v8849_v29 = vld [vmem:[#allocation11 + $0x38] sm:$0xff]   ;;  %v7514_v53 = vld [vmem:[#allocation21] ss:$0 sm:$0xff] }
 0x367   : > { %8059 = vmatpush3.bf16.msra.mxu1 %v8823_v3  ;;  %v7526_v30 = vld [vmem:[#allocation9] ss:$0 sm:$0xff]  ;;  %v8850_v3 = vld [vmem:[#allocation14] sm:$0xff]   ;;  %v8852_v5 = vld [vmem:[#allocation14 + $0x10] sm:$0xff]  }
 0x368   : > { %8060 = vmatprep.subr.bf16.mxu1 %v8824_v4  ;;  %v8854_v7 = vld [vmem:[#allocation14 + $0x20] sm:$0xff]   ;;  %v8855_v8 = vld [vmem:[#allocation14 + $0x28] sm:$0xff]  }
 0x369   : > { %8039 = vmatpush3.bf16.msra.mxu0 %v8835_v10  ;;  %v8857_v10 = vld [vmem:[#allocation14 + $0x38] sm:$0xff]  }
 0x36a   : > { %8040 = vmatprep.subr.bf16.mxu0 %v10291_v2 }
 0x36b   : > { %8061 = vmatpush3.bf16.msra.mxu1 %v8824_v4  ;;  %v8851_v4 = vld [vmem:[#allocation14 + $0x8] sm:$0xff]  }
 0x36c   : > { %8062 = vmatprep.subr.bf16.mxu1 %v8825_v6 }
 0x36d   : > { %8041 = vmatpush3.bf16.msra.mxu0 %v8836_v12 }
 0x36e   : > { %8042 = vmatprep.subr.bf16.mxu0 %v10291_v2 }
 0x36f   : > { %8063 = vmatpush3.bf16.msra.mxu1 %v8825_v6  ;;  %v8853_v6 = vld [vmem:[#allocation14 + $0x18] sm:$0xff]  }
 0x370   : > { %8064 = vmatprep.subr.bf16.mxu1 %v8826_v9 }
 0x371   : > { %8043 = vmatpush3.bf16.msra.mxu0 %v8837_v14 }
 0x372   : > { %8044 = vmatprep.subr.bf16.mxu0 %v10291_v2 }
 0x373   : > { %8065 = vmatpush3.bf16.msra.mxu1 %v8826_v9  ;;  %v8856_v9 = vld [vmem:[#allocation14 + $0x30] sm:$0xff]  }
 0x374   : > { %8066 = vmatprep.subr.bf16.mxu1 %v8827_v11 }
 0x375   : > { %8045 = vmatpush3.bf16.msra.mxu0 %v8838_v16 }
 0x376   : > { %8046 = vmatprep.subr.bf16.mxu0 %v10291_v2 }
 0x377   : > { %8067 = vmatpush3.bf16.msra.mxu1 %v8827_v11  ;;  %v7539_v11 = vld [vmem:[#allocation12] ss:$0 sm:$0xff] }
 0x378   : > { %8068 = vmatprep.subr.bf16.mxu1 %v8828_v13 }
 0x379   : > { %8047 = vmatpush3.bf16.msra.mxu0 %v8839_v18 }
 0x37a   : > { %8048 = vmatprep.subr.bf16.mxu0 %v10291_v2 }
 0x37b   : > { %8069 = vmatpush3.bf16.msra.mxu1 %v8828_v13 }
 0x37c   : > { %8102 = vmatprep.subr.bf16.mxu1 %v8850_v3 }
 0x37d   : > { %8049 = vmatpush3.bf16.msra.mxu0 %v8840_v20 }
 0x37e   : > { %8071 = vmatmul.mubr.bf16.vlgmr.msra.gmra.mrb[0].mxu1 %v8830_v15  ;;  %8078 = vmatprep.subr.bf16.mxu0 %v8842_v21 }
 0x37f   : > { %8074 = vmatprep.mubr.bf16.mxu1 %v8831_v17  ;;  %8103 = vmatpush3.bf16.msra.mxu1 %v8850_v3 }
 0x380   : > { %8051 = vmatmul.mubr.bf16.vlgmr.msra.gmra.mrb[0].mxu0 %v8841_v22  ;;  %8104 = vmatprep.subr.bf16.mxu1 %v8851_v4 }
 0x381   : > { %8079 = vmatpush3.bf16.msra.mxu0 %v8842_v21 }
 0x382   : > { %8080 = vmatprep.subr.bf16.mxu0 %v8843_v23 }
 0x383   : > { %8105 = vmatpush3.bf16.msra.mxu1 %v8851_v4 }
 0x384   : > { %8106 = vmatprep.subr.bf16.mxu1 %v8852_v5 }
 0x385   : > { %8081 = vmatpush3.bf16.msra.mxu0 %v8843_v23 }
 0x386   : > { %8075 = vmatmul.mubr.bf16.gmra.mrb[4].mxu1 %v8832_v19  ;;  %8082 = vmatprep.subr.bf16.mxu0 %v8844_v24 }
 0x387   : > { %8107 = vmatpush3.bf16.msra.mxu1 %v8852_v5 }
 0x388   : > { %8108 = vmatprep.subr.bf16.mxu1 %v8853_v6 }
 0x389   : > { %8083 = vmatpush3.bf16.msra.mxu0 %v8844_v24 }
 0x38a   : > { %8084 = vmatprep.subr.bf16.mxu0 %v8845_v25 }
 0x38b   : > { %8109 = vmatpush3.bf16.msra.mxu1 %v8853_v6 }
 0x38c   : > { %8110 = vmatprep.subr.bf16.mxu1 %v8854_v7 }
 0x38d   : > { %8085 = vmatpush3.bf16.msra.mxu0 %v8845_v25 }
 0x38e   : > { %8086 = vmatprep.subr.bf16.mxu0 %v8846_v26 }
 0x38f   : > { %8111 = vmatpush3.bf16.msra.mxu1 %v8854_v7 }
 0x390   : > { %8112 = vmatprep.subr.bf16.mxu1 %v8855_v8 }
 0x391   : > { %8087 = vmatpush3.bf16.msra.mxu0 %v8846_v26 }
 0x392   : > { %8088 = vmatprep.subr.bf16.mxu0 %v8847_v27 }
 0x393   : > { %8113 = vmatpush3.bf16.msra.mxu1 %v8855_v8 }
 0x394   : > { %8114 = vmatprep.subr.bf16.mxu1 %v8856_v9 }
 0x395   : > { %8089 = vmatpush3.bf16.msra.mxu0 %v8847_v27 }
 0x396   : > { %8090 = vmatprep.subr.bf16.mxu0 %v8848_v28 }
 0x397   : > { %8115 = vmatpush3.bf16.msra.mxu1 %v8856_v9 }
 0x398   : > { %8116 = vmatprep.subr.bf16.mxu1 %v8857_v10 }
 0x399   : > { %8091 = vmatpush3.bf16.msra.mxu0 %v8848_v28 }
 0x39a   : > { %8092 = vmatprep.subr.bf16.mxu0 %v8849_v29 }
 0x39b   : > { %8117 = vmatpush3.bf16.msra.mxu1 %v8857_v10 }
 0x39d   : > { %8093 = vmatpush3.bf16.msra.mxu0 %v8849_v29 }
 0x451   : > { %v8072_v31 = vpop.f32.mrb[0].mxu1 }
 0x452   : > { %v1804_v32 = vadd.f32 %v8072_v31, %v7526_v30  ;;  %v1795_v33 = vpop.f32.mrb[1].mxu1 }
 0x453   : > { %v1796_v34 = vadd.f32 %v7526_v30, %v1795_v33  ;;  %v8073_v35 = vpop.f32.mrb[2].mxu1  ;;  %v1603_v54 = vpop.f32.mrb[0].mxu0 }
 0x454   : > { %v1807_v36 = vadd.f32 %v8073_v35, %v7526_v30  ;;  %v1798_v37 = vpop.f32.mrb[3].mxu1  ;;  %v1828_v39 = vmax.f32 %v1804_v32, 0.0  ;;  %v8052_v57 = vpop.f32.mrb[1].mxu0  ;;  %v11069_v2 = vadd.f32 %v7514_v53, %v1603_v54 }
 0x455   : > { %v1799_v38 = vadd.f32 %v7526_v30, %v1798_v37  ;;  %v1826_v41 = vmax.f32 %v1796_v34, 0.0  ;;  %v1606_v59 = vpop.f32.mrb[2].mxu0 }
 0x456   : > { %v1829_v40 = vmax.f32 %v1807_v36, 0.0  ;;  %v11065_v61 = vadd.f32 %v7514_v53, %v1606_v59  ;;  %v8053_v62 = vpop.f32.mrb[3].mxu0 }
 0x457   : > { %v1827_v42 = vmax.f32 %v1799_v38, 0.0 }
 0x458   : > { %v1835_v43 = vpack.c.bf16 %v1829_v40, %v1828_v39  ;;  %v1615_v1 = vsel %vm1614_vm1, %v11065_v61, 0.0  ;;  %v7548_v40 = vld [vmem:[#allocation15] ss:$0 sm:$0xff] }
 0x459   : > { %v1834_v44 = vpack.c.bf16 %v1827_v42, %v1826_v41  ;;  %v8076_v45 = vpop.f32.mrb[4].mxu1  ;;  %1616 = vadd.xlane.f32.xlu0 %v1615_v1 }
 0x45a   : > { %v1820_v46 = vadd.f32 %v8076_v45, %v7526_v30  ;;  %v1811_v47 = vpop.f32.mrb[5].mxu1 }
 0x45b   : > { %v1812_v48 = vadd.f32 %v7526_v30, %v1811_v47  ;;  %v8077_v49 = vpop.f32.mrb[6].mxu1  ;;  %8094 = vmatprep.mubr.bf16.mxu0 %v1834_v44 }
 0x45c   : > { %v1832_v50 = vmax.f32 %v1820_v46, 0.0  ;;  %v1823_v51 = vadd.f32 %v8077_v49, %v7526_v30  ;;  %v1814_v52 = vpop.f32.mrb[7].mxu1  ;;  %8095 = vmatmul.mubr.bf16.vlgmr.msra.gmra.mrb[4].mxu0 %v1835_v43 }
 0x45d   : > { %v1830_v55 = vmax.f32 %v1812_v48, 0.0  ;;  %v1815_v56 = vadd.f32 %v7526_v30, %v1814_v52  ;;  %1612 = vadd.xlane.f32.xlu0 %v11069_v2 }
 0x45e   : > { %v1833_v58 = vmax.f32 %v1823_v51, 0.0 }
 0x45f   : > { %v1831_v60 = vmax.f32 %v1815_v56, 0.0 }
 0x460   : > { %v1837_v63 = vpack.c.bf16 %v1833_v58, %v1832_v50 }
 0x461   : > { %v1836_v0 = vpack.c.bf16 %v1831_v60, %v1830_v55 }
 0x463   : > { %8098 = vmatprep.mubr.bf16.mxu0 %v1836_v0 }
 0x464   : > { %8099 = vmatmul.mubr.bf16.gmra.mrb[8].mxu0 %v1837_v63 }
 0x4e6   : > { %v1617_v42 = vpop.xlane.xlu0 %1616 }
 0x4e7   : > { %v1620_v56 = vmul.f32 0.0078125, %v1617_v42  ;;  %v10293_v42 = vmov 1966171168  }
 0x4e9   : > { %v11076_v62 = vsub.f32 %v11065_v61, %v1620_v56 }
 0x4ea   : > { %v1613_v49 = vpop.xlane.xlu0 %1612 }
 0x4eb   : > { %v1619_v52 = vmul.f32 0.0078125, %v1613_v49  ;;  %v1624_v1 = vmul.f32 %v11076_v62, %v11076_v62 }
 0x4ed   : > { %v11073_v58 = vsub.f32 %v11069_v2, %v1619_v52  ;;  %v1627_v3 = vsel %vm1614_vm1, %v1624_v1, 0.0 }
 0x4ef   : > { %v1623_v0 = vmul.f32 %v11073_v58, %v11073_v58 }
 0x52f   : > { %v8096_v12 = vpop.f32.mrb[4].mxu0 }
 0x530   : > { %v1952_v13 = vadd.f32 %v8096_v12, %v7539_v11  ;;  %v1943_v14 = vpop.f32.mrb[5].mxu0 }
 0x531   : > { %v1944_v15 = vadd.f32 %v7539_v11, %v1943_v14  ;;  %v8097_v16 = vpop.f32.mrb[6].mxu0 }
 0x532   : > { %v1955_v17 = vadd.f32 %v8097_v16, %v7539_v11  ;;  %v1946_v18 = vpop.f32.mrb[7].mxu0  ;;  %v1976_v20 = vmax.f32 %v1952_v13, 0.0 }
 0x533   : > { %v1947_v19 = vadd.f32 %v7539_v11, %v1946_v18  ;;  %v1974_v22 = vmax.f32 %v1944_v15, 0.0 }
 0x534   : > { %v1977_v21 = vmax.f32 %v1955_v17, 0.0 }
 0x535   : > { %v1975_v23 = vmax.f32 %v1947_v19, 0.0 }
 0x536   : > { %v1983_v24 = vpack.c.bf16 %v1977_v21, %v1976_v20 }
 0x537   : > { %v1982_v25 = vpack.c.bf16 %v1975_v23, %v1974_v22  ;;  %v8100_v26 = vpop.f32.mrb[8].mxu0 }
 0x538   : > { %v1968_v27 = vadd.f32 %v8100_v26, %v7539_v11  ;;  %v1959_v28 = vpop.f32.mrb[9].mxu0 }
 0x539   : > { %v1960_v29 = vadd.f32 %v7539_v11, %v1959_v28  ;;  %v8101_v30 = vpop.f32.mrb[10].mxu0  ;;  %8118 = vmatprep.mubr.bf16.mxu1 %v1982_v25 }
 0x53a   : > { %v1971_v31 = vadd.f32 %v8101_v30, %v7539_v11  ;;  %v1962_v32 = vpop.f32.mrb[11].mxu0  ;;  %8119 = vmatmul.mubr.bf16.vlgmr.msra.gmra.mrb[8].mxu1 %v1983_v24  ;;  %v1980_v34 = vmax.f32 %v1968_v27, 0.0 }
 0x53b   : > { %v1963_v33 = vadd.f32 %v7539_v11, %v1962_v32  ;;  %v1978_v36 = vmax.f32 %v1960_v29, 0.0 }
 0x53c   : > { %v1981_v35 = vmax.f32 %v1971_v31, 0.0 }
 0x53d   : > { %v1979_v37 = vmax.f32 %v1963_v33, 0.0 }
 0x53e   : > { %v1985_v38 = vpack.c.bf16 %v1981_v35, %v1980_v34 }
 0x53f   : > { %v1984_v39 = vpack.c.bf16 %v1979_v37, %v1978_v36 }
 0x541   : > { %8122 = vmatprep.mubr.bf16.mxu1 %v1984_v39 }
 0x542   : > { %8123 = vmatmul.mubr.bf16.gmra.mrb[12].mxu1 %v1985_v38 }
 0x60d   : > { %v8120_v41 = vpop.f32.mrb[8].mxu1 }
 0x60e   : > { %v2100_v43 = vadd.f32 %v8120_v41, %v7548_v40  ;;  %v2091_v44 = vpop.f32.mrb[9].mxu1  ;;  %v7524_v41 = vld [vmem:[#allocation23] ss:$0 sm:$0xff] }
 0x60f   : > { %v2092_v45 = vadd.f32 %v7548_v40, %v2091_v44  ;;  %v8121_v46 = vpop.f32.mrb[10].mxu1  ;;  %v2273_v44 = vlaneseq }
 0x610   : > { %2128 = vadd.xlane.f32.xlu0 %v2100_v43  ;;  %v2094_v47 = vpop.f32.mrb[11].mxu1  ;;  %v2103_v48 = vadd.f32 %v8121_v46, %v7548_v40  ;;  %v7525_v46 = vld [vmem:[#allocation24] ss:$0 sm:$0xff] }
 0x611   : > { %2124 = vadd.xlane.f32.xlu1 %v2092_v45  ;;  %v2095_v53 = vadd.f32 %v7548_v40, %v2094_v47 }
 0x615   : > { %v8124_v50 = vpop.f32.mrb[12].mxu1  ;;  %2130 = vadd.xlane.f32.xlu1 %v2103_v48 }
 0x616   : > { %v2107_v51 = vpop.f32.mrb[13].mxu1  ;;  %v2116_v59 = vadd.f32 %v8124_v50, %v7548_v40  ;;  %v2274_v50 = vshrl.u32 %v2273_v44, 7 }
 0x617   : > { %v2108_v54 = vadd.f32 %v7548_v40, %v2107_v51  ;;  %v8125_v55 = vpop.f32.mrb[14].mxu1 }
 0x618   : > { %v2110_v57 = vpop.f32.mrb[15].mxu1  ;;  %v2119_v63 = vadd.f32 %v8125_v55, %v7548_v40 }
 0x619   : > { %2132 = vadd.xlane.f32.xlu0 %v2108_v54  ;;  %2126 = vadd.xlane.f32.xlu1 %v2095_v53  ;;  %v2111_v60 = vadd.f32 %v7548_v40, %v2110_v57 }
 0x61d   : > { %2136 = vadd.xlane.f32.xlu0 %v2116_v59  ;;  %2134 = vadd.xlane.f32.xlu1 %v2111_v60 }
 0x621   : > { %1625 = vadd.xlane.f32.xlu0 %v1623_v0  ;;  %2138 = vadd.xlane.f32.xlu1 %v2119_v63 }
 0x625   : > { %1628 = vadd.xlane.f32.xlu1 %v1627_v3 }
 0x69d   : > { %v2129_v2 = vpop.xlane.xlu0 %2128 }
 0x69e   : > { %v2142_v4 = vmul.f32 0.0078125, %v2129_v2  ;;  %v2125_v5 = vpop.xlane.xlu1 %2124 }
 0x69f   : > { %v2140_v6 = vmul.f32 0.0078125, %v2125_v5 }
 0x6a0   : > { %v11083_v61 = vsub.f32 %v2100_v43, %v2142_v4  ;;  %v2271_v43 = vunpack.c.l.s4 %v10293_v42 }
 0x6a1   : > { %v11085_v7 = vsub.f32 %v2092_v45, %v2140_v6 }
 0x6a2   : > { %v2131_v8 = vpop.xlane.xlu1 %2130  ;;  %v2158_v9 = vmul.f32 %v11083_v61, %v11083_v61  ;;  %v2272_v49 = vunpack.c.0.s8 %v2271_v43 }
 0x6a3   : > { %v2143_v10 = vmul.f32 0.0078125, %v2131_v8  ;;  %v2156_v14 = vmul.f32 %v11085_v7, %v11085_v7 }
 0x6a4   : > { %2168 = vadd.xlane.f32.xlu0 %v2158_v9  ;;  %v11117_v55 = vsub.s32 %v2272_v49, %v2274_v50 }
 0x6a5   : > { %v11089_v11 = vsub.f32 %v2103_v48, %v2143_v10 }
 0x6a6   : > { %v2133_v12 = vpop.xlane.xlu0 %2132  ;;  %v2127_v13 = vpop.xlane.xlu1 %2126 }
 0x6a7   : > { %v2144_v15 = vmul.f32 0.0078125, %v2133_v12  ;;  %v2141_v16 = vmul.f32 0.0078125, %v2127_v13  ;;  %v2159_v17 = vmul.f32 %v11089_v11, %v11089_v11 }
 0x6a8   : > { %2164 = vadd.xlane.f32.xlu0 %v2156_v14 }
 0x6a9   : > { %v11095_v18 = vsub.f32 %v2108_v54, %v2144_v15  ;;  %v11097_v19 = vsub.f32 %v2095_v53, %v2141_v16  ;;  %2170 = vadd.xlane.f32.xlu1 %v2159_v17 }
 0x6aa   : > { %v2137_v20 = vpop.xlane.xlu0 %2136  ;;  %v2135_v21 = vpop.xlane.xlu1 %2134 }
 0x6ab   : > { %v2146_v22 = vmul.f32 0.0078125, %v2137_v20  ;;  %v2145_v23 = vmul.f32 0.0078125, %v2135_v21  ;;  %v2160_v24 = vmul.f32 %v11095_v18, %v11095_v18  ;;  %v2157_v25 = vmul.f32 %v11097_v19, %v11097_v19 }
 0x6ad   : > { %v11103_v26 = vsub.f32 %v2116_v59, %v2146_v22  ;;  %v11105_v27 = vsub.f32 %v2111_v60, %v2145_v23  ;;  %2172 = vadd.xlane.f32.xlu0 %v2160_v24  ;;  %2166 = vadd.xlane.f32.xlu1 %v2157_v25 }
 0x6ae   : > { %v1626_v28 = vpop.xlane.xlu0 %1625  ;;  %v2139_v29 = vpop.xlane.xlu1 %2138 }
 0x6af   : > { %v1630_v30 = vmul.f32 0.0078125, %v1626_v28  ;;  %v2147_v31 = vmul.f32 0.0078125, %v2139_v29  ;;  %v2162_v32 = vmul.f32 %v11103_v26, %v11103_v26  ;;  %v2161_v33 = vmul.f32 %v11105_v27, %v11105_v27 }
 0x6b1   : > { %v1632_v34 = vadd.f32 1e-05, %v1630_v30  ;;  %v11111_v35 = vsub.f32 %v2119_v63, %v2147_v31  ;;  %2176 = vadd.xlane.f32.xlu0 %v2162_v32  ;;  %2174 = vadd.xlane.f32.xlu1 %v2161_v33 }
 0x6b2   : > { %v1629_v36 = vpop.xlane.xlu1 %1628 }
 0x6b3   : > { %8858 = vrsqrt.f32 %v1632_v34  ;;  %v1631_v37 = vmul.f32 0.0078125, %v1629_v36  ;;  %v2163_v38 = vmul.f32 %v11111_v35, %v11111_v35 }
 0x6b5   : > { %v1633_v39 = vadd.f32 1e-05, %v1631_v37  ;;  %2178 = vadd.xlane.f32.xlu1 %v2163_v38 }
 0x6b7   : > { %8860 = vrsqrt.f32 %v1633_v39 }
 0x6bd   : > { %v8859_v40 = vpop.eup %8858 }
 0x6be   : > { %v1636_v45 = vmul.f32 %v8859_v40, %v11073_v58 }
 0x6c0   : > { %v1644_v47 = vmul.f32 %v7524_v41, %v1636_v45 }
 0x6c1   : > { %v8861_v48 = vpop.eup %8860 }
 0x6c2   : > { %v1652_v51 = vadd.f32 %v7525_v46, %v1644_v47  ;;  %v1637_v52 = vmul.f32 %v8861_v48, %v11076_v62 }
 0x6c4   : > { %v1654_v53 = vmax.f32 %v1652_v51, 0.0  ;;  %v1645_v54 = vmul.f32 %v7524_v41, %v1637_v52 }
 0x6c6   : > { %1656 = vst [vmem:[#allocation42] sm:$0xff] %v1654_v53  ;;  %v2269_v56 = vcombine.high %v1654_v53, %v1654_v53  ;;  %v1653_v57 = vadd.f32 %v7525_v46, %v1645_v54  ;;  %v2276_v29 = vrot.slane %v1654_v53, %v11117_v55 }
 0x6c8   : > { %v2283_v59 = vrot.slane %v2269_v56, %v11117_v55  ;;  %v1655_v60 = vmax.f32 %v1653_v57, 0.0  ;;  %v2284_v36 = vcombine.high %v2276_v29, %v2276_v29  ;;  %v2292_v45 = vrot.slane %v2276_v29, %v11117_v55  ;;  %v11143_v56 = vld [vmem:[#allocation17] ss:$0 sm:$0xff] }
 0x6ca   : > { %v2285_v63 = vcombine.high %v2283_v59, %v2283_v59  ;;  %1657 = vst [vmem:[#allocation42 + $0x8] sm:$0x3f] %v1655_v60  ;;  %v2318_v58 = vcombine.high %v1655_v60, %v1655_v60  ;;  %v2325_v0 = vrot.slane %v1655_v60, %v11117_v55  ;;  %v2299_v43 = vrot.slane %v2283_v59, %v11117_v55 }
 0x6cb   : > { %v2306_v44 = vrot.slane %v2284_v36, %v11117_v55  ;;  %v2314_v57 = vcombine.high %v2292_v45, %v2292_v45 }
 0x6cc   : > { %v11122_v1 = vrot.slane %v2285_v63, %v11117_v55  ;;  %v2332_v62 = vrot.slane %v2318_v58, %v11117_v55  ;;  %v2333_v3 = vcombine.high %v2325_v0, %v2325_v0  ;;  %v2341_v5 = vrot.slane %v2325_v0, %v11117_v55  ;;  %v11146_v58 = vld [vmem:[#allocation18] ss:$0 sm:$0xff] }
 0x6cd   : > { %v2315_v53 = vcombine.high %v2299_v43, %v2299_v43  ;;  %v2316_v54 = vcombine.high %v2306_v44, %v2306_v44 }
 0x6ce   : > { %v7561_v2 = vcombine.high %v11122_v1, %v11122_v1  ;;  %v2334_v4 = vcombine.high %v2332_v62, %v2332_v62  ;;  %v2355_v6 = vrot.slane %v2333_v3, %v11117_v55  ;;  %v2348_v8 = vrot.slane %v2332_v62, %v11117_v55 }
 0x6d0   : > { %v2362_v9 = vrot.slane %v2334_v4, %v11117_v55  ;;  %v2439_v10 = vcombine.low %v2341_v5, %v2355_v6  ;;  %v7562_v12 = vcombine.high %v2341_v5, %v2355_v6  ;;  %v2448_v13 = vrot.slane %v7561_v2, %v11117_v55 }
 0x6d1   : > { %v2391_v4 = vcombine.low %v2316_v54, %v2299_v43  ;;  %v2392_v5 = vcombine.low %v11122_v1, %v2315_v53 }
 0x6d2   : > { %v2441_v14 = vcombine.low %v2348_v8, %v2362_v9  ;;  %v2455_v15 = vrot.slane %v2439_v10, %v11117_v55  ;;  %v2462_v16 = vrot.slane %v7562_v12, %v11117_v55  ;;  %v2390_v8 = vcombine.low %v2306_v44, %v2314_v57  ;;  %v7559_v12 = vld [vmem:[#allocation26] ss:$0 sm:$0xff] }
 0x6d3   : > { %v2420_v1 = vrot.slane %v2392_v5, %v11117_v55 }
 0x6d4   : > { %v2469_v17 = vrot.slane %v2441_v14, %v11117_v55  ;;  %v2470_v20 = vcombine.low %v2448_v13, %v2455_v15  ;;  %v2389_v14 = vcombine.low %v2292_v45, %v2292_v45 }
 0x6d6   : > { %v2471_v21 = vcombine.low %v2462_v16, %v2469_v17  ;;  %v2478_v22 = vrot.slane %v2470_v20, %v11117_v55  ;;  %v2413_v17 = vrot.slane %v2391_v4, %v11117_v55 }
 0x6d8   : > { %v2485_v23 = vrot.slane %v2471_v21, %v11117_v55 }
 0x6da   : > { %v11137_v24 = vcombine.low %v2478_v22, %v2485_v23  ;;  %v2406_v22 = vrot.slane %v2390_v8, %v11117_v55 }
 0x731   : > { %v2169_v25 = vpop.xlane.xlu0 %2168 }
 0x732   : > { %v2182_v28 = vmul.f32 0.0078125, %v2169_v25 }
 0x734   : > { %v2190_v30 = vadd.f32 1e-05, %v2182_v28 }
 0x735   : > { %v2165_v31 = vpop.xlane.xlu0 %2164 }
 0x736   : > { %8862 = vrsqrt.f32 %v2190_v30  ;;  %v2180_v32 = vmul.f32 0.0078125, %v2165_v31  ;;  %v2171_v33 = vpop.xlane.xlu1 %2170  ;;  %v2399_v30 = vrot.slane %v2389_v14, %v11117_v55 }
 0x737   : > { %v2183_v34 = vmul.f32 0.0078125, %v2171_v33 }
 0x738   : > { %v2188_v37 = vadd.f32 1e-05, %v2180_v32 }
 0x739   : > { %v2191_v38 = vadd.f32 1e-05, %v2183_v34  ;;  %v2422_v34 = vcombine.low %v2413_v17, %v2420_v1 }
 0x73a   : > { %8864 = vrsqrt.f32 %v2188_v37  ;;  %v2173_v39 = vpop.xlane.xlu0 %2172  ;;  %v2167_v40 = vpop.xlane.xlu1 %2166 }
 0x73b   : > { %8866 = vrsqrt.f32 %v2191_v38  ;;  %v2184_v41 = vmul.f32 0.0078125, %v2173_v39  ;;  %v2181_v42 = vmul.f32 0.0078125, %v2167_v40  ;;  %v2421_v39 = vcombine.low %v2399_v30, %v2406_v22 }
 0x73d   : > { %v2192_v46 = vadd.f32 1e-05, %v2184_v41  ;;  %v2189_v47 = vadd.f32 1e-05, %v2181_v42  ;;  %v2429_v57 = vrot.slane %v2421_v39, %v11117_v55 }
 0x73e   : > { %v2177_v48 = vpop.xlane.xlu0 %2176  ;;  %v2175_v49 = vpop.xlane.xlu1 %2174 }
 0x73f   : > { %8868 = vrsqrt.f32 %v2192_v46  ;;  %v2186_v50 = vmul.f32 0.0078125, %v2177_v48  ;;  %v2185_v51 = vmul.f32 0.0078125, %v2175_v49 }
 0x740   : > { %v8863_v52 = vpop.eup %8862  ;;  %8870 = vrsqrt.f32 %v2189_v47 }
 0x741   : > { %v2206_v59 = vmul.f32 %v8863_v52, %v11083_v61  ;;  %v2194_v60 = vadd.f32 1e-05, %v2186_v50  ;;  %v2193_v63 = vadd.f32 1e-05, %v2185_v51  ;;  %v2436_v50 = vrot.slane %v2422_v34, %v11117_v55 }
 0x742   : > { %v2179_v0 = vpop.xlane.xlu1 %2178 }
 0x743   : > { %v2220_v62 = vmul.f32 %v11143_v56, %v2206_v59  ;;  %8872 = vrsqrt.f32 %v2194_v60  ;;  %v2187_v3 = vmul.f32 0.0078125, %v2179_v0 }
 0x744   : > { %v8865_v2 = vpop.eup %8864  ;;  %8874 = vrsqrt.f32 %v2193_v63 }
 0x745   : > { %v8867_v6 = vpop.eup %8866  ;;  %v2234_v9 = vadd.f32 %v11146_v58, %v2220_v62  ;;  %v2204_v61 = vmul.f32 %v8865_v2, %v11085_v7  ;;  %v2195_v10 = vadd.f32 1e-05, %v2187_v3  ;;  %v2437_v2 = vcombine.low %v2429_v57, %v2436_v50 }
 0x746   : > { %v2207_v13 = vmul.f32 %v8867_v6, %v11089_v11  ;;  %v2248_v11 = vld [vmem:[#allocation27] sm:$0x1] }
 0x747   : > { %v2242_v15 = vmax.f32 %v2234_v9, 0.0  ;;  %v2218_v16 = vmul.f32 %v11143_v56, %v2204_v61  ;;  %8876 = vrsqrt.f32 %v2195_v10 }
 0x748   : > { %v2221_v20 = vmul.f32 %v11143_v56, %v2207_v13 }
 0x749   : > { %v8869_v21 = vpop.eup %8868  ;;  %v11158_v23 = vadd.f32 %v7559_v12, %v2242_v15  ;;  %v2232_v7 = vadd.f32 %v11146_v58, %v2218_v16 }
 0x74a   : > { %v8871_v25 = vpop.eup %8870  ;;  %v2235_v28 = vadd.f32 %v11146_v58, %v2221_v20  ;;  %v2208_v29 = vmul.f32 %v8869_v21, %v11095_v18 }
 0x74b   : > { %v2371_v31 = vrot.slane %v11158_v23, 7  ;;  %v2240_v32 = vmax.f32 %v2232_v7, 0.0  ;;  %v2205_v33 = vmul.f32 %v8871_v25, %v11097_v19  ;;  %v7560_v19 = vld [vmem:[#allocation26 + $0x1] ss:$0 sm:$0xff] }
 0x74c   : > { %v2243_v36 = vmax.f32 %v2235_v28, 0.0  ;;  %v2222_v37 = vmul.f32 %v11143_v56, %v2208_v29 }
 0x74d   : > { %v8873_v38 = vpop.eup %8872  ;;  %v2492_v40 = vsel %vm2489_vm2, %v2248_v11, %v2371_v31  ;;  %v2254_v41 = vadd.f32 %v7559_v12, %v2240_v32  ;;  %v2219_v42 = vmul.f32 %v11143_v56, %v2205_v33 }
 0x74e   : > { %v8875_v43 = vpop.eup %8874  ;;  %2508 = vst [vmem:[#allocation2 + $0x30] sm:$0xff] %v2492_v40  ;;  %v2257_v18 = vadd.f32 %v7559_v12, %v2243_v36  ;;  %v2236_v44 = vadd.f32 %v11146_v58, %v2222_v37  ;;  %v2210_v45 = vmul.f32 %v8873_v38, %v11103_v26 }
 0x74f   : > { %v2369_v46 = vrot.slane %v2254_v41, 7  ;;  %v2233_v47 = vadd.f32 %v11146_v58, %v2219_v42  ;;  %v2209_v48 = vmul.f32 %v8875_v43, %v11105_v27 }
 0x750   : > { %v2372_v49 = vrot.slane %v2257_v18, 7  ;;  %v2244_v51 = vmax.f32 %v2236_v44, 0.0  ;;  %v2224_v52 = vmul.f32 %v11143_v56, %v2210_v45 }
 0x751   : > { %v8877_v53 = vpop.eup %8876  ;;  %v2490_v54 = vsel %vm2489_vm2, %v2248_v11, %v2369_v46  ;;  %v2241_v59 = vmax.f32 %v2233_v47, 0.0  ;;  %v2223_v26 = vmul.f32 %v11143_v56, %v2209_v48 }
 0x752   : > { %2502 = vst [vmem:[#allocation2] sm:$0xff] %v2490_v54  ;;  %v2493_v60 = vsel %vm2489_vm2, %v2248_v11, %v2372_v49  ;;  %v2263_v63 = vadd.f32 %v7560_v19, %v2244_v51  ;;  %v2238_v27 = vadd.f32 %v11146_v58, %v2224_v52  ;;  %v2211_v0 = vmul.f32 %v8877_v53, %v11111_v35 }
 0x753   : > { %2511 = vst [vmem:[#allocation2 + $0x48] sm:$0xff] %v2493_v60  ;;  %v2255_v62 = vadd.f32 %v7559_v12, %v2241_v59  ;;  %v2237_v3 = vadd.f32 %v11146_v58, %v2223_v26 }
 0x754   : > { %v2381_v4 = vrot.slane %v2263_v63, 7  ;;  %v2246_v5 = vmax.f32 %v2238_v27, 0.0  ;;  %v2225_v55 = vmul.f32 %v11143_v56, %v2211_v0 }
 0x755   : > { %v2370_v6 = vrot.slane %v2255_v62, 7  ;;  %v2245_v8 = vmax.f32 %v2237_v3, 0.0 }
 0x756   : > { %v2494_v9 = vsel %vm2489_vm2, %v2369_v46, %v2381_v4  ;;  %v2498_v61 = vsel %vm2489_vm2, %v2381_v4, %v2437_v2  ;;  %v2265_v10 = vadd.f32 %v7560_v19, %v2246_v5  ;;  %v2239_v13 = vadd.f32 %v11146_v58, %v2225_v55 }
 0x757   : > { %2503 = vst [vmem:[#allocation2 + $0x8] sm:$0xff] %v2494_v9  ;;  %2504 = vst [vmem:[#allocation2 + $0x10] sm:$0xff] %v2498_v61  ;;  %v2491_v35 = vsel %vm2489_vm2, %v2248_v11, %v2370_v6  ;;  %v2264_v12 = vadd.f32 %v7560_v19, %v2245_v8 }
 0x758   : > { %2505 = vst [vmem:[#allocation2 + $0x18] sm:$0xff] %v2491_v35  ;;  %v2383_v14 = vrot.slane %v2265_v10, 7  ;;  %v2247_v15 = vmax.f32 %v2239_v13, 0.0 }
 0x759   : > { %v2382_v16 = vrot.slane %v2264_v12, 7 }
 0x75a   : > { %v2496_v56 = vsel %vm2489_vm2, %v2371_v31, %v2383_v14  ;;  %v2500_v17 = vsel %vm2489_vm2, %v2383_v14, %v11137_v24  ;;  %v2266_v1 = vadd.f32 %v7560_v19, %v2247_v15 }
 0x75b   : > { %2509 = vst [vmem:[#allocation2 + $0x38] sm:$0xff] %v2496_v56  ;;  %2510 = vst [vmem:[#allocation2 + $0x40] sm:$0xff] %v2500_v17  ;;  %v2495_v20 = vsel %vm2489_vm2, %v2370_v6, %v2382_v16  ;;  %v2499_v58 = vsel %vm2489_vm2, %v2382_v16, %v2437_v2 }
 0x75c   : > { %2506 = vst [vmem:[#allocation2 + $0x20] sm:$0xff] %v2495_v20  ;;  %2507 = vst [vmem:[#allocation2 + $0x28] sm:$0xff] %v2499_v58  ;;  %v2384_v21 = vrot.slane %v2266_v1, 7 }
 0x75e   : > { %v2497_v22 = vsel %vm2489_vm2, %v2372_v49, %v2384_v21  ;;  %v2501_v23 = vsel %vm2489_vm2, %v2384_v21, %v11137_v24 }
 0x75f   : > { %2512 = vst [vmem:[#allocation2 + $0x50] sm:$0xff] %v2497_v22  ;;  %2513 = vst [vmem:[#allocation2 + $0x58] sm:$0xff] %v2501_v23 }
 0x760 PF: > { %v8968_v7 = vld [vmem:[%s11037_s8 + $0x4] ss:$12 sps:$4 sm:$0xff]   ;;  %v8970_v25 = vld [vmem:[%s11037_s8] ss:$12 sps:$4 sm:$0xff]   ;;  %v12901_v11 = vmov 0   ;;  %v2516_v52 = vld [vmem:[#allocation2 + $0x10] sm:$0xff]  ;;  %v2566_v5 = vlaneseq }
 0x761   : > { %2741 = vmatprep.mubr.bf16.mxu0 %v12901_v11  ;;  %2709 = vmatprep.subr.bf16.mxu0 %v8968_v7  ;;  %v8971_v28 = vld [vmem:[%s11037_s8 + $0x1c] ss:$12 sps:$4 sm:$0xff]   ;;  %v8973_v24 = vld [vmem:[%s11037_s8 + $0x18] ss:$12 sps:$4 sm:$0xff]   ;;  %v8974_v29 = vld [vmem:[%s11037_s8 + $0x34] ss:$12 sps:$4 sm:$0xff]  }
 0x762   : > { %2710 = vmatpush1.bf16.msra.mxu0 %v8970_v25  ;;  %v8976_v30 = vld [vmem:[%s11037_s8 + $0x30] ss:$12 sps:$4 sm:$0xff]   ;;  %v8977_v31 = vld [vmem:[%s11037_s8 + $0x4c] ss:$12 sps:$4 sm:$0xff]   ;;  %v8979_v32 = vld [vmem:[%s11037_s8 + $0x48] ss:$12 sps:$4 sm:$0xff]  }
 0x763   : > { %2711 = vmatprep.subr.bf16.mxu0 %v8971_v28  ;;  %v8980_v33 = vld [vmem:[%s11037_s8 + $0x64] ss:$12 sps:$4 sm:$0xff]   ;;  %v8982_v38 = vld [vmem:[%s11037_s8 + $0x60] ss:$12 sps:$4 sm:$0xff]   ;;  %v8983_v39 = vld [vmem:[%s11037_s8 + $0x7c] ss:$12 sps:$4 sm:$0xff]  }
 0x764   : > { %v2518_v34 = vld [vmem:[#allocation2 + $0x20] sm:$0xff]  ;;  %v2519_v36 = vld [vmem:[#allocation2 + $0x28] sm:$0xff]  ;;  %v8986_v18 = vld [vmem:[%s11037_s8 + $0x94] ss:$12 sps:$4 sm:$0xff]   ;;  %v11229_v55 = vshrl.u32 %v2566_v5, 7  ;;  %vm2977_vm3 = vcmask 261120  }
 0x765   : > { %v11205_v37 = vpack.c.bf16 %v2519_v36, %v2518_v34  ;;  %v8992_v40 = vld [vmem:[%s11037_s8 + $0x8] ss:$12 sps:$4 sm:$0xff]   ;;  %v8993_v41 = vld [vmem:[%s11037_s8 + $0x20] ss:$12 sps:$4 sm:$0xff]   ;;  %v8985_v42 = vld [vmem:[%s11037_s8 + $0x78] ss:$12 sps:$4 sm:$0xff]  }
 0x766   : > { %2712 = vmatpush1.bf16.msra.mxu0 %v8973_v24  ;;  %8438 = vmatprep.subr.bf16.mxu1 %v8992_v40  ;;  %v8994_v43 = vld [vmem:[%s11037_s8 + $0x38] ss:$12 sps:$4 sm:$0xff]   ;;  %v8988_v44 = vld [vmem:[%s11037_s8 + $0x90] ss:$12 sps:$4 sm:$0xff]   ;;  %v8991_v19 = vld [vmem:[%s11037_s8 + $0xa8] ss:$12 sps:$4 sm:$0xff]  }
 0x767   : > { %2713 = vmatprep.subr.bf16.mxu0 %v8974_v29  ;;  %8146 = vmatprep.mubr.bf16.mxu1 %v11205_v37  ;;  %v8989_v45 = vld [vmem:[%s11037_s8 + $0xac] ss:$12 sps:$4 sm:$0xff]   ;;  %v8995_v46 = vld [vmem:[%s11037_s8 + $0x50] ss:$12 sps:$4 sm:$0xff]   ;;  %v2514_v47 = vld [vmem:[#allocation2] sm:$0xff]  ;;  %13015 = vst [vmem:[#allocation86_spill] sm:$0xff] %v11229_v55 }
 0x768   : > { %8446 = vmatpush3.bf16.msra.mxu1 %v8992_v40  ;;  %v2515_v48 = vld [vmem:[#allocation2 + $0x8] sm:$0xff]  ;;  %v8996_v49 = vld [vmem:[%s11037_s8 + $0x68] ss:$12 sps:$4 sm:$0xff]   ;;  %v2517_v53 = vld [vmem:[#allocation2 + $0x18] sm:$0xff]  ;;  %v12900_v6 = vsub.s32 0, %v11229_v55  ;;  %v12899_v9 = vsub.s32 1, %v11229_v55 }
 0x769   : > { %8439 = vmatprep.subr.bf16.mxu1 %v8993_v41  ;;  %v2526_v50 = vpack.c.bf16 %v2515_v48, %v2514_v47  ;;  %v8997_v51 = vld [vmem:[%s11037_s8 + $0x80] ss:$12 sps:$4 sm:$0xff]   ;;  %v8998_v54 = vld [vmem:[%s11037_s8 + $0x98] ss:$12 sps:$4 sm:$0xff]   ;;  %v2527_v57 = vpack.c.bf16 %v2517_v53, %v2516_v52  ;;  %v8999_v59 = vld [vmem:[%s11037_s8 + $0xb0] ss:$12 sps:$4 sm:$0xff]  }
 0x76a   : > { %2714 = vmatpush1.bf16.msra.mxu0 %v8976_v30  ;;  %v2520_v26 = vld [vmem:[#allocation2 + $0x30] sm:$0xff]  ;;  %v2521_v60 = vld [vmem:[#allocation2 + $0x38] sm:$0xff]  ;;  %v2522_v63 = vld [vmem:[#allocation2 + $0x40] sm:$0xff]  ;;  %v2576_v7 = vsub.s32 2, %v11229_v55  ;;  %vm3410_vm4 = vcmask 1043456   ;;  %vm3260_vm5 = vcmask 195584  }
 0x76b   : > { %2715 = vmatprep.subr.bf16.mxu0 %v8977_v31  ;;  %v2523_v27 = vld [vmem:[#allocation2 + $0x48] sm:$0xff]  ;;  %v2529_v0 = vpack.c.bf16 %v2521_v60, %v2520_v26  ;;  %v2524_v3 = vld [vmem:[#allocation2 + $0x50] sm:$0xff]  ;;  %v2525_v2 = vld [vmem:[#allocation2 + $0x58] sm:$0xff]  ;;  %s10295_s26 = smov 96   ;;  %s10296_s8 = smov 64   ;;  %vm5934_vm6 = vcmask 523264  }
 0x76c   : > { %8447 = vmatpush3.bf16.msra.mxu1 %v8993_v41  ;;  %v2530_v62 = vpack.c.bf16 %v2523_v27, %v2522_v63  ;;  %v2531_v4 = vpack.c.bf16 %v2525_v2, %v2524_v3  ;;  %v2564_v8 = vld [vmem:[%s11047_s11] sm:$0x7]  ;;  %s10297_s15 = smov 32   ;;  %vm5947_vm7 = vcmask 785408  }
 0x76d   : > { %8440 = vmatprep.subr.bf16.mxu1 %v8994_v43  ;;  %v11236_v61 = vrot.slane %v2564_v8, %v12900_v6  ;;  %v11240_v10 = vrot.slane %v2564_v8, %v12899_v9 }
 0x76e   : > { %2716 = vmatpush1.bf16.msra.mxu0 %v8979_v32 }
 0x76f   : > { %2717 = vmatprep.subr.bf16.mxu0 %v8980_v33 }
 0x770   : > { %8448 = vmatpush3.bf16.msra.mxu1 %v8994_v43 }
 0x771   : > { %8441 = vmatprep.subr.bf16.mxu1 %v8995_v46 }
 0x772   : > { %2718 = vmatpush1.bf16.msra.mxu0 %v8982_v38 }
 0x773   : > { %2719 = vmatprep.subr.bf16.mxu0 %v8983_v39 }
 0x774   : > { %8449 = vmatpush3.bf16.msra.mxu1 %v8995_v46 }
 0x775   : > { %8442 = vmatprep.subr.bf16.mxu1 %v8996_v49 }
 0x776   : > { %2720 = vmatpush1.bf16.msra.mxu0 %v8985_v42 }
 0x777   : > { %2721 = vmatprep.subr.bf16.mxu0 %v8986_v18 }
 0x778   : > { %8450 = vmatpush3.bf16.msra.mxu1 %v8996_v49 }
 0x779   : > { %8443 = vmatprep.subr.bf16.mxu1 %v8997_v51 }
 0x77a   : > { %2722 = vmatpush1.bf16.msra.mxu0 %v8988_v44 }
 0x77b   : > { %2723 = vmatprep.subr.bf16.mxu0 %v8989_v45 }
 0x77c   : > { %8451 = vmatpush3.bf16.msra.mxu1 %v8997_v51 }
 0x77d   : > { %8444 = vmatprep.subr.bf16.mxu1 %v8998_v54 }
 0x77e   : > { %2724 = vmatpush1.bf16.msra.mxu0 %v8991_v19 }
 0x77f   : > { %8126 = vmatprep.subr.bf16.mxu0 %v8992_v40 }
 0x780   : > { %8452 = vmatpush3.bf16.msra.mxu1 %v8998_v54 }
 0x781   : > { %2742 = vmatmul.mubr.bf16.vlgmr.msra.gmra.mrb[0].mxu0 %v2526_v50  ;;  %8445 = vmatprep.subr.bf16.mxu1 %v8999_v59 }
 0x782   : > { %2751 = vmatprep.mubr.bf16.mxu0 %v12901_v11  ;;  %8127 = vmatpush3.bf16.msra.mxu0 %v8992_v40 }
 0x783   : > { %8128 = vmatprep.subr.bf16.mxu0 %v8993_v41 }
 0x784   : > { %8453 = vmatpush3.bf16.msra.mxu1 %v8999_v59 }
 0x786   : > { %8129 = vmatpush3.bf16.msra.mxu0 %v8993_v41 }
 0x787   : > { %8130 = vmatprep.subr.bf16.mxu0 %v8994_v43  ;;  %8147 = vmatmul.mubr.bf16.vlgmr.msra.gmra.mrb[0].mxu1 %v2529_v0 }
 0x788   : > { %8150 = vmatprep.mubr.bf16.mxu1 %v2530_v62 }
 0x789   : > { %2752 = vmatmul.mubr.bf16.gmra.mrb[4].mxu0 %v2527_v57 }
 0x78a   : > { %2761 = vmatprep.mubr.bf16.mxu0 %v12901_v11  ;;  %8131 = vmatpush3.bf16.msra.mxu0 %v8994_v43 }
 0x78b   : > { %8132 = vmatprep.subr.bf16.mxu0 %v8995_v46 }
 0x78e   : > { %8133 = vmatpush3.bf16.msra.mxu0 %v8995_v46 }
 0x78f   : > { %8134 = vmatprep.subr.bf16.mxu0 %v8996_v49  ;;  %8151 = vmatmul.mubr.bf16.gmra.mrb[4].mxu1 %v2531_v4 }
 0x791   : > { %2762 = vmatmul.mubr.bf16.gmra.mrb[8].mxu0 %v11205_v37  ;;  %v11265_v37 = vrot.slane %v2564_v8, %v2576_v7 }
 0x792   : > { %2771 = vmatprep.mubr.bf16.mxu0 %v12901_v11  ;;  %8135 = vmatpush3.bf16.msra.mxu0 %v8996_v49 }
 0x793   : > { %8136 = vmatprep.subr.bf16.mxu0 %v8997_v51 }
 0x796   : > { %8137 = vmatpush3.bf16.msra.mxu0 %v8997_v51 }
 0x797   : > { %8138 = vmatprep.subr.bf16.mxu0 %v8998_v54 }
 0x799   : > { %2772 = vmatmul.mubr.bf16.gmra.mrb[12].mxu0 %v2529_v0 }
 0x79a   : > { %2781 = vmatprep.mubr.bf16.mxu0 %v12901_v11  ;;  %8139 = vmatpush3.bf16.msra.mxu0 %v8998_v54 }
 0x79b   : > { %8140 = vmatprep.subr.bf16.mxu0 %v8999_v59 }
 0x79e   : > { %8141 = vmatpush3.bf16.msra.mxu0 %v8999_v59 }
 0x7a1   : > { %2782 = vmatmul.mubr.bf16.gmra.mrb[16].mxu0 %v2530_v62 }
 0x7a2   : > { %2791 = vmatprep.mubr.bf16.mxu0 %v12901_v11 }
 0x7a9   : > { %2792 = vmatmul.mubr.bf16.gmra.mrb[20].mxu0 %v2531_v4 }
 0x7aa   : > { %8142 = vmatprep.mubr.bf16.mxu0 %v2526_v50 }
 0x7b1   : > { %8143 = vmatmul.mubr.bf16.vlgmr.msra.gmra.mrb[24].mxu0 %v2527_v57 }
 0x854   : > { %v2743_v13 = vpop.f32.mrb[0].mxu0 }
 0x855   : > { %v2744_v35 = vadd.f32 %v2743_v13, %v11236_v61  ;;  %v2745_v12 = vpop.f32.mrb[1].mxu0 }
 0x856   : > { %v2746_v14 = vadd.f32 %v2745_v12, %v11240_v10  ;;  %v2747_v15 = vpop.f32.mrb[2].mxu0 }
 0x857   : > { %v2748_v16 = vadd.f32 %v2747_v15, %v11236_v61  ;;  %v2749_v56 = vpop.f32.mrb[3].mxu0 }
 0x858   : > { %v11245_v17 = vpack.c.bf16 %v2746_v14, %v2744_v35  ;;  %v2750_v1 = vadd.f32 %v2749_v56, %v11240_v10 }
 0x859   : > { %v11248_v20 = vpack.c.bf16 %v2748_v16, %v2744_v35 }
 0x85a   : > { %v11250_v58 = vpack.c.bf16 %v2750_v1, %v2748_v16  ;;  %v2967_v22 = vrot.slane %v11245_v17, 4  ;;  %v8148_v41 = vpop.f32.mrb[0].mxu1 }
 0x85b   : > { %8158 = vmatprep.mubr.msk.bf16.mxu1 %vm2977_vm3, %v11248_v20  ;;  %v2861_v18 = vadd.f32 %v8148_v41, %v11265_v37  ;;  %v2852_v44 = vpop.f32.mrb[1].mxu1 }
 0x85c   : > { %v2753_v21 = vpop.f32.mrb[4].mxu0  ;;  %v2968_v23 = vrot.slane %v11250_v58, 4  ;;  %v11273_v19 = vadd.f32 %v2852_v44, %v11265_v37  ;;  %v8149_v47 = vpop.f32.mrb[2].mxu1 }
 0x85d   : > { %v2754_v25 = vadd.f32 %v2753_v21, %v11236_v61  ;;  %v2755_v28 = vpop.f32.mrb[5].mxu0  ;;  %v2864_v51 = vadd.f32 %v8149_v47, %v11265_v37  ;;  %v2855_v52 = vpop.f32.mrb[3].mxu1 }
 0x85e   : > { %v2756_v24 = vadd.f32 %v2755_v28, %v11240_v10  ;;  %v2757_v29 = vpop.f32.mrb[6].mxu0  ;;  %v7600_v30 = vcombine.low %v2967_v22, %v2968_v23  ;;  %v11283_v57 = vadd.f32 %v2855_v52, %v11265_v37 }
 0x85f   : > { %v2758_v31 = vadd.f32 %v2757_v29, %v11236_v61  ;;  %v2759_v32 = vpop.f32.mrb[7].mxu0  ;;  %v11288_v60 = vpack.c.bf16 %v2864_v51, %v2861_v18  ;;  %v11306_v22 = vpack.c.bf16 %v2754_v25, %v2754_v25 }
 0x860   : > { %v11260_v33 = vpack.c.bf16 %v2756_v24, %v2754_v25  ;;  %v2760_v34 = vadd.f32 %v2759_v32, %v11240_v10  ;;  %8454 = vmatprep.subr.msk.bf16.mxu1 %vm2977_vm3, %v7600_v30  ;;  %v2985_v36 = vsel %vm2977_vm3, %v7600_v30, 0  ;;  %v2891_v27 = vpack.c.bf16 %v11283_v57, %v11273_v19 }
 0x861   : > { %v2886_v38 = vpack.c.bf16 %v2758_v31, %v2754_v25  ;;  %8155 = vmatpush3.bf16.xpose.msra.mxu1 %v2985_v36 }
 0x862   : > { %v11267_v39 = vpack.c.bf16 %v2760_v34, %v2758_v31  ;;  %v2969_v40 = vrot.slane %v11260_v33, 4  ;;  %v8152_v5 = vpop.f32.mrb[4].mxu1 }
 0x863   : > { %v2928_v2 = vunpack.c.h.b16 %v2886_v38  ;;  %v2877_v12 = vadd.f32 %v8152_v5, %v11265_v37  ;;  %v2868_v14 = vpop.f32.mrb[5].mxu1 }
 0x864   : > { %v2763_v42 = vpop.f32.mrb[8].mxu0  ;;  %v7601_v43 = vcombine.low %v2969_v40, %v2969_v40  ;;  %v3038_v62 = vrot.slane %v11267_v39, 4  ;;  %v11304_v1 = vadd.f32 %v2868_v14, %v11265_v37  ;;  %v8153_v21 = vpop.f32.mrb[6].mxu1 }
 0x865   : > { %v2764_v45 = vadd.f32 %v2763_v42, %v11236_v61  ;;  %v2765_v46 = vpop.f32.mrb[9].mxu0  ;;  %v11311_v24 = vadd.f32 %v8153_v21, %v11265_v37  ;;  %v2871_v29 = vpop.f32.mrb[7].mxu1 }
 0x866   : > { %v2766_v48 = vadd.f32 %v2765_v46, %v11240_v10  ;;  %v2767_v49 = vpop.f32.mrb[10].mxu0  ;;  %8455 = vmatprep.subr.msk.bf16.mxu1 %vm2977_vm3, %v7601_v43  ;;  %v2988_v50 = vsel %vm2977_vm3, %v7601_v43, 0  ;;  %v2872_v32 = vadd.f32 %v2871_v29, %v11265_v37 }
 0x867   : > { %v11280_v53 = vadd.f32 %v2767_v49, %v11236_v61  ;;  %v2769_v54 = vpop.f32.mrb[11].mxu0  ;;  %v2900_v38 = vpack.c.bf16 %v11311_v24, %v2877_v12 }
 0x868   : > { %v11285_v59 = vpack.c.bf16 %v2766_v48, %v2764_v45  ;;  %v2770_v26 = vadd.f32 %v2769_v54, %v11240_v10  ;;  %v2897_v41 = vpack.c.bf16 %v2872_v32, %v11304_v1 }
 0x869   : > { %v2889_v63 = vpack.c.bf16 %v11280_v53, %v2764_v45  ;;  %8157 = vmatpush3.bf16.xpose.msra.mxu1 %v2988_v50  ;;  %v2951_v18 = vunpack.c.l.b16 %v2900_v38 }
 0x86a   : > { %v11294_v0 = vpack.c.bf16 %v2770_v26, %v11280_v53  ;;  %v3039_v3 = vrot.slane %v11285_v59, 4  ;;  %v2948_v44 = vunpack.c.h.b16 %v2897_v41 }
 0x86b   : > { %v2931_v4 = vunpack.c.l.b16 %v2889_v63 }
 0x86c   : > { %v2773_v8 = vpop.f32.mrb[12].mxu0  ;;  %v7605_v13 = vcombine.low %v3038_v62, %v3039_v3  ;;  %v3040_v35 = vrot.slane %v11294_v0, 4  ;;  %v11335_v49 = vpack.c.b16 %v2951_v18, %v2948_v44 }
 0x86d   : > { %v2774_v15 = vadd.f32 %v2773_v8, %v11236_v61  ;;  %v2775_v16 = vpop.f32.mrb[13].mxu0  ;;  %v11301_v56 = vpack.c.b16 %v2931_v4, %v2928_v2 }
 0x86e   : > { %v2776_v23 = vadd.f32 %v2775_v16, %v11240_v10  ;;  %v2777_v7 = vpop.f32.mrb[14].mxu0  ;;  %8456 = vmatprep.subr.msk.bf16.mxu1 %vm2977_vm3, %v7605_v13  ;;  %v7606_v28 = vcombine.low %v3040_v35, %v3040_v35  ;;  %v3055_v36 = vsel %vm2977_vm3, %v7605_v13, 0  ;;  %v11350_v13 = vpack.c.bf16 %v11280_v53, %v11280_v53 }
 0x86f   : > { %v2778_v30 = vadd.f32 %v2777_v7, %v11236_v61  ;;  %v2779_v31 = vpop.f32.mrb[15].mxu0 }
 0x870   : > { %v11315_v34 = vpack.c.bf16 %v2776_v23, %v2774_v15  ;;  %v2780_v25 = vadd.f32 %v2779_v31, %v11240_v10  ;;  %8159 = vmatmul.mubr.msk.bf16.vlgmr.msra.gmra.mrb[8].mxu1 %vm2977_vm3, %v11306_v22  ;;  %v3058_v52 = vsel %vm2977_vm3, %v7606_v28, 0 }
 0x871   : > { %v11322_v40 = vpack.c.bf16 %v2778_v30, %v2774_v15  ;;  %8163 = vmatpush3.bf16.xpose.msra.mxu1 %v3055_v36  ;;  %8166 = vmatprep.mubr.msk.bf16.mxu1 %vm2977_vm3, %v11301_v56 }
 0x872   : > { %v11327_v42 = vpack.c.bf16 %v2780_v25, %v2778_v30  ;;  %8457 = vmatprep.subr.msk.bf16.mxu1 %vm2977_vm3, %v7606_v28  ;;  %v3108_v43 = vrot.slane %v11315_v34, 4 }
 0x873   : > { %8174 = vmatprep.mubr.msk.bf16.mxu0 %vm2977_vm3, %v11322_v40 }
 0x874   : > { %v2783_v45 = vpop.f32.mrb[16].mxu0  ;;  %v3109_v46 = vrot.slane %v11327_v42, 4 }
 0x875   : > { %v2784_v47 = vadd.f32 %v2783_v45, %v11236_v61  ;;  %v2785_v48 = vpop.f32.mrb[17].mxu0 }
 0x876   : > { %v2786_v50 = vadd.f32 %v2785_v48, %v11240_v10  ;;  %v7610_v51 = vcombine.low %v3108_v43, %v3109_v46  ;;  %v2787_v54 = vpop.f32.mrb[18].mxu0 }
 0x877   : > { %v2788_v26 = vadd.f32 %v2787_v54, %v11236_v61  ;;  %v2789_v63 = vpop.f32.mrb[19].mxu0  ;;  %v11366_v41 = vpack.c.bf16 %v2784_v47, %v2784_v47 }
 0x878   : > { %v11340_v62 = vpack.c.bf16 %v2786_v50, %v2784_v47  ;;  %8458 = vmatprep.subr.msk.bf16.mxu0 %vm2977_vm3, %v7610_v51  ;;  %v3125_v3 = vsel %vm2977_vm3, %v7610_v51, 0  ;;  %v2790_v2 = vadd.f32 %v2789_v63, %v11240_v10  ;;  %v2933_v63 = vunpack.c.l.b16 %v2891_v27 }
 0x879   : > { %8165 = vmatpush3.bf16.xpose.msra.mxu1 %v3058_v52  ;;  %8171 = vmatpush3.bf16.xpose.msra.mxu0 %v3125_v3  ;;  %v2895_v4 = vpack.c.bf16 %v2788_v26, %v2784_v47  ;;  %v11404_v27 = vpack.c.bf16 %v11304_v1, %v11304_v1 }
 0x87a   : > { %v11345_v5 = vpack.c.bf16 %v2790_v2, %v2788_v26  ;;  %v3110_v8 = vrot.slane %v11340_v62, 4 }
 0x87b   : > { %v2946_v31 = vunpack.c.h.b16 %v2895_v4 }
 0x87c   : > { %v2793_v35 = vpop.f32.mrb[20].mxu0  ;;  %v7611_v12 = vcombine.low %v3110_v8, %v3110_v8  ;;  %v3178_v30 = vrot.slane %v11345_v5, 4 }
 0x87d   : > { %v2794_v14 = vadd.f32 %v2793_v35, %v11236_v61  ;;  %v2795_v15 = vpop.f32.mrb[21].mxu0 }
 0x87e   : > { %v2796_v16 = vadd.f32 %v2795_v15, %v11240_v10  ;;  %8459 = vmatprep.subr.msk.bf16.mxu0 %vm2977_vm3, %v7611_v12  ;;  %v3128_v21 = vsel %vm2977_vm3, %v7611_v12, 0  ;;  %v2797_v23 = vpop.f32.mrb[22].mxu0  ;;  %v3532_v12 = vsel %vm3410_vm4, %v11404_v27, 0 }
 0x87f   : > { %v2798_v7 = vadd.f32 %v2797_v23, %v11236_v61  ;;  %v2799_v28 = vpop.f32.mrb[23].mxu0 }
 0x880   : > { %v11357_v29 = vpack.c.bf16 %v2796_v16, %v2794_v14  ;;  %8167 = vmatmul.mubr.msk.bf16.vlgmr.msra.gmra.mrb[12].mxu1 %vm2977_vm3, %v11350_v13  ;;  %v2800_v53 = vadd.f32 %v2799_v28, %v11240_v10 }
 0x881   : > { %8173 = vmatpush3.bf16.xpose.msra.mxu0 %v3128_v21  ;;  %v2898_v32 = vpack.c.bf16 %v2798_v7, %v2794_v14  ;;  %v11399_v19 = vpack.c.bf16 %v2798_v7, %v2798_v7 }
 0x882   : > { %v11363_v25 = vpack.c.bf16 %v2800_v53, %v2798_v7  ;;  %v3179_v36 = vrot.slane %v11357_v29, 4 }
 0x883   : > { %v2949_v38 = vunpack.c.l.b16 %v2898_v32 }
 0x884   : > { %v7615_v61 = vcombine.low %v3178_v30, %v3179_v36  ;;  %v3180_v43 = vrot.slane %v11363_v25, 4  ;;  %v8144_v18 = vpop.f32.mrb[24].mxu0 }
 0x885   : > { %v11369_v44 = vpack.c.b16 %v2949_v38, %v2946_v31  ;;  %v2845_v10 = vadd.f32 %v8144_v18, %v11265_v37  ;;  %v2836_v45 = vpop.f32.mrb[25].mxu0 }
 0x886   : > { %8460 = vmatprep.subr.msk.bf16.mxu1 %vm2977_vm3, %v7615_v61  ;;  %v3195_v46 = vsel %vm2977_vm3, %v7615_v61, 0  ;;  %v7616_v48 = vcombine.low %v3180_v43, %v3180_v43  ;;  %v2837_v50 = vadd.f32 %v2836_v45, %v11265_v37  ;;  %v8145_v51 = vpop.f32.mrb[26].mxu0 }
 0x887   : > { %8179 = vmatpush3.bf16.xpose.msra.mxu1 %v3195_v46  ;;  %8182 = vmatprep.mubr.msk.bf16.mxu1 %vm2977_vm3, %v11369_v44  ;;  %v2848_v47 = vadd.f32 %v8145_v51, %v11265_v37  ;;  %v2839_v52 = vpop.f32.mrb[27].mxu0  ;;  %v11385_v3 = vpack.c.bf16 %v2845_v10, %v2845_v10 }
 0x888   : > { %8175 = vmatmul.mubr.msk.bf16.vlgmr.msra.gmra.mrb[28].mxu0 %vm2977_vm3, %v11366_v41  ;;  %8461 = vmatprep.subr.msk.bf16.mxu1 %vm2977_vm3, %v7616_v48  ;;  %v2840_v54 = vadd.f32 %v2839_v52, %v11265_v37  ;;  %v3198_v8 = vsel %vm2977_vm3, %v7616_v48, 0 }
 0x889   : > { %v2888_v26 = vpack.c.bf16 %v2848_v47, %v2845_v10  ;;  %v3412_v37 = vsel %vm3410_vm4, %v11385_v3, 0 }
 0x88a   : > { %v11387_v2 = vpack.c.bf16 %v2840_v54, %v2837_v50 }
 0x88b   : > { %v2930_v4 = vunpack.c.h.b16 %v2888_v26 }
 0x88c   : > { %8186 = vmatprep.subr.bf16.mxu0 %v11387_v2 }
 0x88d   : > { %v11391_v35 = vpack.c.b16 %v2933_v63, %v2930_v4  ;;  %8187 = vmatpush3.bf16.msra.mxu0 %v11387_v2 }
 0x88e   : > { %8462 = vmatprep.subr.msk.bf16.mxu0 %vm3410_vm4, %v11385_v3 }
 0x88f   : > { %8181 = vmatpush3.bf16.xpose.msra.mxu1 %v3198_v8 }
 0x890   : > { %8202 = vmatprep.subr.bf16.mxu1 %v11288_v60 }
 0x891   : > { %8189 = vmatpush3.bf16.msra.mxu0 %v3412_v37 }
 0x892   : > { %8194 = vmatprep.subr.bf16.mxu0 %v11391_v35 }
 0x896   : > { %8183 = vmatmul.mubr.msk.bf16.vlgmr.msra.gmra.mrb[16].mxu1 %vm2977_vm3, %v11399_v19 }
 0x897   : > { %8203 = vmatpush3.bf16.msra.mxu1 %v11288_v60 }
 0x898   : > { %8464 = vmatprep.subr.msk.bf16.mxu1 %vm3410_vm4, %v11404_v27 }
 0x89b   : > { %8205 = vmatpush3.bf16.msra.mxu1 %v3532_v12 }
 0x943   : > { %v8160_v14 = vpop.f32.mrb[8].mxu1 }
 0x944   : > { %v3250_v15 = vmul.f32 0.17677669, %v8160_v14  ;;  %v3024_v16 = vpop.f32.mrb[9].mxu1 }
 0x945   : > { %v3248_v21 = vmul.f32 0.17677669, %v3024_v16  ;;  %v8161_v23 = vpop.f32.mrb[10].mxu1 }
 0x946   : > { %v3027_v1 = vpop.f32.mrb[11].mxu1  ;;  %v3267_v7 = vsel %vm3260_vm5, %v3250_v15, -inf }
 0x947   : > { %v3249_v28 = vmul.f32 0.17677669, %v3027_v1  ;;  %3268 = vmax.xlane.f32.xlu1 %v3267_v7  ;;  %v3261_v53 = vsel %vm3260_vm5, %v3248_v21, -inf }
 0x948   : > { %3262 = vmax.xlane.f32.xlu0 %v3261_v53 }
 0x949   : > { %v3264_v30 = vsel %vm3260_vm5, %v3249_v28, -inf }
 0x94c   : > { %3265 = vmax.xlane.f32.xlu0 %v3264_v30 }
 0x953   : > { %v8168_v31 = vpop.f32.mrb[12].mxu1 }
 0x954   : > { %v3094_v32 = vpop.f32.mrb[13].mxu1  ;;  %v11416_v36 = vmul.f32 0.17677669, %v8168_v31 }
 0x955   : > { %v11418_v38 = vmul.f32 0.17677669, %v3094_v32  ;;  %v8169_v61 = vpop.f32.mrb[14].mxu1 }
 0x956   : > { %v3097_v43 = vpop.f32.mrb[15].mxu1  ;;  %v3276_v46 = vsel %vm3260_vm5, %v11416_v36, -inf }
 0x957   : > { %v11420_v18 = vmul.f32 0.17677669, %v3097_v43  ;;  %v3270_v10 = vsel %vm3260_vm5, %v11418_v38, -inf }
 0x958   : > { %3271 = vmax.xlane.f32.xlu1 %v3270_v10 }
 0x959   : > { %v3273_v45 = vsel %vm3260_vm5, %v11420_v18, -inf }
 0x95a   : > { %3274 = vmax.xlane.f32.xlu0 %v3273_v45 }
 0x95b   : > { %v8176_v48 = vpop.f32.mrb[28].mxu0 }
 0x95c   : > { %v11428_v50 = vmul.f32 0.17677669, %v8176_v48  ;;  %v3164_v51 = vpop.f32.mrb[29].mxu0  ;;  %3277 = vmax.xlane.f32.xlu1 %v3276_v46 }
 0x95d   : > { %v11430_v47 = vmul.f32 0.17677669, %v3164_v51  ;;  %v8177_v52 = vpop.f32.mrb[30].mxu0 }
 0x95e   : > { %v3167_v54 = vpop.f32.mrb[31].mxu0  ;;  %v3285_v26 = vsel %vm3260_vm5, %v11428_v50, -inf }
 0x95f   : > { %v3255_v63 = vmul.f32 0.17677669, %v3167_v54  ;;  %3286 = vmax.xlane.f32.xlu0 %v3285_v26  ;;  %v3279_v4 = vsel %vm3260_vm5, %v11430_v47, -inf }
 0x961   : > { %v3282_v8 = vsel %vm3260_vm5, %v3255_v63, -inf }
 0x962   : > { %3283 = vmax.xlane.f32.xlu1 %v3282_v8 }
 0x963   : > { %3280 = vmax.xlane.f32.xlu0 %v3279_v4 }
 0x969   : > { %v8184_v37 = vpop.f32.mrb[16].mxu1 }
 0x96a   : > { %v3259_v12 = vmul.f32 0.17677669, %v8184_v37  ;;  %v3234_v14 = vpop.f32.mrb[17].mxu1 }
 0x96b   : > { %v11437_v16 = vmul.f32 0.17677669, %v3234_v14  ;;  %v8185_v23 = vpop.f32.mrb[18].mxu1 }
 0x96c   : > { %v3237_v1 = vpop.f32.mrb[19].mxu1  ;;  %v3294_v7 = vsel %vm3260_vm5, %v3259_v12, -inf }
 0x96d   : > { %v11440_v53 = vmul.f32 0.17677669, %v3237_v1  ;;  %3295 = vmax.xlane.f32.xlu1 %v3294_v7  ;;  %v3288_v30 = vsel %vm3260_vm5, %v11437_v16, -inf }
 0x96f   : > { %v3291_v31 = vsel %vm3260_vm5, %v11440_v53, -inf }
 0x970   : > { %3292 = vmax.xlane.f32.xlu0 %v3291_v31 }
 0x971   : > { %3289 = vmax.xlane.f32.xlu1 %v3288_v30 }
 0x982   : > { %3644 = vrot.lane.b32.xlu1 %v11250_v58, %s10295_s26 }
 0x986   : > { %3720 = vrot.lane.b32.xlu1 %v11267_v39, %s10295_s26  ;;  %3642 = vrot.lane.b32.xlu0 %v11245_v17, %s10295_s26 }
 0x98a   : > { %3722 = vrot.lane.b32.xlu1 %v11285_v59, %s10295_s26 }
 0x98e   : > { %3724 = vrot.lane.b32.xlu1 %v11294_v0, %s10295_s26 }
 0x9d4   : > { %v3269_v32 = vpop.xlane.xlu1 %3268 }
 0x9d5   : > { %v3299_v61 = vsub.f32 %v3250_v15, %v3269_v32  ;;  %v3263_v43 = vpop.xlane.xlu0 %3262 }
 0x9d6   : > { %v3297_v10 = vsub.f32 %v3248_v21, %v3263_v43 }
 0x9d7   : > { %v3313_v45 = vmul.f32 1.442695, %v3299_v61 }
 0x9d8   : > { %v3309_v46 = vmul.f32 1.442695, %v3297_v10 }
 0x9d9   : > { %9048 = vpow2.f32 %v3313_v45  ;;  %v3266_v48 = vpop.xlane.xlu0 %3265 }
 0x9da   : > { %v3298_v51 = vsub.f32 %v3249_v28, %v3266_v48  ;;  %9050 = vpow2.f32 %v3309_v46 }
 0x9dc   : > { %v3311_v52 = vmul.f32 1.442695, %v3298_v51 }
 0x9de   : > { %9052 = vpow2.f32 %v3311_v52 }
 0x9e3   : > { %v11456_v54 = vpop.eup %9048 }
 0x9e4   : > { %v3339_v26 = vsel %vm3260_vm5, %v11456_v54, 0.0  ;;  %v11460_v4 = vpop.eup %9050 }
 0x9e5   : > { %v3272_v8 = vpop.xlane.xlu1 %3271  ;;  %3340 = vadd.xlane.f32.xlu0 %v3339_v26  ;;  %v3333_v37 = vsel %vm3260_vm5, %v11460_v4, 0.0 }
 0x9e6   : > { %v3300_v21 = vsub.f32 %v11418_v38, %v3272_v8 }
 0x9e7   : > { %v3275_v30 = vpop.xlane.xlu0 %3274 }
 0x9e8   : > { %v11462_v15 = vpop.eup %9052  ;;  %v3315_v1 = vmul.f32 1.442695, %v3300_v21 }
 0x9e9   : > { %v3278_v28 = vpop.xlane.xlu1 %3277  ;;  %3334 = vadd.xlane.f32.xlu0 %v3333_v37  ;;  %v3336_v14 = vsel %vm3260_vm5, %v11462_v15, 0.0 }
 0x9ea   : > { %v3302_v23 = vsub.f32 %v11416_v36, %v3278_v28  ;;  %3337 = vadd.xlane.f32.xlu1 %v3336_v14 }
 0x9ec   : > { %v3319_v7 = vmul.f32 1.442695, %v3302_v23  ;;  %v3287_v38 = vpop.xlane.xlu0 %3286 }
 0x9ee   : > { %9054 = vpow2.f32 %v3319_v7 }
 0x9ef   : > { %v3284_v31 = vpop.xlane.xlu1 %3283  ;;  %9056 = vpow2.f32 %v3315_v1 }
 0x9f0   : > { %v3304_v32 = vsub.f32 %v3255_v63, %v3284_v31  ;;  %v3281_v10 = vpop.xlane.xlu0 %3280 }
 0x9f2   : > { %v3323_v61 = vmul.f32 1.442695, %v3304_v32 }
 0x9f4   : > { %9058 = vpow2.f32 %v3323_v61 }
 0x9f8   : > { %v11470_v43 = vpop.eup %9054 }
 0x9f9   : > { %v3348_v45 = vsel %vm3260_vm5, %v11470_v43, 0.0  ;;  %v11474_v46 = vpop.eup %9056 }
 0x9fa   : > { %v3296_v36 = vpop.xlane.xlu1 %3295  ;;  %3349 = vadd.xlane.f32.xlu1 %v3348_v45  ;;  %v3342_v26 = vsel %vm3260_vm5, %v11474_v46, 0.0  ;;  %v3305_v45 = vsub.f32 %v11428_v50, %v3287_v38 }
 0x9fb   : > { %v3308_v48 = vsub.f32 %v3259_v12, %v3296_v36 }
 0x9fd   : > { %v3331_v51 = vmul.f32 1.442695, %v3308_v48  ;;  %v3293_v52 = vpop.xlane.xlu0 %3292 }
 0x9fe   : > { %v11478_v63 = vpop.eup %9058  ;;  %3343 = vadd.xlane.f32.xlu1 %v3342_v26  ;;  %v3290_v8 = vpop.xlane.xlu1 %3289  ;;  %v3303_v26 = vsub.f32 %v11430_v47, %v3281_v10 }
 0x9ff   : > { %9060 = vpow2.f32 %v3331_v51  ;;  %v3306_v21 = vsub.f32 %v11437_v16, %v3290_v8  ;;  %3646 = vrot.lane.b32.xlu0 %v11260_v33, %s10295_s26  ;;  %v3354_v12 = vsel %vm3260_vm5, %v11478_v63, 0.0  ;;  %v3301_v16 = vsub.f32 %v11420_v18, %v3275_v30 }
 0xa00   : > { %v3325_v51 = vmul.f32 1.442695, %v3305_v45  ;;  %v3321_v18 = vmul.f32 1.442695, %v3303_v26  ;;  %v3307_v30 = vsub.f32 %v11440_v53, %v3293_v52 }
 0xa01   : > { %v3327_v37 = vmul.f32 1.442695, %v3306_v21  ;;  %v3643_v28 = vpop.permute.xlu0 %3642  ;;  %v3317_v61 = vmul.f32 1.442695, %v3301_v16 }
 0xa02   : > { %v3648_v14 = vrot.slane %v3643_v28, 4  ;;  %3355 = vadd.xlane.f32.xlu1 %v3354_v12  ;;  %v3645_v23 = vpop.permute.xlu1 %3644  ;;  %v3329_v8 = vmul.f32 1.442695, %v3307_v30  ;;  %v11539_v28 = vpack.c.bf16 %v11283_v57, %v11283_v57  ;;  %v11551_v12 = vpack.c.bf16 %v11311_v24, %v11311_v24 }
 0xa03   : > { %9062 = vpow2.f32 %v3327_v37  ;;  %v3649_v1 = vrot.slane %v3645_v23, 4 }
 0xa04   : > { %9064 = vpow2.f32 %v3317_v61 }
 0xa05   : > { %v11485_v7 = vcombine.low %v3648_v14, %v3649_v1  ;;  %9066 = vpow2.f32 %v3325_v51 }
 0xa06   : > { %9068 = vpow2.f32 %v3321_v18  ;;  %v11571_v57 = vpop.permute.xlu1 %3720 }
 0xa07   : > { %8466 = vmatprep.subr.msk.bf16.mxu1 %vm2977_vm3, %v11485_v7  ;;  %9070 = vpow2.f32 %v3329_v8  ;;  %v3472_v8 = vsel %vm3410_vm4, %v11539_v28, 0 }
 0xa09   : > { %v11490_v31 = vpop.eup %9060 }
 0xa0a   : > { %v3366_v32 = vsel %vm3260_vm5, %v11490_v31, 0.0  ;;  %v11575_v24 = vpop.permute.xlu1 %3722 }
 0xa0b   : > { %3367 = vadd.xlane.f32.xlu1 %v3366_v32 }
 0xa0d   : > { %v11495_v36 = vpop.eup %9062 }
 0xa0e   : > { %v3360_v48 = vsel %vm3260_vm5, %v11495_v36, 0.0  ;;  %v11501_v21 = vpop.eup %9064  ;;  %v11577_v23 = vpop.permute.xlu1 %3724 }
 0xa0f   : > { %3361 = vadd.xlane.f32.xlu1 %v3360_v48  ;;  %v3345_v50 = vsel %vm3260_vm5, %v11501_v21, 0.0  ;;  %v11505_v38 = vpop.eup %9066 }
 0xa10   : > { %v3357_v47 = vsel %vm3260_vm5, %v11505_v38, 0.0  ;;  %v11511_v10 = vpop.eup %9068 }
 0xa11   : > { %v3351_v53 = vsel %vm3260_vm5, %v11511_v10, 0.0  ;;  %v11517_v52 = vpop.eup %9070 }
 0xa12   : > { %v3363_v37 = vsel %vm3260_vm5, %v11517_v52, 0.0 }
 0xa1e   : > { %3346 = vadd.xlane.f32.xlu0 %v3345_v50 }
 0xa20   : > { %3800 = vrot.lane.b32.xlu1 %v11327_v42, %s10295_s26 }
 0xa22   : > { %3358 = vadd.xlane.f32.xlu0 %v3357_v47 }
 0xa24   : > { %3878 = vrot.lane.b32.xlu1 %v11357_v29, %s10295_s26 }
 0xa26   : > { %3352 = vadd.xlane.f32.xlu0 %v3351_v53 }
 0xa28   : > { %3653 = vrot.lane.b32.xlu1 %v11306_v22, %s10295_s26 }
 0xa2a   : > { %3364 = vadd.xlane.f32.xlu0 %v3363_v37 }
 0xa2c   : > { %3731 = vrot.lane.b32.xlu1 %v11350_v13, %s10295_s26 }
 0xa30   : > { %3880 = vrot.lane.b32.xlu1 %v11363_v25, %s10295_s26 }
 0xa34   : > { %3809 = vrot.lane.b32.xlu1 %v11366_v41, %s10295_s26 }
 0xa38   : > { %3887 = vrot.lane.b32.xlu1 %v11399_v19, %s10295_s26 }
 0xa3c   : > { %4168 = vrot.lane.b32.xlu1 %v11391_v35, %s10295_s26 }
 0xa40   : > { %4108 = vrot.lane.b32.xlu1 %v11385_v3, %s10295_s26  ;;  %3798 = vrot.lane.b32.xlu0 %v11315_v34, %s10295_s26 }
 0xa44   : > { %4170 = vrot.lane.b32.xlu1 %v11539_v28, %s10295_s26  ;;  %3876 = vrot.lane.b32.xlu0 %v11345_v5, %s10295_s26 }
 0xa48   : > { %4292 = vrot.lane.b32.xlu1 %v11335_v49, %s10295_s26  ;;  %3651 = vrot.lane.b32.xlu0 %v11248_v20, %s10295_s26 }
 0xa4c   : > { %4294 = vrot.lane.b32.xlu1 %v11551_v12, %s10295_s26  ;;  %3729 = vrot.lane.b32.xlu0 %v11301_v56, %s10295_s26 }
 0xa50   : > { %4356 = vrot.lane.b32.xlu1 %v11250_v58, %s10296_s8  ;;  %3802 = vrot.lane.b32.xlu0 %v11340_v62, %s10295_s26 }
 0xa54   : > { %3807 = vrot.lane.b32.xlu0 %v11322_v40, %s10295_s26 }
 0xa58   : > { %3885 = vrot.lane.b32.xlu0 %v11369_v44, %s10295_s26 }
 0xa5c   : > { %4106 = vrot.lane.b32.xlu0 %v11387_v2, %s10295_s26 }
 0xa60   : > { %4230 = vrot.lane.b32.xlu0 %v11288_v60, %s10295_s26 }
 0xa64   : > { %4232 = vrot.lane.b32.xlu0 %v11404_v27, %s10295_s26 }
 0xa68   : > { %4354 = vrot.lane.b32.xlu0 %v11245_v17, %s10296_s8 }
 0xa72   : > { %v3341_v14 = vpop.xlane.xlu0 %3340 }
 0xa73   : > { %9072 = vrcp.f32 %v3341_v14 }
 0xa76   : > { %v3335_v1 = vpop.xlane.xlu0 %3334 }
 0xa77   : > { %9074 = vrcp.f32 %v3335_v1  ;;  %v3338_v16 = vpop.xlane.xlu1 %3337 }
 0xa78   : > { %9076 = vrcp.f32 %v3338_v16 }
 0xa7a   : > { %v3647_v47 = vpop.permute.xlu0 %3646 }
 0xa7d   : > { %v9073_v32 = vpop.eup %9072 }
 0xa7e   : > { %v3383_v51 = vmul.f32 %v9073_v32, %v11456_v54 }
 0xa80   : > { %v3394_v30 = vpack.c.bf16 %v3383_v51, %v3383_v51 }
 0xa81   : > { %v9075_v61 = vpop.eup %9074 }
 0xa82   : > { %v9077_v45 = vpop.eup %9076  ;;  %v3381_v48 = vmul.f32 %v9075_v61, %v11460_v4 }
 0xa83   : > { %v3382_v26 = vmul.f32 %v9077_v45, %v11462_v15 }
 0xa85   : > { %v3393_v18 = vpack.c.bf16 %v3382_v26, %v3381_v48 }
 0xa87   : > { %8190 = vmatprep.mubr.msk.bf16.mxu0 %vm3260_vm5, %v3393_v18  ;;  %v3350_v54 = vpop.xlane.xlu1 %3349 }
 0xa88   : > { %8191 = vmatmul.mubr.msk.bf16.vlgmr.msra.gmra.mrb[32].mxu0 %vm3260_vm5, %v3394_v30  ;;  %9078 = vrcp.f32 %v3350_v54 }
 0xa89   : > { %8195 = vmatpush3.bf16.msra.mxu0 %v11391_v35 }
 0xa8a   : > { %8463 = vmatprep.subr.msk.bf16.mxu0 %vm3410_vm4, %v11539_v28 }
 0xa8b   : > { %v3344_v4 = vpop.xlane.xlu1 %3343 }
 0xa8c   : > { %9080 = vrcp.f32 %v3344_v4 }
 0xa8d   : > { %8197 = vmatpush3.bf16.msra.mxu0 %v3472_v8 }
 0xa8e   : > { %8210 = vmatprep.subr.bf16.mxu0 %v11335_v49 }
 0xa8f   : > { %v3356_v15 = vpop.xlane.xlu1 %3355 }
 0xa92   : > { %v9079_v16 = vpop.eup %9078 }
 0xa93   : > { %v3386_v48 = vmul.f32 %v9079_v16, %v11470_v43 }
 0xa95   : > { %v3396_v54 = vpack.c.bf16 %v3386_v48, %v3386_v48  ;;  %v3650_v48 = vrot.slane %v3647_v47, 4 }
 0xa96   : > { %v9081_v61 = vpop.eup %9080 }
 0xa97   : > { %v3384_v26 = vmul.f32 %v9081_v61, %v11474_v46  ;;  %v3726_v46 = vrot.slane %v11571_v57, 4 }
 0xa98   : > { %v3368_v50 = vpop.xlane.xlu1 %3367 }
 0xa9c   : > { %v3362_v37 = vpop.xlane.xlu1 %3361 }
 0xaa0   : > { %v11590_v1 = vpop.permute.xlu1 %3800 }
 0xaa4   : > { %v11595_v30 = vpop.permute.xlu1 %3878 }
 0xaab   : > { %v3347_v53 = vpop.xlane.xlu0 %3346 }
 0xaac   : > { %9082 = vrcp.f32 %v3347_v53 }
 0xaaf   : > { %v3359_v14 = vpop.xlane.xlu0 %3358 }
 0xab0   : > { %9084 = vrcp.f32 %v3359_v14 }
 0xab1   : > { %9086 = vrcp.f32 %v3356_v15 }
 0xab3   : > { %v3353_v32 = vpop.xlane.xlu0 %3352 }
 0xab4   : > { %9088 = vrcp.f32 %v3353_v32 }
 0xab5   : > { %9090 = vrcp.f32 %v3368_v50  ;;  %v3727_v50 = vrot.slane %v11575_v24, 4 }
 0xab6   : > { %v9083_v45 = vpop.eup %9082  ;;  %9092 = vrcp.f32 %v3362_v37 }
 0xab7   : > { %v3365_v51 = vpop.xlane.xlu0 %3364  ;;  %v3385_v18 = vmul.f32 %v9083_v45, %v11501_v21  ;;  %v3654_v21 = vpop.permute.xlu1 %3653  ;;  %v7635_v45 = vcombine.low %v3726_v46, %v3727_v50 }
 0xab8   : > { %9094 = vrcp.f32 %v3365_v51  ;;  %v3592_v51 = vsel %vm3410_vm4, %v11551_v12, 0 }
 0xab9   : > { %v3395_v8 = vpack.c.bf16 %v3385_v18, %v3384_v26  ;;  %v3745_v46 = vsel %vm2977_vm3, %v7635_v45, 0 }
 0xaba   : > { %v9085_v4 = vpop.eup %9084 }
 0xabb   : > { %8198 = vmatprep.mubr.msk.bf16.mxu0 %vm3260_vm5, %v3395_v8  ;;  %v3799_v15 = vpop.permute.xlu0 %3798  ;;  %v9087_v53 = vpop.eup %9086  ;;  %v3389_v37 = vmul.f32 %v9085_v4, %v11505_v38  ;;  %v3667_v4 = vsel %vm2977_vm3, %v11485_v7, 0  ;;  %v3805_v7 = vrot.slane %v11590_v1, 4 }
 0xabc   : > { %8199 = vmatmul.mubr.msk.bf16.vlgmr.msra.gmra.mrb[36].mxu0 %vm3260_vm5, %v3396_v54  ;;  %v3388_v61 = vmul.f32 %v9087_v53, %v11478_v63  ;;  %v7632_v54 = vcombine.low %v3650_v48, %v3650_v48  ;;  %v3732_v47 = vpop.permute.xlu1 %3731  ;;  %v3728_v53 = vrot.slane %v11577_v23, 4 }
 0xabd   : > { %8211 = vmatpush3.bf16.msra.mxu0 %v11335_v49  ;;  %v3398_v18 = vpack.c.bf16 %v3389_v37, %v3389_v37 }
 0xabe   : > { %v9089_v43 = vpop.eup %9088  ;;  %8465 = vmatprep.subr.msk.bf16.mxu0 %vm3410_vm4, %v11551_v12 }
 0xabf   : > { %v9091_v14 = vpop.eup %9090  ;;  %v3877_v16 = vpop.permute.xlu0 %3876  ;;  %v3387_v32 = vmul.f32 %v9089_v43, %v11511_v10  ;;  %v7636_v43 = vcombine.low %v3728_v53, %v3728_v53 }
 0xac0   : > { %v9093_v24 = vpop.eup %9092  ;;  %v3392_v38 = vmul.f32 %v9091_v14, %v11490_v31  ;;  %v3881_v23 = vpop.permute.xlu1 %3880 }
 0xac1   : > { %8213 = vmatpush3.bf16.msra.mxu0 %v3592_v51  ;;  %v3397_v57 = vpack.c.bf16 %v3388_v61, %v3387_v32  ;;  %v3390_v10 = vmul.f32 %v9093_v24, %v11495_v36  ;;  %v3670_v32 = vsel %vm2977_vm3, %v7632_v54, 0  ;;  %v3882_v61 = vrot.slane %v3877_v16, 4 }
 0xac2   : > { %v9095_v26 = vpop.eup %9094  ;;  %8468 = vmatprep.subr.msk.bf16.mxu0 %vm2977_vm3, %v7635_v45  ;;  %v3400_v50 = vpack.c.bf16 %v3392_v38, %v3392_v38  ;;  %v3748_v1 = vsel %vm2977_vm3, %v7636_v43, 0  ;;  %v3884_v16 = vrot.slane %v3881_v23, 4 }
 0xac3   : > { %8206 = vmatprep.mubr.msk.bf16.mxu1 %vm3260_vm5, %v3397_v57  ;;  %v3652_v8 = vpop.permute.xlu0 %3651  ;;  %v3391_v63 = vmul.f32 %v9095_v26, %v11517_v52  ;;  %v3804_v52 = vrot.slane %v3799_v15, 4  ;;  %v3883_v15 = vrot.slane %v11595_v30, 4 }
 0xac4   : > { %8207 = vmatmul.mubr.msk.bf16.vlgmr.msra.gmra.mrb[20].mxu1 %vm3260_vm5, %v3398_v18  ;;  %v3810_v24 = vpop.permute.xlu1 %3809  ;;  %v7644_v38 = vcombine.low %v3884_v16, %v3884_v16 }
 0xac5   : > { %8219 = vmatpush3.bf16.xpose.msra.mxu1 %v3667_v4  ;;  %8222 = vmatprep.mubr.msk.bf16.mxu1 %vm2977_vm3, %v3652_v8  ;;  %v3399_v31 = vpack.c.bf16 %v3391_v63, %v3390_v10  ;;  %v7639_v14 = vcombine.low %v3804_v52, %v3805_v7  ;;  %v7643_v48 = vcombine.low %v3882_v61, %v3883_v15 }
 0xac6   : > { %8467 = vmatprep.subr.msk.bf16.mxu1 %vm2977_vm3, %v7632_v54  ;;  %v3904_v54 = vsel %vm2977_vm3, %v7644_v38, 0 }
 0xac7   : > { %8214 = vmatprep.mubr.msk.bf16.mxu0 %vm3260_vm5, %v3399_v31  ;;  %v3730_v36 = vpop.permute.xlu0 %3729  ;;  %v3823_v26 = vsel %vm2977_vm3, %v7639_v14, 0  ;;  %v3901_v8 = vsel %vm2977_vm3, %v7643_v48, 0 }
 0xac8   : > { %8215 = vmatmul.mubr.msk.bf16.vlgmr.msra.gmra.mrb[40].mxu0 %vm3260_vm5, %v3400_v50  ;;  %v3888_v18 = vpop.permute.xlu1 %3887 }
 0xac9   : > { %8230 = vmatprep.mubr.msk.bf16.mxu0 %vm2977_vm3, %v3730_v36 }
 0xaca   : > { %8227 = vmatpush3.bf16.xpose.msra.mxu0 %v3745_v46 }
 0xacb   : > { %8469 = vmatprep.subr.msk.bf16.mxu0 %vm2977_vm3, %v7636_v43  ;;  %v3803_v37 = vpop.permute.xlu0 %3802 }
 0xacc   : > { %v3806_v45 = vrot.slane %v3803_v37, 4 }
 0xacd   : > { %8221 = vmatpush3.bf16.xpose.msra.mxu1 %v3670_v32 }
 0xace   : > { %8470 = vmatprep.subr.msk.bf16.mxu1 %vm2977_vm3, %v7639_v14  ;;  %v7640_v57 = vcombine.low %v3806_v45, %v3806_v45 }
 0xacf   : > { %v3808_v51 = vpop.permute.xlu0 %3807 }
 0xad0   : > { %v3826_v10 = vsel %vm2977_vm3, %v7640_v57, 0 }
 0xad2   : > { %8229 = vmatpush3.bf16.xpose.msra.mxu0 %v3748_v1 }
 0xad3   : > { %8472 = vmatprep.subr.msk.bf16.mxu0 %vm2977_vm3, %v7643_v48  ;;  %v3886_v30 = vpop.permute.xlu0 %3885 }
 0xad4   : > { %8223 = vmatmul.mubr.msk.bf16.vlgmr.msra.gmra.mrb[24].mxu1 %vm2977_vm3, %v3654_v21  ;;  %v4169_v21 = vpop.permute.xlu1 %4168 }
 0xad5   : > { %8235 = vmatpush3.bf16.xpose.msra.mxu1 %v3823_v26  ;;  %8238 = vmatprep.mubr.msk.bf16.mxu1 %vm2977_vm3, %v3808_v51 }
 0xad6   : > { %8471 = vmatprep.subr.msk.bf16.mxu1 %vm2977_vm3, %v7640_v57 }
 0xad7   : > { %v4107_v63 = vpop.permute.xlu0 %4106 }
 0xad8   : > { %v4109_v4 = vpop.permute.xlu1 %4108 }
 0xad9   : > { %8231 = vmatmul.mubr.msk.bf16.vlgmr.msra.gmra.mrb[44].mxu0 %vm2977_vm3, %v3732_v47  ;;  %v4118_v53 = vsel %vm3410_vm4, %v4109_v4, 0 }
 0xada   : > { %8243 = vmatpush3.bf16.xpose.msra.mxu0 %v3901_v8  ;;  %8246 = vmatprep.mubr.msk.bf16.mxu0 %vm2977_vm3, %v3886_v30 }
 0xadb   : > { %8473 = vmatprep.subr.msk.bf16.mxu0 %vm2977_vm3, %v7644_v38  ;;  %v11644_v31 = vpop.permute.xlu0 %4230 }
 0xadc   : > { %v4171_v47 = vpop.permute.xlu1 %4170 }
 0xadd   : > { %8237 = vmatpush3.bf16.xpose.msra.mxu1 %v3826_v10  ;;  %v4180_v50 = vsel %vm3410_vm4, %v4171_v47, 0 }
 0xade   : > { %8250 = vmatprep.subr.bf16.mxu1 %v4107_v63 }
 0xae0   : > { %v11650_v36 = vpop.permute.xlu1 %4292 }
 0xae2   : > { %8245 = vmatpush3.bf16.xpose.msra.mxu0 %v3904_v54 }
 0xae3   : > { %8258 = vmatprep.subr.bf16.mxu0 %v4169_v21 }
 0xae4   : > { %8239 = vmatmul.mubr.msk.bf16.vlgmr.msra.gmra.mrb[28].mxu1 %vm2977_vm3, %v3810_v24 }
 0xae5   : > { %8251 = vmatpush3.bf16.msra.mxu1 %v4107_v63 }
 0xae6   : > { %8474 = vmatprep.subr.msk.bf16.mxu1 %vm3410_vm4, %v4109_v4 }
 0xae9   : > { %8247 = vmatmul.mubr.msk.bf16.vlgmr.msra.gmra.mrb[48].mxu0 %vm2977_vm3, %v3888_v18  ;;  %8253 = vmatpush3.bf16.msra.mxu1 %v4118_v53 }
 0xaea   : > { %8259 = vmatpush3.bf16.msra.mxu0 %v4169_v21  ;;  %8266 = vmatprep.subr.bf16.mxu1 %v11644_v31 }
 0xaeb   : > { %8475 = vmatprep.subr.msk.bf16.mxu0 %vm3410_vm4, %v4171_v47 }
 0xaee   : > { %8261 = vmatpush3.bf16.msra.mxu0 %v4180_v50 }
 0xaef   : > { %8274 = vmatprep.subr.bf16.mxu0 %v11650_v36 }
 0xb5b   : > { %v11653_v52 = vpop.f32.mrb[32].mxu0 }
 0xb5c   : > { %13016 = vst [vmem:[#allocation87_spill] sm:$0xff] %v11653_v52  ;;  %v11655_v43 = vpop.f32.mrb[33].mxu0 }
 0xb5d   : > { %13017 = vst [vmem:[#allocation88_spill] sm:$0xff] %v11655_v43  ;;  %v8193_v46 = vpop.f32.mrb[34].mxu0 }
 0xb5e   : > { %v11657_v7 = vpop.f32.mrb[35].mxu0 }
 0xb5f   : > { %13018 = vst [vmem:[#allocation89_spill] sm:$0xff] %v11657_v7 }
 0xb8f   : > { %v11659_v23 = vpop.f32.mrb[36].mxu0 }
 0xb90   : > { %13019 = vst [vmem:[#allocation90_spill] sm:$0xff] %v11659_v23  ;;  %v11661_v37 = vpop.f32.mrb[37].mxu0 }
 0xb91   : > { %13020 = vst [vmem:[#allocation91_spill] sm:$0xff] %v11661_v37  ;;  %v8201_v14 = vpop.f32.mrb[38].mxu0 }
 0xb92   : > { %v11663_v32 = vpop.f32.mrb[39].mxu0 }
 0xb93   : > { %13021 = vst [vmem:[#allocation92_spill] sm:$0xff] %v11663_v32 }
 0xb97   : > { %v11665_v61 = vpop.f32.mrb[20].mxu1 }
 0xb98   : > { %13022 = vst [vmem:[#allocation93_spill] sm:$0xff] %v11665_v61  ;;  %v11667_v15 = vpop.f32.mrb[21].mxu1 }
 0xb99   : > { %13023 = vst [vmem:[#allocation94_spill] sm:$0xff] %v11667_v15  ;;  %v8209_v24 = vpop.f32.mrb[22].mxu1 }
 0xb9a   : > { %v11669_v45 = vpop.f32.mrb[23].mxu1 }
 0xb9b   : > { %13024 = vst [vmem:[#allocation95_spill] sm:$0xff] %v11669_v45  ;;  %v11671_v48 = vpop.f32.mrb[40].mxu0 }
 0xb9c   : > { %13025 = vst [vmem:[#allocation96_spill] sm:$0xff] %v11671_v48  ;;  %v11673_v51 = vpop.f32.mrb[41].mxu0 }
 0xb9d   : > { %13026 = vst [vmem:[#allocation97_spill] sm:$0xff] %v11673_v51  ;;  %v8217_v1 = vpop.f32.mrb[42].mxu0 }
 0xb9e   : > { %v11675_v57 = vpop.f32.mrb[43].mxu0 }
 0xb9f   : > { %13027 = vst [vmem:[#allocation98_spill] sm:$0xff] %v11675_v57 }
 0xba7   : > { %v8224_v26 = vpop.f32.mrb[24].mxu1 }
 0xba8   : > { %v3956_v16 = vmul.f32 0.17677669, %v8224_v26  ;;  %v3706_v18 = vpop.f32.mrb[25].mxu1 }
 0xba9   : > { %v8225_v30 = vpop.f32.mrb[26].mxu1  ;;  %v11677_v38 = vmul.f32 0.17677669, %v3706_v18 }
 0xbaa   : > { %v3709_v8 = vpop.f32.mrb[27].mxu1  ;;  %v3972_v21 = vsel %vm3260_vm5, %v3956_v16, -inf }
 0xbab   : > { %v3955_v10 = vmul.f32 0.17677669, %v3709_v8  ;;  %3973 = vmax.xlane.f32.xlu0 %v3972_v21  ;;  %v3966_v46 = vsel %vm3260_vm5, %v11677_v38, -inf }
 0xbac   : > { %v8232_v63 = vpop.f32.mrb[44].mxu0 }
 0xbad   : > { %v11680_v54 = vmul.f32 0.17677669, %v8232_v63  ;;  %v3784_v4 = vpop.f32.mrb[45].mxu0  ;;  %v3969_v47 = vsel %vm3260_vm5, %v3955_v10, -inf }
 0xbae   : > { %v3957_v53 = vmul.f32 0.17677669, %v3784_v4  ;;  %3970 = vmax.xlane.f32.xlu1 %v3969_v47  ;;  %v8233_v50 = vpop.f32.mrb[46].mxu0 }
 0xbaf   : > { %3967 = vmax.xlane.f32.xlu0 %v3966_v46  ;;  %v3787_v14 = vpop.f32.mrb[47].mxu0  ;;  %v3981_v24 = vsel %vm3260_vm5, %v11680_v54, -inf }
 0xbb0   : > { %v3975_v1 = vsel %vm3260_vm5, %v3957_v53, -inf  ;;  %v11688_v21 = vmul.f32 0.17677669, %v3787_v14 }
 0xbb2   : > { %3982 = vmax.xlane.f32.xlu1 %v3981_v24  ;;  %v3978_v14 = vsel %vm3260_vm5, %v11688_v21, -inf }
 0xbb3   : > { %3976 = vmax.xlane.f32.xlu0 %v3975_v1 }
 0xbb7   : > { %v8240_v26 = vpop.f32.mrb[28].mxu1 }
 0xbb8   : > { %v3962_v18 = vmul.f32 0.17677669, %v8240_v26  ;;  %v3862_v30 = vpop.f32.mrb[29].mxu1 }
 0xbb9   : > { %v8241_v8 = vpop.f32.mrb[30].mxu1  ;;  %v11697_v1 = vmul.f32 0.17677669, %v3862_v30 }
 0xbba   : > { %v3865_v63 = vpop.f32.mrb[31].mxu1  ;;  %v3990_v4 = vsel %vm3260_vm5, %v3962_v18, -inf }
 0xbbb   : > { %v11691_v47 = vmul.f32 0.17677669, %v3865_v63  ;;  %3991 = vmax.xlane.f32.xlu0 %v3990_v4 }
 0xbbc   : > { %v8248_v50 = vpop.f32.mrb[48].mxu0 }
 0xbbd   : > { %v11693_v46 = vmul.f32 0.17677669, %v8248_v50  ;;  %v3940_v9 = vpop.f32.mrb[49].mxu0  ;;  %v3987_v24 = vsel %vm3260_vm5, %v11691_v47, -inf  ;;  %v3984_v50 = vsel %vm3260_vm5, %v11697_v1, -inf }
 0xbbe   : > { %3988 = vmax.xlane.f32.xlu1 %v3987_v24  ;;  %v8249_v26 = vpop.f32.mrb[50].mxu0  ;;  %v11701_v6 = vmul.f32 0.17677669, %v3940_v9  ;;  %v11717_v9 = vpop.permute.xlu0 %4232 }
 0xbbf   : > { %3979 = vmax.xlane.f32.xlu0 %v3978_v14  ;;  %v3943_v8 = vpop.f32.mrb[51].mxu0  ;;  %v3999_v63 = vsel %vm3260_vm5, %v11693_v46, -inf  ;;  %v11719_v26 = vpop.permute.xlu1 %4294 }
 0xbc0   : > { %v11705_v4 = vmul.f32 0.17677669, %v3943_v8  ;;  %v3993_v30 = vsel %vm3260_vm5, %v11701_v6, -inf }
 0xbc2   : > { %4000 = vmax.xlane.f32.xlu1 %v3999_v63  ;;  %v3996_v24 = vsel %vm3260_vm5, %v11705_v4, -inf  ;;  %v11721_v14 = vpop.permute.xlu0 %4354 }
 0xbc3   : > { %3985 = vmax.xlane.f32.xlu0 %v3984_v50  ;;  %v11723_v8 = vpop.permute.xlu1 %4356 }
 0xbc6   : > { %3994 = vmax.xlane.f32.xlu1 %v3993_v30 }
 0xbc7   : > { %3997 = vmax.xlane.f32.xlu0 %v3996_v24 }
 0xbd7   : > { %4434 = vrot.lane.b32.xlu1 %v11285_v59, %s10296_s8 }
 0xbdd   : > { %4432 = vrot.lane.b32.xlu0 %v11267_v39, %s10296_s8 }
 0xc38   : > { %v3974_v63 = vpop.xlane.xlu0 %3973 }
 0xc39   : > { %v4004_v50 = vsub.f32 %v3956_v16, %v3974_v63 }
 0xc3b   : > { %v4018_v30 = vmul.f32 1.442695, %v4004_v50  ;;  %v3971_v11 = vpop.xlane.xlu1 %3970 }
 0xc3c   : > { %v4003_v55 = vsub.f32 %v3955_v10, %v3971_v11  ;;  %v3968_v24 = vpop.xlane.xlu0 %3967 }
 0xc3d   : > { %9096 = vpow2.f32 %v4018_v30  ;;  %v4002_v57 = vsub.f32 %v11677_v38, %v3968_v24 }
 0xc3e   : > { %v4016_v48 = vmul.f32 1.442695, %v4003_v55 }
 0xc3f   : > { %v4014_v61 = vmul.f32 1.442695, %v4002_v57  ;;  %v3983_v51 = vpop.xlane.xlu1 %3982 }
 0xc40   : > { %9098 = vpow2.f32 %v4016_v48  ;;  %v4007_v15 = vsub.f32 %v11680_v54, %v3983_v51  ;;  %v3977_v45 = vpop.xlane.xlu0 %3976 }
 0xc41   : > { %9100 = vpow2.f32 %v4014_v61  ;;  %v4005_v32 = vsub.f32 %v3957_v53, %v3977_v45 }
 0xc42   : > { %v4024_v23 = vmul.f32 1.442695, %v4007_v15 }
 0xc43   : > { %v4020_v52 = vmul.f32 1.442695, %v4005_v32 }
 0xc44   : > { %9102 = vpow2.f32 %v4024_v23 }
 0xc45   : > { %9104 = vpow2.f32 %v4020_v52 }
 0xc47   : > { %v11727_v16 = vpop.eup %9096 }
 0xc48   : > { %v3992_v11 = vpop.xlane.xlu0 %3991  ;;  %v4044_v10 = vsel %vm3260_vm5, %v11727_v16, 0.0 }
 0xc49   : > { %v4010_v38 = vsub.f32 %v3962_v18, %v3992_v11  ;;  %4045 = vadd.xlane.f32.xlu0 %v4044_v10 }
 0xc4a   : > { %v11731_v55 = vpop.eup %9098 }
 0xc4b   : > { %v11733_v48 = vpop.eup %9100  ;;  %v4030_v51 = vmul.f32 1.442695, %v4010_v38  ;;  %v4041_v61 = vsel %vm3260_vm5, %v11731_v55, 0.0  ;;  %v3989_v30 = vpop.xlane.xlu1 %3988 }
 0xc4c   : > { %4042 = vadd.xlane.f32.xlu1 %v4041_v61  ;;  %v3980_v32 = vpop.xlane.xlu0 %3979  ;;  %v4038_v52 = vsel %vm3260_vm5, %v11733_v48, 0.0  ;;  %v4009_v11 = vsub.f32 %v11691_v47, %v3989_v30 }
 0xc4d   : > { %9106 = vpow2.f32 %v4030_v51  ;;  %v4006_v23 = vsub.f32 %v11688_v21, %v3980_v32  ;;  %4039 = vadd.xlane.f32.xlu0 %v4038_v52 }
 0xc4e   : > { %v11740_v15 = vpop.eup %9102  ;;  %v4028_v10 = vmul.f32 1.442695, %v4009_v11 }
 0xc4f   : > { %v4022_v45 = vmul.f32 1.442695, %v4006_v23  ;;  %v4053_v57 = vsel %vm3260_vm5, %v11740_v15, 0.0  ;;  %v11744_v54 = vpop.eup %9104  ;;  %v4001_v24 = vpop.xlane.xlu1 %4000 }
 0xc50   : > { %4054 = vadd.xlane.f32.xlu1 %v4053_v57  ;;  %v4047_v53 = vsel %vm3260_vm5, %v11744_v54, 0.0  ;;  %v4013_v38 = vsub.f32 %v11693_v46, %v4001_v24  ;;  %v3986_v51 = vpop.xlane.xlu0 %3985 }
 0xc51   : > { %9108 = vpow2.f32 %v4022_v45  ;;  %v4008_v23 = vsub.f32 %v11697_v1, %v3986_v51 }
 0xc52   : > { %9110 = vpow2.f32 %v4028_v10  ;;  %v4036_v32 = vmul.f32 1.442695, %v4013_v38 }
 0xc53   : > { %v3995_v61 = vpop.xlane.xlu1 %3994 }
 0xc54   : > { %4048 = vadd.xlane.f32.xlu1 %v4047_v53  ;;  %v4011_v52 = vsub.f32 %v11701_v6, %v3995_v61  ;;  %v3998_v45 = vpop.xlane.xlu0 %3997  ;;  %9112 = vpow2.f32 %v4036_v32  ;;  %v4026_v53 = vmul.f32 1.442695, %v4008_v23 }
 0xc55   : > { %v4012_v47 = vsub.f32 %v11705_v4, %v3998_v45 }
 0xc56   : > { %v4032_v57 = vmul.f32 1.442695, %v4011_v52 }
 0xc57   : > { %v11748_v18 = vpop.eup %9106  ;;  %v4435_v61 = vpop.permute.xlu1 %4434 }
 0xc58   : > { %v4062_v21 = vsel %vm3260_vm5, %v11748_v18, 0.0  ;;  %9114 = vpow2.f32 %v4032_v57  ;;  %v4433_v51 = vpop.permute.xlu0 %4432 }
 0xc59   : > { %4063 = vadd.xlane.f32.xlu0 %v4062_v21  ;;  %9116 = vpow2.f32 %v4026_v53  ;;  %v4034_v21 = vmul.f32 1.442695, %v4012_v47 }
 0xc5b   : > { %v11752_v63 = vpop.eup %9108  ;;  %9118 = vpow2.f32 %v4034_v21 }
 0xc5c   : > { %v4050_v50 = vsel %vm3260_vm5, %v11752_v63, 0.0 }
 0xc5d   : > { %4051 = vadd.xlane.f32.xlu0 %v4050_v50  ;;  %v11765_v50 = vpop.eup %9110 }
 0xc5e   : > { %v4059_v46 = vsel %vm3260_vm5, %v11765_v50, 0.0  ;;  %v11769_v30 = vpop.eup %9112 }
 0xc5f   : > { %v4071_v6 = vsel %vm3260_vm5, %v11769_v30, 0.0 }
 0xc62   : > { %v11773_v1 = vpop.eup %9114 }
 0xc63   : > { %v11775_v24 = vpop.eup %9116  ;;  %v4065_v4 = vsel %vm3260_vm5, %v11773_v1, 0.0 }
 0xc64   : > { %v4056_v11 = vsel %vm3260_vm5, %v11775_v24, 0.0 }
 0xc65   : > { %4436 = vrot.lane.b32.xlu1 %v11294_v0, %s10296_s8  ;;  %v11781_v10 = vpop.eup %9118 }
 0xc66   : > { %v4068_v38 = vsel %vm3260_vm5, %v11781_v10, 0.0 }
 0xc73   : > { %4358 = vrot.lane.b32.xlu0 %v11260_v33, %s10296_s8 }
 0xc89   : > { %4060 = vadd.xlane.f32.xlu1 %v4059_v46 }
 0xc8d   : > { %4072 = vadd.xlane.f32.xlu1 %v4071_v6 }
 0xc91   : > { %4066 = vadd.xlane.f32.xlu1 %v4065_v4 }
 0xc92   : > { %4057 = vadd.xlane.f32.xlu0 %v4056_v11 }
 0xc96   : > { %4069 = vadd.xlane.f32.xlu0 %v4068_v38 }
 0xca2   : > { %4512 = vrot.lane.b32.xlu1 %v11327_v42, %s10296_s8 }
 0xca6   : > { %4590 = vrot.lane.b32.xlu1 %v11357_v29, %s10296_s8 }
 0xcaa   : > { %4365 = vrot.lane.b32.xlu1 %v11306_v22, %s10296_s8 }
 0xcac   : > { %4510 = vrot.lane.b32.xlu0 %v11315_v34, %s10296_s8 }
 0xcae   : > { %4443 = vrot.lane.b32.xlu1 %v11350_v13, %s10296_s8 }
 0xcb0   : > { %4588 = vrot.lane.b32.xlu0 %v11345_v5, %s10296_s8 }
 0xcb2   : > { %4592 = vrot.lane.b32.xlu1 %v11363_v25, %s10296_s8 }
 0xcb4   : > { %4363 = vrot.lane.b32.xlu0 %v11248_v20, %s10296_s8 }
 0xcb6   : > { %4521 = vrot.lane.b32.xlu1 %v11366_v41, %s10296_s8 }
 0xcb8   : > { %4441 = vrot.lane.b32.xlu0 %v11301_v56, %s10296_s8 }
 0xcba   : > { %4599 = vrot.lane.b32.xlu1 %v11399_v19, %s10296_s8 }
 0xcbc   : > { %4514 = vrot.lane.b32.xlu0 %v11340_v62, %s10296_s8 }
 0xcbe   : > { %4880 = vrot.lane.b32.xlu1 %v11391_v35, %s10296_s8 }
 0xcc0   : > { %4519 = vrot.lane.b32.xlu0 %v11322_v40, %s10296_s8 }
 0xcc2   : > { %4820 = vrot.lane.b32.xlu1 %v11385_v3, %s10296_s8 }
 0xcc4   : > { %4597 = vrot.lane.b32.xlu0 %v11369_v44, %s10296_s8 }
 0xcc6   : > { %4882 = vrot.lane.b32.xlu1 %v11539_v28, %s10296_s8 }
 0xcc8   : > { %4818 = vrot.lane.b32.xlu0 %v11387_v2, %s10296_s8 }
 0xcca   : > { %5004 = vrot.lane.b32.xlu1 %v11335_v49, %s10296_s8 }
 0xccc   : > { %4942 = vrot.lane.b32.xlu0 %v11288_v60, %s10296_s8 }
 0xcce   : > { %5006 = vrot.lane.b32.xlu1 %v11551_v12, %s10296_s8 }
 0xcd0   : > { %4944 = vrot.lane.b32.xlu0 %v11404_v27, %s10296_s8 }
 0xcd6   : > { %v4046_v32 = vpop.xlane.xlu0 %4045 }
 0xcd7   : > { %9120 = vrcp.f32 %v4046_v32 }
 0xcd9   : > { %v4043_v52 = vpop.xlane.xlu1 %4042 }
 0xcda   : > { %9122 = vrcp.f32 %v4043_v52  ;;  %v4040_v23 = vpop.xlane.xlu0 %4039 }
 0xcdb   : > { %9124 = vrcp.f32 %v4040_v23  ;;  %v4360_v23 = vrot.slane %v11721_v14, 4 }
 0xcdd   : > { %v4055_v45 = vpop.xlane.xlu1 %4054 }
 0xcde   : > { %9126 = vrcp.f32 %v4055_v45 }
 0xce1   : > { %v9121_v57 = vpop.eup %9120  ;;  %v4049_v6 = vpop.xlane.xlu1 %4048 }
 0xce2   : > { %v4088_v46 = vmul.f32 %v9121_v57, %v11727_v16  ;;  %9128 = vrcp.f32 %v4049_v6  ;;  %v4361_v16 = vrot.slane %v11723_v8, 4  ;;  %v4438_v6 = vrot.slane %v4433_v51, 4 }
 0xce4   : > { %v9123_v53 = vpop.eup %9122  ;;  %v4099_v32 = vpack.c.bf16 %v4088_v46, %v4088_v46  ;;  %v4439_v46 = vrot.slane %v4435_v61, 4 }
 0xce5   : > { %v9125_v47 = vpop.eup %9124  ;;  %v4087_v21 = vmul.f32 %v9123_v53, %v11731_v55  ;;  %v7655_v55 = vcombine.low %v4360_v23, %v4361_v16 }
 0xce6   : > { %v4064_v4 = vpop.xlane.xlu0 %4063  ;;  %v4086_v11 = vmul.f32 %v9125_v47, %v11733_v48  ;;  %v4242_v48 = vsel %vm3410_vm4, %v11717_v9, 0 }
 0xce8   : > { %v4098_v38 = vpack.c.bf16 %v4087_v21, %v4086_v11  ;;  %v9127_v45 = vpop.eup %9126 }
 0xce9   : > { %v4091_v53 = vmul.f32 %v9127_v45, %v11740_v15  ;;  %v4304_v15 = vsel %vm3410_vm4, %v11719_v26, 0 }
 0xcea   : > { %8254 = vmatprep.mubr.msk.bf16.mxu1 %vm3260_vm5, %v4098_v38  ;;  %v4052_v52 = vpop.xlane.xlu0 %4051 }
 0xceb   : > { %9130 = vrcp.f32 %v4052_v52  ;;  %8255 = vmatmul.mubr.msk.bf16.vlgmr.msra.gmra.mrb[32].mxu1 %vm3260_vm5, %v4099_v32  ;;  %v4101_v21 = vpack.c.bf16 %v4091_v53, %v4091_v53 }
 0xcec   : > { %8267 = vmatpush3.bf16.msra.mxu1 %v11644_v31  ;;  %v9129_v57 = vpop.eup %9128  ;;  %9132 = vrcp.f32 %v4064_v4 }
 0xced   : > { %8476 = vmatprep.subr.msk.bf16.mxu1 %vm3410_vm4, %v11717_v9  ;;  %v4089_v47 = vmul.f32 %v9129_v57, %v11744_v54  ;;  %v7659_v9 = vcombine.low %v4438_v6, %v4439_v46  ;;  %v4437_v54 = vpop.permute.xlu1 %4436 }
 0xcee   : > { %v4359_v38 = vpop.permute.xlu0 %4358 }
 0xcf0   : > { %8269 = vmatpush3.bf16.msra.mxu1 %v4242_v48 }
 0xcf1   : > { %8478 = vmatprep.subr.msk.bf16.mxu1 %vm2977_vm3, %v7655_v55 }
 0xcf5   : > { %v9131_v14 = vpop.eup %9130 }
 0xcf6   : > { %v4090_v31 = vmul.f32 %v9131_v14, %v11752_v63  ;;  %v9133_v23 = vpop.eup %9132 }
 0xcf7   : > { %v4094_v57 = vmul.f32 %v9133_v23, %v11748_v18 }
 0xcf8   : > { %v4100_v8 = vpack.c.bf16 %v4090_v31, %v4089_v47 }
 0xcf9   : > { %v4103_v6 = vpack.c.bf16 %v4094_v57, %v4094_v57 }
 0xcfa   : > { %8262 = vmatprep.mubr.msk.bf16.mxu0 %vm3260_vm5, %v4100_v8  ;;  %v4362_v8 = vrot.slane %v4359_v38, 4 }
 0xcfb   : > { %8263 = vmatmul.mubr.msk.bf16.vlgmr.msra.gmra.mrb[52].mxu0 %vm3260_vm5, %v4101_v21 }
 0xcfc   : > { %8275 = vmatpush3.bf16.msra.mxu0 %v11650_v36 }
 0xcfd   : > { %8477 = vmatprep.subr.msk.bf16.mxu0 %vm3410_vm4, %v11719_v26 }
 0xd00   : > { %8277 = vmatpush3.bf16.msra.mxu0 %v4304_v15 }
 0xd01   : > { %8480 = vmatprep.subr.msk.bf16.mxu0 %vm2977_vm3, %v7659_v9 }
 0xd16   : > { %v4061_v63 = vpop.xlane.xlu1 %4060 }
 0xd17   : > { %9134 = vrcp.f32 %v4061_v63 }
 0xd1a   : > { %v4073_v11 = vpop.xlane.xlu1 %4072 }
 0xd1e   : > { %v4067_v51 = vpop.xlane.xlu1 %4066 }
 0xd1f   : > { %v4058_v61 = vpop.xlane.xlu0 %4057 }
 0xd20   : > { %9136 = vrcp.f32 %v4058_v61  ;;  %v4440_v61 = vrot.slane %v4437_v54, 4 }
 0xd21   : > { %9138 = vrcp.f32 %v4073_v11  ;;  %v9135_v16 = vpop.eup %9134 }
 0xd22   : > { %9140 = vrcp.f32 %v4067_v51  ;;  %v4513_v36 = vpop.permute.xlu1 %4512  ;;  %v4093_v47 = vmul.f32 %v9135_v16, %v11765_v50  ;;  %v4379_v50 = vsel %vm2977_vm3, %v7655_v55, 0  ;;  %v7660_v23 = vcombine.low %v4440_v61, %v4440_v61 }
 0xd23   : > { %v4070_v32 = vpop.xlane.xlu0 %4069  ;;  %v4517_v55 = vrot.slane %v4513_v36, 4 }
 0xd24   : > { %9142 = vrcp.f32 %v4070_v32  ;;  %v7656_v32 = vcombine.low %v4362_v8, %v4362_v8 }
 0xd26   : > { %v4591_v52 = vpop.permute.xlu1 %4590 }
 0xd27   : > { %v4511_v26 = vpop.permute.xlu0 %4510 }
 0xd2a   : > { %v9137_v48 = vpop.eup %9136  ;;  %v4366_v45 = vpop.permute.xlu1 %4365 }
 0xd2b   : > { %v9139_v14 = vpop.eup %9138  ;;  %v4589_v53 = vpop.permute.xlu0 %4588  ;;  %v4092_v4 = vmul.f32 %v9137_v48, %v11775_v24 }
 0xd2c   : > { %v9141_v31 = vpop.eup %9140  ;;  %v4097_v15 = vmul.f32 %v9139_v14, %v11769_v30  ;;  %v4594_v57 = vrot.slane %v4589_v53, 4  ;;  %v4382_v14 = vsel %vm2977_vm3, %v7656_v32, 0 }
 0xd2d   : > { %v4102_v21 = vpack.c.bf16 %v4093_v47, %v4092_v4  ;;  %v4095_v51 = vmul.f32 %v9141_v31, %v11773_v1  ;;  %v4516_v1 = vrot.slane %v4511_v26, 4  ;;  %v4595_v4 = vrot.slane %v4591_v52, 4 }
 0xd2e   : > { %v9143_v46 = vpop.eup %9142  ;;  %v4444_v63 = vpop.permute.xlu1 %4443  ;;  %v4105_v30 = vpack.c.bf16 %v4097_v15, %v4097_v15 }
 0xd2f   : > { %8270 = vmatprep.mubr.msk.bf16.mxu1 %vm3260_vm5, %v4102_v21  ;;  %v4364_v11 = vpop.permute.xlu0 %4363  ;;  %v4096_v18 = vmul.f32 %v9143_v46, %v11781_v10  ;;  %v4457_v10 = vsel %vm2977_vm3, %v7659_v9, 0  ;;  %v7663_v48 = vcombine.low %v4516_v1, %v4517_v55  ;;  %v7667_v47 = vcombine.low %v4594_v57, %v4595_v4 }
 0xd30   : > { %8271 = vmatmul.mubr.msk.bf16.vlgmr.msra.gmra.mrb[36].mxu1 %vm3260_vm5, %v4103_v6  ;;  %v4460_v9 = vsel %vm2977_vm3, %v7660_v23, 0 }
 0xd31   : > { %8283 = vmatpush3.bf16.xpose.msra.mxu1 %v4379_v50  ;;  %8286 = vmatprep.mubr.msk.bf16.mxu1 %vm2977_vm3, %v4364_v11  ;;  %v4104_v24 = vpack.c.bf16 %v4096_v18, %v4095_v51  ;;  %v4535_v53 = vsel %vm2977_vm3, %v7663_v48, 0  ;;  %v4613_v15 = vsel %vm2977_vm3, %v7667_v47, 0 }
 0xd32   : > { %8479 = vmatprep.subr.msk.bf16.mxu1 %vm2977_vm3, %v7656_v32  ;;  %v4593_v54 = vpop.permute.xlu1 %4592 }
 0xd33   : > { %8278 = vmatprep.mubr.msk.bf16.mxu0 %vm3260_vm5, %v4104_v24  ;;  %v4442_v38 = vpop.permute.xlu0 %4441  ;;  %v4596_v36 = vrot.slane %v4593_v54, 4 }
 0xd34   : > { %8279 = vmatmul.mubr.msk.bf16.vlgmr.msra.gmra.mrb[56].mxu0 %vm3260_vm5, %v4105_v30 }
 0xd35   : > { %8291 = vmatpush3.bf16.xpose.msra.mxu0 %v4457_v10  ;;  %8294 = vmatprep.mubr.msk.bf16.mxu0 %vm2977_vm3, %v4442_v38  ;;  %v7668_v6 = vcombine.low %v4596_v36, %v4596_v36 }
 0xd36   : > { %8481 = vmatprep.subr.msk.bf16.mxu0 %vm2977_vm3, %v7660_v23  ;;  %v4522_v26 = vpop.permute.xlu1 %4521 }
 0xd37   : > { %v4515_v16 = vpop.permute.xlu0 %4514  ;;  %v4616_v18 = vsel %vm2977_vm3, %v7668_v6, 0 }
 0xd38   : > { %v4518_v31 = vrot.slane %v4515_v16, 4 }
 0xd39   : > { %8285 = vmatpush3.bf16.xpose.msra.mxu1 %v4382_v14 }
 0xd3a   : > { %8482 = vmatprep.subr.msk.bf16.mxu1 %vm2977_vm3, %v7663_v48  ;;  %v7664_v21 = vcombine.low %v4518_v31, %v4518_v31  ;;  %v4600_v46 = vpop.permute.xlu1 %4599 }
 0xd3b   : > { %v4520_v8 = vpop.permute.xlu0 %4519 }
 0xd3c   : > { %v4538_v11 = vsel %vm2977_vm3, %v7664_v21, 0 }
 0xd3d   : > { %8293 = vmatpush3.bf16.xpose.msra.mxu0 %v4460_v9 }
 0xd3e   : > { %8484 = vmatprep.subr.msk.bf16.mxu0 %vm2977_vm3, %v7667_v47 }
 0xd3f   : > { %v4598_v52 = vpop.permute.xlu0 %4597 }
 0xd40   : > { %8287 = vmatmul.mubr.msk.bf16.vlgmr.msra.gmra.mrb[40].mxu1 %vm2977_vm3, %v4366_v45  ;;  %v4881_v45 = vpop.permute.xlu1 %4880 }
 0xd41   : > { %8299 = vmatpush3.bf16.xpose.msra.mxu1 %v4535_v53  ;;  %8302 = vmatprep.mubr.msk.bf16.mxu1 %vm2977_vm3, %v4520_v8 }
 0xd42   : > { %8483 = vmatprep.subr.msk.bf16.mxu1 %vm2977_vm3, %v7664_v21 }
 0xd43   : > { %v4819_v51 = vpop.permute.xlu0 %4818 }
 0xd44   : > { %8295 = vmatmul.mubr.msk.bf16.vlgmr.msra.gmra.mrb[60].mxu0 %vm2977_vm3, %v4444_v63  ;;  %v4821_v61 = vpop.permute.xlu1 %4820 }
 0xd45   : > { %8307 = vmatpush3.bf16.xpose.msra.mxu0 %v4613_v15  ;;  %8310 = vmatprep.mubr.msk.bf16.mxu0 %vm2977_vm3, %v4598_v52  ;;  %v4830_v32 = vsel %vm3410_vm4, %v4821_v61, 0 }
 0xd46   : > { %8485 = vmatprep.subr.msk.bf16.mxu0 %vm2977_vm3, %v7668_v6 }
 0xd47   : > { %v11887_v50 = vpop.permute.xlu0 %4942 }
 0xd48   : > { %v4883_v63 = vpop.permute.xlu1 %4882 }
 0xd49   : > { %8301 = vmatpush3.bf16.xpose.msra.mxu1 %v4538_v11  ;;  %v4892_v24 = vsel %vm3410_vm4, %v4883_v63, 0 }
 0xd4a   : > { %8314 = vmatprep.subr.bf16.mxu1 %v4819_v51 }
 0xd4c   : > { %v11892_v30 = vpop.permute.xlu1 %5004 }
 0xd4d   : > { %8309 = vmatpush3.bf16.xpose.msra.mxu0 %v4616_v18 }
 0xd4e   : > { %8322 = vmatprep.subr.bf16.mxu0 %v4881_v45 }
 0xd50   : > { %8303 = vmatmul.mubr.msk.bf16.vlgmr.msra.gmra.mrb[44].mxu1 %vm2977_vm3, %v4522_v26 }
 0xd51   : > { %8315 = vmatpush3.bf16.msra.mxu1 %v4819_v51 }
 0xd52   : > { %8486 = vmatprep.subr.msk.bf16.mxu1 %vm3410_vm4, %v4821_v61 }
 0xd54   : > { %8311 = vmatmul.mubr.msk.bf16.vlgmr.msra.gmra.mrb[64].mxu0 %vm2977_vm3, %v4600_v46 }
 0xd55   : > { %8317 = vmatpush3.bf16.msra.mxu1 %v4830_v32  ;;  %8323 = vmatpush3.bf16.msra.mxu0 %v4881_v45 }
 0xd56   : > { %8487 = vmatprep.subr.msk.bf16.mxu0 %vm3410_vm4, %v4883_v63  ;;  %8330 = vmatprep.subr.bf16.mxu1 %v11887_v50 }
 0xd59   : > { %8325 = vmatpush3.bf16.msra.mxu0 %v4892_v24 }
 0xd5a   : > { %8338 = vmatprep.subr.bf16.mxu0 %v11892_v30 }
 0xdbe   : > { %v11895_v38 = vpop.f32.mrb[32].mxu1 }
 0xdbf   : > { %v11897_v23 = vpop.f32.mrb[33].mxu1 }
 0xdc0   : > { %v8257_v1 = vpop.f32.mrb[34].mxu1 }
 0xdc1   : > { %v11899_v10 = vpop.f32.mrb[35].mxu1 }
 0xdce   : > { %v11903_v55 = vpop.f32.mrb[52].mxu0 }
 0xdcf   : > { %v11905_v16 = vpop.f32.mrb[53].mxu0 }
 0xdd0   : > { %v8265_v57 = vpop.f32.mrb[54].mxu0 }
 0xdd1   : > { %v11909_v14 = vpop.f32.mrb[55].mxu0 }
 0xe03   : > { %v11913_v26 = vpop.f32.mrb[36].mxu1 }
 0xe04   : > { %13028 = vst [vmem:[#allocation99_spill] sm:$0xff] %v11913_v26  ;;  %v11915_v47 = vpop.f32.mrb[37].mxu1 }
 0xe05   : > { %13029 = vst [vmem:[#allocation100_spill] sm:$0xff] %v11915_v47  ;;  %v8273_v31 = vpop.f32.mrb[38].mxu1 }
 0xe06   : > { %v11917_v9 = vpop.f32.mrb[39].mxu1 }
 0xe07   : > { %13030 = vst [vmem:[#allocation101_spill] sm:$0xff] %v11917_v9  ;;  %v11921_v36 = vpop.f32.mrb[56].mxu0 }
 0xe08   : > { %13031 = vst [vmem:[#allocation102_spill] sm:$0xff] %v11921_v36  ;;  %v11923_v21 = vpop.f32.mrb[57].mxu0 }
 0xe09   : > { %13032 = vst [vmem:[#allocation103_spill] sm:$0xff] %v11923_v21  ;;  %v8281_v46 = vpop.f32.mrb[58].mxu0 }
 0xe0a   : > { %v11927_v52 = vpop.f32.mrb[59].mxu0 }
 0xe0b   : > { %13033 = vst [vmem:[#allocation104_spill] sm:$0xff] %v11927_v52 }
 0xe13   : > { %v8288_v15 = vpop.f32.mrb[40].mxu1 }
 0xe14   : > { %v4668_v45 = vmul.f32 0.17677669, %v8288_v15  ;;  %v4418_v11 = vpop.f32.mrb[41].mxu1 }
 0xe15   : > { %v8289_v51 = vpop.f32.mrb[42].mxu1  ;;  %v4666_v18 = vmul.f32 0.17677669, %v4418_v11 }
 0xe16   : > { %v4421_v61 = vpop.f32.mrb[43].mxu1  ;;  %v4684_v63 = vsel %vm3260_vm5, %v4668_v45, -inf }
 0xe17   : > { %v4667_v32 = vmul.f32 0.17677669, %v4421_v61  ;;  %4685 = vmax.xlane.f32.xlu0 %v4684_v63  ;;  %v8296_v24 = vpop.f32.mrb[60].mxu0  ;;  %v4678_v6 = vsel %vm3260_vm5, %v4666_v18, -inf }
 0xe18   : > { %v4496_v1 = vpop.f32.mrb[61].mxu0  ;;  %v4671_v57 = vmul.f32 0.17677669, %v8296_v24 }
 0xe19   : > { %v8297_v31 = vpop.f32.mrb[62].mxu0  ;;  %v4681_v46 = vsel %vm3260_vm5, %v4667_v32, -inf  ;;  %v4669_v53 = vmul.f32 0.17677669, %v4496_v1 }
 0xe1a   : > { %4682 = vmax.xlane.f32.xlu1 %v4681_v46  ;;  %v4499_v8 = vpop.f32.mrb[63].mxu0  ;;  %v4693_v15 = vsel %vm3260_vm5, %v4671_v57, -inf }
 0xe1b   : > { %4679 = vmax.xlane.f32.xlu0 %v4678_v6  ;;  %v4687_v11 = vsel %vm3260_vm5, %v4669_v53, -inf  ;;  %v11936_v24 = vmul.f32 0.17677669, %v4499_v8 }
 0xe1d   : > { %v4690_v8 = vsel %vm3260_vm5, %v11936_v24, -inf }
 0xe1e   : > { %4694 = vmax.xlane.f32.xlu1 %v4693_v15 }
 0xe1f   : > { %4688 = vmax.xlane.f32.xlu0 %v4687_v11 }
 0xe23   : > { %v8304_v51 = vpop.f32.mrb[44].mxu1 }
 0xe24   : > { %v4674_v61 = vmul.f32 0.17677669, %v8304_v51  ;;  %v4574_v63 = vpop.f32.mrb[45].mxu1 }
 0xe25   : > { %v8305_v4 = vpop.f32.mrb[46].mxu1  ;;  %v11945_v37 = vmul.f32 0.17677669, %v4574_v63 }
 0xe26   : > { %v4577_v31 = vpop.f32.mrb[47].mxu1  ;;  %v4702_v1 = vsel %vm3260_vm5, %v4674_v61, -inf }
 0xe27   : > { %v11939_v46 = vmul.f32 0.17677669, %v4577_v31  ;;  %4703 = vmax.xlane.f32.xlu0 %v4702_v1  ;;  %v8312_v48 = vpop.f32.mrb[64].mxu0 }
 0xe28   : > { %v4652_v6 = vpop.f32.mrb[65].mxu0  ;;  %v11941_v54 = vmul.f32 0.17677669, %v8312_v48  ;;  %v4696_v48 = vsel %vm3260_vm5, %v11945_v37, -inf }
 0xe29   : > { %v8313_v15 = vpop.f32.mrb[66].mxu0  ;;  %v4699_v11 = vsel %vm3260_vm5, %v11939_v46, -inf  ;;  %v11949_v51 = vmul.f32 0.17677669, %v4652_v6  ;;  %v11965_v6 = vpop.permute.xlu0 %4944 }
 0xe2a   : > { %4700 = vmax.xlane.f32.xlu1 %v4699_v11  ;;  %v4655_v4 = vpop.f32.mrb[67].mxu0  ;;  %v4711_v31 = vsel %vm3260_vm5, %v11941_v54, -inf  ;;  %v11967_v11 = vpop.permute.xlu1 %5006 }
 0xe2b   : > { %4691 = vmax.xlane.f32.xlu0 %v4690_v8  ;;  %v11953_v1 = vmul.f32 0.17677669, %v4655_v4  ;;  %v4705_v63 = vsel %vm3260_vm5, %v11949_v51, -inf }
 0xe2d   : > { %v4708_v15 = vsel %vm3260_vm5, %v11953_v1, -inf }
 0xe2e   : > { %4712 = vmax.xlane.f32.xlu1 %v4711_v31 }
 0xe2f   : > { %4697 = vmax.xlane.f32.xlu0 %v4696_v48 }
 0xe32   : > { %4706 = vmax.xlane.f32.xlu1 %v4705_v63 }
 0xe33   : > { %4709 = vmax.xlane.f32.xlu0 %v4708_v15 }
 0xe43   : > { %5068 = vrot.lane.b32.xlu1 %v11250_v58, %s10297_s15 }
 0xe49   : > { %5066 = vrot.lane.b32.xlu0 %v11245_v17, %s10297_s15 }
 0xea4   : > { %v4686_v4 = vpop.xlane.xlu0 %4685 }
 0xea5   : > { %v4716_v8 = vsub.f32 %v4668_v45, %v4686_v4 }
 0xea7   : > { %v4730_v31 = vmul.f32 1.442695, %v4716_v8  ;;  %v4683_v48 = vpop.xlane.xlu1 %4682 }
 0xea8   : > { %v4715_v63 = vsub.f32 %v4667_v32, %v4683_v48  ;;  %v4680_v43 = vpop.xlane.xlu0 %4679 }
 0xea9   : > { %9144 = vpow2.f32 %v4730_v31  ;;  %v4714_v7 = vsub.f32 %v4666_v18, %v4680_v43 }
 0xeaa   : > { %v4728_v15 = vmul.f32 1.442695, %v4715_v63 }
 0xeab   : > { %v4726_v52 = vmul.f32 1.442695, %v4714_v7  ;;  %v4695_v36 = vpop.xlane.xlu1 %4694 }
 0xeac   : > { %9146 = vpow2.f32 %v4728_v15  ;;  %v4719_v58 = vsub.f32 %v4671_v57, %v4695_v36  ;;  %v4689_v26 = vpop.xlane.xlu0 %4688 }
 0xead   : > { %9148 = vpow2.f32 %v4726_v52  ;;  %v4717_v17 = vsub.f32 %v4669_v53, %v4689_v26 }
 0xeae   : > { %v4736_v21 = vmul.f32 1.442695, %v4719_v58 }
 0xeaf   : > { %v4732_v47 = vmul.f32 1.442695, %v4717_v17 }
 0xeb0   : > { %9150 = vpow2.f32 %v4736_v21 }
 0xeb1   : > { %9152 = vpow2.f32 %v4732_v47 }
 0xeb3   : > { %v11969_v9 = vpop.eup %9144 }
 0xeb4   : > { %v4704_v45 = vpop.xlane.xlu0 %4703  ;;  %v4756_v32 = vsel %vm3260_vm5, %v11969_v9, 0.0 }
 0xeb5   : > { %v4722_v4 = vsub.f32 %v4674_v61, %v4704_v45  ;;  %4757 = vadd.xlane.f32.xlu0 %v4756_v32 }
 0xeb6   : > { %v11973_v43 = vpop.eup %9146 }
 0xeb7   : > { %v11975_v7 = vpop.eup %9148  ;;  %v4742_v36 = vmul.f32 1.442695, %v4722_v4  ;;  %v4753_v26 = vsel %vm3260_vm5, %v11973_v43, 0.0  ;;  %v4701_v15 = vpop.xlane.xlu1 %4700 }
 0xeb8   : > { %4754 = vadd.xlane.f32.xlu1 %v4753_v26  ;;  %v4692_v53 = vpop.xlane.xlu0 %4691  ;;  %v4750_v47 = vsel %vm3260_vm5, %v11975_v7, 0.0  ;;  %v4721_v17 = vsub.f32 %v11939_v46, %v4701_v15 }
 0xeb9   : > { %9154 = vpow2.f32 %v4742_v36  ;;  %v4718_v21 = vsub.f32 %v11936_v24, %v4692_v53  ;;  %4751 = vadd.xlane.f32.xlu0 %v4750_v47 }
 0xeba   : > { %v11982_v52 = vpop.eup %9150  ;;  %v4740_v45 = vmul.f32 1.442695, %v4721_v17 }
 0xebb   : > { %v4734_v18 = vmul.f32 1.442695, %v4718_v21  ;;  %v4765_v57 = vsel %vm3260_vm5, %v11982_v52, 0.0  ;;  %v11986_v61 = vpop.eup %9152  ;;  %v4713_v58 = vpop.xlane.xlu1 %4712 }
 0xebc   : > { %4766 = vadd.xlane.f32.xlu1 %v4765_v57  ;;  %v4759_v8 = vsel %vm3260_vm5, %v11986_v61, 0.0  ;;  %v4725_v32 = vsub.f32 %v11941_v54, %v4713_v58  ;;  %v4698_v4 = vpop.xlane.xlu0 %4697 }
 0xebd   : > { %9156 = vpow2.f32 %v4734_v18  ;;  %v4720_v47 = vsub.f32 %v11945_v37, %v4698_v4 }
 0xebe   : > { %9158 = vpow2.f32 %v4740_v45  ;;  %v4748_v26 = vmul.f32 1.442695, %v4725_v32 }
 0xebf   : > { %v4707_v36 = vpop.xlane.xlu1 %4706  ;;  %v4738_v18 = vmul.f32 1.442695, %v4720_v47 }
 0xec0   : > { %4760 = vadd.xlane.f32.xlu1 %v4759_v8  ;;  %v4723_v53 = vsub.f32 %v11949_v51, %v4707_v36  ;;  %v4710_v21 = vpop.xlane.xlu0 %4709  ;;  %9160 = vpow2.f32 %v4748_v26 }
 0xec1   : > { %v4724_v46 = vsub.f32 %v11953_v1, %v4710_v21 }
 0xec3   : > { %v11990_v31 = vpop.eup %9154 }
 0xec4   : > { %v4774_v24 = vsel %vm3260_vm5, %v11990_v31, 0.0 }
 0xec5   : > { %4775 = vadd.xlane.f32.xlu0 %v4774_v24 }
 0xec7   : > { %v11994_v48 = vpop.eup %9156 }
 0xec8   : > { %v4762_v63 = vsel %vm3260_vm5, %v11994_v48, 0.0  ;;  %v12007_v57 = vpop.eup %9158 }
 0xec9   : > { %4763 = vadd.xlane.f32.xlu0 %v4762_v63  ;;  %v4771_v54 = vsel %vm3260_vm5, %v12007_v57, 0.0 }
 0xeca   : > { %v12011_v8 = vpop.eup %9160 }
 0xecb   : > { %v4783_v37 = vsel %vm3260_vm5, %v12011_v8, 0.0 }
 0xed1   : > { %5146 = vrot.lane.b32.xlu1 %v11285_v59, %s10297_s15  ;;  %v4744_v59 = vmul.f32 1.442695, %v4723_v53 }
 0xed3   : > { %9162 = vpow2.f32 %v4744_v59 }
 0xed4   : > { %9164 = vpow2.f32 %v4738_v18 }
 0xedd   : > { %v12015_v51 = vpop.eup %9162 }
 0xede   : > { %v12017_v24 = vpop.eup %9164  ;;  %v4777_v1 = vsel %vm3260_vm5, %v12015_v51, 0.0 }
 0xedf   : > { %5144 = vrot.lane.b32.xlu0 %v11267_v39, %s10297_s15  ;;  %v4746_v39 = vmul.f32 1.442695, %v4724_v46  ;;  %v4768_v63 = vsel %vm3260_vm5, %v12017_v24, 0.0 }
 0xee1   : > { %9166 = vpow2.f32 %v4746_v39 }
 0xeeb   : > { %v12023_v15 = vpop.eup %9166 }
 0xeec   : > { %v4780_v58 = vsel %vm3260_vm5, %v12023_v15, 0.0 }
 0xef5   : > { %4772 = vadd.xlane.f32.xlu1 %v4771_v54 }
 0xef9   : > { %4784 = vadd.xlane.f32.xlu1 %v4783_v37 }
 0xefd   : > { %4778 = vadd.xlane.f32.xlu1 %v4777_v1 }
 0xefe   : > { %4769 = vadd.xlane.f32.xlu0 %v4768_v63 }
 0xf02   : > { %4781 = vadd.xlane.f32.xlu0 %v4780_v58 }
 0xf0e   : > { %5148 = vrot.lane.b32.xlu1 %v11294_v0, %s10297_s15 }
 0xf12   : > { %5224 = vrot.lane.b32.xlu1 %v11327_v42, %s10297_s15 }
 0xf16   : > { %5077 = vrot.lane.b32.xlu1 %v11306_v22, %s10297_s15 }
 0xf18   : > { %5070 = vrot.lane.b32.xlu0 %v11260_v33, %s10297_s15  ;;  %v5069_v33 = vpop.permute.xlu1 %5068 }
 0xf19   : > { %v5073_v45 = vrot.slane %v5069_v33, 4 }
 0xf1a   : > { %5155 = vrot.lane.b32.xlu1 %v11350_v13, %s10297_s15 }
 0xf1c   : > { %5222 = vrot.lane.b32.xlu0 %v11315_v34, %s10297_s15 }
 0xf1e   : > { %5300 = vrot.lane.b32.xlu1 %v11345_v5, %s10297_s15 }
 0xf20   : > { %5075 = vrot.lane.b32.xlu0 %v11248_v20, %s10297_s15  ;;  %v5067_v20 = vpop.permute.xlu0 %5066 }
 0xf21   : > { %v5072_v32 = vrot.slane %v5067_v20, 4 }
 0xf22   : > { %5231 = vrot.lane.b32.xlu1 %v11322_v40, %s10297_s15 }
 0xf24   : > { %5153 = vrot.lane.b32.xlu0 %v11301_v56, %s10297_s15 }
 0xf26   : > { %5304 = vrot.lane.b32.xlu1 %v11363_v25, %s10297_s15 }
 0xf28   : > { %5226 = vrot.lane.b32.xlu0 %v11340_v62, %s10297_s15 }
 0xf2a   : > { %5311 = vrot.lane.b32.xlu1 %v11399_v19, %s10297_s15 }
 0xf2c   : > { %5302 = vrot.lane.b32.xlu0 %v11357_v29, %s10297_s15 }
 0xf30   : > { %5233 = vrot.lane.b32.xlu0 %v11366_v41, %s10297_s15 }
 0xf34   : > { %5309 = vrot.lane.b32.xlu0 %v11369_v44, %s10297_s15 }
 0xf42   : > { %v4758_v0 = vpop.xlane.xlu0 %4757 }
 0xf43   : > { %9168 = vrcp.f32 %v4758_v0 }
 0xf45   : > { %v4755_v56 = vpop.xlane.xlu1 %4754 }
 0xf46   : > { %9170 = vrcp.f32 %v4755_v56  ;;  %v4752_v22 = vpop.xlane.xlu0 %4751 }
 0xf47   : > { %9172 = vrcp.f32 %v4752_v22 }
 0xf49   : > { %v4767_v34 = vpop.xlane.xlu1 %4766 }
 0xf4a   : > { %9174 = vrcp.f32 %v4767_v34 }
 0xf4d   : > { %v9169_v40 = vpop.eup %9168  ;;  %v4761_v29 = vpop.xlane.xlu1 %4760 }
 0xf4e   : > { %v4800_v13 = vmul.f32 %v9169_v40, %v11969_v9  ;;  %9176 = vrcp.f32 %v4761_v29  ;;  %v7679_v9 = vcombine.low %v5072_v32, %v5073_v45 }
 0xf50   : > { %v9171_v42 = vpop.eup %9170  ;;  %v4811_v19 = vpack.c.bf16 %v4800_v13, %v4800_v13 }
 0xf51   : > { %v9173_v62 = vpop.eup %9172  ;;  %v4799_v5 = vmul.f32 %v9171_v42, %v11973_v43  ;;  %v4954_v43 = vsel %vm3410_vm4, %v11965_v6, 0  ;;  %v5147_v18 = vpop.permute.xlu1 %5146 }
 0xf52   : > { %v4776_v25 = vpop.xlane.xlu0 %4775  ;;  %v4798_v41 = vmul.f32 %v9173_v62, %v11975_v7 }
 0xf54   : > { %v4810_v44 = vpack.c.bf16 %v4799_v5, %v4798_v41  ;;  %v9175_v7 = vpop.eup %9174 }
 0xf55   : > { %v4803_v26 = vmul.f32 %v9175_v7, %v11982_v52 }
 0xf56   : > { %8318 = vmatprep.mubr.msk.bf16.mxu1 %vm3260_vm5, %v4810_v44  ;;  %v4764_v17 = vpop.xlane.xlu0 %4763 }
 0xf57   : > { %9178 = vrcp.f32 %v4764_v17  ;;  %8319 = vmatmul.mubr.msk.bf16.vlgmr.msra.gmra.mrb[48].mxu1 %vm3260_vm5, %v4811_v19  ;;  %v4813_v59 = vpack.c.bf16 %v4803_v26, %v4803_v26 }
 0xf58   : > { %8331 = vmatpush3.bf16.msra.mxu1 %v11887_v50  ;;  %v9177_v4 = vpop.eup %9176  ;;  %9180 = vrcp.f32 %v4776_v25 }
 0xf59   : > { %8488 = vmatprep.subr.msk.bf16.mxu1 %vm3410_vm4, %v11965_v6  ;;  %v4801_v53 = vmul.f32 %v9177_v4, %v11986_v61  ;;  %v5151_v6 = vrot.slane %v5147_v18, 4  ;;  %v5016_v61 = vsel %vm3410_vm4, %v11967_v11, 0 }
 0xf5a   : > { %v5145_v50 = vpop.permute.xlu0 %5144 }
 0xf5b   : > { %v5150_v46 = vrot.slane %v5145_v50, 4 }
 0xf5c   : > { %8333 = vmatpush3.bf16.msra.mxu1 %v4954_v43 }
 0xf5d   : > { %8490 = vmatprep.subr.msk.bf16.mxu1 %vm2977_vm3, %v7679_v9  ;;  %v7683_v52 = vcombine.low %v5150_v46, %v5151_v6 }
 0xf61   : > { %v9179_v36 = vpop.eup %9178 }
 0xf62   : > { %v4802_v47 = vmul.f32 %v9179_v36, %v11994_v48  ;;  %v9181_v58 = vpop.eup %9180 }
 0xf63   : > { %v4806_v56 = vmul.f32 %v9181_v58, %v11990_v31 }
 0xf64   : > { %v4812_v21 = vpack.c.bf16 %v4802_v47, %v4801_v53 }
 0xf65   : > { %v4815_v41 = vpack.c.bf16 %v4806_v56, %v4806_v56 }
 0xf66   : > { %8326 = vmatprep.mubr.msk.bf16.mxu0 %vm3260_vm5, %v4812_v21 }
 0xf67   : > { %8327 = vmatmul.mubr.msk.bf16.vlgmr.msra.gmra.mrb[68].mxu0 %vm3260_vm5, %v4813_v59 }
 0xf68   : > { %8339 = vmatpush3.bf16.msra.mxu0 %v11892_v30 }
 0xf69   : > { %8489 = vmatprep.subr.msk.bf16.mxu0 %vm3410_vm4, %v11967_v11 }
 0xf6c   : > { %8341 = vmatpush3.bf16.msra.mxu0 %v5016_v61 }
 0xf6d   : > { %8492 = vmatprep.subr.msk.bf16.mxu0 %vm2977_vm3, %v7683_v52 }
 0xf82   : > { %v4773_v48 = vpop.xlane.xlu1 %4772 }
 0xf83   : > { %9182 = vrcp.f32 %v4773_v48 }
 0xf86   : > { %v4785_v39 = vpop.xlane.xlu1 %4784 }
 0xf8a   : > { %v4779_v54 = vpop.xlane.xlu1 %4778 }
 0xf8b   : > { %v4770_v37 = vpop.xlane.xlu0 %4769 }
 0xf8c   : > { %9184 = vrcp.f32 %v4770_v37 }
 0xf8d   : > { %9186 = vrcp.f32 %v4785_v39  ;;  %v9183_v33 = vpop.eup %9182 }
 0xf8e   : > { %9188 = vrcp.f32 %v4779_v54  ;;  %v5149_v30 = vpop.permute.xlu1 %5148  ;;  %v4805_v42 = vmul.f32 %v9183_v33, %v12007_v57  ;;  %v5091_v57 = vsel %vm2977_vm3, %v7679_v9, 0 }
 0xf8f   : > { %v4782_v1 = vpop.xlane.xlu0 %4781  ;;  %v5152_v45 = vrot.slane %v5149_v30, 4 }
 0xf90   : > { %9190 = vrcp.f32 %v4782_v1 }
 0xf92   : > { %v5225_v63 = vpop.permute.xlu1 %5224 }
 0xf93   : > { %v5071_v20 = vpop.permute.xlu0 %5070  ;;  %v5229_v9 = vrot.slane %v5225_v63, 4 }
 0xf94   : > { %v5074_v5 = vrot.slane %v5071_v20, 4 }
 0xf96   : > { %v9185_v11 = vpop.eup %9184  ;;  %v5078_v0 = vpop.permute.xlu1 %5077  ;;  %v7680_v32 = vcombine.low %v5074_v5, %v5074_v5 }
 0xf97   : > { %v9187_v22 = vpop.eup %9186  ;;  %v5223_v34 = vpop.permute.xlu0 %5222  ;;  %v4804_v40 = vmul.f32 %v9185_v11, %v12017_v24 }
 0xf98   : > { %v9189_v62 = vpop.eup %9188  ;;  %v4809_v44 = vmul.f32 %v9187_v22, %v12011_v8  ;;  %v5228_v4 = vrot.slane %v5223_v34, 4  ;;  %v5094_v47 = vsel %vm2977_vm3, %v7680_v32, 0 }
 0xf99   : > { %v4814_v13 = vpack.c.bf16 %v4805_v42, %v4804_v40  ;;  %v4807_v17 = vmul.f32 %v9189_v62, %v12015_v51  ;;  %v7684_v51 = vcombine.low %v5152_v45, %v5152_v45 }
 0xf9a   : > { %v9191_v29 = vpop.eup %9190  ;;  %v5156_v25 = vpop.permute.xlu1 %5155  ;;  %v4817_v43 = vpack.c.bf16 %v4809_v44, %v4809_v44  ;;  %v7687_v53 = vcombine.low %v5228_v4, %v5229_v9 }
 0xf9b   : > { %8334 = vmatprep.mubr.msk.bf16.mxu1 %vm3260_vm5, %v4814_v13  ;;  %v5076_v19 = vpop.permute.xlu0 %5075  ;;  %v4808_v31 = vmul.f32 %v9191_v29, %v12023_v15  ;;  %v5169_v15 = vsel %vm2977_vm3, %v7683_v52, 0  ;;  %v5172_v46 = vsel %vm2977_vm3, %v7684_v51, 0 }
 0xf9c   : > { %8335 = vmatmul.mubr.msk.bf16.vlgmr.msra.gmra.mrb[52].mxu1 %vm3260_vm5, %v4815_v41  ;;  %v5247_v54 = vsel %vm2977_vm3, %v7687_v53, 0 }
 0xf9d   : > { %8347 = vmatpush3.bf16.xpose.msra.mxu1 %v5091_v57  ;;  %8350 = vmatprep.mubr.msk.bf16.mxu1 %vm2977_vm3, %v5076_v19  ;;  %v4816_v24 = vpack.c.bf16 %v4808_v31, %v4807_v17 }
 0xf9e   : > { %8491 = vmatprep.subr.msk.bf16.mxu1 %vm2977_vm3, %v7680_v32  ;;  %v5301_v8 = vpop.permute.xlu1 %5300 }
 0xf9f   : > { %8342 = vmatprep.mubr.msk.bf16.mxu0 %vm3260_vm5, %v4816_v24  ;;  %v5154_v7 = vpop.permute.xlu0 %5153  ;;  %v5306_v21 = vrot.slane %v5301_v8, 4 }
 0xfa0   : > { %8343 = vmatmul.mubr.msk.bf16.vlgmr.msra.gmra.mrb[72].mxu0 %vm3260_vm5, %v4817_v43 }
 0xfa1   : > { %8355 = vmatpush3.bf16.xpose.msra.mxu0 %v5169_v15  ;;  %8358 = vmatprep.mubr.msk.bf16.mxu0 %vm2977_vm3, %v5154_v7 }
 0xfa2   : > { %8493 = vmatprep.subr.msk.bf16.mxu0 %vm2977_vm3, %v7684_v51  ;;  %v5232_v36 = vpop.permute.xlu1 %5231 }
 0xfa3   : > { %v5227_v26 = vpop.permute.xlu0 %5226 }
 0xfa4   : > { %v5230_v59 = vrot.slane %v5227_v26, 4 }
 0xfa5   : > { %8349 = vmatpush3.bf16.xpose.msra.mxu1 %v5094_v47 }
 0xfa6   : > { %8494 = vmatprep.subr.msk.bf16.mxu1 %vm2977_vm3, %v7687_v53  ;;  %v5305_v6 = vpop.permute.xlu1 %5304  ;;  %v7688_v48 = vcombine.low %v5230_v59, %v5230_v59 }
 0xfa7   : > { %v5303_v50 = vpop.permute.xlu0 %5302  ;;  %v5308_v39 = vrot.slane %v5305_v6, 4 }
 0xfa8   : > { %v5307_v18 = vrot.slane %v5303_v50, 4  ;;  %v5250_v63 = vsel %vm2977_vm3, %v7688_v48, 0 }
 0xfa9   : > { %8357 = vmatpush3.bf16.xpose.msra.mxu0 %v5172_v46  ;;  %v7692_v30 = vcombine.low %v5308_v39, %v5308_v39 }
 0xfaa   : > { %v7691_v52 = vcombine.low %v5306_v21, %v5307_v18  ;;  %v5312_v20 = vpop.permute.xlu1 %5311 }
 0xfab   : > { %v5234_v61 = vpop.permute.xlu0 %5233  ;;  %v5328_v58 = vsel %vm2977_vm3, %v7692_v30, 0 }
 0xfac   : > { %8351 = vmatmul.mubr.msk.bf16.vlgmr.msra.gmra.mrb[56].mxu1 %vm2977_vm3, %v5078_v0  ;;  %8496 = vmatprep.subr.msk.bf16.mxu0 %vm2977_vm3, %v7691_v52  ;;  %v5325_v1 = vsel %vm2977_vm3, %v7691_v52, 0 }
 0xfad   : > { %8363 = vmatpush3.bf16.xpose.msra.mxu1 %v5247_v54  ;;  %8366 = vmatprep.mubr.msk.bf16.mxu1 %vm2977_vm3, %v5232_v36 }
 0xfae   : > { %8495 = vmatprep.subr.msk.bf16.mxu1 %vm2977_vm3, %v7688_v48 }
 0xfaf   : > { %v5310_v37 = vpop.permute.xlu0 %5309 }
 0xfb0   : > { %8359 = vmatmul.mubr.msk.bf16.vlgmr.msra.gmra.mrb[76].mxu0 %vm2977_vm3, %v5156_v25 }
 0xfb1   : > { %8371 = vmatpush3.bf16.xpose.msra.mxu0 %v5325_v1  ;;  %8374 = vmatprep.mubr.msk.bf16.mxu0 %vm2977_vm3, %v5310_v37 }
 0xfb2   : > { %8497 = vmatprep.subr.msk.bf16.mxu0 %vm2977_vm3, %v7692_v30 }
 0xfb5   : > { %8365 = vmatpush3.bf16.xpose.msra.mxu1 %v5250_v63 }
 0xfb9   : > { %8373 = vmatpush3.bf16.xpose.msra.mxu0 %v5328_v58 }
 0xfbc   : > { %8367 = vmatmul.mubr.msk.bf16.vlgmr.msra.gmra.mrb[60].mxu1 %vm2977_vm3, %v5234_v61 }
 0xfc0   : > { %8375 = vmatmul.mubr.msk.bf16.vlgmr.msra.gmra.mrb[80].mxu0 %vm2977_vm3, %v5312_v20 }
0x102a   : > { %v12113_v33 = vpop.f32.mrb[48].mxu1 }
0x102b   : > { %v12115_v11 = vpop.f32.mrb[49].mxu1 }
0x102c   : > { %v8321_v0 = vpop.f32.mrb[50].mxu1 }
0x102d   : > { %v12117_v56 = vpop.f32.mrb[51].mxu1 }
0x102e   : > { %v8888_v22 = vpack.i.bf16 %v12117_v56, %v12115_v11 }
0x103a   : > { %v12121_v34 = vpop.f32.mrb[68].mxu0 }
0x103b   : > { %v12123_v40 = vpop.f32.mrb[69].mxu0 }
0x103c   : > { %v8893_v42 = vpack.i.bf16 %v12123_v40, %v12113_v33  ;;  %v8329_v62 = vpop.f32.mrb[70].mxu0 }
0x103d   : > { %v12127_v5 = vpop.f32.mrb[71].mxu0 }
0x103e   : > { %v8918_v13 = vpack.i.bf16 %v12121_v34, %v12127_v5 }
0x106f   : > { %v12131_v29 = vpop.f32.mrb[52].mxu1 }
0x1070   : > { %v12133_v25 = vpop.f32.mrb[53].mxu1 }
0x1071   : > { %v8337_v41 = vpop.f32.mrb[54].mxu1 }
0x1072   : > { %v12135_v44 = vpop.f32.mrb[55].mxu1 }
0x1073   : > { %v8923_v19 = vpack.i.bf16 %v12135_v44, %v12133_v25  ;;  %v12139_v17 = vpop.f32.mrb[72].mxu0  ;;  %v13044_v25 = vld [vmem:[#allocation102_spill] sm:$0xff]  ;;  %v13045_v44 = vld [vmem:[#allocation104_spill] sm:$0xff] }
0x1074   : > { %v12141_v31 = vpop.f32.mrb[73].mxu0 }
0x1075   : > { %v8948_v45 = vpack.i.bf16 %v12141_v31, %v12131_v29  ;;  %v8345_v32 = vpop.f32.mrb[74].mxu0  ;;  %v13046_v29 = vpack.i.bf16 %v13044_v25, %v13045_v44 }
0x1076   : > { %v12145_v57 = vpop.f32.mrb[75].mxu0 }
0x1077   : > { %v8953_v24 = vpack.i.bf16 %v12139_v17, %v12145_v57 }
0x107f   : > { %v8352_v8 = vpop.f32.mrb[56].mxu1 }
0x1080   : > { %v5380_v43 = vmul.f32 0.17677669, %v8352_v8  ;;  %v5130_v7 = vpop.f32.mrb[57].mxu1 }
0x1081   : > { %v8353_v51 = vpop.f32.mrb[58].mxu1  ;;  %v5378_v4 = vmul.f32 0.17677669, %v5130_v7 }
0x1082   : > { %v5133_v15 = vpop.f32.mrb[59].mxu1  ;;  %v5396_v9 = vsel %vm3260_vm5, %v5380_v43, -inf }
0x1083   : > { %v5379_v36 = vmul.f32 0.17677669, %v5133_v15  ;;  %5397 = vmax.xlane.f32.xlu0 %v5396_v9  ;;  %v8360_v26 = vpop.f32.mrb[76].mxu0  ;;  %v5390_v46 = vsel %vm3260_vm5, %v5378_v4, -inf }
0x1084   : > { %v5208_v53 = vpop.f32.mrb[77].mxu0  ;;  %v5383_v47 = vmul.f32 0.17677669, %v8360_v26 }
0x1085   : > { %v8361_v50 = vpop.f32.mrb[78].mxu0  ;;  %v5393_v21 = vsel %vm3260_vm5, %v5379_v36, -inf  ;;  %v5381_v59 = vmul.f32 0.17677669, %v5208_v53 }
0x1086   : > { %5394 = vmax.xlane.f32.xlu1 %v5393_v21  ;;  %v5211_v18 = vpop.f32.mrb[79].mxu0  ;;  %v5405_v6 = vsel %vm3260_vm5, %v5383_v47, -inf }
0x1087   : > { %5391 = vmax.xlane.f32.xlu0 %v5390_v46  ;;  %v12153_v52 = vmul.f32 0.17677669, %v5211_v18  ;;  %v5399_v61 = vsel %vm3260_vm5, %v5381_v59, -inf }
0x1089   : > { %v5402_v48 = vsel %vm3260_vm5, %v12153_v52, -inf }
0x108a   : > { %5406 = vmax.xlane.f32.xlu1 %v5405_v6 }
0x108b   : > { %5400 = vmax.xlane.f32.xlu0 %v5399_v61 }
0x108f   : > { %5403 = vmax.xlane.f32.xlu0 %v5402_v48  ;;  %v8368_v39 = vpop.f32.mrb[60].mxu1 }
0x1090   : > { %v5386_v54 = vmul.f32 0.17677669, %v8368_v39  ;;  %v5286_v37 = vpop.f32.mrb[61].mxu1 }
0x1091   : > { %v8369_v30 = vpop.f32.mrb[62].mxu1  ;;  %v12158_v1 = vmul.f32 0.17677669, %v5286_v37 }
0x1092   : > { %v5289_v63 = vpop.f32.mrb[63].mxu1  ;;  %v5414_v58 = vsel %vm3260_vm5, %v5386_v54, -inf }
0x1093   : > { %5415 = vmax.xlane.f32.xlu0 %v5414_v58  ;;  %v8376_v20 = vpop.f32.mrb[80].mxu0  ;;  %v5408_v32 = vsel %vm3260_vm5, %v12158_v1, -inf  ;;  %v12171_v51 = vmul.f32 0.17677669, %v5289_v63 }
0x1094   : > { %v5364_v0 = vpop.f32.mrb[81].mxu0  ;;  %v12173_v15 = vmul.f32 0.17677669, %v8376_v20 }
0x1095   : > { %v8377_v62 = vpop.f32.mrb[82].mxu0  ;;  %v5411_v9 = vsel %vm3260_vm5, %v12171_v51, -inf  ;;  %v12177_v26 = vmul.f32 0.17677669, %v5364_v0 }
0x1096   : > { %v5367_v41 = vpop.f32.mrb[83].mxu0  ;;  %v5423_v53 = vsel %vm3260_vm5, %v12173_v15, -inf }
0x1097   : > { %v12163_v8 = vmul.f32 0.17677669, %v5367_v41  ;;  %5409 = vmax.xlane.f32.xlu0 %v5408_v32 }
0x1099   : > { %v5420_v7 = vsel %vm3260_vm5, %v12163_v8, -inf }
0x109b   : > { %5530 = vrot.lane.b32.xlu1 %v11387_v2, %s10297_s15  ;;  %5421 = vmax.xlane.f32.xlu0 %v5420_v7  ;;  %v5417_v2 = vsel %vm3260_vm5, %v12177_v26, -inf }
0x10b1   : > { %5592 = vrot.lane.b32.xlu0 %v11391_v35, %s10297_s15 }
0x10bf   : > { %5412 = vmax.xlane.f32.xlu1 %v5411_v9 }
0x10c3   : > { %5424 = vmax.xlane.f32.xlu1 %v5423_v53 }
0x10c7   : > { %5418 = vmax.xlane.f32.xlu1 %v5417_v2 }
0x10d8   : > { %5532 = vrot.lane.b32.xlu1 %v11385_v3, %s10297_s15 }
0x10dc   : > { %5594 = vrot.lane.b32.xlu1 %v11539_v28, %s10297_s15 }
0x1110   : > { %v5398_v35 = vpop.xlane.xlu0 %5397 }
0x1111   : > { %v5428_v50 = vsub.f32 %v5380_v43, %v5398_v35 }
0x1113   : > { %v5442_v21 = vmul.f32 1.442695, %v5428_v50  ;;  %v5395_v18 = vpop.xlane.xlu1 %5394 }
0x1114   : > { %v5427_v46 = vsub.f32 %v5379_v36, %v5395_v18  ;;  %v5392_v6 = vpop.xlane.xlu0 %5391 }
0x1115   : > { %9192 = vpow2.f32 %v5442_v21  ;;  %v5426_v61 = vsub.f32 %v5378_v4, %v5392_v6 }
0x1116   : > { %v5440_v48 = vmul.f32 1.442695, %v5427_v46 }
0x1117   : > { %v5438_v39 = vmul.f32 1.442695, %v5426_v61  ;;  %v5407_v37 = vpop.xlane.xlu1 %5406 }
0x1118   : > { %9194 = vpow2.f32 %v5440_v48  ;;  %v5431_v30 = vsub.f32 %v5383_v47, %v5407_v37  ;;  %v5401_v63 = vpop.xlane.xlu0 %5400 }
0x1119   : > { %9196 = vpow2.f32 %v5438_v39  ;;  %v5429_v58 = vsub.f32 %v5381_v59, %v5401_v63 }
0x111a   : > { %v5448_v3 = vmul.f32 1.442695, %v5431_v30 }
0x111b   : > { %v5444_v20 = vmul.f32 1.442695, %v5429_v58  ;;  %v5531_v0 = vpop.permute.xlu1 %5530 }
0x111c   : > { %9198 = vpow2.f32 %v5448_v3  ;;  %8378 = vmatprep.subr.bf16.mxu1 %v5531_v0  ;;  %v5404_v28 = vpop.xlane.xlu0 %5403 }
0x111d   : > { %8379 = vmatpush3.bf16.msra.mxu1 %v5531_v0  ;;  %9200 = vpow2.f32 %v5444_v20  ;;  %v5430_v4 = vsub.f32 %v12153_v52, %v5404_v28 }
0x111f   : > { %v12187_v43 = vpop.eup %9192  ;;  %v5446_v32 = vmul.f32 1.442695, %v5430_v4 }
0x1120   : > { %v5416_v36 = vpop.xlane.xlu0 %5415  ;;  %v5468_v62 = vsel %vm3260_vm5, %v12187_v43, 0.0 }
0x1121   : > { %v5434_v47 = vsub.f32 %v5386_v54, %v5416_v36  ;;  %5469 = vadd.xlane.f32.xlu0 %v5468_v62 }
0x1122   : > { %v12192_v41 = vpop.eup %9194 }
0x1123   : > { %v12194_v59 = vpop.eup %9196  ;;  %v5454_v7 = vmul.f32 1.442695, %v5434_v47  ;;  %v5465_v9 = vsel %vm3260_vm5, %v12192_v41, 0.0 }
0x1124   : > { %5466 = vadd.xlane.f32.xlu1 %v5465_v9  ;;  %v5410_v53 = vpop.xlane.xlu0 %5409  ;;  %v5462_v52 = vsel %vm3260_vm5, %v12194_v59, 0.0 }
0x1125   : > { %9202 = vpow2.f32 %v5454_v7  ;;  %v5432_v2 = vsub.f32 %v12158_v1, %v5410_v53  ;;  %5463 = vadd.xlane.f32.xlu0 %v5462_v52 }
0x1126   : > { %v12201_v54 = vpop.eup %9198  ;;  %9204 = vpow2.f32 %v5446_v32 }
0x1127   : > { %v5450_v35 = vmul.f32 1.442695, %v5432_v2  ;;  %v5477_v50 = vsel %vm3260_vm5, %v12201_v54, 0.0  ;;  %v12205_v21 = vpop.eup %9200 }
0x1128   : > { %5478 = vadd.xlane.f32.xlu1 %v5477_v50  ;;  %v5422_v18 = vpop.xlane.xlu0 %5421  ;;  %v5471_v46 = vsel %vm3260_vm5, %v12205_v21, 0.0 }
0x1129   : > { %9206 = vpow2.f32 %v5450_v35  ;;  %v5436_v3 = vsub.f32 %v12163_v8, %v5422_v18 }
0x112b   : > { %v5458_v4 = vmul.f32 1.442695, %v5436_v3 }
0x112c   : > { %5472 = vadd.xlane.f32.xlu1 %v5471_v46  ;;  %v5593_v6 = vpop.permute.xlu0 %5592  ;;  %v13034_v46 = vpack.i.bf16 %v11899_v10, %v11897_v23 }
0x112d   : > { %8386 = vmatprep.subr.bf16.mxu0 %v5593_v6 }
0x112e   : > { %8387 = vmatpush3.bf16.msra.mxu0 %v5593_v6  ;;  %v13035_v6 = vpack.i.bf16 %v11905_v16, %v11895_v38 }
0x112f   : > { %v12209_v1 = vpop.eup %9202 }
0x1130   : > { %v5486_v61 = vsel %vm3260_vm5, %v12209_v1, 0.0  ;;  %v12213_v48 = vpop.eup %9204 }
0x1131   : > { %5487 = vadd.xlane.f32.xlu0 %v5486_v61  ;;  %v5474_v39 = vsel %vm3260_vm5, %v12213_v48, 0.0 }
0x1133   : > { %v12217_v37 = vpop.eup %9206 }
0x1134   : > { %v5480_v30 = vsel %vm3260_vm5, %v12217_v37, 0.0 }
0x1135   : > { %5475 = vadd.xlane.f32.xlu0 %v5474_v39 }
0x1139   : > { %5481 = vadd.xlane.f32.xlu0 %v5480_v30 }
0x114c   : > { %v5413_v63 = vpop.xlane.xlu1 %5412 }
0x114d   : > { %v5433_v58 = vsub.f32 %v12171_v51, %v5413_v63 }
0x114f   : > { %v5452_v20 = vmul.f32 1.442695, %v5433_v58 }
0x1150   : > { %v5425_v0 = vpop.xlane.xlu1 %5424 }
0x1151   : > { %9208 = vpow2.f32 %v5452_v20  ;;  %v5437_v28 = vsub.f32 %v12173_v15, %v5425_v0 }
0x1153   : > { %v5460_v36 = vmul.f32 1.442695, %v5437_v28 }
0x1154   : > { %v5419_v62 = vpop.xlane.xlu1 %5418 }
0x1155   : > { %9210 = vpow2.f32 %v5460_v36  ;;  %v5435_v47 = vsub.f32 %v12177_v26, %v5419_v62 }
0x1156   : > { %9212 = vpow2.f32 %v5458_v4 }
0x1157   : > { %v5456_v32 = vmul.f32 1.442695, %v5435_v47 }
0x1158   : > { %v5533_v7 = vpop.permute.xlu1 %5532 }
0x1159   : > { %9214 = vpow2.f32 %v5456_v32  ;;  %v5542_v9 = vsel %vm3410_vm4, %v5533_v7, 0  ;;  %8498 = vmatprep.subr.msk.bf16.mxu1 %vm3410_vm4, %v5533_v7 }
0x115a   : > { %8381 = vmatpush3.bf16.msra.mxu1 %v5542_v9 }
0x115b   : > { %v12227_v8 = vpop.eup %9208 }
0x115c   : > { %v5595_v51 = vpop.permute.xlu1 %5594  ;;  %v5483_v15 = vsel %vm3260_vm5, %v12227_v8, 0.0 }
0x115d   : > { %v5604_v53 = vsel %vm3410_vm4, %v5595_v51, 0  ;;  %5484 = vadd.xlane.f32.xlu1 %v5483_v15  ;;  %8499 = vmatprep.subr.msk.bf16.mxu0 %vm3410_vm4, %v5595_v51 }
0x115e   : > { %8389 = vmatpush3.bf16.msra.mxu0 %v5604_v53 }
0x115f   : > { %v12233_v26 = vpop.eup %9210 }
0x1160   : > { %v5495_v52 = vsel %vm3260_vm5, %v12233_v26, 0.0  ;;  %v12237_v2 = vpop.eup %9212 }
0x1161   : > { %5496 = vadd.xlane.f32.xlu0 %v5495_v52  ;;  %v5492_v18 = vsel %vm3260_vm5, %v12237_v2, 0.0 }
0x1163   : > { %v12239_v35 = vpop.eup %9214 }
0x1164   : > { %v5489_v50 = vsel %vm3260_vm5, %v12239_v35, 0.0 }
0x1165   : > { %5490 = vadd.xlane.f32.xlu1 %v5489_v50  ;;  %5493 = vadd.xlane.f32.xlu0 %v5492_v18 }
0x1176   : > { %5656 = vrot.lane.b32.xlu1 %v11404_v27, %s10297_s15 }
0x117a   : > { %5716 = vrot.lane.b32.xlu1 %v11335_v49, %s10297_s15 }
0x117b   : > { %5654 = vrot.lane.b32.xlu0 %v11288_v60, %s10297_s15 }
0x117e   : > { %5718 = vrot.lane.b32.xlu1 %v11551_v12, %s10297_s15 }
0x117f   : > { %8879 = vrot.lane.b32.xlu0 %v13034_v46, %s10297_s15 }
0x1182   : > { %8884 = vrot.lane.b32.xlu1 %v13035_v6, %s10297_s15 }
0x1183   : > { %8889 = vrot.lane.b32.xlu0 %v8888_v22, %s10296_s8 }
0x1186   : > { %8894 = vrot.lane.b32.xlu1 %v8893_v42, %s10296_s8 }
0x11ae   : > { %v5470_v60 = vpop.xlane.xlu0 %5469 }
0x11af   : > { %9216 = vrcp.f32 %v5470_v60 }
0x11b1   : > { %v5467_v49 = vpop.xlane.xlu1 %5466 }
0x11b2   : > { %9218 = vrcp.f32 %v5467_v49  ;;  %v5464_v27 = vpop.xlane.xlu0 %5463 }
0x11b3   : > { %9220 = vrcp.f32 %v5464_v27 }
0x11b5   : > { %v5479_v12 = vpop.xlane.xlu1 %5478 }
0x11b6   : > { %9222 = vrcp.f32 %v5479_v12  ;;  %v9001_v12 = vld [vmem:[%s11049_s9 + $0x8] sm:$0xff]  }
0x11b9   : > { %v9217_v23 = vpop.eup %9216  ;;  %v5473_v56 = vpop.xlane.xlu1 %5472 }
0x11ba   : > { %v5512_v16 = vmul.f32 %v9217_v23, %v12187_v43  ;;  %9224 = vrcp.f32 %v5473_v56  ;;  %v9002_v23 = vld [vmem:[%s11049_s9 + $0x10] sm:$0xff]  }
0x11bc   : > { %v9219_v38 = vpop.eup %9218  ;;  %v5523_v40 = vpack.c.bf16 %v5512_v16, %v5512_v16 }
0x11bd   : > { %v9221_v10 = vpop.eup %9220  ;;  %v5511_v11 = vmul.f32 %v9219_v38, %v12192_v41  ;;  %v9004_v38 = vld [vmem:[%s11049_s9 + $0x20] sm:$0xff]  }
0x11be   : > { %v5488_v22 = vpop.xlane.xlu0 %5487  ;;  %v5510_v61 = vmul.f32 %v9221_v10, %v12194_v59  ;;  %v9005_v10 = vld [vmem:[%s11049_s9 + $0x28] sm:$0xff]  }
0x11c0   : > { %v5522_v33 = vpack.c.bf16 %v5511_v11, %v5510_v61  ;;  %v9223_v39 = vpop.eup %9222  ;;  %v9006_v61 = vld [vmem:[%s11049_s9 + $0x30] sm:$0xff]  }
0x11c1   : > { %v5515_v43 = vmul.f32 %v9223_v39, %v12201_v54 }
0x11c2   : > { %8382 = vmatprep.mubr.msk.bf16.mxu1 %vm3260_vm5, %v5522_v33  ;;  %v5476_v42 = vpop.xlane.xlu0 %5475 }
0x11c3   : > { %9226 = vrcp.f32 %v5476_v42  ;;  %8383 = vmatmul.mubr.msk.bf16.vlgmr.msra.gmra.mrb[64].mxu1 %vm3260_vm5, %v5523_v40  ;;  %v5525_v3 = vpack.c.bf16 %v5515_v43, %v5515_v43  ;;  %v9007_v40 = vld [vmem:[%s11049_s9 + $0x38] sm:$0xff]   ;;  %v13037_v42 = vpack.i.bf16 %v11903_v55, %v11909_v14 }
0x11c4   : > { %v9225_v30 = vpop.eup %9224  ;;  %v13039_v55 = vld [vmem:[#allocation100_spill] sm:$0xff] }
0x11c5   : > { %v5513_v41 = vmul.f32 %v9225_v30, %v12205_v21 }
0x11c6   : > { %v5482_v20 = vpop.xlane.xlu0 %5481 }
0x11c7   : > { %9228 = vrcp.f32 %v5482_v20  ;;  %v13042_v20 = vld [vmem:[#allocation99_spill] sm:$0xff] }
0x11cd   : > { %v9227_v63 = vpop.eup %9226 }
0x11ce   : > { %v5514_v58 = vmul.f32 %v9227_v63, %v12213_v48 }
0x11d0   : > { %v5524_v59 = vpack.c.bf16 %v5514_v58, %v5513_v41 }
0x11d1   : > { %v9229_v54 = vpop.eup %9228 }
0x11d2   : > { %8390 = vmatprep.mubr.msk.bf16.mxu0 %vm3260_vm5, %v5524_v59  ;;  %v5516_v32 = vmul.f32 %v9229_v54, %v12217_v37  ;;  %v13038_v59 = vld [vmem:[#allocation101_spill] sm:$0xff] }
0x11d3   : > { %8391 = vmatmul.mubr.msk.bf16.vlgmr.msra.gmra.mrb[84].mxu0 %vm3260_vm5, %v5525_v3  ;;  %v13040_v14 = vpack.i.bf16 %v13038_v59, %v13039_v55  ;;  %v13041_v3 = vld [vmem:[#allocation103_spill] sm:$0xff] }
0x11d4   : > { %v13043_v34 = vpack.i.bf16 %v13041_v3, %v13042_v20 }
0x11ea   : > { %v5485_v0 = vpop.xlane.xlu1 %5484 }
0x11eb   : > { %9230 = vrcp.f32 %v5485_v0 }
0x11ec   : > { %9232 = vrcp.f32 %v5488_v22 }
0x11ee   : > { %v5497_v28 = vpop.xlane.xlu0 %5496 }
0x11ef   : > { %9234 = vrcp.f32 %v5497_v28 }
0x11f2   : > { %v5491_v4 = vpop.xlane.xlu1 %5490  ;;  %v5494_v36 = vpop.xlane.xlu0 %5493 }
0x11f3   : > { %9236 = vrcp.f32 %v5491_v4 }
0x11f4   : > { %9238 = vrcp.f32 %v5494_v36 }
0x11f5   : > { %v9231_v21 = vpop.eup %9230 }
0x11f6   : > { %v9233_v48 = vpop.eup %9232  ;;  %v5657_v62 = vpop.permute.xlu1 %5656  ;;  %v5517_v7 = vmul.f32 %v9231_v21, %v12227_v8 }
0x11f7   : > { %v5655_v47 = vpop.permute.xlu0 %5654  ;;  %v5518_v51 = vmul.f32 %v9233_v48, %v12209_v1  ;;  %v5666_v52 = vsel %vm3410_vm4, %v5657_v62, 0 }
0x11f8   : > { %8394 = vmatprep.subr.bf16.mxu1 %v5655_v47  ;;  %v5526_v9 = vpack.c.bf16 %v5517_v7, %v5516_v32 }
0x11f9   : > { %8395 = vmatpush3.bf16.msra.mxu1 %v5655_v47  ;;  %v9235_v53 = vpop.eup %9234  ;;  %v5527_v37 = vpack.c.bf16 %v5518_v51, %v5518_v51 }
0x11fa   : > { %8500 = vmatprep.subr.msk.bf16.mxu1 %vm3410_vm4, %v5657_v62  ;;  %v5717_v15 = vpop.permute.xlu1 %5716  ;;  %8398 = vmatprep.mubr.msk.bf16.mxu1 %vm3260_vm5, %v5526_v9  ;;  %v5521_v18 = vmul.f32 %v9235_v53, %v12233_v26  ;;  %v13036_v26 = vmov 0  }
0x11fb   : > { %8402 = vmatprep.subr.bf16.mxu0 %v5717_v15 }
0x11fc   : > { %8403 = vmatpush3.bf16.msra.mxu0 %v5717_v15  ;;  %v5529_v27 = vpack.c.bf16 %v5521_v18, %v5521_v18  ;;  %v13047_v15 = vld [vmem:[#allocation89_spill] sm:$0xff] }
0x11fd   : > { %8397 = vmatpush3.bf16.msra.mxu1 %v5666_v52  ;;  %v9237_v50 = vpop.eup %9236  ;;  %v13048_v52 = vld [vmem:[#allocation88_spill] sm:$0xff] }
0x11fe   : > { %v9239_v8 = vpop.eup %9238  ;;  %v5719_v46 = vpop.permute.xlu1 %5718  ;;  %v5519_v1 = vmul.f32 %v9237_v50, %v12239_v35  ;;  %v9000_v35 = vld [vmem:[%s11049_s9] sm:$0xff]  }
0x11ff   : > { %v5728_v6 = vsel %vm3410_vm4, %v5719_v46, 0  ;;  %8501 = vmatprep.subr.msk.bf16.mxu0 %vm3410_vm4, %v5719_v46  ;;  %v5520_v60 = vmul.f32 %v9239_v8, %v12237_v2  ;;  %8410 = vmatprep.subr.bf16.mxu1 %v9000_v35  ;;  %v9003_v2 = vld [vmem:[%s11049_s9 + $0x18] sm:$0xff]  }
0x1200   : > { %8399 = vmatmul.mubr.msk.bf16.vlgmr.msra.gmra.mrb[68].mxu1 %vm3260_vm5, %v5527_v37  ;;  %8405 = vmatpush3.bf16.msra.mxu0 %v5728_v6 }
0x1201   : > { %v5528_v49 = vpack.c.bf16 %v5520_v60, %v5519_v1  ;;  %8411 = vmatpush3.bf16.msra.mxu1 %v9000_v35 }
0x1202   : > { %8412 = vmatprep.subr.bf16.mxu1 %v9001_v12  ;;  %v8885_v8 = vpop.permute.xlu1 %8884 }
0x1203   : > { %8406 = vmatprep.mubr.msk.bf16.mxu0 %vm3260_vm5, %v5528_v49  ;;  %v8887_v49 = vunpack.i.h.bf16 %v8885_v8 }
0x1204   : > { %8407 = vmatmul.mubr.msk.bf16.vlgmr.msra.gmra.mrb[88].mxu0 %vm3260_vm5, %v5529_v27  ;;  %v8886_v27 = vunpack.i.l.bf16 %v8885_v8 }
0x1205   : > { %6459 = vmatprep.mubr.bf16.mxu0 %v13036_v26  ;;  %8413 = vmatpush3.bf16.msra.mxu1 %v9001_v12 }
0x1206   : > { %8414 = vmatprep.subr.bf16.mxu1 %v9002_v23  ;;  %v8895_v60 = vpop.permute.xlu1 %8894 }
0x1207   : > { %v8897_v12 = vunpack.i.h.bf16 %v8895_v60 }
0x1209   : > { %8415 = vmatpush3.bf16.msra.mxu1 %v9002_v23  ;;  %v8896_v23 = vunpack.i.l.bf16 %v8895_v60 }
0x120a   : > { %8416 = vmatprep.subr.bf16.mxu1 %v9003_v2 }
0x120d   : > { %8417 = vmatpush3.bf16.msra.mxu1 %v9003_v2 }
0x120e   : > { %8418 = vmatprep.subr.bf16.mxu1 %v9004_v38 }
0x1211   : > { %8419 = vmatpush3.bf16.msra.mxu1 %v9004_v38 }
0x1212   : > { %8420 = vmatprep.subr.bf16.mxu1 %v9005_v10 }
0x1215   : > { %8421 = vmatpush3.bf16.msra.mxu1 %v9005_v10 }
0x1216   : > { %8422 = vmatprep.subr.bf16.mxu1 %v9006_v61 }
0x1219   : > { %8423 = vmatpush3.bf16.msra.mxu1 %v9006_v61  ;;  %v13050_v61 = vld [vmem:[#allocation87_spill] sm:$0xff] }
0x121a   : > { %8424 = vmatprep.subr.bf16.mxu1 %v9007_v40 }
0x121d   : > { %8425 = vmatpush3.bf16.msra.mxu1 %v9007_v40 }
0x1296   : > { %v8384_v16 = vpop.f32.mrb[64].mxu1 }
0x1297   : > { %v5578_v11 = vpop.f32.mrb[65].mxu1 }
0x1298   : > { %v8385_v56 = vpop.f32.mrb[66].mxu1 }
0x1299   : > { %v5581_v22 = vpop.f32.mrb[67].mxu1  ;;  %v13049_v56 = vld [vmem:[#allocation91_spill] sm:$0xff] }
0x129a   : > { %v8898_v33 = vpack.i.bf16 %v5581_v22, %v5578_v11  ;;  %v5925_v22 = vsel %vm2977_vm3, %v13049_v56, %v8887_v49 }
0x129c   : > { %8899 = vrot.lane.b32.xlu0 %v8898_v33, %s10295_s26  ;;  %v5924_v33 = vsel %vm2977_vm3, %v13050_v61, %v8886_v27 }
0x12a0   : > { %8909 = vrot.lane.b32.xlu0 %v13037_v42, %s10297_s15 }
0x12a4   : > { %8919 = vrot.lane.b32.xlu0 %v8918_v13, %s10296_s8 }
0x12a6   : > { %v8392_v39 = vpop.f32.mrb[84].mxu0 }
0x12a7   : > { %v5640_v30 = vpop.f32.mrb[85].mxu0 }
0x12a8   : > { %v8903_v63 = vpack.i.bf16 %v5640_v30, %v8384_v16  ;;  %v8393_v43 = vpop.f32.mrb[86].mxu0  ;;  %v5938_v30 = vsel %vm5934_vm6, %v5925_v22, %v8897_v12 }
0x12a9   : > { %v5643_v41 = vpop.f32.mrb[87].mxu0 }
0x12aa   : > { %v8928_v58 = vpack.i.bf16 %v8392_v39, %v5643_v41  ;;  %8904 = vrot.lane.b32.xlu1 %v8903_v63, %s10295_s26  ;;  %v5937_v39 = vsel %vm5934_vm6, %v5924_v33, %v8896_v23  ;;  %v13051_v63 = vld [vmem:[#allocation90_spill] sm:$0xff]  ;;  %v13052_v41 = vld [vmem:[#allocation92_spill] sm:$0xff] }
0x12ab   : > { %v13057_v33 = vld [vmem:[#allocation96_spill] sm:$0xff] }
0x12ac   : > { %8929 = vrot.lane.b32.xlu0 %v8928_v58, %s10295_s26 }
0x12ae   : > { %8914 = vrot.lane.b32.xlu1 %v13040_v14, %s10297_s15 }
0x12b0   : > { %8939 = vrot.lane.b32.xlu0 %v13043_v34, %s10297_s15 }
0x12b2   : > { %8924 = vrot.lane.b32.xlu1 %v8923_v19, %s10296_s8  ;;  %v8880_v19 = vpop.permute.xlu0 %8879 }
0x12b3   : > { %v8881_v32 = vunpack.i.l.bf16 %v8880_v19 }
0x12b4   : > { %8949 = vrot.lane.b32.xlu0 %v8948_v45, %s10296_s8  ;;  %v8882_v45 = vunpack.i.h.bf16 %v8880_v19  ;;  %v13053_v19 = vld [vmem:[#allocation95_spill] sm:$0xff] }
0x12b5   : > { %v5922_v50 = vsel %vm2977_vm3, %v13048_v52, %v8881_v32 }
0x12b6   : > { %v8890_v31 = vpop.permute.xlu0 %8889  ;;  %v5923_v53 = vsel %vm2977_vm3, %v13047_v15, %v8882_v45  ;;  %v13054_v45 = vld [vmem:[#allocation94_spill] sm:$0xff] }
0x12b7   : > { %v8892_v7 = vunpack.i.h.bf16 %v8890_v31  ;;  %v8891_v9 = vunpack.i.l.bf16 %v8890_v31 }
0x12b9   : > { %v5935_v57 = vsel %vm5934_vm6, %v5922_v50, %v8891_v9 }
0x12d3   : > { %v8400_v5 = vpop.f32.mrb[68].mxu1 }
0x12d4   : > { %v5702_v13 = vpop.f32.mrb[69].mxu1 }
0x12d5   : > { %v8401_v0 = vpop.f32.mrb[70].mxu1 }
0x12d6   : > { %v5705_v28 = vpop.f32.mrb[71].mxu1 }
0x12d7   : > { %v8933_v4 = vpack.i.bf16 %v5705_v28, %v5702_v13  ;;  %v8408_v36 = vpop.f32.mrb[88].mxu0 }
0x12d8   : > { %v5764_v54 = vpop.f32.mrb[89].mxu0 }
0x12d9   : > { %8934 = vrot.lane.b32.xlu1 %v8933_v4, %s10295_s26  ;;  %v8958_v21 = vpack.i.bf16 %v5764_v54, %v8400_v5  ;;  %v8409_v48 = vpop.f32.mrb[90].mxu0 }
0x12da   : > { %v5767_v62 = vpop.f32.mrb[91].mxu0 }
0x12db   : > { %v8963_v47 = vpack.i.bf16 %v8408_v36, %v5767_v62  ;;  %8959 = vrot.lane.b32.xlu0 %v8958_v21, %s10295_s26 }
0x12dd   : > { %8944 = vrot.lane.b32.xlu1 %v13046_v29, %s10297_s15 }
0x12e1   : > { %8954 = vrot.lane.b32.xlu1 %v8953_v24, %s10296_s8  ;;  %v5936_v24 = vsel %vm5934_vm6, %v5923_v53, %v8892_v7 }
0x12e5   : > { %8964 = vrot.lane.b32.xlu1 %v8963_v47, %s10295_s26 }
0x130e   : > { %v8900_v51 = vpop.permute.xlu0 %8899 }
0x130f   : > { %v8902_v37 = vunpack.i.h.bf16 %v8900_v51  ;;  %v8901_v17 = vunpack.i.l.bf16 %v8900_v51 }
0x1311   : > { %v5948_v18 = vsel %vm5947_vm7, %v5935_v57, %v8901_v17  ;;  %v5949_v46 = vsel %vm5947_vm7, %v5936_v24, %v8902_v37  ;;  %v13055_v17 = vld [vmem:[#allocation97_spill] sm:$0xff] }
0x1312   : > { %v5960_v1 = vpack.c.bf16 %v5949_v46, %v5948_v18  ;;  %v8910_v6 = vpop.permute.xlu0 %8909  ;;  %v13056_v46 = vld [vmem:[#allocation93_spill] sm:$0xff] }
0x1313   : > { %v8912_v2 = vunpack.i.h.bf16 %v8910_v6  ;;  %v8911_v38 = vunpack.i.l.bf16 %v8910_v6 }
0x1314   : > { %8426 = vmatprep.mubr.bf16.mxu1 %v5960_v1 }
0x1315   : > { %v5927_v43 = vsel %vm2977_vm3, %v13051_v63, %v8912_v2  ;;  %v5926_v58 = vsel %vm2977_vm3, %v13052_v41, %v8911_v38 }
0x1316   : > { %v8920_v35 = vpop.permute.xlu0 %8919 }
0x1317   : > { %v8922_v10 = vunpack.i.h.bf16 %v8920_v35  ;;  %v8921_v16 = vunpack.i.l.bf16 %v8920_v35 }
0x1319   : > { %v5939_v34 = vsel %vm5934_vm6, %v5926_v58, %v8921_v16  ;;  %v5940_v5 = vsel %vm5934_vm6, %v5927_v43, %v8922_v10 }
0x131c   : > { %v8905_v11 = vpop.permute.xlu1 %8904 }
0x131d   : > { %v8907_v40 = vunpack.i.h.bf16 %v8905_v11  ;;  %v8906_v42 = vunpack.i.l.bf16 %v8905_v11 }
0x131e   : > { %v8930_v59 = vpop.permute.xlu0 %8929 }
0x131f   : > { %v5951_v55 = vsel %vm5947_vm7, %v5938_v30, %v8907_v40  ;;  %v5950_v14 = vsel %vm5947_vm7, %v5937_v39, %v8906_v42  ;;  %v8932_v3 = vunpack.i.h.bf16 %v8930_v59  ;;  %v8931_v20 = vunpack.i.l.bf16 %v8930_v59  ;;  %v13058_v42 = vld [vmem:[#allocation98_spill] sm:$0xff] }
0x1320   : > { %v5961_v13 = vpack.c.bf16 %v5951_v55, %v5950_v14  ;;  %v8915_v36 = vpop.permute.xlu1 %8914  ;;  %v7703_v14 = vld [vmem:[%s1299_s14] ss:$0 sm:$0xff] }
0x1321   : > { %v5952_v0 = vsel %vm5947_vm7, %v5939_v34, %v8931_v20  ;;  %v5953_v28 = vsel %vm5947_vm7, %v5940_v5, %v8932_v3  ;;  %v8917_v48 = vunpack.i.h.bf16 %v8915_v36  ;;  %v8916_v62 = vunpack.i.l.bf16 %v8915_v36  ;;  %v6118_v34 = vld [vmem:[#allocation2] sm:$0xff] }
0x1322   : > { %8427 = vmatmul.mubr.bf16.vlgmr.msra.gmra.mrb[72].mxu1 %v5961_v13  ;;  %v5962_v4 = vpack.c.bf16 %v5953_v28, %v5952_v0  ;;  %v8940_v54 = vpop.permute.xlu0 %8939  ;;  %v6119_v28 = vld [vmem:[#allocation2 + $0x8] sm:$0xff] }
0x1323   : > { %v8942_v29 = vunpack.i.h.bf16 %v8940_v54  ;;  %v5929_v31 = vsel %vm2977_vm3, %v13053_v19, %v8917_v48  ;;  %v5928_v32 = vsel %vm2977_vm3, %v13054_v45, %v8916_v62  ;;  %v8941_v7 = vunpack.i.l.bf16 %v8940_v54 }
0x1324   : > { %8430 = vmatprep.mubr.bf16.mxu1 %v5962_v4  ;;  %v8925_v21 = vpop.permute.xlu1 %8924 }
0x1325   : > { %v8927_v47 = vunpack.i.h.bf16 %v8925_v21  ;;  %v8926_v25 = vunpack.i.l.bf16 %v8925_v21  ;;  %v5931_v57 = vsel %vm2977_vm3, %v13055_v17, %v8942_v29  ;;  %v5930_v1 = vsel %vm2977_vm3, %v13056_v46, %v8941_v7  ;;  %v6120_v21 = vld [vmem:[#allocation2 + $0x10] sm:$0xff]  ;;  %v6125_v17 = vld [vmem:[#allocation2 + $0x38] sm:$0xff]  ;;  %v6126_v46 = vld [vmem:[#allocation2 + $0x40] sm:$0xff] }
0x1326   : > { %v8950_v44 = vpop.permute.xlu0 %8949 }
0x1327   : > { %v8952_v51 = vunpack.i.h.bf16 %v8950_v44  ;;  %v8951_v15 = vunpack.i.l.bf16 %v8950_v44  ;;  %v5941_v50 = vsel %vm5934_vm6, %v5928_v32, %v8926_v25  ;;  %v5942_v37 = vsel %vm5934_vm6, %v5929_v31, %v8927_v47  ;;  %v6121_v25 = vld [vmem:[#allocation2 + $0x18] sm:$0xff]  ;;  %v6122_v31 = vld [vmem:[#allocation2 + $0x20] sm:$0xff] }
0x1329   : > { %v5943_v35 = vsel %vm5934_vm6, %v5930_v1, %v8951_v15  ;;  %v5944_v12 = vsel %vm5934_vm6, %v5931_v57, %v8952_v51 }
0x134b   : > { %v8935_v9 = vpop.permute.xlu1 %8934 }
0x134c   : > { %v8937_v53 = vunpack.i.h.bf16 %v8935_v9  ;;  %v8936_v52 = vunpack.i.l.bf16 %v8935_v9  ;;  %v6123_v9 = vld [vmem:[#allocation2 + $0x28] sm:$0xff] }
0x134d   : > { %v8960_v24 = vpop.permute.xlu0 %8959 }
0x134e   : > { %v5954_v8 = vsel %vm5947_vm7, %v5941_v50, %v8936_v52  ;;  %v5955_v18 = vsel %vm5947_vm7, %v5942_v37, %v8937_v53  ;;  %v8962_v6 = vunpack.i.h.bf16 %v8960_v24  ;;  %v8961_v60 = vunpack.i.l.bf16 %v8960_v24  ;;  %v6124_v52 = vld [vmem:[#allocation2 + $0x30] sm:$0xff] }
0x134f   : > { %v8945_v49 = vpop.permute.xlu1 %8944  ;;  %v5963_v27 = vpack.c.bf16 %v5955_v18, %v5954_v8 }
0x1350   : > { %v5956_v23 = vsel %vm5947_vm7, %v5943_v35, %v8961_v60  ;;  %v5957_v2 = vsel %vm5947_vm7, %v5944_v12, %v8962_v6  ;;  %v8947_v16 = vunpack.i.h.bf16 %v8945_v49  ;;  %v8946_v11 = vunpack.i.l.bf16 %v8945_v49 }
0x1351   : > { %8431 = vmatmul.mubr.bf16.gmra.mrb[76].mxu1 %v5963_v27  ;;  %v5964_v38 = vpack.c.bf16 %v5957_v2, %v5956_v23  ;;  %v6127_v27 = vld [vmem:[#allocation2 + $0x48] sm:$0xff]  ;;  %v6128_v2 = vld [vmem:[#allocation2 + $0x50] sm:$0xff] }
0x1352   : > { %v5933_v40 = vsel %vm2977_vm3, %v13057_v33, %v8947_v16  ;;  %v5932_v39 = vsel %vm2977_vm3, %v13058_v42, %v8946_v11  ;;  %v9011_v33 = vld [vmem:[%s11054_s1 + $0x10] ss:$8 sps:$4 sm:$0xff]  }
0x1353   : > { %v8955_v10 = vpop.permute.xlu1 %8954  ;;  %8434 = vmatprep.mubr.bf16.mxu1 %v5964_v38 }
0x1354   : > { %v8957_v56 = vunpack.i.h.bf16 %v8955_v10  ;;  %v8956_v22 = vunpack.i.l.bf16 %v8955_v10  ;;  %v6129_v10 = vld [vmem:[#allocation2 + $0x58] sm:$0xff] }
0x1356   : > { %v5945_v43 = vsel %vm5934_vm6, %v5932_v39, %v8956_v22  ;;  %v5946_v41 = vsel %vm5934_vm6, %v5933_v40, %v8957_v56  ;;  %v9008_v56 = vld [vmem:[%s11054_s1] ss:$8 sps:$4 sm:$0xff]   ;;  %v9010_v22 = vld [vmem:[%s11054_s1 + $0x4] ss:$8 sps:$4 sm:$0xff]  }
0x1357   : > { %v8965_v61 = vpop.permute.xlu1 %8964  ;;  %6427 = vmatprep.subr.bf16.mxu0 %v9010_v22 }
0x1358   : > { %v8967_v30 = vunpack.i.h.bf16 %v8965_v61  ;;  %v8966_v63 = vunpack.i.l.bf16 %v8965_v61  ;;  %v9013_v61 = vld [vmem:[%s11054_s1 + $0x14] ss:$8 sps:$4 sm:$0xff]   ;;  %6428 = vmatpush1.bf16.msra.mxu0 %v9008_v56 }
0x1359   : > { %6429 = vmatprep.subr.bf16.mxu0 %v9013_v61  ;;  %v9032_v61 = vld [vmem:[%s11058_s4 + $0x40] sm:$0xff]  }
0x135a   : > { %v5958_v58 = vsel %vm5947_vm7, %v5945_v43, %v8966_v63  ;;  %v5959_v59 = vsel %vm5947_vm7, %v5946_v41, %v8967_v30  ;;  %7982 = vmatprep.subr.bf16.mxu1 %v9032_v61 }
0x135b   : > { %v5965_v55 = vpack.c.bf16 %v5959_v59, %v5958_v58 }
0x135c   : > { %6430 = vmatpush1.bf16.msra.mxu0 %v9011_v33  ;;  %v9033_v33 = vld [vmem:[%s11058_s4] sm:$0xff]  }
0x135d   : > { %8435 = vmatmul.mubr.bf16.gmra.mrb[80].mxu1 %v5965_v55 }
0x135e   : > { %7983 = vmatpush3.bf16.msra.mxu1 %v9033_v33 }
0x13f5   : > { %v8428_v3 = vpop.f32.mrb[72].mxu1 }
0x13f6   : > { %v6071_v20 = vpop.f32.mrb[73].mxu1  ;;  %v6080_v4 = vadd.f32 %v8428_v3, %v7703_v14 }
0x13f7   : > { %v6072_v5 = vadd.f32 %v7703_v14, %v6071_v20  ;;  %v8429_v13 = vpop.f32.mrb[74].mxu1 }
0x13f8   : > { %v6074_v0 = vpop.f32.mrb[75].mxu1  ;;  %v12395_v62 = vadd.f32 %v6120_v21, %v6080_v4  ;;  %v6083_v47 = vadd.f32 %v8429_v13, %v7703_v14  ;;  %v9019_v4 = vld [vmem:[%s11054_s1 + $0x34] ss:$8 sps:$4 sm:$0xff]   ;;  %v9020_v21 = vld [vmem:[%s11054_s1 + $0x40] ss:$8 sps:$4 sm:$0xff]  }
0x13f9   : > { %v12390_v36 = vadd.f32 %v6118_v34, %v6072_v5  ;;  %v6075_v54 = vadd.f32 %v7703_v14, %v6074_v0  ;;  %v9016_v0 = vld [vmem:[%s11054_s1 + $0x24] ss:$8 sps:$4 sm:$0xff]  }
0x13fa   : > { %v12399_v44 = vadd.f32 %v6121_v25, %v6083_v47  ;;  %6431 = vmatprep.subr.bf16.mxu0 %v9016_v0  ;;  %v9028_v47 = vld [vmem:[%s11054_s1 + $0x64] ss:$8 sps:$4 sm:$0xff]   ;;  %v9026_v25 = vld [vmem:[%s11054_s1 + $0x60] ss:$8 sps:$4 sm:$0xff]  }
0x13fb   : > { %v12392_v48 = vadd.f32 %v6119_v28, %v6075_v54  ;;  %6144 = vadd.xlane.f32.xlu0 %v12390_v36  ;;  %v9014_v28 = vld [vmem:[%s11054_s1 + $0x20] ss:$8 sps:$4 sm:$0xff]   ;;  %v9022_v54 = vld [vmem:[%s11054_s1 + $0x44] ss:$8 sps:$4 sm:$0xff]  }
0x13fc   : > { %6432 = vmatpush1.bf16.msra.mxu0 %v9014_v28 }
0x13fd   : > { %6146 = vadd.xlane.f32.xlu1 %v12392_v48  ;;  %6433 = vmatprep.subr.bf16.mxu0 %v9019_v4 }
0x13ff   : > { %6148 = vadd.xlane.f32.xlu0 %v12395_v62 }
0x1403   : > { %6150 = vadd.xlane.f32.xlu0 %v12399_v44 }
0x1424   : > { %v8432_v29 = vpop.f32.mrb[76].mxu1 }
0x1425   : > { %v6087_v19 = vpop.f32.mrb[77].mxu1  ;;  %v6096_v51 = vadd.f32 %v8432_v29, %v7703_v14  ;;  %v9029_v29 = vld [vmem:[%s11054_s1 + $0x70] ss:$8 sps:$4 sm:$0xff]  }
0x1426   : > { %v6088_v45 = vadd.f32 %v7703_v14, %v6087_v19  ;;  %v8433_v32 = vpop.f32.mrb[78].mxu1 }
0x1427   : > { %v6090_v7 = vpop.f32.mrb[79].mxu1  ;;  %v6099_v50 = vadd.f32 %v8433_v32, %v7703_v14  ;;  %v12407_v57 = vadd.f32 %v6124_v52, %v6096_v51 }
0x1428   : > { %v12402_v15 = vadd.f32 %v6122_v31, %v6088_v45  ;;  %v6091_v53 = vadd.f32 %v7703_v14, %v6090_v7 }
0x1429   : > { %v12410_v24 = vadd.f32 %v6125_v17, %v6099_v50 }
0x142a   : > { %v12404_v37 = vadd.f32 %v6123_v9, %v6091_v53  ;;  %6152 = vadd.xlane.f32.xlu0 %v12402_v15 }
0x142c   : > { %6154 = vadd.xlane.f32.xlu1 %v12404_v37 }
0x142e   : > { %6156 = vadd.xlane.f32.xlu0 %v12407_v57 }
0x1430   : > { %v8436_v8 = vpop.f32.mrb[80].mxu1  ;;  %6158 = vadd.xlane.f32.xlu1 %v12410_v24 }
0x1431   : > { %v6103_v18 = vpop.f32.mrb[81].mxu1  ;;  %v6112_v35 = vadd.f32 %v8436_v8, %v7703_v14 }
0x1432   : > { %v6104_v1 = vadd.f32 %v7703_v14, %v6103_v18  ;;  %v8437_v6 = vpop.f32.mrb[82].mxu1 }
0x1433   : > { %v6115_v60 = vadd.f32 %v8437_v6, %v7703_v14  ;;  %v6106_v49 = vpop.f32.mrb[83].mxu1  ;;  %v12419_v16 = vadd.f32 %v6128_v2, %v6112_v35 }
0x1434   : > { %v12414_v12 = vadd.f32 %v6126_v46, %v6104_v1  ;;  %v6107_v23 = vadd.f32 %v7703_v14, %v6106_v49 }
0x1435   : > { %v12422_v11 = vadd.f32 %v6129_v10, %v6115_v60 }
0x1436   : > { %v12416_v38 = vadd.f32 %v6127_v27, %v6107_v23  ;;  %6160 = vadd.xlane.f32.xlu0 %v12414_v12 }
0x1438   : > { %6162 = vadd.xlane.f32.xlu1 %v12416_v38 }
0x143a   : > { %6164 = vadd.xlane.f32.xlu0 %v12419_v16 }
0x143c   : > { %6166 = vadd.xlane.f32.xlu1 %v12422_v11 }
0x1488   : > { %v6145_v40 = vpop.xlane.xlu0 %6144 }
0x1489   : > { %v6169_v42 = vmul.f32 0.0078125, %v6145_v40  ;;  %v9034_v40 = vld [vmem:[%s11058_s4 + $0x48] sm:$0xff]  }
0x148a   : > { %v6147_v39 = vpop.xlane.xlu1 %6146  ;;  %7984 = vmatprep.subr.bf16.mxu1 %v9034_v40 }
0x148b   : > { %v12431_v30 = vsub.f32 %v12390_v36, %v6169_v42  ;;  %v6170_v63 = vmul.f32 0.0078125, %v6147_v39  ;;  %v9017_v36 = vld [vmem:[%s11054_s1 + $0x30] ss:$8 sps:$4 sm:$0xff]  }
0x148c   : > { %v6149_v43 = vpop.xlane.xlu0 %6148  ;;  %6434 = vmatpush1.bf16.msra.mxu0 %v9017_v36  ;;  %v9036_v42 = vld [vmem:[%s11058_s4 + $0x50] sm:$0xff]  }
0x148d   : > { %v12434_v41 = vsub.f32 %v12392_v48, %v6170_v63  ;;  %v6171_v58 = vmul.f32 0.0078125, %v6149_v43  ;;  %v6193_v59 = vmul.f32 %v12431_v30, %v12431_v30  ;;  %6435 = vmatprep.subr.bf16.mxu0 %v9022_v54  ;;  %v9025_v48 = vld [vmem:[%s11054_s1 + $0x54] ss:$8 sps:$4 sm:$0xff]  }
0x148e   : > { %v9037_v39 = vld [vmem:[%s11058_s4 + $0x10] sm:$0xff]   ;;  %v9038_v63 = vld [vmem:[%s11058_s4 + $0x58] sm:$0xff]  }
0x148f   : > { %v12439_v55 = vsub.f32 %v12395_v62, %v6171_v58  ;;  %6205 = vadd.xlane.f32.xlu0 %v6193_v59  ;;  %v6194_v14 = vmul.f32 %v12434_v41, %v12434_v41  ;;  %v9023_v62 = vld [vmem:[%s11054_s1 + $0x50] ss:$8 sps:$4 sm:$0xff]   ;;  %v9039_v43 = vld [vmem:[%s11058_s4 + $0x18] sm:$0xff]   ;;  %v9040_v58 = vld [vmem:[%s11058_s4 + $0x60] sm:$0xff]  }
0x1490   : > { %v6151_v3 = vpop.xlane.xlu0 %6150  ;;  %6436 = vmatpush1.bf16.msra.mxu0 %v9020_v21  ;;  %v9041_v59 = vld [vmem:[%s11058_s4 + $0x20] sm:$0xff]  }
0x1491   : > { %v6172_v20 = vmul.f32 0.0078125, %v6151_v3  ;;  %6207 = vadd.xlane.f32.xlu1 %v6194_v14  ;;  %v6195_v34 = vmul.f32 %v12439_v55, %v12439_v55  ;;  %6437 = vmatprep.subr.bf16.mxu0 %v9025_v48  ;;  %v9042_v14 = vld [vmem:[%s11058_s4 + $0x68] sm:$0xff]  }
0x1493   : > { %v12446_v5 = vsub.f32 %v12399_v44, %v6172_v20  ;;  %6209 = vadd.xlane.f32.xlu0 %v6195_v34  ;;  %v9031_v44 = vld [vmem:[%s11054_s1 + $0x74] ss:$8 sps:$4 sm:$0xff]  }
0x1494   : > { %6438 = vmatpush1.bf16.msra.mxu0 %v9023_v62 }
0x1495   : > { %v6196_v13 = vmul.f32 %v12446_v5, %v12446_v5  ;;  %6439 = vmatprep.subr.bf16.mxu0 %v9028_v47 }
0x1497   : > { %6211 = vadd.xlane.f32.xlu1 %v6196_v13 }
0x1498   : > { %6440 = vmatpush1.bf16.msra.mxu0 %v9026_v25  ;;  %v12515_v25 = vld [vmem:[%s1307_s2] ss:$0 sm:$0xff] }
0x1499   : > { %6441 = vmatprep.subr.bf16.mxu0 %v9031_v44 }
0x149c   : > { %6442 = vmatpush1.bf16.msra.mxu0 %v9029_v29 }
0x14b7   : > { %v6153_v19 = vpop.xlane.xlu0 %6152 }
0x14b8   : > { %v6173_v31 = vmul.f32 0.0078125, %v6153_v19 }
0x14b9   : > { %v6155_v45 = vpop.xlane.xlu1 %6154 }
0x14ba   : > { %v12463_v32 = vsub.f32 %v12402_v15, %v6173_v31  ;;  %v6174_v7 = vmul.f32 0.0078125, %v6155_v45 }
0x14bb   : > { %v6157_v9 = vpop.xlane.xlu0 %6156 }
0x14bc   : > { %v12466_v51 = vsub.f32 %v12404_v37, %v6174_v7  ;;  %v6175_v53 = vmul.f32 0.0078125, %v6157_v9  ;;  %v6197_v52 = vmul.f32 %v12463_v32, %v12463_v32  ;;  %v12522_v7 = vld [vmem:[%s1315_s7] ss:$0 sm:$0xff] }
0x14bd   : > { %v6159_v50 = vpop.xlane.xlu1 %6158 }
0x14be   : > { %v12471_v17 = vsub.f32 %v12407_v57, %v6175_v53  ;;  %v6176_v8 = vmul.f32 0.0078125, %v6159_v50  ;;  %6213 = vadd.xlane.f32.xlu0 %v6197_v52  ;;  %v6198_v18 = vmul.f32 %v12466_v51, %v12466_v51 }
0x14c0   : > { %v12476_v15 = vsub.f32 %v12410_v24, %v6176_v8  ;;  %6215 = vadd.xlane.f32.xlu1 %v6198_v18  ;;  %v6199_v37 = vmul.f32 %v12471_v17, %v12471_v17 }
0x14c2   : > { %6217 = vadd.xlane.f32.xlu0 %v6199_v37  ;;  %v6200_v46 = vmul.f32 %v12476_v15, %v12476_v15 }
0x14c3   : > { %v6161_v1 = vpop.xlane.xlu0 %6160 }
0x14c4   : > { %v6177_v6 = vmul.f32 0.0078125, %v6161_v1  ;;  %6219 = vadd.xlane.f32.xlu1 %v6200_v46 }
0x14c5   : > { %v6163_v57 = vpop.xlane.xlu1 %6162 }
0x14c6   : > { %v12483_v60 = vsub.f32 %v12414_v12, %v6177_v6  ;;  %v6178_v49 = vmul.f32 0.0078125, %v6163_v57 }
0x14c7   : > { %v6165_v27 = vpop.xlane.xlu0 %6164 }
0x14c8   : > { %v12486_v24 = vsub.f32 %v12416_v38, %v6178_v49  ;;  %v6179_v35 = vmul.f32 0.0078125, %v6165_v27  ;;  %v6201_v23 = vmul.f32 %v12483_v60, %v12483_v60 }
0x14c9   : > { %v6167_v2 = vpop.xlane.xlu1 %6166 }
0x14ca   : > { %v12491_v10 = vsub.f32 %v12419_v16, %v6179_v35  ;;  %v6180_v56 = vmul.f32 0.0078125, %v6167_v2  ;;  %6221 = vadd.xlane.f32.xlu0 %v6201_v23  ;;  %v6202_v12 = vmul.f32 %v12486_v24, %v12486_v24 }
0x14cc   : > { %v12496_v38 = vsub.f32 %v12422_v11, %v6180_v56  ;;  %6223 = vadd.xlane.f32.xlu1 %v6202_v12  ;;  %v6203_v22 = vmul.f32 %v12491_v10, %v12491_v10  ;;  %v9035_v11 = vld [vmem:[%s11058_s4 + $0x8] sm:$0xff]  }
0x14cd   : > { %7985 = vmatpush3.bf16.msra.mxu1 %v9035_v11 }
0x14ce   : > { %6225 = vadd.xlane.f32.xlu0 %v6203_v22  ;;  %v6204_v16 = vmul.f32 %v12496_v38, %v12496_v38  ;;  %7986 = vmatprep.subr.bf16.mxu1 %v9036_v42 }
0x14d0   : > { %6227 = vadd.xlane.f32.xlu1 %v6204_v16 }
0x14d1   : > { %7987 = vmatpush3.bf16.msra.mxu1 %v9037_v39 }
0x14d2   : > { %7988 = vmatprep.subr.bf16.mxu1 %v9038_v63 }
0x14d5   : > { %7989 = vmatpush3.bf16.msra.mxu1 %v9039_v43 }
0x14d6   : > { %7990 = vmatprep.subr.bf16.mxu1 %v9040_v58 }
0x14d9   : > { %7991 = vmatpush3.bf16.msra.mxu1 %v9041_v59 }
0x14da   : > { %7992 = vmatprep.subr.bf16.mxu1 %v9042_v14 }
0x151c   : > { %v6206_v3 = vpop.xlane.xlu0 %6205 }
0x151d   : > { %v6229_v20 = vmul.f32 0.0078125, %v6206_v3 }
0x151e   : > { %v6208_v34 = vpop.xlane.xlu1 %6207 }
0x151f   : > { %v6241_v13 = vadd.f32 1e-05, %v6229_v20  ;;  %v6230_v0 = vmul.f32 0.0078125, %v6208_v34 }
0x1520   : > { %v6210_v28 = vpop.xlane.xlu0 %6209 }
0x1521   : > { %9240 = vrsqrt.f32 %v6241_v13  ;;  %v6242_v4 = vadd.f32 1e-05, %v6230_v0  ;;  %v6231_v36 = vmul.f32 0.0078125, %v6210_v28 }
0x1523   : > { %9242 = vrsqrt.f32 %v6242_v4  ;;  %v6243_v54 = vadd.f32 1e-05, %v6231_v36 }
0x1524   : > { %v6212_v21 = vpop.xlane.xlu1 %6211 }
0x1525   : > { %9244 = vrsqrt.f32 %v6243_v54  ;;  %v6232_v48 = vmul.f32 0.0078125, %v6212_v21 }
0x1527   : > { %v6244_v62 = vadd.f32 1e-05, %v6232_v48 }
0x1529   : > { %9246 = vrsqrt.f32 %v6244_v62 }
0x152b   : > { %v9241_v47 = vpop.eup %9240 }
0x152c   : > { %v6265_v44 = vmul.f32 %v9241_v47, %v12431_v30 }
0x152d   : > { %v9243_v29 = vpop.eup %9242 }
0x152e   : > { %v6266_v19 = vmul.f32 %v9243_v29, %v12434_v41  ;;  %v6283_v31 = vmul.f32 %v12515_v25, %v6265_v44 }
0x152f   : > { %v9245_v45 = vpop.eup %9244 }
0x1530   : > { %v6284_v9 = vmul.f32 %v12515_v25, %v6266_v19  ;;  %v12526_v53 = vadd.f32 %v12522_v7, %v6283_v31  ;;  %v6267_v50 = vmul.f32 %v9245_v45, %v12439_v55 }
0x1532   : > { %v12529_v52 = vadd.f32 %v12522_v7, %v6284_v9  ;;  %v6285_v18 = vmul.f32 %v12515_v25, %v6267_v50 }
0x1533   : > { %v9247_v30 = vpop.eup %9246 }
0x1534   : > { %v6313_v41 = vpack.c.bf16 %v12529_v52, %v12526_v53  ;;  %v6268_v8 = vmul.f32 %v9247_v30, %v12446_v5  ;;  %v12542_v1 = vadd.f32 %v12522_v7, %v6285_v18 }
0x1536   : > { %6460 = vmatmul.mubr.bf16.vlgmr.msra.gmra.mrb[92].mxu0 %v6313_v41  ;;  %v6286_v37 = vmul.f32 %v12515_v25, %v6268_v8 }
0x1537   : > { %6469 = vmatprep.mubr.bf16.mxu0 %v13036_v26 }
0x1538   : > { %v12539_v46 = vadd.f32 %v12522_v7, %v6286_v37 }
0x153a   : > { %v6314_v55 = vpack.c.bf16 %v12539_v46, %v12542_v1 }
0x153e   : > { %6470 = vmatmul.mubr.bf16.gmra.mrb[96].mxu0 %v6314_v55 }
0x153f   : > { %6479 = vmatprep.mubr.bf16.mxu0 %v13036_v26 }
0x154b   : > { %v6214_v5 = vpop.xlane.xlu0 %6213 }
0x154c   : > { %v6233_v6 = vmul.f32 0.0078125, %v6214_v5 }
0x154d   : > { %v6216_v57 = vpop.xlane.xlu1 %6215 }
0x154e   : > { %v6245_v49 = vadd.f32 1e-05, %v6233_v6  ;;  %v6234_v27 = vmul.f32 0.0078125, %v6216_v57  ;;  %v9043_v57 = vld [vmem:[%s11058_s4 + $0x28] sm:$0xff]  }
0x154f   : > { %v6218_v35 = vpop.xlane.xlu0 %6217  ;;  %7993 = vmatpush3.bf16.msra.mxu1 %v9043_v57 }
0x1550   : > { %9248 = vrsqrt.f32 %v6245_v49  ;;  %v6246_v23 = vadd.f32 1e-05, %v6234_v27  ;;  %v6235_v2 = vmul.f32 0.0078125, %v6218_v35  ;;  %v9044_v49 = vld [vmem:[%s11058_s4 + $0x70] sm:$0xff]   ;;  %v9046_v35 = vld [vmem:[%s11058_s4 + $0x78] sm:$0xff]  }
0x1551   : > { %v6220_v56 = vpop.xlane.xlu1 %6219  ;;  %v9045_v27 = vld [vmem:[%s11058_s4 + $0x30] sm:$0xff]   ;;  %7994 = vmatprep.subr.bf16.mxu1 %v9044_v49 }
0x1552   : > { %9250 = vrsqrt.f32 %v6246_v23  ;;  %v6247_v12 = vadd.f32 1e-05, %v6235_v2  ;;  %v6236_v22 = vmul.f32 0.0078125, %v6220_v56  ;;  %v6335_v23 = vld [vmem:[%s11056_s0] sm:$0x3] }
0x1553   : > { %7995 = vmatpush3.bf16.msra.mxu1 %v9045_v27  ;;  %v13059_v2 = vld [vmem:[#allocation86_spill] sm:$0xff] }
0x1554   : > { %9252 = vrsqrt.f32 %v6247_v12  ;;  %v6248_v16 = vadd.f32 1e-05, %v6236_v22  ;;  %7996 = vmatprep.subr.bf16.mxu1 %v9046_v35  ;;  %v13060_v56 = vsub.s32 0, %v13059_v2 }
0x1556   : > { %9254 = vrsqrt.f32 %v6248_v16  ;;  %v12606_v12 = vrot.slane %v6335_v23, %v13060_v56 }
0x1557   : > { %v6222_v61 = vpop.xlane.xlu0 %6221 }
0x1558   : > { %v6237_v33 = vmul.f32 0.0078125, %v6222_v61 }
0x1559   : > { %v6224_v40 = vpop.xlane.xlu1 %6223 }
0x155a   : > { %v9249_v11 = vpop.eup %9248  ;;  %v6249_v42 = vadd.f32 1e-05, %v6237_v33  ;;  %v6238_v39 = vmul.f32 0.0078125, %v6224_v40 }
0x155b   : > { %v6226_v63 = vpop.xlane.xlu0 %6225  ;;  %v6269_v43 = vmul.f32 %v9249_v11, %v12463_v32 }
0x155c   : > { %v9251_v58 = vpop.eup %9250  ;;  %9256 = vrsqrt.f32 %v6249_v42  ;;  %v6250_v59 = vadd.f32 1e-05, %v6238_v39  ;;  %v6239_v14 = vmul.f32 0.0078125, %v6226_v63 }
0x155d   : > { %v6228_v3 = vpop.xlane.xlu1 %6227  ;;  %v6270_v20 = vmul.f32 %v9251_v58, %v12466_v51  ;;  %v6287_v34 = vmul.f32 %v12515_v25, %v6269_v43 }
0x155e   : > { %v9253_v13 = vpop.eup %9252  ;;  %9258 = vrsqrt.f32 %v6250_v59  ;;  %v6251_v0 = vadd.f32 1e-05, %v6239_v14  ;;  %v6240_v28 = vmul.f32 0.0078125, %v6228_v3 }
0x155f   : > { %v6288_v4 = vmul.f32 %v12515_v25, %v6270_v20  ;;  %v12552_v32 = vadd.f32 %v12522_v7, %v6287_v34  ;;  %v6271_v48 = vmul.f32 %v9253_v13, %v12471_v17 }
0x1560   : > { %v9255_v36 = vpop.eup %9254  ;;  %9260 = vrsqrt.f32 %v6251_v0  ;;  %v6252_v54 = vadd.f32 1e-05, %v6240_v28 }
0x1561   : > { %v12555_v21 = vadd.f32 %v12522_v7, %v6288_v4  ;;  %v6272_v51 = vmul.f32 %v9255_v36, %v12476_v15  ;;  %v6289_v44 = vmul.f32 %v12515_v25, %v6271_v48 }
0x1562   : > { %9262 = vrsqrt.f32 %v6252_v54 }
0x1563   : > { %v6315_v62 = vpack.c.bf16 %v12555_v21, %v12552_v32  ;;  %v6290_v47 = vmul.f32 %v12515_v25, %v6272_v51  ;;  %v12568_v17 = vadd.f32 %v12522_v7, %v6289_v44 }
0x1565   : > { %6480 = vmatmul.mubr.bf16.gmra.mrb[100].mxu0 %v6315_v62  ;;  %v12565_v19 = vadd.f32 %v12522_v7, %v6290_v47 }
0x1566   : > { %v9257_v29 = vpop.eup %9256  ;;  %6489 = vmatprep.mubr.bf16.mxu0 %v13036_v26 }
0x1567   : > { %v6273_v15 = vmul.f32 %v9257_v29, %v12483_v60  ;;  %v6316_v50 = vpack.c.bf16 %v12565_v19, %v12568_v17 }
0x1568   : > { %v9259_v31 = vpop.eup %9258 }
0x1569   : > { %v6274_v45 = vmul.f32 %v9259_v31, %v12486_v24  ;;  %v6291_v18 = vmul.f32 %v12515_v25, %v6273_v15 }
0x156a   : > { %v9261_v9 = vpop.eup %9260 }
0x156b   : > { %v6292_v30 = vmul.f32 %v12515_v25, %v6274_v45  ;;  %v6275_v41 = vmul.f32 %v9261_v9, %v12491_v10  ;;  %v12588_v5 = vadd.f32 %v12522_v7, %v6291_v18 }
0x156c   : > { %v9263_v8 = vpop.eup %9262 }
0x156d   : > { %6490 = vmatmul.mubr.bf16.gmra.mrb[104].mxu0 %v6316_v50  ;;  %v6276_v37 = vmul.f32 %v9263_v8, %v12496_v38  ;;  %v6293_v60 = vmul.f32 %v12515_v25, %v6275_v41  ;;  %v12581_v24 = vadd.f32 %v12522_v7, %v6292_v30 }
0x156e   : > { %6499 = vmatprep.mubr.bf16.mxu0 %v13036_v26 }
0x156f   : > { %v6294_v55 = vmul.f32 %v12515_v25, %v6276_v37  ;;  %v12585_v10 = vadd.f32 %v12522_v7, %v6293_v60  ;;  %v6317_v6 = vpack.c.bf16 %v12581_v24, %v12588_v5 }
0x1571   : > { %v12591_v38 = vadd.f32 %v12522_v7, %v6294_v55  ;;  %v9047_v7 = vld [vmem:[%s11058_s4 + $0x38] sm:$0xff]  }
0x1572   : > { %7997 = vmatpush3.bf16.msra.mxu1 %v9047_v7 }
0x1573   : > { %v6318_v25 = vpack.c.bf16 %v12591_v38, %v12585_v10 }
0x1575   : > { %6500 = vmatmul.mubr.bf16.gmra.mrb[108].mxu0 %v6317_v6 }
0x1576   : > { %6509 = vmatprep.mubr.bf16.mxu0 %v13036_v26  ;;  %v13061_v26 = vsub.s32 1, %v13059_v2 }
0x1578   : > { %v12610_v22 = vrot.slane %v6335_v23, %v13061_v26 }
0x157d   : > { %6510 = vmatmul.mubr.bf16.gmra.mrb[112].mxu0 %v6318_v25 }
0x1609   : > { %v6461_v16 = vpop.f32.mrb[92].mxu0 }
0x160a   : > { %v6462_v61 = vadd.f32 %v6461_v16, %v12606_v12  ;;  %v6463_v33 = vpop.f32.mrb[93].mxu0 }
0x160b   : > { %v6464_v40 = vadd.f32 %v6463_v33, %v12610_v22  ;;  %v6465_v11 = vpop.f32.mrb[94].mxu0 }
0x160c   : > { %v6466_v42 = vadd.f32 %v6465_v11, %v12606_v12  ;;  %v6467_v39 = vpop.f32.mrb[95].mxu0  ;;  %v6520_v43 = vmax.f32 %v6462_v61, 0.0 }
0x160d   : > { %v6468_v63 = vadd.f32 %v6467_v39, %v12610_v22  ;;  %v6521_v59 = vmax.f32 %v6464_v40, 0.0 }
0x160e   : > { %v6522_v58 = vmax.f32 %v6466_v42, 0.0 }
0x160f   : > { %v6523_v14 = vmax.f32 %v6468_v63, 0.0 }
0x1610   : > { %v6544_v3 = vpack.c.bf16 %v6522_v58, %v6520_v43 }
0x1611   : > { %v6545_v20 = vpack.c.bf16 %v6523_v14, %v6521_v59  ;;  %v6471_v34 = vpop.f32.mrb[96].mxu0 }
0x1612   : > { %v6472_v13 = vadd.f32 %v6471_v34, %v12606_v12  ;;  %v6473_v0 = vpop.f32.mrb[97].mxu0 }
0x1613   : > { %v6474_v28 = vadd.f32 %v6473_v0, %v12610_v22  ;;  %v6475_v4 = vpop.f32.mrb[98].mxu0  ;;  %6723 = vmatprep.mubr.bf16.mxu1 %v6545_v20 }
0x1614   : > { %v6476_v36 = vadd.f32 %v6475_v4, %v12606_v12  ;;  %v6477_v54 = vpop.f32.mrb[99].mxu0  ;;  %6724 = vmatmul.mubr.bf16.vlgmr.msra.gmra.mrb[84].mxu1 %v6544_v3  ;;  %v6524_v51 = vmax.f32 %v6472_v13, 0.0 }
0x1615   : > { %v6478_v48 = vadd.f32 %v6477_v54, %v12610_v22  ;;  %v6525_v47 = vmax.f32 %v6474_v28, 0.0 }
0x1616   : > { %v6526_v62 = vmax.f32 %v6476_v36, 0.0 }
0x1617   : > { %v6527_v44 = vmax.f32 %v6478_v48, 0.0 }
0x1618   : > { %v6546_v29 = vpack.c.bf16 %v6526_v62, %v6524_v51 }
0x1619   : > { %v6547_v31 = vpack.c.bf16 %v6527_v44, %v6525_v47 }
0x161b   : > { %6731 = vmatprep.mubr.bf16.mxu1 %v6547_v31 }
0x161c   : > { %6732 = vmatmul.mubr.bf16.gmra.mrb[88].mxu1 %v6546_v29 }
0x1638   : > { %v6481_v15 = vpop.f32.mrb[100].mxu0 }
0x1639   : > { %v6482_v45 = vadd.f32 %v6481_v15, %v12606_v12  ;;  %v6483_v9 = vpop.f32.mrb[101].mxu0 }
0x163a   : > { %v6484_v50 = vadd.f32 %v6483_v9, %v12610_v22  ;;  %v6485_v30 = vpop.f32.mrb[102].mxu0 }
0x163b   : > { %v6486_v41 = vadd.f32 %v6485_v30, %v12606_v12  ;;  %v6487_v8 = vpop.f32.mrb[103].mxu0  ;;  %v6528_v37 = vmax.f32 %v6482_v45, 0.0 }
0x163c   : > { %v6488_v18 = vadd.f32 %v6487_v8, %v12610_v22  ;;  %v6529_v55 = vmax.f32 %v6484_v50, 0.0 }
0x163d   : > { %v6530_v60 = vmax.f32 %v6486_v41, 0.0 }
0x163e   : > { %v6531_v6 = vmax.f32 %v6488_v18, 0.0  ;;  %v12638_v18 = vld [vmem:[%s1350_s5] ss:$0 sm:$0xff] }
0x163f   : > { %v6548_v25 = vpack.c.bf16 %v6530_v60, %v6528_v37 }
0x1640   : > { %v6549_v57 = vpack.c.bf16 %v6531_v6, %v6529_v55  ;;  %v6491_v49 = vpop.f32.mrb[104].mxu0 }
0x1641   : > { %v6492_v27 = vadd.f32 %v6491_v49, %v12606_v12  ;;  %v6493_v35 = vpop.f32.mrb[105].mxu0 }
0x1642   : > { %v6494_v7 = vadd.f32 %v6493_v35, %v12610_v22  ;;  %v6495_v23 = vpop.f32.mrb[106].mxu0  ;;  %6739 = vmatprep.mubr.bf16.mxu1 %v6549_v57 }
0x1643   : > { %v6496_v2 = vadd.f32 %v6495_v23, %v12606_v12  ;;  %v6497_v56 = vpop.f32.mrb[107].mxu0  ;;  %6740 = vmatmul.mubr.bf16.gmra.mrb[92].mxu1 %v6548_v25  ;;  %v6532_v16 = vmax.f32 %v6492_v27, 0.0 }
0x1644   : > { %v6498_v26 = vadd.f32 %v6497_v56, %v12610_v22  ;;  %v6533_v33 = vmax.f32 %v6494_v7, 0.0 }
0x1645   : > { %v6534_v61 = vmax.f32 %v6496_v2, 0.0 }
0x1646   : > { %v6535_v40 = vmax.f32 %v6498_v26, 0.0 }
0x1647   : > { %v6550_v11 = vpack.c.bf16 %v6534_v61, %v6532_v16 }
0x1648   : > { %v6551_v42 = vpack.c.bf16 %v6535_v40, %v6533_v33  ;;  %v6501_v39 = vpop.f32.mrb[108].mxu0 }
0x1649   : > { %v6502_v63 = vadd.f32 %v6501_v39, %v12606_v12  ;;  %v6503_v43 = vpop.f32.mrb[109].mxu0 }
0x164a   : > { %v6504_v58 = vadd.f32 %v6503_v43, %v12610_v22  ;;  %v6505_v59 = vpop.f32.mrb[110].mxu0  ;;  %6747 = vmatprep.mubr.bf16.mxu1 %v6551_v42 }
0x164b   : > { %v6506_v14 = vadd.f32 %v6505_v59, %v12606_v12  ;;  %v6507_v3 = vpop.f32.mrb[111].mxu0  ;;  %6748 = vmatmul.mubr.bf16.gmra.mrb[96].mxu1 %v6550_v11  ;;  %v6536_v34 = vmax.f32 %v6502_v63, 0.0 }
0x164c   : > { %v6508_v20 = vadd.f32 %v6507_v3, %v12610_v22  ;;  %v6537_v0 = vmax.f32 %v6504_v58, 0.0 }
0x164d   : > { %v6538_v13 = vmax.f32 %v6506_v14, 0.0 }
0x164e   : > { %v6539_v28 = vmax.f32 %v6508_v20, 0.0 }
0x164f   : > { %v6552_v4 = vpack.c.bf16 %v6538_v13, %v6536_v34 }
0x1650   : > { %v6553_v36 = vpack.c.bf16 %v6539_v28, %v6537_v0  ;;  %v6511_v54 = vpop.f32.mrb[112].mxu0 }
0x1651   : > { %v6512_v48 = vadd.f32 %v6511_v54, %v12606_v12  ;;  %v6513_v51 = vpop.f32.mrb[113].mxu0 }
0x1652   : > { %v6514_v62 = vadd.f32 %v6513_v51, %v12610_v22  ;;  %v6515_v47 = vpop.f32.mrb[114].mxu0  ;;  %6755 = vmatprep.mubr.bf16.mxu1 %v6553_v36 }
0x1653   : > { %v6516_v44 = vadd.f32 %v6515_v47, %v12606_v12  ;;  %v6517_v29 = vpop.f32.mrb[115].mxu0  ;;  %6756 = vmatmul.mubr.bf16.gmra.mrb[100].mxu1 %v6552_v4  ;;  %v6540_v15 = vmax.f32 %v6512_v48, 0.0 }
0x1654   : > { %v6518_v31 = vadd.f32 %v6517_v29, %v12610_v22  ;;  %v6541_v9 = vmax.f32 %v6514_v62, 0.0 }
0x1655   : > { %v6542_v45 = vmax.f32 %v6516_v44, 0.0 }
0x1656   : > { %v6543_v50 = vmax.f32 %v6518_v31, 0.0 }
0x1657   : > { %v6554_v30 = vpack.c.bf16 %v6542_v45, %v6540_v15 }
0x1658   : > { %v6555_v41 = vpack.c.bf16 %v6543_v50, %v6541_v9 }
0x165a   : > { %6763 = vmatprep.mubr.bf16.mxu1 %v6555_v41 }
0x165b   : > { %6764 = vmatmul.mubr.bf16.gmra.mrb[104].mxu1 %v6554_v30 }
0x16e7   : > { %v7998_v8 = vpop.f32.mrb[84].mxu1 }
0x16e8   : > { %v7999_v37 = vpop.f32.mrb[85].mxu1 }
0x16e9   : > { %v8000_v60 = vadd.f32 %v7999_v37, %v7998_v8  ;;  %v8001_v55 = vpop.f32.mrb[86].mxu1 }
0x16ea   : > { %v8002_v12 = vpop.f32.mrb[87].mxu1 }
0x16eb   : > { %v6726_v6 = vadd.f32 %v8000_v60, %v12638_v18  ;;  %v8003_v25 = vadd.f32 %v8002_v12, %v8001_v55 }
0x16ed   : > { %v6729_v22 = vadd.f32 %v8003_v25, %v12638_v18  ;;  %v12643_v57 = vadd.f32 %v6726_v6, %v12526_v53 }
0x16ef   : > { %6786 = vadd.xlane.f32.xlu0 %v12643_v57  ;;  %v8004_v49 = vpop.f32.mrb[88].mxu1  ;;  %v12647_v27 = vadd.f32 %v6729_v22, %v12529_v52 }
0x16f0   : > { %v8005_v35 = vpop.f32.mrb[89].mxu1 }
0x16f1   : > { %v8006_v7 = vadd.f32 %v8005_v35, %v8004_v49  ;;  %6788 = vadd.xlane.f32.xlu1 %v12647_v27  ;;  %v8007_v23 = vpop.f32.mrb[90].mxu1 }
0x16f2   : > { %v8008_v2 = vpop.f32.mrb[91].mxu1 }
0x16f3   : > { %v6734_v56 = vadd.f32 %v8006_v7, %v12638_v18  ;;  %v8009_v26 = vadd.f32 %v8008_v2, %v8007_v23 }
0x16f5   : > { %v6737_v16 = vadd.f32 %v8009_v26, %v12638_v18  ;;  %v12653_v53 = vadd.f32 %v6734_v56, %v12542_v1 }
0x16f7   : > { %6790 = vadd.xlane.f32.xlu0 %v12653_v53  ;;  %v12657_v61 = vadd.f32 %v6737_v16, %v12539_v46 }
0x16f9   : > { %6792 = vadd.xlane.f32.xlu1 %v12657_v61 }
0x1716   : > { %v8010_v52 = vpop.f32.mrb[92].mxu1 }
0x1717   : > { %v8011_v33 = vpop.f32.mrb[93].mxu1 }
0x1718   : > { %v8012_v40 = vadd.f32 %v8011_v33, %v8010_v52  ;;  %v8013_v11 = vpop.f32.mrb[94].mxu1 }
0x1719   : > { %v8014_v42 = vpop.f32.mrb[95].mxu1 }
0x171a   : > { %v6742_v39 = vadd.f32 %v8012_v40, %v12638_v18  ;;  %v8015_v63 = vadd.f32 %v8014_v42, %v8013_v11 }
0x171c   : > { %v6745_v43 = vadd.f32 %v8015_v63, %v12638_v18  ;;  %v12663_v1 = vadd.f32 %v6742_v39, %v12552_v32 }
0x171e   : > { %6794 = vadd.xlane.f32.xlu0 %v12663_v1  ;;  %v8016_v58 = vpop.f32.mrb[96].mxu1  ;;  %v6777_v46 = vadd.f32 %v6745_v43, %v12555_v21 }
0x171f   : > { %v8017_v59 = vpop.f32.mrb[97].mxu1 }
0x1720   : > { %v8018_v14 = vadd.f32 %v8017_v59, %v8016_v58  ;;  %6796 = vadd.xlane.f32.xlu1 %v6777_v46  ;;  %v8019_v3 = vpop.f32.mrb[98].mxu1 }
0x1721   : > { %v8020_v20 = vpop.f32.mrb[99].mxu1 }
0x1722   : > { %v6750_v34 = vadd.f32 %v8018_v14, %v12638_v18  ;;  %v8021_v13 = vadd.f32 %v8020_v20, %v8019_v3 }
0x1724   : > { %v6753_v0 = vadd.f32 %v8021_v13, %v12638_v18  ;;  %v6778_v28 = vadd.f32 %v6750_v34, %v12568_v17 }
0x1726   : > { %6798 = vadd.xlane.f32.xlu0 %v6778_v28  ;;  %v8022_v32 = vpop.f32.mrb[100].mxu1  ;;  %v6779_v4 = vadd.f32 %v6753_v0, %v12565_v19 }
0x1727   : > { %v8023_v36 = vpop.f32.mrb[101].mxu1 }
0x1728   : > { %v8024_v54 = vadd.f32 %v8023_v36, %v8022_v32  ;;  %6800 = vadd.xlane.f32.xlu1 %v6779_v4  ;;  %v8025_v21 = vpop.f32.mrb[102].mxu1 }
0x1729   : > { %v8026_v48 = vpop.f32.mrb[103].mxu1 }
0x172a   : > { %v6758_v51 = vadd.f32 %v8024_v54, %v12638_v18  ;;  %v8027_v62 = vadd.f32 %v8026_v48, %v8025_v21 }
0x172c   : > { %v6761_v47 = vadd.f32 %v8027_v62, %v12638_v18  ;;  %v6780_v44 = vadd.f32 %v6758_v51, %v12588_v5 }
0x172e   : > { %6802 = vadd.xlane.f32.xlu0 %v6780_v44  ;;  %v8028_v29 = vpop.f32.mrb[104].mxu1  ;;  %v6781_v17 = vadd.f32 %v6761_v47, %v12581_v24 }
0x172f   : > { %v8029_v31 = vpop.f32.mrb[105].mxu1 }
0x1730   : > { %v8030_v15 = vadd.f32 %v8029_v31, %v8028_v29  ;;  %6804 = vadd.xlane.f32.xlu1 %v6781_v17  ;;  %v8031_v19 = vpop.f32.mrb[106].mxu1 }
0x1731   : > { %v8032_v45 = vpop.f32.mrb[107].mxu1 }
0x1732   : > { %v6766_v9 = vadd.f32 %v8030_v15, %v12638_v18  ;;  %v8033_v50 = vadd.f32 %v8032_v45, %v8031_v19 }
0x1734   : > { %v6769_v30 = vadd.f32 %v8033_v50, %v12638_v18  ;;  %v6782_v41 = vadd.f32 %v6766_v9, %v12585_v10 }
0x1736   : > { %6806 = vadd.xlane.f32.xlu0 %v6782_v41  ;;  %v6783_v8 = vadd.f32 %v6769_v30, %v12591_v38  ;;  %v12734_v30 = vld [vmem:[%s1358_s6] ss:$0 sm:$0xff] }
0x1738   : > { %6808 = vadd.xlane.f32.xlu1 %v6783_v8 }
0x177c   : > { %v6787_v5 = vpop.xlane.xlu0 %6786 }
0x177d   : > { %v6810_v37 = vmul.f32 0.0078125, %v6787_v5  ;;  %v12739_v5 = vld [vmem:[%s1366_s12] ss:$0 sm:$0xff]  ;;  %s13062_s12 = sld [smem:[#allocation81_spill]] }
0x177e   : > { %v6789_v60 = vpop.xlane.xlu1 %6788 }
0x177f   : > { %v12680_v24 = vsub.f32 %v12643_v57, %v6810_v37  ;;  %v6811_v55 = vmul.f32 0.0078125, %v6789_v60 }
0x1781   : > { %v12683_v12 = vsub.f32 %v12647_v27, %v6811_v55  ;;  %v6834_v6 = vmul.f32 %v12680_v24, %v12680_v24 }
0x1783   : > { %6846 = vadd.xlane.f32.xlu0 %v6834_v6  ;;  %v6835_v10 = vmul.f32 %v12683_v12, %v12683_v12  ;;  %p7749_p1 = scmp.ge.s32.totalorder %s13062_s12, 1 }
0x1784   : > { %v6791_v18 = vpop.xlane.xlu0 %6790 }
0x1785   : > { %v6812_v38 = vmul.f32 0.0078125, %v6791_v18  ;;  %6848 = vadd.xlane.f32.xlu1 %v6835_v10 }
0x1786   : > { %v6793_v25 = vpop.xlane.xlu1 %6792 }
0x1787   : > { %v12690_v22 = vsub.f32 %v12653_v53, %v6812_v38  ;;  %v6813_v57 = vmul.f32 0.0078125, %v6793_v25 }
0x1789   : > { %v12693_v49 = vsub.f32 %v12657_v61, %v6813_v57  ;;  %v6836_v27 = vmul.f32 %v12690_v22, %v12690_v22 }
0x178b   : > { %6850 = vadd.xlane.f32.xlu0 %v6836_v27  ;;  %v6837_v35 = vmul.f32 %v12693_v49, %v12693_v49 }
0x178d   : > { %6852 = vadd.xlane.f32.xlu1 %v6837_v35 }
0x17ab   : > { %v6795_v7 = vpop.xlane.xlu0 %6794 }
0x17ac   : > { %v6814_v23 = vmul.f32 0.0078125, %v6795_v7 }
0x17ad   : > { %v6797_v2 = vpop.xlane.xlu1 %6796 }
0x17ae   : > { %v12700_v56 = vsub.f32 %v12663_v1, %v6814_v23  ;;  %v6815_v26 = vmul.f32 0.0078125, %v6797_v2 }
0x17b0   : > { %v12702_v16 = vsub.f32 %v6777_v46, %v6815_v26  ;;  %v6838_v53 = vmul.f32 %v12700_v56, %v12700_v56 }
0x17b2   : > { %6854 = vadd.xlane.f32.xlu0 %v6838_v53  ;;  %v6839_v61 = vmul.f32 %v12702_v16, %v12702_v16 }
0x17b3   : > { %v6799_v52 = vpop.xlane.xlu0 %6798 }
0x17b4   : > { %v6816_v33 = vmul.f32 0.0078125, %v6799_v52  ;;  %6856 = vadd.xlane.f32.xlu1 %v6839_v61 }
0x17b5   : > { %v6801_v40 = vpop.xlane.xlu1 %6800 }
0x17b6   : > { %v12708_v11 = vsub.f32 %v6778_v28, %v6816_v33  ;;  %v6817_v42 = vmul.f32 0.0078125, %v6801_v40 }
0x17b8   : > { %v12710_v39 = vsub.f32 %v6779_v4, %v6817_v42  ;;  %v6840_v63 = vmul.f32 %v12708_v11, %v12708_v11 }
0x17ba   : > { %6858 = vadd.xlane.f32.xlu0 %v6840_v63  ;;  %v6841_v43 = vmul.f32 %v12710_v39, %v12710_v39 }
0x17bb   : > { %v6803_v1 = vpop.xlane.xlu0 %6802 }
0x17bc   : > { %v6818_v58 = vmul.f32 0.0078125, %v6803_v1  ;;  %6860 = vadd.xlane.f32.xlu1 %v6841_v43 }
0x17bd   : > { %v6805_v46 = vpop.xlane.xlu1 %6804 }
0x17be   : > { %v12716_v59 = vsub.f32 %v6780_v44, %v6818_v58  ;;  %v6819_v14 = vmul.f32 0.0078125, %v6805_v46 }
0x17c0   : > { %v12718_v3 = vsub.f32 %v6781_v17, %v6819_v14  ;;  %v6842_v20 = vmul.f32 %v12716_v59, %v12716_v59 }
0x17c2   : > { %6862 = vadd.xlane.f32.xlu0 %v6842_v20  ;;  %v6843_v34 = vmul.f32 %v12718_v3, %v12718_v3 }
0x17c3   : > { %v6807_v13 = vpop.xlane.xlu0 %6806 }
0x17c4   : > { %v6820_v0 = vmul.f32 0.0078125, %v6807_v13  ;;  %6864 = vadd.xlane.f32.xlu1 %v6843_v34 }
0x17c5   : > { %v6809_v28 = vpop.xlane.xlu1 %6808 }
0x17c6   : > { %v12724_v32 = vsub.f32 %v6782_v41, %v6820_v0  ;;  %v6821_v4 = vmul.f32 0.0078125, %v6809_v28 }
0x17c8   : > { %v12726_v36 = vsub.f32 %v6783_v8, %v6821_v4  ;;  %v6844_v54 = vmul.f32 %v12724_v32, %v12724_v32 }
0x17ca   : > { %6866 = vadd.xlane.f32.xlu0 %v6844_v54  ;;  %v6845_v21 = vmul.f32 %v12726_v36, %v12726_v36 }
0x17cc   : > { %6868 = vadd.xlane.f32.xlu1 %v6845_v21 }
0x1810   : > { %v6847_v48 = vpop.xlane.xlu0 %6846 }
0x1811   : > { %v6870_v51 = vmul.f32 0.0078125, %v6847_v48 }
0x1812   : > { %v6849_v62 = vpop.xlane.xlu1 %6848 }
0x1813   : > { %v6882_v47 = vadd.f32 1e-05, %v6870_v51  ;;  %v6871_v44 = vmul.f32 0.0078125, %v6849_v62 }
0x1815   : > { %9264 = vrsqrt.f32 %v6882_v47  ;;  %v6883_v29 = vadd.f32 1e-05, %v6871_v44 }
0x1817   : > { %9266 = vrsqrt.f32 %v6883_v29 }
0x1818   : > { %v6851_v17 = vpop.xlane.xlu0 %6850 }
0x1819   : > { %v6872_v31 = vmul.f32 0.0078125, %v6851_v17 }
0x181a   : > { %v6853_v15 = vpop.xlane.xlu1 %6852 }
0x181b   : > { %v6884_v19 = vadd.f32 1e-05, %v6872_v31  ;;  %v6873_v45 = vmul.f32 0.0078125, %v6853_v15 }
0x181d   : > { %9268 = vrsqrt.f32 %v6884_v19  ;;  %v6885_v9 = vadd.f32 1e-05, %v6873_v45 }
0x181f   : > { %v9265_v50 = vpop.eup %9264  ;;  %9270 = vrsqrt.f32 %v6885_v9 }
0x1820   : > { %v6906_v41 = vmul.f32 %v9265_v50, %v12680_v24 }
0x1821   : > { %v9267_v8 = vpop.eup %9266 }
0x1822   : > { %v6924_v37 = vmul.f32 %v12734_v30, %v6906_v41  ;;  %v6907_v60 = vmul.f32 %v9267_v8, %v12683_v12 }
0x1824   : > { %v12744_v55 = vadd.f32 %v12739_v5, %v6924_v37  ;;  %v6925_v6 = vmul.f32 %v12734_v30, %v6907_v60 }
0x1826   : > { %v12748_v10 = vadd.f32 %v12739_v5, %v6925_v6  ;;  %6958 = vst [vmem:[#allocation2] sm:$0xff] (!%p7749_p1), %v12744_v55 }
0x1827   : > { %v9269_v18 = vpop.eup %9268 }
0x1828   : > { %v6908_v38 = vmul.f32 %v9269_v18, %v12690_v22  ;;  %6959 = vst [vmem:[#allocation2 + $0x8] sm:$0xff] (!%p7749_p1), %v12748_v10 }
0x1829   : > { %v9271_v24 = vpop.eup %9270 }
0x182a   : > { %v6926_v25 = vmul.f32 %v12734_v30, %v6908_v38  ;;  %v6909_v57 = vmul.f32 %v9271_v24, %v12693_v49 }
0x182c   : > { %v12754_v27 = vadd.f32 %v12739_v5, %v6926_v25  ;;  %v6927_v12 = vmul.f32 %v12734_v30, %v6909_v57 }
0x182e   : > { %v12758_v35 = vadd.f32 %v12739_v5, %v6927_v12  ;;  %6960 = vst [vmem:[#allocation2 + $0x10] sm:$0xff] (!%p7749_p1), %v12754_v27 }
0x1830   : > { %6961 = vst [vmem:[#allocation2 + $0x18] sm:$0xff] (!%p7749_p1), %v12758_v35 }
0x183f   : > { %v6855_v7 = vpop.xlane.xlu0 %6854 }
0x1840   : > { %v6874_v23 = vmul.f32 0.0078125, %v6855_v7 }
0x1841   : > { %v6857_v2 = vpop.xlane.xlu1 %6856 }
0x1842   : > { %v6886_v26 = vadd.f32 1e-05, %v6874_v23  ;;  %v6875_v53 = vmul.f32 0.0078125, %v6857_v2 }
0x1844   : > { %9272 = vrsqrt.f32 %v6886_v26  ;;  %v6887_v22 = vadd.f32 1e-05, %v6875_v53 }
0x1846   : > { %9274 = vrsqrt.f32 %v6887_v22 }
0x1847   : > { %v6859_v61 = vpop.xlane.xlu0 %6858 }
0x1848   : > { %v6876_v52 = vmul.f32 0.0078125, %v6859_v61 }
0x1849   : > { %v6861_v33 = vpop.xlane.xlu1 %6860 }
0x184a   : > { %v6888_v49 = vadd.f32 1e-05, %v6876_v52  ;;  %v6877_v40 = vmul.f32 0.0078125, %v6861_v33 }
0x184c   : > { %9276 = vrsqrt.f32 %v6888_v49  ;;  %v6889_v42 = vadd.f32 1e-05, %v6877_v40 }
0x184e   : > { %v9273_v63 = vpop.eup %9272  ;;  %9278 = vrsqrt.f32 %v6889_v42 }
0x184f   : > { %v6910_v43 = vmul.f32 %v9273_v63, %v12700_v56  ;;  %v6863_v1 = vpop.xlane.xlu0 %6862 }
0x1850   : > { %v9275_v58 = vpop.eup %9274  ;;  %v6878_v46 = vmul.f32 0.0078125, %v6863_v1 }
0x1851   : > { %v6928_v14 = vmul.f32 %v12734_v30, %v6910_v43  ;;  %v6911_v20 = vmul.f32 %v9275_v58, %v12702_v16  ;;  %v6865_v34 = vpop.xlane.xlu1 %6864 }
0x1852   : > { %v6890_v13 = vadd.f32 1e-05, %v6878_v46  ;;  %v6879_v0 = vmul.f32 0.0078125, %v6865_v34 }
0x1853   : > { %v6946_v28 = vadd.f32 %v12739_v5, %v6928_v14  ;;  %v6929_v4 = vmul.f32 %v12734_v30, %v6911_v20 }
0x1854   : > { %9280 = vrsqrt.f32 %v6890_v13  ;;  %v6891_v54 = vadd.f32 1e-05, %v6879_v0 }
0x1855   : > { %v6947_v21 = vadd.f32 %v12739_v5, %v6929_v4  ;;  %6962 = vst [vmem:[#allocation2 + $0x20] sm:$0xff] (!%p7749_p1), %v6946_v28 }
0x1856   : > { %v9277_v48 = vpop.eup %9276  ;;  %9282 = vrsqrt.f32 %v6891_v54 }
0x1857   : > { %v6912_v56 = vmul.f32 %v9277_v48, %v12708_v11  ;;  %v6867_v51 = vpop.xlane.xlu0 %6866  ;;  %6963 = vst [vmem:[#allocation2 + $0x28] sm:$0xff] (!%p7749_p1), %v6947_v21 }
0x1858   : > { %v9279_v62 = vpop.eup %9278  ;;  %v6880_v47 = vmul.f32 0.0078125, %v6867_v51 }
0x1859   : > { %v6930_v16 = vmul.f32 %v12734_v30, %v6912_v56  ;;  %v6913_v44 = vmul.f32 %v9279_v62, %v12710_v39  ;;  %v6869_v29 = vpop.xlane.xlu1 %6868 }
0x185a   : > { %v6892_v17 = vadd.f32 1e-05, %v6880_v47  ;;  %v6881_v31 = vmul.f32 0.0078125, %v6869_v29 }
0x185b   : > { %v6948_v15 = vadd.f32 %v12739_v5, %v6930_v16  ;;  %v6931_v19 = vmul.f32 %v12734_v30, %v6913_v44 }
0x185c   : > { %9284 = vrsqrt.f32 %v6892_v17  ;;  %v6893_v45 = vadd.f32 1e-05, %v6881_v31 }
0x185d   : > { %v6949_v9 = vadd.f32 %v12739_v5, %v6931_v19  ;;  %6964 = vst [vmem:[#allocation2 + $0x30] sm:$0xff] (!%p7749_p1), %v6948_v15 }
0x185e   : > { %v9281_v50 = vpop.eup %9280  ;;  %9286 = vrsqrt.f32 %v6893_v45 }
0x185f   : > { %v6914_v11 = vmul.f32 %v9281_v50, %v12716_v59  ;;  %6965 = vst [vmem:[#allocation2 + $0x38] sm:$0xff] (!%p7749_p1), %v6949_v9 }
0x1860   : > { %v9283_v41 = vpop.eup %9282 }
0x1861   : > { %v6932_v8 = vmul.f32 %v12734_v30, %v6914_v11  ;;  %v6915_v39 = vmul.f32 %v9283_v41, %v12718_v3 }
0x1863   : > { %v6950_v37 = vadd.f32 %v12739_v5, %v6932_v8  ;;  %v6933_v60 = vmul.f32 %v12734_v30, %v6915_v39 }
0x1865   : > { %v6951_v6 = vadd.f32 %v12739_v5, %v6933_v60  ;;  %6966 = vst [vmem:[#allocation2 + $0x40] sm:$0xff] (!%p7749_p1), %v6950_v37 }
0x1866   : > { %v9285_v18 = vpop.eup %9284 }
0x1867   : > { %v6916_v38 = vmul.f32 %v9285_v18, %v12724_v32  ;;  %6957 = sbr.rel (%p7749_p1) target bundleno = 6256 (0x1870), region = 252  ;;  %6967 = vst [vmem:[#allocation2 + $0x48] sm:$0xff] (!%p7749_p1), %v6951_v6 }
0x1868   : > { %v9287_v24 = vpop.eup %9286 }
0x1869   : > { %v6934_v25 = vmul.f32 %v12734_v30, %v6916_v38  ;;  %v6917_v57 = vmul.f32 %v9287_v24, %v12726_v36 }
0x186b   : > { %v6952_v59 = vadd.f32 %v12739_v5, %v6934_v25  ;;  %v6935_v12 = vmul.f32 %v12734_v30, %v6917_v57 }
0x186d   : > { %v6953_v3 = vadd.f32 %v12739_v5, %v6935_v12  ;;  %6968 = vst [vmem:[#allocation2 + $0x50] sm:$0xff] (!%p7749_p1), %v6952_v59 }
0x186f   : > { %6969 = vst [vmem:[#allocation2 + $0x58] sm:$0xff] %v6953_v3 }
0x1870 PF: > { %s13063_s5 = sld [smem:[#allocation81_spill]] }
0x1876   : > { %p7750_p11 = scmp.ne.s32.totalorder %s13063_s5, 1 }
0x1877   : > { %v6978_v32 = vrot.slane (!%p7750_p11), %v12758_v35, 7  ;;  %vm6979_vm8 = vcmask (!%p7750_p11), 1041409   ;;  %v6981_v36 = vrot.slane (!%p7750_p11), %v6948_v15, 6  ;;  %vm6982_vm9 = vcmask (!%p7750_p11), 1042434  }
0x1878   : > { %6973 = sbr.rel (%p7750_p11) target bundleno = 6271 (0x187f), region = 256  ;;  %v6984_v30 = vrot.slane (!%p7750_p11), %v6951_v6, 5  ;;  %vm6985_vm10 = vcmask (!%p7750_p11), 1043459  }
0x1879   : > { %v6980_v5 = vsel (!%p7750_p11), %vm6979_vm8, %v6978_v32, %v12744_v55 }
0x187a   : > { %v6983_v10 = vsel (!%p7750_p11), %vm6982_vm9, %v6981_v36, %v6980_v5 }
0x187b   : > { %v6986_v27 = vsel (!%p7750_p11), %vm6985_vm10, %v6984_v30, %v6983_v10 }
0x187c   : > { %6988 = vst [vmem:[#allocation41] sm:$0xf] (!%p7750_p11), %v6986_v27 }
0x187f PF: > { %s13064_s4 = sld [smem:[#allocation81_spill]]  ;;  %s10298_s6 = smov [#allocation41]  }
0x1880   : > { %s6996_s3 = sshll.u32 %s10298_s6, 4  ;;  %s10299_s23 = smov [#allocation42]   ;;  %s6997_s3 = int_to_ptr.vmem [resolvable:$true] %s6996_s3 }
0x1881   : > { %s7006_s16 = sshll.u32 %s10299_s23, 4  ;;  %s10096_s10 = scalar_lea.vmem %s6997_s3, 64  ;;  %s7007_s16 = int_to_ptr.vmem [resolvable:$true] %s7006_s16 }
0x1882   : > { %p10097_p12 = scmp.ne.s32.totalorder %s6997_s3, %s10096_s10  ;;  %p10103_p10 = scmp.lt.s32.totalorder %s6997_s3, %s6997_s3 }
0x1883   : > { %p10104_p6 = scmp.lt.s32.totalorder %s10096_s10, %s10096_s10 }
0x1885   : > { %p8723_p9 = scmp.eq.s32.totalorder %s13064_s4, 1  ;;  %p10105_p7 = por %p10104_p6, %p10103_p10 }
0x1887   : > { %p10098_p3 = pnand %p10097_p12, %p8723_p9 }
0x1889   : > { %p10099_p4 = pneg %p10098_p3 }
0x188b   : > { %p10106_p8 = pnand %p10105_p7, %p10099_p4 }
0x188d   : > { %10109 = shalt.err (!%p10106_p8)
}
0x188e   : > { %s13065_s11 = sld [smem:[#allocation77_spill]] }
0x1894   : > { %s13066_s9 = smov %s13065_s11  ;;  %s10110_s14 = scalar_lea.hbm %s13065_s11, 64 }
0x1895   : > { %p10111_p2 = scmp.ne.s32.totalorder %s13066_s9, %s10110_s14  ;;  %p10116_p5 = scmp.lt.u32.totalorder %s10110_s14, %s13066_s9 }
0x1897   : > { %p10112_p0 = pnand %p10111_p2, %p8723_p9 }
0x1899   : > { %p10113_p13 = pneg %p10112_p0 }
0x189b   : > { %p10118_p1 = pnand %p10116_p5, %p10113_p13 }
0x189d   : > { %10121 = shalt.err (!%p10118_p1)
}
0x189e   : > { %8597 = dma.vmem_to_hbm [thread:$0]  (%p8723_p9), %s6997_s3, 64, %s13066_s9, [#allocation5]  }
0x189f   : > { %s10122_s2 = scalar_lea.vmem %s7007_s16, 256  ;;  %p10129_p4 = scmp.lt.s32.totalorder %s7007_s16, %s7007_s16 }
0x18a0   : > { %p10123_p11 = scmp.ne.s32.totalorder %s7007_s16, %s10122_s2  ;;  %p10130_p10 = scmp.lt.s32.totalorder %s10122_s2, %s10122_s2 }
0x18a2   : > { %p10124_p12 = pnand %p10123_p11, %p8723_p9  ;;  %p10131_p6 = por %p10130_p10, %p10129_p4 }
0x18a4   : > { %p10125_p3 = pneg %p10124_p12 }
0x18a6   : > { %p10132_p7 = pnand %p10131_p6, %p10125_p3 }
0x18a8   : > { %10135 = shalt.err (!%p10132_p7)
}
0x18a9   : > { %s13067_s7 = sld [smem:[#allocation78_spill]] }
0x18af   : > { %s13068_s1 = smov %s13067_s7  ;;  %s10136_s0 = scalar_lea.hbm %s13067_s7, 256 }
0x18b0   : > { %p10137_p8 = scmp.ne.s32.totalorder %s13068_s1, %s10136_s0  ;;  %p10142_p13 = scmp.lt.u32.totalorder %s10136_s0, %s13068_s1 }
0x18b2   : > { %p10138_p2 = pnand %p10137_p8, %p8723_p9 }
0x18b4   : > { %p10139_p0 = pneg %p10138_p2 }
0x18b6   : > { %p10144_p5 = pnand %p10142_p13, %p10139_p0 }
0x18b8   : > { %10147 = shalt.err (!%p10144_p5)
}
0x18b9   : > { %s10300_s26 = smov 128   ;;  %s10301_s8 = smov 8  }
0x18ba   : > { %8599 = dma.vmem_to_hbm [thread:$0]  (%p8723_p9), %s7007_s16, 256, %s13068_s1, [#allocation43], %s10300_s26, %s10300_s26, %s10301_s8  }
0x18bb   : > { %10205 = dma.done.wait (%p8723_p9), [#allocation5], 64  }
0x18bc   : > { %10207 = vsyncadd (%p8723_p9), [#allocation5], 4294967232 }
0x18bd   : > { %10209 = dma.done.wait (%p8723_p9), [#allocation43], 256  }
0x18be   : > { %10211 = vsyncadd (%p8723_p9), [#allocation43], 4294967040 }
0x18bf PF: > { %s13069_s15 = sld [smem:[#allocation83_spill]]  ;;  %s13070_s7 = sld [smem:[#allocation79_spill]] }
0x18c0   : > { %s13071_s10 = sld [smem:[#allocation80_spill]]  ;;  %s13072_s11 = sld [smem:[#allocation84_spill]] }
0x18c5   : > { %p78_p1 = scmp.ge.s32.totalorder %s13069_s15, 4  }
0x18c7   :  { %80 = sbr.rel (!%p78_p1) target bundleno = 68 (0x44), region = 402 }
0x18ce   :  { %7026 = vsyncpa [#allocation4], 1 }
0x18cf   :  { %7028 = vsyncpa [#allocation4 + $0x1], 1 }
0x18d0   :  { %7029 = vsyncpa [#allocation7], 1 }
0x18d1   :  { %7030 = vsyncpa [#allocation10], 1 }
0x18d2   :  { %7031 = vsyncpa [#allocation13], 1 }
0x18d3   :  { %7032 = vsyncpa [#allocation16], 1 }
0x18d4   :  { %7033 = vsyncpa [#allocation19], 1 }
0x18d5   :  { %7034 = vsyncpa [#allocation22], 1 }
0x18d6   :  { %7035 = vsyncpa [#allocation25], 1 }
0x18d7   :  { %7036 = vsyncpa [#allocation28], 1 }
0x18d8   :  { %7037 = vsyncpa [#allocation5], 1 }
0x18d9   :  { %7039 = vsyncpa [#allocation5 + $0x1], 1 }
0x18da   :  { %7040 = vsyncpa [#allocation43], 1 }

</bundles_post_ra>
